<compile_context>
chip_gen: v7x
topology: tpu7x:2x2x1
jax: 0.10.0
libtpu: 0.0.40
codegen_flags: <defaults>
</compile_context>

<pallas_src>
import jax
import jax.numpy as jnp
from jax.experimental import pallas as pl
from jax.experimental.pallas import tpu as pltpu

D_IN = 128
D1, D2, D3 = 256, 512, 1024
D_OUT = 28 * 28            # 784
D_OUT_PAD = 896            # 7 * 128 -> lane-dense stores for the last layer
BLOCK_BATCH = 128          # max batch tile (multiple of 8); 256 also good on v6e/v7x
VMEM_LIMIT_BYTES = 32 * 1024 * 1024


def _leaky_relu(x, slope=0.2):
    # slope=0.2 matches the GAN Generator's F.leaky_relu(x, 0.2), not PyTorch's
    # 0.01 default (intentional).
    return jnp.where(x > 0, x, slope * x)


def _round_up(x, m):
    return (x + m - 1) // m * m


def generator_kernel(x_ref,
                     w1_ref, b1_ref,
                     w2_ref, b2_ref,
                     w3_ref, b3_ref,
                     w4_ref, b4_ref,
                     o_ref):
    # Activations cast to bf16 for the MXU; accumulation in f32; bias/activation
    # math in f32.
    x = x_ref[...].astype(jnp.bfloat16)                               # (tb, 128)

    h = jnp.dot(x, w1_ref[...], preferred_element_type=jnp.float32)
    h = _leaky_relu(h + b1_ref[...])                                  # (tb, 256)

    h = jnp.dot(h.astype(jnp.bfloat16), w2_ref[...],
                preferred_element_type=jnp.float32)
    h = _leaky_relu(h + b2_ref[...])                                  # (tb, 512)

    h = jnp.dot(h.astype(jnp.bfloat16), w3_ref[...],
                preferred_element_type=jnp.float32)
    h = _leaky_relu(h + b3_ref[...])                                  # (tb, 1024)

    h = jnp.dot(h.astype(jnp.bfloat16), w4_ref[...],
                preferred_element_type=jnp.float32)
    o_ref[...] = jnp.tanh(h + b4_ref[...])                            # (tb, 896)


def prepare_params(params):
    """One-time packing: bf16 weights, (1, D) f32 biases, w4/b4 padded to 896."""
    w1, b1, w2, b2, w3, b3, w4, b4 = params
    w4p = jnp.zeros((D3, D_OUT_PAD), jnp.float32).at[:, :D_OUT].set(w4)
    b4p = jnp.zeros((1, D_OUT_PAD), jnp.float32).at[:, :D_OUT].set(
        jnp.reshape(b4, (1, D_OUT)))
    return (
        w1.astype(jnp.bfloat16), jnp.reshape(b1, (1, D1)).astype(jnp.float32),
        w2.astype(jnp.bfloat16), jnp.reshape(b2, (1, D2)).astype(jnp.float32),
        w3.astype(jnp.bfloat16), jnp.reshape(b3, (1, D3)).astype(jnp.float32),
        w4p.astype(jnp.bfloat16), b4p,
    )


def _build_generator_call(b_padded, tb, *, single_buffer_weights):
    if single_buffer_weights:
        # Weights/biases are grid-invariant; don't double-buffer them.
        res_kwargs = dict(pipeline_mode=pl.Buffered(1))
    else:
        res_kwargs = {}

    def resident(shape):
        return pl.BlockSpec(shape, lambda i: (0, 0), **res_kwargs)

    grid_spec = pltpu.PrefetchScalarGridSpec(
        num_scalar_prefetch=0,
        grid=(b_padded // tb,),
        in_specs=[
            pl.BlockSpec((tb, D_IN), lambda i: (i, 0)),      # x tile
            resident((D_IN, D1)), resident((1, D1)),
            resident((D1, D2)),   resident((1, D2)),
            resident((D2, D3)),   resident((1, D3)),
            resident((D3, D_OUT_PAD)), resident((1, D_OUT_PAD)),
        ],
        out_specs=pl.BlockSpec((tb, D_OUT_PAD), lambda i: (i, 0)),
    )
    return pl.pallas_call(
        generator_kernel,
        out_shape=jax.ShapeDtypeStruct((b_padded, D_OUT_PAD), jnp.float32),
        grid_spec=grid_spec,
        compiler_params=pltpu.CompilerParams(
            dimension_semantics=("parallel",),
            vmem_limit_bytes=VMEM_LIMIT_BYTES,
        ),
    )


_single_buffer_weights = True  # flipped off if this jax rejects pl.Buffered(1)


def generator_forward(x, prepared_params, *, block_batch=BLOCK_BATCH):
    """x: (B, 128) float32. prepared_params: output of prepare_params.
    Returns (B, 1, 28, 28) float32."""
    global _single_buffer_weights
    B = x.shape[0]

    # Batch tile: as large as possible (<= block_batch), but aim for >= 2 grid
    # steps so both v7x TensorCores get work.  Always a multiple of 8.
    tb = max(8, min(block_batch, _round_up(pl.cdiv(B, 2), 8)))
    b_padded = _round_up(B, tb)
    xp = x if b_padded == B else jnp.pad(x, ((0, b_padded - B), (0, 0)))

    args = (xp, *prepared_params)
    if _single_buffer_weights:
        try:
            out = _build_generator_call(
                b_padded, tb, single_buffer_weights=True)(*args)
        except Exception:
            _single_buffer_weights = False
            out = _build_generator_call(
                b_padded, tb, single_buffer_weights=False)(*args)
    else:
        out = _build_generator_call(
            b_padded, tb, single_buffer_weights=False)(*args)

    # TODO(synk): if the consumer can take the padded (B, 896) output directly,
    # drop this slice/reshape — it is an extra HBM pass over the output.
    return out[:B, :D_OUT].reshape(-1, 1, 28, 28)


def init_params(key):
    """PyTorch-style uniform(-1/sqrt(fan_in), 1/sqrt(fan_in)) init (f32 master)."""
    dims = [(D_IN, D1), (D1, D2), (D2, D3), (D3, D_OUT)]
    params = []
    for (fi, fo) in dims:
        key, kw, kb = jax.random.split(key, 3)
        bound = 1.0 / jnp.sqrt(jnp.float32(fi))
        w = jax.random.uniform(kw, (fi, fo), jnp.float32, -bound, bound)
        b = jax.random.uniform(kb, (fo,), jnp.float32, -bound, bound)
        params += [w, b]
    return tuple(params)


def reference_forward(x, params):
    (w1, b1, w2, b2, w3, b3, w4, b4) = params
    h = _leaky_relu(x @ w1 + b1)
    h = _leaky_relu(h @ w2 + b2)
    h = _leaky_relu(h @ w3 + b3)
    h = jnp.tanh(h @ w4 + b4)
    return h.reshape(-1, 1, 28, 28)


if __name__ == "__main__":
    key = jax.random.PRNGKey(0)
    kx, kp = jax.random.split(key)

    params = init_params(kp)
    prepared = prepare_params(params)

    # Small shape consistent with the module: latent vectors of size 128.
    B = 8
    x = jax.random.normal(kx, (B, D_IN), jnp.float32)
    out = jax.block_until_ready(generator_forward(x, prepared))
    ref = jax.block_until_ready(reference_forward(x, params))
    assert out.shape == (B, 1, 28, 28), out.shape
    err = float(jnp.max(jnp.abs(out - ref)))
    assert err < 2e-2, err  # bf16 weights -> relaxed tolerance vs f32 reference

    # Also exercise the tiled path (tb=128, 2 grid steps).
    B2 = 256
    x2 = jax.random.normal(jax.random.PRNGKey(1), (B2, D_IN), jnp.float32)
    out2 = jax.block_until_ready(generator_forward(x2, prepared))
    ref2 = jax.block_until_ready(reference_forward(x2, params))
    assert out2.shape == (B2, 1, 28, 28), out2.shape
    err2 = float(jnp.max(jnp.abs(out2 - ref2)))
    assert err2 < 2e-2, err2

    print("KERNEL_OK")
</pallas_src>

<mosaic_0001>
module attributes {stable_mosaic.version = 11 : i64} {
  func.func @generator_kernel(%arg0: i32, %arg1: memref<8x128xf32, #tpu.memory_space<vmem>>, %arg2: memref<128x256xbf16, #tpu.memory_space<vmem>>, %arg3: memref<1x256xf32, #tpu.memory_space<vmem>>, %arg4: memref<256x512xbf16, #tpu.memory_space<vmem>>, %arg5: memref<1x512xf32, #tpu.memory_space<vmem>>, %arg6: memref<512x1024xbf16, #tpu.memory_space<vmem>>, %arg7: memref<1x1024xf32, #tpu.memory_space<vmem>>, %arg8: memref<1024x896xbf16, #tpu.memory_space<vmem>>, %arg9: memref<1x896xf32, #tpu.memory_space<vmem>>, %arg10: memref<8x896xf32, #tpu.memory_space<vmem>>) attributes {dimension_semantics = [#tpu.dimension_semantics<parallel>], iteration_bounds = array<i64: 1>, scalar_prefetch = 0 : i64, scratch_operands = 0 : i64, tpu.core_type = #tpu.core_type<tc>, window_params = [{transform_indices = @transform_0, window_bounds = array<i64: 8, 128>}, {pipeline_mode = #tpu.pipeline_mode<synchronous>, transform_indices = @transform_1, window_bounds = array<i64: 128, 256>}, {pipeline_mode = #tpu.pipeline_mode<synchronous>, transform_indices = @transform_2, window_bounds = array<i64: 1, 256>}, {pipeline_mode = #tpu.pipeline_mode<synchronous>, transform_indices = @transform_3, window_bounds = array<i64: 256, 512>}, {pipeline_mode = #tpu.pipeline_mode<synchronous>, transform_indices = @transform_4, window_bounds = array<i64: 1, 512>}, {pipeline_mode = #tpu.pipeline_mode<synchronous>, transform_indices = @transform_5, window_bounds = array<i64: 512, 1024>}, {pipeline_mode = #tpu.pipeline_mode<synchronous>, transform_indices = @transform_6, window_bounds = array<i64: 1, 1024>}, {pipeline_mode = #tpu.pipeline_mode<synchronous>, transform_indices = @transform_7, window_bounds = array<i64: 1024, 896>}, {pipeline_mode = #tpu.pipeline_mode<synchronous>, transform_indices = @transform_8, window_bounds = array<i64: 1, 896>}, {transform_indices = @transform_9, window_bounds = array<i64: 8, 896>}]} {
    %c0 = arith.constant 0 : index
    %c0_0 = arith.constant 0 : index
    %0 = vector.load %arg1[%c0, %c0_0] : memref<8x128xf32, #tpu.memory_space<vmem>>, vector<8x128xf32>
    %1 = arith.truncf %0 : vector<8x128xf32> to vector<8x128xbf16>
    %c0_1 = arith.constant 0 : index
    %c0_2 = arith.constant 0 : index
    %2 = vector.load %arg2[%c0_1, %c0_2] : memref<128x256xbf16, #tpu.memory_space<vmem>>, vector<128x256xbf16>
    %cst = arith.constant dense<0.000000e+00> : vector<8x256xf32>
    %3 = tpu.matmul %1, %2, %cst {dimension_numbers = #tpu.dot_dimension_numbers<[1], [0], [0], [1], [0, 0, 1, 1], [], []>} : vector<8x128xbf16>, vector<128x256xbf16>, vector<8x256xf32> -> vector<8x256xf32>
    %c0_3 = arith.constant 0 : index
    %c0_4 = arith.constant 0 : index
    %4 = vector.load %arg3[%c0_3, %c0_4] : memref<1x256xf32, #tpu.memory_space<vmem>>, vector<1x256xf32>
    %5 = vector.broadcast %4 : vector<1x256xf32> to vector<8x256xf32>
    %6 = arith.addf %3, %5 : vector<8x256xf32>
    %cst_5 = arith.constant 0.000000e+00 : f32
    %7 = vector.broadcast %cst_5 : f32 to vector<8x256xf32>
    %8 = arith.cmpf ogt, %6, %7 : vector<8x256xf32>
    %cst_6 = arith.constant 2.000000e-01 : f32
    %9 = vector.broadcast %cst_6 : f32 to vector<8x256xf32>
    %10 = arith.mulf %9, %6 : vector<8x256xf32>
    %11 = arith.select %8, %6, %10 : vector<8x256xi1>, vector<8x256xf32>
    %12 = arith.truncf %11 : vector<8x256xf32> to vector<8x256xbf16>
    %c0_7 = arith.constant 0 : index
    %c0_8 = arith.constant 0 : index
    %13 = vector.load %arg4[%c0_7, %c0_8] : memref<256x512xbf16, #tpu.memory_space<vmem>>, vector<256x512xbf16>
    %cst_9 = arith.constant dense<0.000000e+00> : vector<8x512xf32>
    %14 = tpu.matmul %12, %13, %cst_9 {dimension_numbers = #tpu.dot_dimension_numbers<[1], [0], [0], [1], [0, 0, 1, 1], [], []>} : vector<8x256xbf16>, vector<256x512xbf16>, vector<8x512xf32> -> vector<8x512xf32>
    %c0_10 = arith.constant 0 : index
    %c0_11 = arith.constant 0 : index
    %15 = vector.load %arg5[%c0_10, %c0_11] : memref<1x512xf32, #tpu.memory_space<vmem>>, vector<1x512xf32>
    %16 = vector.broadcast %15 : vector<1x512xf32> to vector<8x512xf32>
    %17 = arith.addf %14, %16 : vector<8x512xf32>
    %cst_12 = arith.constant 0.000000e+00 : f32
    %18 = vector.broadcast %cst_12 : f32 to vector<8x512xf32>
    %19 = arith.cmpf ogt, %17, %18 : vector<8x512xf32>
    %cst_13 = arith.constant 2.000000e-01 : f32
    %20 = vector.broadcast %cst_13 : f32 to vector<8x512xf32>
    %21 = arith.mulf %20, %17 : vector<8x512xf32>
    %22 = arith.select %19, %17, %21 : vector<8x512xi1>, vector<8x512xf32>
    %23 = arith.truncf %22 : vector<8x512xf32> to vector<8x512xbf16>
    %c0_14 = arith.constant 0 : index
    %c0_15 = arith.constant 0 : index
    %24 = vector.load %arg6[%c0_14, %c0_15] : memref<512x1024xbf16, #tpu.memory_space<vmem>>, vector<512x1024xbf16>
    %cst_16 = arith.constant dense<0.000000e+00> : vector<8x1024xf32>
    %25 = tpu.matmul %23, %24, %cst_16 {dimension_numbers = #tpu.dot_dimension_numbers<[1], [0], [0], [1], [0, 0, 1, 1], [], []>} : vector<8x512xbf16>, vector<512x1024xbf16>, vector<8x1024xf32> -> vector<8x1024xf32>
    %c0_17 = arith.constant 0 : index
    %c0_18 = arith.constant 0 : index
    %26 = vector.load %arg7[%c0_17, %c0_18] : memref<1x1024xf32, #tpu.memory_space<vmem>>, vector<1x1024xf32>
    %27 = vector.broadcast %26 : vector<1x1024xf32> to vector<8x1024xf32>
    %28 = arith.addf %25, %27 : vector<8x1024xf32>
    %cst_19 = arith.constant 0.000000e+00 : f32
    %29 = vector.broadcast %cst_19 : f32 to vector<8x1024xf32>
    %30 = arith.cmpf ogt, %28, %29 : vector<8x1024xf32>
    %cst_20 = arith.constant 2.000000e-01 : f32
    %31 = vector.broadcast %cst_20 : f32 to vector<8x1024xf32>
    %32 = arith.mulf %31, %28 : vector<8x1024xf32>
    %33 = arith.select %30, %28, %32 : vector<8x1024xi1>, vector<8x1024xf32>
    %34 = arith.truncf %33 : vector<8x1024xf32> to vector<8x1024xbf16>
    %c0_21 = arith.constant 0 : index
    %c0_22 = arith.constant 0 : index
    %35 = vector.load %arg8[%c0_21, %c0_22] : memref<1024x896xbf16, #tpu.memory_space<vmem>>, vector<1024x896xbf16>
    %cst_23 = arith.constant dense<0.000000e+00> : vector<8x896xf32>
    %36 = tpu.matmul %34, %35, %cst_23 {dimension_numbers = #tpu.dot_dimension_numbers<[1], [0], [0], [1], [0, 0, 1, 1], [], []>} : vector<8x1024xbf16>, vector<1024x896xbf16>, vector<8x896xf32> -> vector<8x896xf32>
    %c0_24 = arith.constant 0 : index
    %c0_25 = arith.constant 0 : index
    %37 = vector.load %arg9[%c0_24, %c0_25] : memref<1x896xf32, #tpu.memory_space<vmem>>, vector<1x896xf32>
    %38 = vector.broadcast %37 : vector<1x896xf32> to vector<8x896xf32>
    %39 = arith.addf %36, %38 : vector<8x896xf32>
    %40 = math.tanh %39 : vector<8x896xf32>
    %c0_26 = arith.constant 0 : index
    %c0_27 = arith.constant 0 : index
    %41 = vector.load %arg10[%c0_26, %c0_27] : memref<8x896xf32, #tpu.memory_space<vmem>>, vector<8x896xf32>
    tpu.vector_store %arg10[%c0_26, %c0_27], %40 {strides = array<i32>} : memref<8x896xf32, #tpu.memory_space<vmem>>, vector<8x896xf32>,
    return
  }
  func.func @transform_0(%arg0: i32) -> (i32, i32) {
    %c0_i32 = arith.constant 0 : i32
    %c0_i32_0 = arith.constant 0 : i32
    return %arg0, %c0_i32 : i32, i32
  }
  func.func @transform_1(%arg0: i32) -> (i32, i32) {
    %c0_i32 = arith.constant 0 : i32
    %c0_i32_0 = arith.constant 0 : i32
    %c0_i32_1 = arith.constant 0 : i32
    return %c0_i32, %c0_i32_0 : i32, i32
  }
  func.func @transform_2(%arg0: i32) -> (i32, i32) {
    %c0_i32 = arith.constant 0 : i32
    %c0_i32_0 = arith.constant 0 : i32
    %c0_i32_1 = arith.constant 0 : i32
    return %c0_i32, %c0_i32_0 : i32, i32
  }
  func.func @transform_3(%arg0: i32) -> (i32, i32) {
    %c0_i32 = arith.constant 0 : i32
    %c0_i32_0 = arith.constant 0 : i32
    %c0_i32_1 = arith.constant 0 : i32
    return %c0_i32, %c0_i32_0 : i32, i32
  }
  func.func @transform_4(%arg0: i32) -> (i32, i32) {
    %c0_i32 = arith.constant 0 : i32
    %c0_i32_0 = arith.constant 0 : i32
    %c0_i32_1 = arith.constant 0 : i32
    return %c0_i32, %c0_i32_0 : i32, i32
  }
  func.func @transform_5(%arg0: i32) -> (i32, i32) {
    %c0_i32 = arith.constant 0 : i32
    %c0_i32_0 = arith.constant 0 : i32
    %c0_i32_1 = arith.constant 0 : i32
    return %c0_i32, %c0_i32_0 : i32, i32
  }
  func.func @transform_6(%arg0: i32) -> (i32, i32) {
    %c0_i32 = arith.constant 0 : i32
    %c0_i32_0 = arith.constant 0 : i32
    %c0_i32_1 = arith.constant 0 : i32
    return %c0_i32, %c0_i32_0 : i32, i32
  }
  func.func @transform_7(%arg0: i32) -> (i32, i32) {
    %c0_i32 = arith.constant 0 : i32
    %c0_i32_0 = arith.constant 0 : i32
    %c0_i32_1 = arith.constant 0 : i32
    return %c0_i32, %c0_i32_0 : i32, i32
  }
  func.func @transform_8(%arg0: i32) -> (i32, i32) {
    %c0_i32 = arith.constant 0 : i32
    %c0_i32_0 = arith.constant 0 : i32
    %c0_i32_1 = arith.constant 0 : i32
    return %c0_i32, %c0_i32_0 : i32, i32
  }
  func.func @transform_9(%arg0: i32) -> (i32, i32) {
    %c0_i32 = arith.constant 0 : i32
    %c0_i32_0 = arith.constant 0 : i32
    return %arg0, %c0_i32 : i32, i32
  }
}

module attributes {stable_mosaic.version = 11 : i64} {
  func.func @generator_kernel(%arg0: i32, %arg1: memref<8x128xf32, #tpu.memory_space<vmem>>, %arg2: memref<128x256xbf16, #tpu.memory_space<vmem>>, %arg3: memref<1x256xf32, #tpu.memory_space<vmem>>, %arg4: memref<256x512xbf16, #tpu.memory_space<vmem>>, %arg5: memref<1x512xf32, #tpu.memory_space<vmem>>, %arg6: memref<512x1024xbf16, #tpu.memory_space<vmem>>, %arg7: memref<1x1024xf32, #tpu.memory_space<vmem>>, %arg8: memref<1024x896xbf16, #tpu.memory_space<vmem>>, %arg9: memref<1x896xf32, #tpu.memory_space<vmem>>, %arg10: memref<8x896xf32, #tpu.memory_space<vmem>>) attributes {dimension_semantics = [#tpu.dimension_semantics<parallel>], iteration_bounds = array<i64: 1>, scalar_prefetch = 0 : i64, scratch_operands = 0 : i64, tpu.core_type = #tpu.core_type<tc>, window_params = [{transform_indices = @transform_0, window_bounds = array<i64: 8, 128>}, {pipeline_mode = #tpu.pipeline_mode<synchronous>, transform_indices = @transform_1, window_bounds = array<i64: 128, 256>}, {pipeline_mode = #tpu.pipeline_mode<synchronous>, transform_indices = @transform_2, window_bounds = array<i64: 1, 256>}, {pipeline_mode = #tpu.pipeline_mode<synchronous>, transform_indices = @transform_3, window_bounds = array<i64: 256, 512>}, {pipeline_mode = #tpu.pipeline_mode<synchronous>, transform_indices = @transform_4, window_bounds = array<i64: 1, 512>}, {pipeline_mode = #tpu.pipeline_mode<synchronous>, transform_indices = @transform_5, window_bounds = array<i64: 512, 1024>}, {pipeline_mode = #tpu.pipeline_mode<synchronous>, transform_indices = @transform_6, window_bounds = array<i64: 1, 1024>}, {pipeline_mode = #tpu.pipeline_mode<synchronous>, transform_indices = @transform_7, window_bounds = array<i64: 1024, 896>}, {pipeline_mode = #tpu.pipeline_mode<synchronous>, transform_indices = @transform_8, window_bounds = array<i64: 1, 896>}, {transform_indices = @transform_9, window_bounds = array<i64: 8, 896>}]} {
    %c0 = arith.constant 0 : index
    %c0_0 = arith.constant 0 : index
    %0 = vector.load %arg1[%c0, %c0_0] : memref<8x128xf32, #tpu.memory_space<vmem>>, vector<8x128xf32>
    %1 = arith.truncf %0 : vector<8x128xf32> to vector<8x128xbf16>
    %c0_1 = arith.constant 0 : index
    %c0_2 = arith.constant 0 : index
    %2 = vector.load %arg2[%c0_1, %c0_2] : memref<128x256xbf16, #tpu.memory_space<vmem>>, vector<128x256xbf16>
    %cst = arith.constant dense<0.000000e+00> : vector<8x256xf32>
    %3 = tpu.matmul %1, %2, %cst {dimension_numbers = #tpu.dot_dimension_numbers<[1], [0], [0], [1], [0, 0, 1, 1], [], []>} : vector<8x128xbf16>, vector<128x256xbf16>, vector<8x256xf32> -> vector<8x256xf32>
    %c0_3 = arith.constant 0 : index
    %c0_4 = arith.constant 0 : index
    %4 = vector.load %arg3[%c0_3, %c0_4] : memref<1x256xf32, #tpu.memory_space<vmem>>, vector<1x256xf32>
    %5 = vector.broadcast %4 : vector<1x256xf32> to vector<8x256xf32>
    %6 = arith.addf %3, %5 : vector<8x256xf32>
    %cst_5 = arith.constant 0.000000e+00 : f32
    %7 = vector.broadcast %cst_5 : f32 to vector<8x256xf32>
    %8 = arith.cmpf ogt, %6, %7 : vector<8x256xf32>
    %cst_6 = arith.constant 2.000000e-01 : f32
    %9 = vector.broadcast %cst_6 : f32 to vector<8x256xf32>
    %10 = arith.mulf %9, %6 : vector<8x256xf32>
    %11 = arith.select %8, %6, %10 : vector<8x256xi1>, vector<8x256xf32>
    %12 = arith.truncf %11 : vector<8x256xf32> to vector<8x256xbf16>
    %c0_7 = arith.constant 0 : index
    %c0_8 = arith.constant 0 : index
    %13 = vector.load %arg4[%c0_7, %c0_8] : memref<256x512xbf16, #tpu.memory_space<vmem>>, vector<256x512xbf16>
    %cst_9 = arith.constant dense<0.000000e+00> : vector<8x512xf32>
    %14 = tpu.matmul %12, %13, %cst_9 {dimension_numbers = #tpu.dot_dimension_numbers<[1], [0], [0], [1], [0, 0, 1, 1], [], []>} : vector<8x256xbf16>, vector<256x512xbf16>, vector<8x512xf32> -> vector<8x512xf32>
    %c0_10 = arith.constant 0 : index
    %c0_11 = arith.constant 0 : index
    %15 = vector.load %arg5[%c0_10, %c0_11] : memref<1x512xf32, #tpu.memory_space<vmem>>, vector<1x512xf32>
    %16 = vector.broadcast %15 : vector<1x512xf32> to vector<8x512xf32>
    %17 = arith.addf %14, %16 : vector<8x512xf32>
    %cst_12 = arith.constant 0.000000e+00 : f32
    %18 = vector.broadcast %cst_12 : f32 to vector<8x512xf32>
    %19 = arith.cmpf ogt, %17, %18 : vector<8x512xf32>
    %cst_13 = arith.constant 2.000000e-01 : f32
    %20 = vector.broadcast %cst_13 : f32 to vector<8x512xf32>
    %21 = arith.mulf %20, %17 : vector<8x512xf32>
    %22 = arith.select %19, %17, %21 : vector<8x512xi1>, vector<8x512xf32>
    %23 = arith.truncf %22 : vector<8x512xf32> to vector<8x512xbf16>
    %c0_14 = arith.constant 0 : index
    %c0_15 = arith.constant 0 : index
    %24 = vector.load %arg6[%c0_14, %c0_15] : memref<512x1024xbf16, #tpu.memory_space<vmem>>, vector<512x1024xbf16>
    %cst_16 = arith.constant dense<0.000000e+00> : vector<8x1024xf32>
    %25 = tpu.matmul %23, %24, %cst_16 {dimension_numbers = #tpu.dot_dimension_numbers<[1], [0], [0], [1], [0, 0, 1, 1], [], []>} : vector<8x512xbf16>, vector<512x1024xbf16>, vector<8x1024xf32> -> vector<8x1024xf32>
    %c0_17 = arith.constant 0 : index
    %c0_18 = arith.constant 0 : index
    %26 = vector.load %arg7[%c0_17, %c0_18] : memref<1x1024xf32, #tpu.memory_space<vmem>>, vector<1x1024xf32>
    %27 = vector.broadcast %26 : vector<1x1024xf32> to vector<8x1024xf32>
    %28 = arith.addf %25, %27 : vector<8x1024xf32>
    %cst_19 = arith.constant 0.000000e+00 : f32
    %29 = vector.broadcast %cst_19 : f32 to vector<8x1024xf32>
    %30 = arith.cmpf ogt, %28, %29 : vector<8x1024xf32>
    %cst_20 = arith.constant 2.000000e-01 : f32
    %31 = vector.broadcast %cst_20 : f32 to vector<8x1024xf32>
    %32 = arith.mulf %31, %28 : vector<8x1024xf32>
    %33 = arith.select %30, %28, %32 : vector<8x1024xi1>, vector<8x1024xf32>
    %34 = arith.truncf %33 : vector<8x1024xf32> to vector<8x1024xbf16>
    %c0_21 = arith.constant 0 : index
    %c0_22 = arith.constant 0 : index
    %35 = vector.load %arg8[%c0_21, %c0_22] : memref<1024x896xbf16, #tpu.memory_space<vmem>>, vector<1024x896xbf16>
    %cst_23 = arith.constant dense<0.000000e+00> : vector<8x896xf32>
    %36 = tpu.matmul %34, %35, %cst_23 {dimension_numbers = #tpu.dot_dimension_numbers<[1], [0], [0], [1], [0, 0, 1, 1], [], []>} : vector<8x1024xbf16>, vector<1024x896xbf16>, vector<8x896xf32> -> vector<8x896xf32>
    %c0_24 = arith.constant 0 : index
    %c0_25 = arith.constant 0 : index
    %37 = vector.load %arg9[%c0_24, %c0_25] : memref<1x896xf32, #tpu.memory_space<vmem>>, vector<1x896xf32>
    %38 = vector.broadcast %37 : vector<1x896xf32> to vector<8x896xf32>
    %39 = arith.addf %36, %38 : vector<8x896xf32>
    %40 = math.tanh %39 : vector<8x896xf32>
    %c0_26 = arith.constant 0 : index
    %c0_27 = arith.constant 0 : index
    %41 = vector.load %arg10[%c0_26, %c0_27] : memref<8x896xf32, #tpu.memory_space<vmem>>, vector<8x896xf32>
    tpu.vector_store %arg10[%c0_26, %c0_27], %40 {strides = array<i32>} : memref<8x896xf32, #tpu.memory_space<vmem>>, vector<8x896xf32>,
    return
  }
  func.func @transform_0(%arg0: i32) -> (i32, i32) {
    %c0_i32 = arith.constant 0 : i32
    %c0_i32_0 = arith.constant 0 : i32
    return %arg0, %c0_i32 : i32, i32
  }
  func.func @transform_1(%arg0: i32) -> (i32, i32) {
    %c0_i32 = arith.constant 0 : i32
    %c0_i32_0 = arith.constant 0 : i32
    %c0_i32_1 = arith.constant 0 : i32
    return %c0_i32, %c0_i32_0 : i32, i32
  }
  func.func @transform_2(%arg0: i32) -> (i32, i32) {
    %c0_i32 = arith.constant 0 : i32
    %c0_i32_0 = arith.constant 0 : i32
    %c0_i32_1 = arith.constant 0 : i32
    return %c0_i32, %c0_i32_0 : i32, i32
  }
  func.func @transform_3(%arg0: i32) -> (i32, i32) {
    %c0_i32 = arith.constant 0 : i32
    %c0_i32_0 = arith.constant 0 : i32
    %c0_i32_1 = arith.constant 0 : i32
    return %c0_i32, %c0_i32_0 : i32, i32
  }
  func.func @transform_4(%arg0: i32) -> (i32, i32) {
    %c0_i32 = arith.constant 0 : i32
    %c0_i32_0 = arith.constant 0 : i32
    %c0_i32_1 = arith.constant 0 : i32
    return %c0_i32, %c0_i32_0 : i32, i32
  }
  func.func @transform_5(%arg0: i32) -> (i32, i32) {
    %c0_i32 = arith.constant 0 : i32
    %c0_i32_0 = arith.constant 0 : i32
    %c0_i32_1 = arith.constant 0 : i32
    return %c0_i32, %c0_i32_0 : i32, i32
  }
  func.func @transform_6(%arg0: i32) -> (i32, i32) {
    %c0_i32 = arith.constant 0 : i32
    %c0_i32_0 = arith.constant 0 : i32
    %c0_i32_1 = arith.constant 0 : i32
    return %c0_i32, %c0_i32_0 : i32, i32
  }
  func.func @transform_7(%arg0: i32) -> (i32, i32) {
    %c0_i32 = arith.constant 0 : i32
    %c0_i32_0 = arith.constant 0 : i32
    %c0_i32_1 = arith.constant 0 : i32
    return %c0_i32, %c0_i32_0 : i32, i32
  }
  func.func @transform_8(%arg0: i32) -> (i32, i32) {
    %c0_i32 = arith.constant 0 : i32
    %c0_i32_0 = arith.constant 0 : i32
    %c0_i32_1 = arith.constant 0 : i32
    return %c0_i32, %c0_i32_0 : i32, i32
  }
  func.func @transform_9(%arg0: i32) -> (i32, i32) {
    %c0_i32 = arith.constant 0 : i32
    %c0_i32_0 = arith.constant 0 : i32
    return %arg0, %c0_i32 : i32, i32
  }
}

</mosaic_0001>

<bundles_post_ra>
// kernel: tpu_custom_call.1
= control target key start
LH: loop header
LB: loop body
LE: loop exit
PB: predicated region body
PF: predicated region fallthrough
CT: control target
= control target key end

     0   :  { %14 = vsyncpa [#allocation3], 0  ;;  %s8610_s0 = inlined_call_operand.hbm [shape: f32[8,128], index: 0, kind: input, shape index: {}]   ;;  %s8611_s1 = inlined_call_operand.hbm [shape: bf16[128,256], index: 1, kind: input, shape index: {}]   ;;  %s8612_s2 = inlined_call_operand.hbm [shape: f32[1,256], index: 2, kind: input, shape index: {}]   ;;  %s8613_s3 = inlined_call_operand.hbm [shape: bf16[256,512], index: 3, kind: input, shape index: {}]   ;;  %s8614_s4 = inlined_call_operand.hbm [shape: f32[1,512], index: 4, kind: input, shape index: {}]   ;;  %s8615_s5 = inlined_call_operand.hbm [shape: bf16[512,1024], index: 5, kind: input, shape index: {}]   ;;  %s8616_s6 = inlined_call_operand.hbm [shape: f32[1,1024], index: 6, kind: input, shape index: {}]   ;;  %s8617_s7 = inlined_call_operand.hbm [shape: bf16[1024,896], index: 7, kind: input, shape index: {}]   ;;  %s8618_s8 = inlined_call_operand.hbm [shape: f32[1,896], index: 8, kind: input, shape index: {}]   ;;  %s8619_s9 = inlined_call_operand.hbm [shape: f32[8,896], index: 9, kind: output, shape index: {}]  }
   0x1   :  { %15 = vsyncpa [#allocation6], 0 }
   0x2   :  { %16 = vsyncpa [#allocation9], 0 }
   0x3   :  { %17 = vsyncpa [#allocation12], 0 }
   0x4   :  { %18 = vsyncpa [#allocation15], 0 }
   0x5   :  { %19 = vsyncpa [#allocation4], 0  ;;  %s8248_s30 = smov [#allocation5]   ;;  %s8016_s13 = scalar_lea.hbm %s8611_s1, 2048 }
   0x6   :  { %s35_s10 = sshll.u32 %s8248_s30, 4  ;;  %p8017_p0 = scmp.ne.s32.totalorder %s8611_s1, %s8016_s13  ;;  %s36_s10 = int_to_ptr.vmem [resolvable:$true] %s35_s10 }
   0x7   :  { %p8020_p1 = scmp.lt.u32.totalorder %s8016_s13, %s8611_s1 }
   0x9   :  { %p8022_p2 = pnand %p8020_p1, %p8017_p0 }
   0xb   :  { %8025 = shalt.err (!%p8022_p2)
}
   0xc   :  { %s8026_s18 = scalar_lea.vmem %s36_s10, 2048  ;;  %p8031_p4 = scmp.lt.s32.totalorder %s36_s10, %s36_s10 }
   0xd   :  { %p8027_p3 = scmp.ne.s32.totalorder %s36_s10, %s8026_s18  ;;  %p8032_p5 = scmp.lt.s32.totalorder %s8026_s18, %s8026_s18 }
   0xf   :  { %p8033_p6 = por %p8032_p5, %p8031_p4 }
  0x11   :  { %p8034_p7 = pnand %p8033_p6, %p8027_p3 }
  0x13   :  { %8037 = shalt.err (!%p8034_p7)
}
  0x14   :  { %s8249_s19 = smov 128   ;;  %s8250_s20 = smov 8  }
  0x15   :  { %41 = dma.hbm_to_vmem [thread:$0]  %s8611_s1, 2048, %s36_s10, [#allocation6], %s8249_s19, %s8249_s19, %s8250_s20  }
  0x16   :  { %s8251_s23 = smov [#allocation8]   ;;  %s8038_s27 = scalar_lea.hbm %s8613_s3, 8192 }
  0x17   :  { %s57_s24 = sshll.u32 %s8251_s23, 4  ;;  %p8039_p8 = scmp.ne.s32.totalorder %s8613_s3, %s8038_s27  ;;  %s58_s24 = int_to_ptr.vmem [resolvable:$true] %s57_s24 }
  0x18   :  { %p8042_p9 = scmp.lt.u32.totalorder %s8038_s27, %s8613_s3 }
  0x1a   :  { %p8044_p10 = pnand %p8042_p9, %p8039_p8 }
  0x1c   :  { %8047 = shalt.err (!%p8044_p10)
}
  0x1d   :  { %s8048_s12 = scalar_lea.vmem %s58_s24, 8192  ;;  %p8053_p12 = scmp.lt.s32.totalorder %s58_s24, %s58_s24 }
  0x1e   :  { %p8049_p11 = scmp.ne.s32.totalorder %s58_s24, %s8048_s12  ;;  %p8054_p13 = scmp.lt.s32.totalorder %s8048_s12, %s8048_s12 }
  0x20   :  { %p8055_p0 = por %p8054_p13, %p8053_p12 }
  0x22   :  { %p8056_p1 = pnand %p8055_p0, %p8049_p11 }
  0x24   :  { %8059 = shalt.err (!%p8056_p1)
}
  0x25   :  { %s8252_s1 = smov 256   ;;  %s8253_s10 = smov 16  }
  0x26   :  { %63 = dma.hbm_to_vmem [thread:$0]  %s8613_s3, 8192, %s58_s24, [#allocation9], %s8252_s1, %s8252_s1, %s8253_s10  }
  0x27   :  { %s8254_s15 = smov [#allocation11]   ;;  %s8060_s19 = scalar_lea.hbm %s8615_s5, 32768 }
  0x28   :  { %s79_s16 = sshll.u32 %s8254_s15, 4  ;;  %p8061_p2 = scmp.ne.s32.totalorder %s8615_s5, %s8060_s19  ;;  %s80_s16 = int_to_ptr.vmem [resolvable:$true] %s79_s16 }
  0x29   :  { %p8064_p3 = scmp.lt.u32.totalorder %s8060_s19, %s8615_s5 }
  0x2b   :  { %p8066_p4 = pnand %p8064_p3, %p8061_p2 }
  0x2d   :  { %8069 = shalt.err (!%p8066_p4)
}
  0x2e   :  { %s8070_s25 = scalar_lea.vmem %s80_s16, 32768  ;;  %p8075_p6 = scmp.lt.s32.totalorder %s80_s16, %s80_s16 }
  0x2f   :  { %p8071_p5 = scmp.ne.s32.totalorder %s80_s16, %s8070_s25  ;;  %p8076_p7 = scmp.lt.s32.totalorder %s8070_s25, %s8070_s25 }
  0x31   :  { %p8077_p8 = por %p8076_p7, %p8075_p6 }
  0x33   :  { %p8078_p9 = pnand %p8077_p8, %p8071_p5 }
  0x35   :  { %8081 = shalt.err (!%p8078_p9)
}
  0x36   :  { %s8255_s3 = smov 512   ;;  %s8256_s24 = smov 32  }
  0x37   :  { %85 = dma.hbm_to_vmem [thread:$0]  %s8615_s5, 32768, %s80_s16, [#allocation12], %s8255_s3, %s8255_s3, %s8256_s24  }
  0x38   :  { %s8257_s28 = smov [#allocation14]   ;;  %s8082_s12 = scalar_lea.hbm %s8617_s7, 57344 }
  0x39   :  { %s101_s29 = sshll.u32 %s8257_s28, 4  ;;  %p8083_p10 = scmp.ne.s32.totalorder %s8617_s7, %s8082_s12  ;;  %s102_s29 = int_to_ptr.vmem [resolvable:$true] %s101_s29 }
  0x3a   :  { %p8086_p11 = scmp.lt.u32.totalorder %s8082_s12, %s8617_s7 }
  0x3c   :  { %p8088_p12 = pnand %p8086_p11, %p8083_p10 }
  0x3e   :  { %8091 = shalt.err (!%p8088_p12)
}
  0x3f   :  { %s8092_s15 = scalar_lea.vmem %s102_s29, 57344  ;;  %p8097_p0 = scmp.lt.s32.totalorder %s102_s29, %s102_s29 }
  0x40   :  { %p8093_p13 = scmp.ne.s32.totalorder %s102_s29, %s8092_s15  ;;  %p8098_p1 = scmp.lt.s32.totalorder %s8092_s15, %s8092_s15 }
  0x42   :  { %p8099_p2 = por %p8098_p1, %p8097_p0 }
  0x44   :  { %p8100_p3 = pnand %p8099_p2, %p8093_p13 }
  0x46   :  { %8103 = shalt.err (!%p8100_p3)
}
  0x47   :  { %s8258_s5 = smov 448   ;;  %s8259_s16 = smov 28  }
  0x48   :  { %107 = dma.hbm_to_vmem [thread:$0]  %s8617_s7, 57344, %s102_s29, [#allocation15], %s8258_s5, %s8258_s5, %s8259_s16  }
  0x49   :  { %s8260_s19 = smov [#allocation2]   ;;  %s8261_s21 = smov [#allocation7]  }
  0x4a   :  { %s26_s20 = sshll.u32 %s8260_s19, 4  ;;  %s48_s22 = sshll.u32 %s8261_s21, 4  ;;  %s27_s20 = int_to_ptr.vmem [resolvable:$true] %s26_s20  ;;  %s49_s22 = int_to_ptr.vmem [resolvable:$true] %s48_s22 }
  0x4b   :  { %s8104_s3 = scalar_lea.hbm %s8610_s0, 128 }
  0x4c   :  { %p8105_p4 = scmp.ne.s32.totalorder %s8610_s0, %s8104_s3  ;;  %p8108_p5 = scmp.lt.u32.totalorder %s8104_s3, %s8610_s0 }
  0x4e   :  { %p8110_p6 = pnand %p8108_p5, %p8105_p4 }
  0x50   :  { %8113 = shalt.err (!%p8110_p6)
}
  0x51   :  { %s8114_s7 = scalar_lea.vmem %s27_s20, 128  ;;  %p8119_p8 = scmp.lt.s32.totalorder %s27_s20, %s27_s20 }
  0x52   :  { %p8115_p7 = scmp.ne.s32.totalorder %s27_s20, %s8114_s7  ;;  %p8120_p9 = scmp.lt.s32.totalorder %s8114_s7, %s8114_s7 }
  0x54   :  { %p8121_p10 = por %p8120_p9, %p8119_p8 }
  0x56   :  { %p8122_p11 = pnand %p8121_p10, %p8115_p7 }
  0x58   :  { %8125 = shalt.err (!%p8122_p11)
}
  0x59   :  { %29 = dma.hbm_to_vmem [thread:$0]  %s8610_s0, 128, %s27_s20, [#allocation3]  }
  0x5a   :  { %s8126_s1 = scalar_lea.hbm %s8612_s2, 32 }
  0x5b   :  { %p8127_p12 = scmp.ne.s32.totalorder %s8612_s2, %s8126_s1  ;;  %p8130_p13 = scmp.lt.u32.totalorder %s8126_s1, %s8612_s2 }
  0x5d   :  { %p8132_p0 = pnand %p8130_p13, %p8127_p12 }
  0x5f   :  { %8135 = shalt.err (!%p8132_p0)
}
  0x60   :  { %s8136_s5 = scalar_lea.vmem %s49_s22, 32  ;;  %p8141_p2 = scmp.lt.s32.totalorder %s49_s22, %s49_s22 }
  0x61   :  { %p8137_p1 = scmp.ne.s32.totalorder %s49_s22, %s8136_s5  ;;  %p8142_p3 = scmp.lt.s32.totalorder %s8136_s5, %s8136_s5 }
  0x63   :  { %p8143_p4 = por %p8142_p3, %p8141_p2 }
  0x65   :  { %p8144_p5 = pnand %p8143_p4, %p8137_p1 }
  0x67   :  { %8147 = shalt.err (!%p8144_p5)
}
  0x68   :  { %51 = dma.hbm_to_vmem [thread:$0]  %s8612_s2, 32, %s49_s22, [#allocation6]  }
  0x69   :  { %s8262_s17 = smov [#allocation10]   ;;  %s8263_s19 = smov [#allocation13]  }
  0x6a   :  { %s70_s18 = sshll.u32 %s8262_s17, 4  ;;  %s92_s20 = sshll.u32 %s8263_s19, 4  ;;  %s71_s18 = int_to_ptr.vmem [resolvable:$true] %s70_s18  ;;  %s93_s20 = int_to_ptr.vmem [resolvable:$true] %s92_s20 }
  0x6b   :  { %s8148_s25 = scalar_lea.hbm %s8614_s4, 64 }
  0x6c   :  { %p8149_p6 = scmp.ne.s32.totalorder %s8614_s4, %s8148_s25  ;;  %p8152_p7 = scmp.lt.u32.totalorder %s8148_s25, %s8614_s4 }
  0x6e   :  { %p8154_p8 = pnand %p8152_p7, %p8149_p6 }
  0x70   :  { %8157 = shalt.err (!%p8154_p8)
}
  0x71   :  { %s8158_s2 = scalar_lea.vmem %s71_s18, 64  ;;  %p8163_p10 = scmp.lt.s32.totalorder %s71_s18, %s71_s18 }
  0x72   :  { %p8159_p9 = scmp.ne.s32.totalorder %s71_s18, %s8158_s2  ;;  %p8164_p11 = scmp.lt.s32.totalorder %s8158_s2, %s8158_s2 }
  0x74   :  { %p8165_p12 = por %p8164_p11, %p8163_p10 }
  0x76   :  { %p8166_p13 = pnand %p8165_p12, %p8159_p9 }
  0x78   :  { %8169 = shalt.err (!%p8166_p13)
}
  0x79   :  { %73 = dma.hbm_to_vmem [thread:$0]  %s8614_s4, 64, %s71_s18, [#allocation9]  }
  0x7a   :  { %s8170_s30 = scalar_lea.hbm %s8616_s6, 128 }
  0x7b   :  { %p8171_p0 = scmp.ne.s32.totalorder %s8616_s6, %s8170_s30  ;;  %p8174_p1 = scmp.lt.u32.totalorder %s8170_s30, %s8616_s6 }
  0x7d   :  { %p8176_p2 = pnand %p8174_p1, %p8171_p0 }
  0x7f   :  { %8179 = shalt.err (!%p8176_p2)
}
  0x80   :  { %s8180_s13 = scalar_lea.vmem %s93_s20, 128  ;;  %p8185_p4 = scmp.lt.s32.totalorder %s93_s20, %s93_s20 }
  0x81   :  { %p8181_p3 = scmp.ne.s32.totalorder %s93_s20, %s8180_s13  ;;  %p8186_p5 = scmp.lt.s32.totalorder %s8180_s13, %s8180_s13 }
  0x83   :  { %p8187_p6 = por %p8186_p5, %p8185_p4 }
  0x85   :  { %p8188_p7 = pnand %p8187_p6, %p8181_p3 }
  0x87   :  { %8191 = shalt.err (!%p8188_p7)
}
  0x88   :  { %95 = dma.hbm_to_vmem [thread:$0]  %s8616_s6, 128, %s93_s20, [#allocation12]  }
  0x89   :  { %s8264_s15 = smov [#allocation16]   ;;  %s8192_s17 = scalar_lea.hbm %s8618_s8, 112 }
  0x8a   :  { %s114_s5 = sshll.u32 %s8264_s15, 4  ;;  %p8193_p8 = scmp.ne.s32.totalorder %s8618_s8, %s8192_s17  ;;  %s115_s5 = int_to_ptr.vmem [resolvable:$true] %s114_s5 }
  0x8b   :  { %p8196_p9 = scmp.lt.u32.totalorder %s8192_s17, %s8618_s8 }
  0x8d   :  { %p8198_p10 = pnand %p8196_p9, %p8193_p8 }
  0x8f   :  { %8201 = shalt.err (!%p8198_p10)
}
  0x90   :  { %s8202_s25 = scalar_lea.vmem %s115_s5, 112  ;;  %s8206_s6 = scalar_lea.vmem %s115_s5, 128 }
  0x91   :  { %p8203_p11 = scmp.ne.s32.totalorder %s115_s5, %s8202_s25  ;;  %p8207_p12 = scmp.lt.s32.totalorder %s115_s5, %s115_s5 }
  0x92   :  { %p8208_p13 = scmp.lt.s32.totalorder %s8206_s6, %s8202_s25 }
  0x94   :  { %p8209_p0 = por %p8208_p13, %p8207_p12 }
  0x96   :  { %p8210_p1 = pnand %p8209_p0, %p8203_p11 }
  0x98   :  { %8213 = shalt.err (!%p8210_p1)
}
  0x99   :  { %117 = dma.hbm_to_vmem [thread:$0]  %s8618_s8, 112, %s115_s5, [#allocation15]  }
  0x9a   :  { %8236 = dma.done.wait [#allocation3], 128  }
  0x9b   :  { %8237 = vsyncadd [#allocation3], 4294967168 }
  0x9c   :  { %8238 = dma.done.wait [#allocation6], 2080  }
  0x9d   :  { %8239 = vsyncadd [#allocation6], 4294965216 }
  0x9e   :  { %8240 = dma.done.wait [#allocation9], 8256  }
  0x9f   :  { %8241 = vsyncadd [#allocation9], 4294959040 }
  0xa0   :  { %8242 = dma.done.wait [#allocation12], 32896  }
  0xa1   :  { %8243 = vsyncadd [#allocation12], 4294934400 }
  0xa2   :  { %8244 = dma.done.wait [#allocation15], 57456  }
  0xa3   :  { %8245 = vsyncadd [#allocation15], 4294909840  ;;  %v8265_v0 = vmov 0   ;;  %v7242_v1 = vld [vmem:[#allocation5 + $0x4] ss:$8 sps:$4 sm:$0xff]   ;;  %v146_v17 = vld [vmem:[#allocation2] sm:$0xff] }
  0xa4   :  { %288 = vmatprep.mubr.bf16.mxu0 %v8265_v0  ;;  %v7244_v2 = vld [vmem:[#allocation5] ss:$8 sps:$4 sm:$0xff]   ;;  %256 = vmatprep.subr.bf16.mxu0 %v7242_v1  ;;  %v7245_v3 = vld [vmem:[#allocation5 + $0x14] ss:$8 sps:$4 sm:$0xff]   ;;  %v7247_v4 = vld [vmem:[#allocation5 + $0x10] ss:$8 sps:$4 sm:$0xff]   ;;  %v147_v20 = vpack.c.bf16 %v146_v17, %v146_v17 }
  0xa5   :  { %257 = vmatpush1.bf16.msra.mxu0 %v7244_v2  ;;  %v7248_v5 = vld [vmem:[#allocation5 + $0x24] ss:$8 sps:$4 sm:$0xff]   ;;  %v7250_v6 = vld [vmem:[#allocation5 + $0x20] ss:$8 sps:$4 sm:$0xff]   ;;  %v7251_v7 = vld [vmem:[#allocation5 + $0x34] ss:$8 sps:$4 sm:$0xff]  }
  0xa6   :  { %258 = vmatprep.subr.bf16.mxu0 %v7245_v3  ;;  %v7253_v8 = vld [vmem:[#allocation5 + $0x30] ss:$8 sps:$4 sm:$0xff]   ;;  %v7254_v9 = vld [vmem:[#allocation5 + $0x44] ss:$8 sps:$4 sm:$0xff]   ;;  %v7256_v10 = vld [vmem:[#allocation5 + $0x40] ss:$8 sps:$4 sm:$0xff]  }
  0xa7   :  { %v7257_v11 = vld [vmem:[#allocation5 + $0x54] ss:$8 sps:$4 sm:$0xff]   ;;  %v7259_v12 = vld [vmem:[#allocation5 + $0x50] ss:$8 sps:$4 sm:$0xff]   ;;  %v7260_v13 = vld [vmem:[#allocation5 + $0x64] ss:$8 sps:$4 sm:$0xff]  }
  0xa8   :  { %v7262_v14 = vld [vmem:[#allocation5 + $0x60] ss:$8 sps:$4 sm:$0xff]   ;;  %v7263_v15 = vld [vmem:[#allocation5 + $0x74] ss:$8 sps:$4 sm:$0xff]   ;;  %v7265_v16 = vld [vmem:[#allocation5 + $0x70] ss:$8 sps:$4 sm:$0xff]  }
  0xa9   :  { %259 = vmatpush1.bf16.msra.mxu0 %v7247_v4  ;;  %v7268_v18 = vld [vmem:[#allocation8 + $0x4] ss:$16 sps:$4 sm:$0xff]   ;;  %v7266_v19 = vld [vmem:[#allocation8] ss:$16 sps:$4 sm:$0xff]   ;;  %v7316_v51 = vld [vmem:[#allocation8 + $0xc] ss:$16 sps:$4 sm:$0xff]  }
  0xaa   :  { %260 = vmatprep.subr.bf16.mxu0 %v7248_v5  ;;  %v7271_v21 = vld [vmem:[#allocation8 + $0x24] ss:$16 sps:$4 sm:$0xff]   ;;  %v7269_v22 = vld [vmem:[#allocation8 + $0x20] ss:$16 sps:$4 sm:$0xff]   ;;  %s8266_s8 = smov [#allocation17]  }
  0xab   :  { %v7274_v23 = vld [vmem:[#allocation8 + $0x44] ss:$16 sps:$4 sm:$0xff]   ;;  %v7272_v24 = vld [vmem:[#allocation8 + $0x40] ss:$16 sps:$4 sm:$0xff]   ;;  %s6272_s24 = sshll.u32 %s8266_s8, 4  ;;  %s6273_s24 = int_to_ptr.vmem [resolvable:$true] %s6272_s24 }
  0xac   :  { %v7277_v25 = vld [vmem:[#allocation8 + $0x64] ss:$16 sps:$4 sm:$0xff]   ;;  %v7275_v26 = vld [vmem:[#allocation8 + $0x60] ss:$16 sps:$4 sm:$0xff]   ;;  %s8214_s26 = scalar_lea.vmem %s6273_s24, 896  ;;  %p8219_p3 = scmp.lt.s32.totalorder %s6273_s24, %s6273_s24 }
  0xad   :  { %261 = vmatpush1.bf16.msra.mxu0 %v7250_v6  ;;  %v7280_v27 = vld [vmem:[#allocation8 + $0x84] ss:$16 sps:$4 sm:$0xff]   ;;  %v7278_v28 = vld [vmem:[#allocation8 + $0x80] ss:$16 sps:$4 sm:$0xff]   ;;  %p8215_p2 = scmp.ne.s32.totalorder %s6273_s24, %s8214_s26  ;;  %p8220_p4 = scmp.lt.s32.totalorder %s8214_s26, %s8214_s26 }
  0xae   :  { %262 = vmatprep.subr.bf16.mxu0 %v7251_v7  ;;  %v7283_v29 = vld [vmem:[#allocation8 + $0xa4] ss:$16 sps:$4 sm:$0xff]   ;;  %v7281_v30 = vld [vmem:[#allocation8 + $0xa0] ss:$16 sps:$4 sm:$0xff]  }
  0xaf   :  { %v7286_v31 = vld [vmem:[#allocation8 + $0xc4] ss:$16 sps:$4 sm:$0xff]   ;;  %v7284_v32 = vld [vmem:[#allocation8 + $0xc0] ss:$16 sps:$4 sm:$0xff]   ;;  %p8221_p5 = por %p8220_p4, %p8219_p3 }
  0xb0   :  { %v7289_v33 = vld [vmem:[#allocation8 + $0xe4] ss:$16 sps:$4 sm:$0xff]   ;;  %v7287_v34 = vld [vmem:[#allocation8 + $0xe0] ss:$16 sps:$4 sm:$0xff]  }
  0xb1   :  { %263 = vmatpush1.bf16.msra.mxu0 %v7253_v8  ;;  %v7292_v35 = vld [vmem:[#allocation8 + $0x104] ss:$16 sps:$4 sm:$0xff]   ;;  %v7290_v36 = vld [vmem:[#allocation8 + $0x100] ss:$16 sps:$4 sm:$0xff]   ;;  %p8222_p6 = pnand %p8221_p5, %p8215_p2 }
  0xb2   :  { %264 = vmatprep.subr.bf16.mxu0 %v7254_v9  ;;  %v7295_v37 = vld [vmem:[#allocation8 + $0x124] ss:$16 sps:$4 sm:$0xff]   ;;  %v7293_v38 = vld [vmem:[#allocation8 + $0x120] ss:$16 sps:$4 sm:$0xff]  }
  0xb3   :  { %v7298_v39 = vld [vmem:[#allocation8 + $0x144] ss:$16 sps:$4 sm:$0xff]   ;;  %v7296_v40 = vld [vmem:[#allocation8 + $0x140] ss:$16 sps:$4 sm:$0xff]  }
  0xb4   :  { %v7301_v41 = vld [vmem:[#allocation8 + $0x164] ss:$16 sps:$4 sm:$0xff]   ;;  %v7299_v42 = vld [vmem:[#allocation8 + $0x160] ss:$16 sps:$4 sm:$0xff]  }
  0xb5   :  { %265 = vmatpush1.bf16.msra.mxu0 %v7256_v10  ;;  %v7304_v43 = vld [vmem:[#allocation8 + $0x184] ss:$16 sps:$4 sm:$0xff]   ;;  %v7302_v44 = vld [vmem:[#allocation8 + $0x180] ss:$16 sps:$4 sm:$0xff]  }
  0xb6   :  { %266 = vmatprep.subr.bf16.mxu0 %v7257_v11  ;;  %v7307_v45 = vld [vmem:[#allocation8 + $0x1a4] ss:$16 sps:$4 sm:$0xff]   ;;  %v7305_v46 = vld [vmem:[#allocation8 + $0x1a0] ss:$16 sps:$4 sm:$0xff]  }
  0xb7   :  { %v7310_v47 = vld [vmem:[#allocation8 + $0x1c4] ss:$16 sps:$4 sm:$0xff]   ;;  %v7308_v48 = vld [vmem:[#allocation8 + $0x1c0] ss:$16 sps:$4 sm:$0xff]  }
  0xb8   :  { %v7313_v49 = vld [vmem:[#allocation8 + $0x1e4] ss:$16 sps:$4 sm:$0xff]   ;;  %v7311_v50 = vld [vmem:[#allocation8 + $0x1e0] ss:$16 sps:$4 sm:$0xff]  }
  0xb9   :  { %267 = vmatpush1.bf16.msra.mxu0 %v7259_v12  ;;  %v809_v52 = vld [vmem:[#allocation11] sm:$0xff] }
  0xba   :  { %268 = vmatprep.subr.bf16.mxu0 %v7260_v13  ;;  %v813_v53 = vld [vmem:[#allocation11 + $0x20] sm:$0xff] }
  0xbb   :  { %v6366_v54 = vcombine.high %v809_v52, %v813_v53  ;;  %v6365_v55 = vcombine.low %v809_v52, %v813_v53  ;;  %v817_v56 = vld [vmem:[#allocation11 + $0x40] sm:$0xff] }
  0xbc   :  { %v821_v57 = vld [vmem:[#allocation11 + $0x60] sm:$0xff] }
  0xbd   :  { %269 = vmatpush1.bf16.msra.mxu0 %v7262_v14  ;;  %v6374_v58 = vcombine.high %v817_v56, %v821_v57  ;;  %2387 = vmatprep.subr.bf16.mxu1 %v6366_v54  ;;  %v6373_v59 = vcombine.low %v817_v56, %v821_v57  ;;  %v825_v60 = vld [vmem:[#allocation11 + $0x80] sm:$0xff] }
  0xbe   :  { %270 = vmatprep.subr.bf16.mxu0 %v7263_v15  ;;  %2388 = vmatpush1.bf16.msra.mxu1 %v6365_v55  ;;  %v829_v61 = vld [vmem:[#allocation11 + $0xa0] sm:$0xff] }
  0xbf   :  { %2389 = vmatprep.subr.bf16.mxu1 %v6374_v58  ;;  %v6382_v62 = vcombine.high %v825_v60, %v829_v61  ;;  %v6381_v63 = vcombine.low %v825_v60, %v829_v61  ;;  %v833_v0 = vld [vmem:[#allocation11 + $0xc0] sm:$0xff] }
  0xc0   :  { %v837_v1 = vld [vmem:[#allocation11 + $0xe0] sm:$0xff] }
  0xc1   :  { %271 = vmatpush1.bf16.msra.mxu0 %v7265_v16  ;;  %v6390_v2 = vcombine.high %v833_v0, %v837_v1  ;;  %v6389_v3 = vcombine.low %v833_v0, %v837_v1  ;;  %v841_v4 = vld [vmem:[#allocation11 + $0x100] sm:$0xff]  ;;  %v7319_v0 = vld [vmem:[#allocation8 + $0x2c] ss:$16 sps:$4 sm:$0xff]  }
  0xc2   :  { %711 = vmatprep.subr.bf16.mxu0 %v7268_v18  ;;  %2390 = vmatpush1.bf16.msra.mxu1 %v6373_v59  ;;  %v845_v5 = vld [vmem:[#allocation11 + $0x120] sm:$0xff] }
  0xc3   :  { %2391 = vmatprep.subr.bf16.mxu1 %v6382_v62  ;;  %v6398_v6 = vcombine.high %v841_v4, %v845_v5  ;;  %v6397_v7 = vcombine.low %v841_v4, %v845_v5  ;;  %v849_v8 = vld [vmem:[#allocation11 + $0x140] sm:$0xff]  ;;  %v7325_v4 = vld [vmem:[#allocation8 + $0x6c] ss:$16 sps:$4 sm:$0xff]  }
  0xc4   :  { %289 = vmatmul.mubr.bf16.vlgmr.msra.gmra.mrb[0].mxu0 %v147_v20  ;;  %v853_v9 = vld [vmem:[#allocation11 + $0x160] sm:$0xff] }
  0xc5   :  { %712 = vmatpush1.bf16.msra.mxu0 %v7266_v19  ;;  %v6406_v10 = vcombine.high %v849_v8, %v853_v9  ;;  %v6405_v11 = vcombine.low %v849_v8, %v853_v9  ;;  %v857_v12 = vld [vmem:[#allocation11 + $0x180] sm:$0xff]  ;;  %v7331_v8 = vld [vmem:[#allocation8 + $0xac] ss:$16 sps:$4 sm:$0xff]  }
  0xc6   :  { %713 = vmatprep.subr.bf16.mxu0 %v7271_v21  ;;  %2392 = vmatpush1.bf16.msra.mxu1 %v6381_v63  ;;  %v861_v13 = vld [vmem:[#allocation11 + $0x1a0] sm:$0xff] }
  0xc7   :  { %2393 = vmatprep.subr.bf16.mxu1 %v6390_v2  ;;  %v6414_v14 = vcombine.high %v857_v12, %v861_v13  ;;  %v6413_v15 = vcombine.low %v857_v12, %v861_v13  ;;  %v865_v16 = vld [vmem:[#allocation11 + $0x1c0] sm:$0xff]  ;;  %v7322_v2 = vld [vmem:[#allocation8 + $0x4c] ss:$16 sps:$4 sm:$0xff]  }
  0xc8   :  { %v869_v17 = vld [vmem:[#allocation11 + $0x1e0] sm:$0xff]  ;;  %v7337_v12 = vld [vmem:[#allocation8 + $0xec] ss:$16 sps:$4 sm:$0xff]  }
  0xc9   :  { %714 = vmatpush1.bf16.msra.mxu0 %v7269_v22  ;;  %v6422_v18 = vcombine.high %v865_v16, %v869_v17  ;;  %v6421_v19 = vcombine.low %v865_v16, %v869_v17  ;;  %v873_v20 = vld [vmem:[#allocation11 + $0x200] sm:$0xff]  ;;  %v7343_v16 = vld [vmem:[#allocation8 + $0x12c] ss:$16 sps:$4 sm:$0xff]  }
  0xca   :  { %715 = vmatprep.subr.bf16.mxu0 %v7274_v23  ;;  %2394 = vmatpush1.bf16.msra.mxu1 %v6389_v3  ;;  %v877_v21 = vld [vmem:[#allocation11 + $0x220] sm:$0xff] }
  0xcb   :  { %2395 = vmatprep.subr.bf16.mxu1 %v6398_v6  ;;  %v6430_v22 = vcombine.high %v873_v20, %v877_v21  ;;  %v6429_v23 = vcombine.low %v873_v20, %v877_v21  ;;  %v7314_v62 = vld [vmem:[#allocation8 + $0x8] ss:$16 sps:$4 sm:$0xff]   ;;  %v7328_v6 = vld [vmem:[#allocation8 + $0x8c] ss:$16 sps:$4 sm:$0xff]  }
  0xcc   :  { %v7317_v1 = vld [vmem:[#allocation8 + $0x28] ss:$16 sps:$4 sm:$0xff]   ;;  %v7349_v20 = vld [vmem:[#allocation8 + $0x16c] ss:$16 sps:$4 sm:$0xff]  }
  0xcd   :  { %716 = vmatpush1.bf16.msra.mxu0 %v7272_v24  ;;  %v881_v24 = vld [vmem:[#allocation11 + $0x240] sm:$0xff] }
  0xce   :  { %717 = vmatprep.subr.bf16.mxu0 %v7277_v25  ;;  %2396 = vmatpush1.bf16.msra.mxu1 %v6397_v7  ;;  %v885_v25 = vld [vmem:[#allocation11 + $0x260] sm:$0xff] }
  0xcf   :  { %2397 = vmatprep.subr.bf16.mxu1 %v6406_v10  ;;  %v7320_v3 = vld [vmem:[#allocation8 + $0x48] ss:$16 sps:$4 sm:$0xff]   ;;  %v7334_v10 = vld [vmem:[#allocation8 + $0xcc] ss:$16 sps:$4 sm:$0xff]  }
  0xd0   :  { %v7323_v5 = vld [vmem:[#allocation8 + $0x68] ss:$16 sps:$4 sm:$0xff]  }
  0xd1   :  { %718 = vmatpush1.bf16.msra.mxu0 %v7275_v26  ;;  %v6438_v26 = vcombine.high %v881_v24, %v885_v25  ;;  %v7326_v7 = vld [vmem:[#allocation8 + $0x88] ss:$16 sps:$4 sm:$0xff]  }
  0xd2   :  { %719 = vmatprep.subr.bf16.mxu0 %v7280_v27  ;;  %2398 = vmatpush1.bf16.msra.mxu1 %v6405_v11  ;;  %v6437_v27 = vcombine.low %v881_v24, %v885_v25  ;;  %v7329_v9 = vld [vmem:[#allocation8 + $0xa8] ss:$16 sps:$4 sm:$0xff]   ;;  %v7355_v24 = vld [vmem:[#allocation8 + $0x1ac] ss:$16 sps:$4 sm:$0xff]  }
  0xd3   :  { %2399 = vmatprep.subr.bf16.mxu1 %v6414_v14  ;;  %v7332_v11 = vld [vmem:[#allocation8 + $0xc8] ss:$16 sps:$4 sm:$0xff]   ;;  %v7340_v14 = vld [vmem:[#allocation8 + $0x10c] ss:$16 sps:$4 sm:$0xff]  }
  0xd4   :  { %v7335_v13 = vld [vmem:[#allocation8 + $0xe8] ss:$16 sps:$4 sm:$0xff]  }
  0xd5   :  { %720 = vmatpush1.bf16.msra.mxu0 %v7278_v28  ;;  %v889_v28 = vld [vmem:[#allocation11 + $0x280] sm:$0xff] }
  0xd6   :  { %721 = vmatprep.subr.bf16.mxu0 %v7283_v29  ;;  %2400 = vmatpush1.bf16.msra.mxu1 %v6413_v15  ;;  %v893_v29 = vld [vmem:[#allocation11 + $0x2a0] sm:$0xff] }
  0xd7   :  { %2401 = vmatprep.subr.bf16.mxu1 %v6422_v18  ;;  %v7338_v15 = vld [vmem:[#allocation8 + $0x108] ss:$16 sps:$4 sm:$0xff]   ;;  %v7346_v18 = vld [vmem:[#allocation8 + $0x14c] ss:$16 sps:$4 sm:$0xff]  }
  0xd8   :  { %v7341_v17 = vld [vmem:[#allocation8 + $0x128] ss:$16 sps:$4 sm:$0xff]  }
  0xd9   :  { %722 = vmatpush1.bf16.msra.mxu0 %v7281_v30  ;;  %v6446_v30 = vcombine.high %v889_v28, %v893_v29  ;;  %v7347_v21 = vld [vmem:[#allocation8 + $0x168] ss:$16 sps:$4 sm:$0xff]  }
  0xda   :  { %723 = vmatprep.subr.bf16.mxu0 %v7286_v31  ;;  %2402 = vmatpush1.bf16.msra.mxu1 %v6421_v19  ;;  %v166_v31 = vlaneseq  ;;  %v7344_v19 = vld [vmem:[#allocation8 + $0x148] ss:$16 sps:$4 sm:$0xff]  }
  0xdb   :  { %2403 = vmatprep.subr.bf16.mxu1 %v6430_v22  ;;  %v7352_v22 = vld [vmem:[#allocation8 + $0x18c] ss:$16 sps:$4 sm:$0xff]   ;;  %v7353_v25 = vld [vmem:[#allocation8 + $0x1a8] ss:$16 sps:$4 sm:$0xff]  }
  0xdd   :  { %724 = vmatpush1.bf16.msra.mxu0 %v7284_v32  ;;  %v6445_v32 = vcombine.low %v889_v28, %v893_v29  ;;  %v7361_v28 = vld [vmem:[#allocation8 + $0x1ec] ss:$16 sps:$4 sm:$0xff]  }
  0xde   :  { %725 = vmatprep.subr.bf16.mxu0 %v7289_v33  ;;  %2404 = vmatpush1.bf16.msra.mxu1 %v6429_v23  ;;  %v897_v33 = vld [vmem:[#allocation11 + $0x2c0] sm:$0xff]  ;;  %v810_v29 = vld [vmem:[#allocation11 + $0x8] sm:$0xff] }
  0xdf   :  { %2405 = vmatprep.subr.bf16.mxu1 %v6438_v26  ;;  %v7350_v23 = vld [vmem:[#allocation8 + $0x188] ss:$16 sps:$4 sm:$0xff]   ;;  %v7358_v26 = vld [vmem:[#allocation8 + $0x1cc] ss:$16 sps:$4 sm:$0xff]  }
  0xe1   :  { %726 = vmatpush1.bf16.msra.mxu0 %v7287_v34  ;;  %v901_v34 = vld [vmem:[#allocation11 + $0x2e0] sm:$0xff] }
  0xe2   :  { %727 = vmatprep.subr.bf16.mxu0 %v7292_v35  ;;  %2406 = vmatpush1.bf16.msra.mxu1 %v6437_v27  ;;  %v6454_v35 = vcombine.high %v897_v33, %v901_v34  ;;  %v7356_v27 = vld [vmem:[#allocation8 + $0x1c8] ss:$16 sps:$4 sm:$0xff]  }
  0xe3   :  { %2407 = vmatprep.subr.bf16.mxu1 %v6446_v30  ;;  %v814_v30 = vld [vmem:[#allocation11 + $0x28] sm:$0xff] }
  0xe5   :  { %728 = vmatpush1.bf16.msra.mxu0 %v7290_v36  ;;  %v8425_v36 = vshrl.u32 %v166_v31, 7  ;;  %v7359_v31 = vld [vmem:[#allocation8 + $0x1e8] ss:$16 sps:$4 sm:$0xff]  }
  0xe6   :  { %729 = vmatprep.subr.bf16.mxu0 %v7295_v37  ;;  %2408 = vmatpush1.bf16.msra.mxu1 %v6445_v32  ;;  %v6453_v37 = vcombine.low %v897_v33, %v901_v34  ;;  %v6368_v32 = vcombine.high %v810_v29, %v814_v30  ;;  %v818_v33 = vld [vmem:[#allocation11 + $0x48] sm:$0xff] }
  0xe7   :  { %2409 = vmatprep.subr.bf16.mxu1 %v6454_v35  ;;  %v822_v34 = vld [vmem:[#allocation11 + $0x68] sm:$0xff]  ;;  %v6367_v35 = vcombine.low %v810_v29, %v814_v30 }
  0xe9   :  { %730 = vmatpush1.bf16.msra.mxu0 %v7293_v38  ;;  %v905_v38 = vld [vmem:[#allocation11 + $0x300] sm:$0xff] }
  0xea   :  { %731 = vmatprep.subr.bf16.mxu0 %v7298_v39  ;;  %v909_v39 = vld [vmem:[#allocation11 + $0x320] sm:$0xff]  ;;  %2410 = vmatpush1.bf16.msra.mxu1 %v6453_v37  ;;  %v6376_v37 = vcombine.high %v818_v33, %v822_v34 }
  0xed   :  { %732 = vmatpush1.bf16.msra.mxu0 %v7296_v40  ;;  %v164_v40 = vld [vmem:[#allocation7] sm:$0x3] }
  0xee   :  { %733 = vmatprep.subr.bf16.mxu0 %v7301_v41  ;;  %v6462_v41 = vcombine.high %v905_v38, %v909_v39 }
  0xf0   :  { %2411 = vmatprep.subr.bf16.mxu1 %v6462_v41 }
  0xf1   :  { %734 = vmatpush1.bf16.msra.mxu0 %v7299_v42  ;;  %v8428_v42 = vsub.s32 0, %v8425_v36 }
  0xf2   :  { %735 = vmatprep.subr.bf16.mxu0 %v7304_v43  ;;  %v8431_v43 = vsub.s32 1, %v8425_v36 }
  0xf5   :  { %736 = vmatpush1.bf16.msra.mxu0 %v7302_v44  ;;  %v6461_v44 = vcombine.low %v905_v38, %v909_v39  ;;  %v826_v38 = vld [vmem:[#allocation11 + $0x88] sm:$0xff] }
  0xf6   :  { %737 = vmatprep.subr.bf16.mxu0 %v7307_v45  ;;  %v913_v45 = vld [vmem:[#allocation11 + $0x340] sm:$0xff]  ;;  %v830_v39 = vld [vmem:[#allocation11 + $0xa8] sm:$0xff] }
  0xf7   :  { %2412 = vmatpush1.bf16.msra.mxu1 %v6461_v44  ;;  %v6384_v41 = vcombine.high %v826_v38, %v830_v39  ;;  %v834_v44 = vld [vmem:[#allocation11 + $0xc8] sm:$0xff] }
  0xf9   :  { %738 = vmatpush1.bf16.msra.mxu0 %v7305_v46  ;;  %v917_v46 = vld [vmem:[#allocation11 + $0x360] sm:$0xff] }
  0xfa   :  { %739 = vmatprep.subr.bf16.mxu0 %v7310_v47  ;;  %v6470_v47 = vcombine.high %v913_v45, %v917_v46 }
  0xfc   :  { %2413 = vmatprep.subr.bf16.mxu1 %v6470_v47 }
  0xfd   :  { %740 = vmatpush1.bf16.msra.mxu0 %v7308_v48  ;;  %v169_v48 = vrot.slane %v164_v40, %v8428_v42 }
  0xfe   :  { %741 = vmatprep.subr.bf16.mxu0 %v7313_v49  ;;  %v173_v49 = vrot.slane %v164_v40, %v8431_v43  ;;  %v6375_v40 = vcombine.low %v818_v33, %v822_v34 }
 0x101   :  { %742 = vmatpush1.bf16.msra.mxu0 %v7311_v50  ;;  %v6469_v50 = vcombine.low %v913_v45, %v917_v46  ;;  %v838_v45 = vld [vmem:[#allocation11 + $0xe8] sm:$0xff]  ;;  %v6383_v46 = vcombine.low %v826_v38, %v830_v39 }
 0x102   :  { %752 = vmatprep.subr.bf16.mxu0 %v7316_v51  ;;  %v6392_v47 = vcombine.high %v834_v44, %v838_v45 }
 0x103   :  { %2414 = vmatpush1.bf16.msra.mxu1 %v6469_v50  ;;  %v6391_v50 = vcombine.low %v834_v44, %v838_v45 }
 0x197   :  { %v290_v51 = vpop.f32.mrb[0].mxu0 }
 0x198   :  { %v291_v52 = vadd.f32 %v290_v51, %v169_v48  ;;  %v292_v53 = vpop.f32.mrb[1].mxu0  ;;  %v842_v48 = vld [vmem:[#allocation11 + $0x108] sm:$0xff] }
 0x199   :  { %v293_v54 = vadd.f32 %v292_v53, %v173_v49  ;;  %v294_v55 = vpop.f32.mrb[2].mxu0  ;;  %v846_v49 = vld [vmem:[#allocation11 + $0x128] sm:$0xff] }
 0x19a   :  { %vm297_vm0 = vcmp.gt.f32.partialorder %v291_v52, 0.0  ;;  %v299_v56 = vmul.f32 0.2, %v291_v52  ;;  %v295_v57 = vpop.f32.mrb[3].mxu0  ;;  %v6400_v51 = vcombine.high %v842_v48, %v846_v49  ;;  %v854_v53 = vld [vmem:[#allocation11 + $0x168] sm:$0xff] }
 0x19b   :  { %vm298_vm1 = vcmp.gt.f32.partialorder %v293_v54, 0.0  ;;  %v300_v58 = vmul.f32 0.2, %v293_v54  ;;  %v862_v57 = vld [vmem:[#allocation11 + $0x1a8] sm:$0xff] }
 0x19c   :  { %v301_v59 = vsel %vm297_vm0, %v291_v52, %v299_v56  ;;  %v850_v52 = vld [vmem:[#allocation11 + $0x148] sm:$0xff] }
 0x19d   :  { %v302_v60 = vsel %vm298_vm1, %v293_v54, %v300_v58  ;;  %v8435_v63 = vpack.c.bf16 %v301_v59, %v301_v59  ;;  %v6399_v54 = vcombine.low %v842_v48, %v846_v49  ;;  %v6408_v55 = vcombine.high %v850_v52, %v854_v53  ;;  %v858_v56 = vld [vmem:[#allocation11 + $0x188] sm:$0xff] }
 0x19e   :  { %v304_v61 = vpack.c.bf16 %v302_v60, %v302_v60  ;;  %v6407_v58 = vcombine.low %v850_v52, %v854_v53  ;;  %v6416_v59 = vcombine.high %v858_v56, %v862_v57  ;;  %v921_v60 = vld [vmem:[#allocation11 + $0x380] sm:$0xff]  ;;  %v8455_v52 = vld [vmem:[#allocation10] sm:$0xf] }
 0x19f   :  { %v374_v53 = vrot.slane %v8455_v52, %v8428_v42 }
 0x1a0   :  { %743 = vmatprep.mubr.bf16.mxu0 %v304_v61 }
 0x1a1   :  { %744 = vmatmul.mubr.bf16.vlgmr.msra.gmra.mrb[4].mxu0 %v8435_v63 }
 0x1a2   :  { %753 = vmatpush1.bf16.msra.mxu0 %v7314_v62  ;;  %784 = vmatprep.mubr.bf16.mxu0 %v304_v61  ;;  %v925_v61 = vld [vmem:[#allocation11 + $0x3a0] sm:$0xff]  ;;  %v866_v62 = vld [vmem:[#allocation11 + $0x1c8] sm:$0xff] }
 0x1a3   :  { %754 = vmatprep.subr.bf16.mxu0 %v7319_v0  ;;  %v6478_v0 = vcombine.high %v921_v60, %v925_v61 }
 0x1a5   :  { %2415 = vmatprep.subr.bf16.mxu1 %v6478_v0 }
 0x1a6   :  { %755 = vmatpush1.bf16.msra.mxu0 %v7317_v1  ;;  %v6477_v1 = vcombine.low %v921_v60, %v925_v61 }
 0x1a7   :  { %756 = vmatprep.subr.bf16.mxu0 %v7322_v2  ;;  %v6415_v2 = vcombine.low %v858_v56, %v862_v57 }
 0x1a8   :  { %2416 = vmatpush1.bf16.msra.mxu1 %v6477_v1  ;;  %v949_v1 = vld [vmem:[#allocation11 + $0x460] sm:$0xff] }
 0x1aa   :  { %757 = vmatpush1.bf16.msra.mxu0 %v7320_v3 }
 0x1ab   :  { %758 = vmatprep.subr.bf16.mxu0 %v7325_v4  ;;  %v929_v4 = vld [vmem:[#allocation11 + $0x3c0] sm:$0xff] }
 0x1ae   :  { %759 = vmatpush1.bf16.msra.mxu0 %v7323_v5  ;;  %v933_v5 = vld [vmem:[#allocation11 + $0x3e0] sm:$0xff] }
 0x1af   :  { %760 = vmatprep.subr.bf16.mxu0 %v7328_v6  ;;  %v874_v6 = vld [vmem:[#allocation11 + $0x208] sm:$0xff] }
 0x1b2   :  { %761 = vmatpush1.bf16.msra.mxu0 %v7326_v7  ;;  %v878_v7 = vld [vmem:[#allocation11 + $0x228] sm:$0xff] }
 0x1b3   :  { %762 = vmatprep.subr.bf16.mxu0 %v7331_v8  ;;  %v6486_v8 = vcombine.high %v929_v4, %v933_v5 }
 0x1b5   :  { %2417 = vmatprep.subr.bf16.mxu1 %v6486_v8 }
 0x1b6   :  { %763 = vmatpush1.bf16.msra.mxu0 %v7329_v9  ;;  %v6485_v9 = vcombine.low %v929_v4, %v933_v5 }
 0x1b7   :  { %764 = vmatprep.subr.bf16.mxu0 %v7334_v10 }
 0x1b8   :  { %2418 = vmatpush1.bf16.msra.mxu1 %v6485_v9  ;;  %v953_v9 = vld [vmem:[#allocation11 + $0x480] sm:$0xff] }
 0x1ba   :  { %765 = vmatpush1.bf16.msra.mxu0 %v7332_v11  ;;  %v6432_v11 = vcombine.high %v874_v6, %v878_v7 }
 0x1bb   :  { %766 = vmatprep.subr.bf16.mxu0 %v7337_v12  ;;  %v8439_v12 = vld [vmem:[#allocation11 + $0x400] sm:$0xff] }
 0x1be   :  { %767 = vmatpush1.bf16.msra.mxu0 %v7335_v13  ;;  %v8441_v13 = vld [vmem:[#allocation11 + $0x420] sm:$0xff] }
 0x1bf   :  { %768 = vmatprep.subr.bf16.mxu0 %v7340_v14  ;;  %v8443_v14 = vld [vmem:[#allocation11 + $0x408] sm:$0xff] }
 0x1c2   :  { %769 = vmatpush1.bf16.msra.mxu0 %v7338_v15  ;;  %v882_v15 = vld [vmem:[#allocation11 + $0x248] sm:$0xff] }
 0x1c3   :  { %770 = vmatprep.subr.bf16.mxu0 %v7343_v16  ;;  %v886_v16 = vld [vmem:[#allocation11 + $0x268] sm:$0xff] }
 0x1c6   :  { %771 = vmatpush1.bf16.msra.mxu0 %v7341_v17  ;;  %v6494_v17 = vcombine.high %v8439_v12, %v8441_v13 }
 0x1c7   :  { %772 = vmatprep.subr.bf16.mxu0 %v7346_v18  ;;  %v8447_v18 = vld [vmem:[#allocation11 + $0x428] sm:$0xff] }
 0x1c8   :  { %2428 = vmatprep.subr.bf16.mxu1 %v6494_v17 }
 0x1ca   :  { %773 = vmatpush1.bf16.msra.mxu0 %v7344_v19  ;;  %v6493_v19 = vcombine.low %v8439_v12, %v8441_v13 }
 0x1cb   :  { %774 = vmatprep.subr.bf16.mxu0 %v7349_v20  ;;  %v6495_v20 = vcombine.low %v8443_v14, %v8447_v18 }
 0x1ce   :  { %775 = vmatpush1.bf16.msra.mxu0 %v7347_v21  ;;  %v6431_v21 = vcombine.low %v874_v6, %v878_v7 }
 0x1cf   :  { %776 = vmatprep.subr.bf16.mxu0 %v7352_v22  ;;  %v6440_v22 = vcombine.high %v882_v15, %v886_v16 }
 0x1d2   :  { %777 = vmatpush1.bf16.msra.mxu0 %v7350_v23  ;;  %v890_v23 = vld [vmem:[#allocation11 + $0x288] sm:$0xff] }
 0x1d3   :  { %778 = vmatprep.subr.bf16.mxu0 %v7355_v24  ;;  %v894_v24 = vld [vmem:[#allocation11 + $0x2a8] sm:$0xff] }
 0x1d4   :  { %v6447_v29 = vcombine.low %v890_v23, %v894_v24 }
 0x1d6   :  { %779 = vmatpush1.bf16.msra.mxu0 %v7353_v25  ;;  %v6439_v25 = vcombine.low %v882_v15, %v886_v16  ;;  %v958_v15 = vld [vmem:[#allocation11 + $0x4a8] sm:$0xff] }
 0x1d7   :  { %780 = vmatprep.subr.bf16.mxu0 %v7358_v26  ;;  %v6448_v26 = vcombine.high %v890_v23, %v894_v24  ;;  %v961_v23 = vld [vmem:[#allocation11 + $0x4c0] sm:$0xff] }
 0x1d8   :  { %v965_v24 = vld [vmem:[#allocation11 + $0x4e0] sm:$0xff] }
 0x1d9   :  { %v6518_v12 = vcombine.high %v961_v23, %v965_v24 }
 0x1da   :  { %781 = vmatpush1.bf16.msra.mxu0 %v7356_v27  ;;  %v898_v27 = vld [vmem:[#allocation11 + $0x2c8] sm:$0xff] }
 0x1db   :  { %782 = vmatprep.subr.bf16.mxu0 %v7361_v28  ;;  %v902_v28 = vld [vmem:[#allocation11 + $0x2e8] sm:$0xff] }
 0x1dc   :  { %v6456_v30 = vcombine.high %v898_v27, %v902_v28  ;;  %v6455_v33 = vcombine.low %v898_v27, %v902_v28 }
 0x1de   :  { %783 = vmatpush1.bf16.msra.mxu0 %v7359_v31  ;;  %v906_v31 = vld [vmem:[#allocation11 + $0x308] sm:$0xff] }
 0x1df   :  { %2469 = vmatprep.subr.bf16.mxu0 %v6368_v32  ;;  %v910_v32 = vld [vmem:[#allocation11 + $0x328] sm:$0xff] }
 0x1e0   :  { %v6464_v34 = vcombine.high %v906_v31, %v910_v32  ;;  %v6463_v38 = vcombine.low %v906_v31, %v910_v32 }
 0x1e1   :  { %785 = vmatmul.mubr.bf16.vlgmr.msra.gmra.mrb[8].mxu0 %v8435_v63  ;;  %v870_v63 = vld [vmem:[#allocation11 + $0x1e8] sm:$0xff] }
 0x1e2   :  { %2470 = vmatpush1.bf16.msra.mxu0 %v6367_v35  ;;  %v6424_v3 = vcombine.high %v866_v62, %v870_v63  ;;  %v6423_v10 = vcombine.low %v866_v62, %v870_v63  ;;  %v914_v35 = vld [vmem:[#allocation11 + $0x348] sm:$0xff]  ;;  %v945_v63 = vld [vmem:[#allocation11 + $0x440] sm:$0xff] }
 0x1e3   :  { %2471 = vmatprep.subr.bf16.mxu0 %v6376_v37  ;;  %v918_v37 = vld [vmem:[#allocation11 + $0x368] sm:$0xff]  ;;  %v6502_v7 = vcombine.high %v945_v63, %v949_v1  ;;  %v6501_v16 = vcombine.low %v945_v63, %v949_v1 }
 0x1e4   :  { %v6472_v39 = vcombine.high %v914_v35, %v918_v37  ;;  %v6471_v44 = vcombine.low %v914_v35, %v918_v37  ;;  %v978_v35 = vld [vmem:[#allocation11 + $0x548] sm:$0xff] }
 0x1e5   :  { %v982_v37 = vld [vmem:[#allocation11 + $0x568] sm:$0xff] }
 0x1e6   :  { %2472 = vmatpush1.bf16.msra.mxu0 %v6375_v40  ;;  %v922_v40 = vld [vmem:[#allocation11 + $0x388] sm:$0xff] }
 0x1e7   :  { %2473 = vmatprep.subr.bf16.mxu0 %v6384_v41  ;;  %v926_v41 = vld [vmem:[#allocation11 + $0x3a8] sm:$0xff] }
 0x1e8   :  { %v6480_v45 = vcombine.high %v922_v40, %v926_v41  ;;  %v6479_v48 = vcombine.low %v922_v40, %v926_v41  ;;  %v6536_v41 = vcombine.high %v978_v35, %v982_v37  ;;  %v1002_v63 = vld [vmem:[#allocation11 + $0x608] sm:$0xff] }
 0x1ea   :  { %2474 = vmatpush1.bf16.msra.mxu0 %v6383_v46  ;;  %v930_v46 = vld [vmem:[#allocation11 + $0x3c8] sm:$0xff] }
 0x1eb   :  { %2475 = vmatprep.subr.bf16.mxu0 %v6392_v47  ;;  %v934_v47 = vld [vmem:[#allocation11 + $0x3e8] sm:$0xff] }
 0x1ec   :  { %v6488_v49 = vcombine.high %v930_v46, %v934_v47 }
 0x1ee   :  { %2476 = vmatpush1.bf16.msra.mxu0 %v6391_v50  ;;  %v6487_v50 = vcombine.low %v930_v46, %v934_v47  ;;  %v986_v46 = vld [vmem:[#allocation11 + $0x588] sm:$0xff] }
 0x1ef   :  { %2477 = vmatprep.subr.bf16.mxu0 %v6400_v51  ;;  %v6496_v51 = vcombine.high %v8443_v14, %v8447_v18  ;;  %v969_v14 = vld [vmem:[#allocation11 + $0x500] sm:$0xff]  ;;  %v990_v47 = vld [vmem:[#allocation11 + $0x5a8] sm:$0xff] }
 0x1f0   :  { %v973_v18 = vld [vmem:[#allocation11 + $0x520] sm:$0xff] }
 0x1f1   :  { %v6526_v31 = vcombine.high %v969_v14, %v973_v18 }
 0x1f2   :  { %2478 = vmatpush1.bf16.msra.mxu0 %v6399_v54  ;;  %v378_v54 = vrot.slane %v8455_v52, %v8431_v43 }
 0x1f3   :  { %2479 = vmatprep.subr.bf16.mxu0 %v6408_v55 }
 0x1f6   :  { %2480 = vmatpush1.bf16.msra.mxu0 %v6407_v58 }
 0x1f7   :  { %2481 = vmatprep.subr.bf16.mxu0 %v6416_v59 }
 0x1fa   :  { %2482 = vmatpush1.bf16.msra.mxu0 %v6415_v2  ;;  %v946_v2 = vld [vmem:[#allocation11 + $0x448] sm:$0xff] }
 0x1fb   :  { %2483 = vmatprep.subr.bf16.mxu0 %v6424_v3  ;;  %v950_v3 = vld [vmem:[#allocation11 + $0x468] sm:$0xff] }
 0x1fc   :  { %v6504_v8 = vcombine.high %v946_v2, %v950_v3  ;;  %v6503_v17 = vcombine.low %v946_v2, %v950_v3 }
 0x1fe   :  { %2484 = vmatpush1.bf16.msra.mxu0 %v6423_v10  ;;  %v957_v10 = vld [vmem:[#allocation11 + $0x4a0] sm:$0xff] }
 0x1ff   :  { %2485 = vmatprep.subr.bf16.mxu0 %v6432_v11  ;;  %v954_v11 = vld [vmem:[#allocation11 + $0x488] sm:$0xff]  ;;  %v6509_v27 = vcombine.low %v953_v9, %v957_v10 }
 0x200   :  { %v6511_v28 = vcombine.low %v954_v11, %v958_v15 }
 0x202   :  { %2486 = vmatpush1.bf16.msra.mxu0 %v6431_v21  ;;  %v6510_v21 = vcombine.high %v953_v9, %v957_v10  ;;  %v1010_v9 = vld [vmem:[#allocation11 + $0x648] sm:$0xff] }
 0x203   :  { %2487 = vmatprep.subr.bf16.mxu0 %v6440_v22  ;;  %v6512_v22 = vcombine.high %v954_v11, %v958_v15  ;;  %v1014_v10 = vld [vmem:[#allocation11 + $0x668] sm:$0xff] }
 0x206   :  { %2488 = vmatpush1.bf16.msra.mxu0 %v6439_v25  ;;  %v962_v25 = vld [vmem:[#allocation11 + $0x4c8] sm:$0xff] }
 0x207   :  { %2489 = vmatprep.subr.bf16.mxu0 %v6448_v26  ;;  %v966_v26 = vld [vmem:[#allocation11 + $0x4e8] sm:$0xff] }
 0x208   :  { %v6520_v13 = vcombine.high %v962_v25, %v966_v26 }
 0x20a   :  { %2490 = vmatpush1.bf16.msra.mxu0 %v6447_v29  ;;  %v6517_v29 = vcombine.low %v961_v23, %v965_v24  ;;  %v1018_v23 = vld [vmem:[#allocation11 + $0x688] sm:$0xff] }
 0x20b   :  { %2491 = vmatprep.subr.bf16.mxu0 %v6456_v30  ;;  %v6519_v30 = vcombine.low %v962_v25, %v966_v26  ;;  %v1022_v24 = vld [vmem:[#allocation11 + $0x6a8] sm:$0xff]  ;;  %v6567_v26 = vcombine.low %v1010_v9, %v1014_v10 }
 0x20e   :  { %2492 = vmatpush1.bf16.msra.mxu0 %v6455_v33  ;;  %v977_v33 = vld [vmem:[#allocation11 + $0x540] sm:$0xff] }
 0x20f   :  { %2493 = vmatprep.subr.bf16.mxu0 %v6464_v34  ;;  %v981_v34 = vld [vmem:[#allocation11 + $0x560] sm:$0xff] }
 0x210   :  { %v6534_v40 = vcombine.high %v977_v33, %v981_v34 }
 0x212   :  { %2494 = vmatpush1.bf16.msra.mxu0 %v6463_v38  ;;  %v6525_v38 = vcombine.low %v969_v14, %v973_v18  ;;  %v1026_v14 = vld [vmem:[#allocation11 + $0x6c8] sm:$0xff] }
 0x213   :  { %2495 = vmatprep.subr.bf16.mxu0 %v6472_v39  ;;  %v1030_v18 = vld [vmem:[#allocation11 + $0x6e8] sm:$0xff] }
 0x216   :  { %2496 = vmatpush1.bf16.msra.mxu0 %v6471_v44  ;;  %v985_v44 = vld [vmem:[#allocation11 + $0x580] sm:$0xff] }
 0x217   :  { %2497 = vmatprep.subr.bf16.mxu0 %v6480_v45  ;;  %v989_v45 = vld [vmem:[#allocation11 + $0x5a0] sm:$0xff] }
 0x21a   :  { %2498 = vmatpush1.bf16.msra.mxu0 %v6479_v48  ;;  %v6533_v48 = vcombine.low %v977_v33, %v981_v34  ;;  %v1034_v33 = vld [vmem:[#allocation11 + $0x708] sm:$0xff] }
 0x21b   :  { %2499 = vmatprep.subr.bf16.mxu0 %v6488_v49  ;;  %v6535_v49 = vcombine.low %v978_v35, %v982_v37  ;;  %v1038_v34 = vld [vmem:[#allocation11 + $0x728] sm:$0xff]  ;;  %v6583_v37 = vcombine.low %v1026_v14, %v1030_v18 }
 0x21e   :  { %2500 = vmatpush1.bf16.msra.mxu0 %v6487_v50  ;;  %v6542_v50 = vcombine.high %v985_v44, %v989_v45 }
 0x21f   :  { %2510 = vmatprep.subr.bf16.mxu0 %v6496_v51  ;;  %v6544_v51 = vcombine.high %v986_v46, %v990_v47 }
 0x274   :  { %v745_v55 = vpop.f32.mrb[4].mxu0 }
 0x275   :  { %v746_v56 = vadd.f32 %v745_v55, %v374_v53  ;;  %v747_v57 = vpop.f32.mrb[5].mxu0  ;;  %v993_v53 = vld [vmem:[#allocation11 + $0x5c0] sm:$0xff]  ;;  %v994_v55 = vld [vmem:[#allocation11 + $0x5c8] sm:$0xff] }
 0x276   :  { %v748_v58 = vadd.f32 %v747_v57, %v378_v54  ;;  %v749_v59 = vpop.f32.mrb[6].mxu0  ;;  %v997_v54 = vld [vmem:[#allocation11 + $0x5e0] sm:$0xff]  ;;  %v6541_v57 = vcombine.low %v985_v44, %v989_v45  ;;  %v1042_v44 = vld [vmem:[#allocation11 + $0x748] sm:$0xff] }
 0x277   :  { %vm793_vm2 = vcmp.gt.f32.partialorder %v746_v56, 0.0  ;;  %v797_v60 = vmul.f32 0.2, %v746_v56  ;;  %v750_v61 = vpop.f32.mrb[7].mxu0  ;;  %v6550_v59 = vcombine.high %v993_v53, %v997_v54  ;;  %v6549_v1 = vcombine.low %v993_v53, %v997_v54  ;;  %v1046_v45 = vld [vmem:[#allocation11 + $0x768] sm:$0xff]  ;;  %v1053_v53 = vld [vmem:[#allocation11 + $0x7a0] sm:$0xff] }
 0x278   :  { %vm794_vm3 = vcmp.gt.f32.partialorder %v748_v58, 0.0  ;;  %v798_v62 = vmul.f32 0.2, %v748_v58  ;;  %v1001_v61 = vld [vmem:[#allocation11 + $0x600] sm:$0xff]  ;;  %v1050_v54 = vld [vmem:[#allocation11 + $0x788] sm:$0xff] }
 0x279   :  { %v801_v0 = vsel %vm793_vm2, %v746_v56, %v797_v60  ;;  %v998_v56 = vld [vmem:[#allocation11 + $0x5e8] sm:$0xff] }
 0x27a   :  { %v802_v4 = vsel %vm794_vm3, %v748_v58, %v798_v62  ;;  %v8463_v6 = vpack.c.bf16 %v801_v0, %v801_v0  ;;  %v6543_v58 = vcombine.low %v986_v46, %v990_v47  ;;  %v6552_v60 = vcombine.high %v994_v55, %v998_v56  ;;  %v1005_v62 = vld [vmem:[#allocation11 + $0x620] sm:$0xff]  ;;  %v1006_v0 = vld [vmem:[#allocation11 + $0x628] sm:$0xff] }
 0x27b   :  { %v8461_v5 = vpack.c.bf16 %v802_v4, %v802_v4  ;;  %v6551_v2 = vcombine.low %v994_v55, %v998_v56  ;;  %v6558_v3 = vcombine.high %v1001_v61, %v1005_v62  ;;  %v6560_v4 = vcombine.high %v1002_v63, %v1006_v0  ;;  %v1054_v55 = vld [vmem:[#allocation11 + $0x7a8] sm:$0xff] }
 0x27c   :  { %v6557_v11 = vcombine.low %v1001_v61, %v1005_v62  ;;  %v6559_v15 = vcombine.low %v1002_v63, %v1006_v0  ;;  %v6591_v47 = vcombine.low %v1034_v33, %v1038_v34  ;;  %v8479_v56 = vsub.s32 3, %v8425_v36  ;;  %v1057_v61 = vld [vmem:[#allocation11 + $0x7c0] sm:$0xff]  ;;  %v1058_v0 = vld [vmem:[#allocation11 + $0x7c8] sm:$0xff] }
 0x27d   :  { %2419 = vmatprep.mubr.bf16.mxu1 %v8461_v5  ;;  %2501 = vmatprep.mubr.bf16.mxu0 %v8461_v5  ;;  %v1061_v63 = vld [vmem:[#allocation11 + $0x7e0] sm:$0xff] }
 0x27e   :  { %2420 = vmatmul.mubr.bf16.vlgmr.msra.gmra.mrb[0].mxu1 %v8463_v6  ;;  %2502 = vmatmul.mubr.bf16.vlgmr.msra.gmra.mrb[12].mxu0 %v8463_v6 }
 0x27f   :  { %2429 = vmatpush1.bf16.msra.mxu1 %v6493_v19  ;;  %2511 = vmatpush1.bf16.msra.mxu0 %v6495_v20  ;;  %v970_v19 = vld [vmem:[#allocation11 + $0x508] sm:$0xff] }
 0x280   :  { %2430 = vmatprep.subr.bf16.mxu1 %v6502_v7  ;;  %2512 = vmatprep.subr.bf16.mxu0 %v6504_v8  ;;  %v974_v20 = vld [vmem:[#allocation11 + $0x528] sm:$0xff]  ;;  %v1009_v7 = vld [vmem:[#allocation11 + $0x640] sm:$0xff] }
 0x281   :  { %v6528_v32 = vcombine.high %v970_v19, %v974_v20  ;;  %v6527_v39 = vcombine.low %v970_v19, %v974_v20  ;;  %v1013_v8 = vld [vmem:[#allocation11 + $0x660] sm:$0xff]  ;;  %v6575_v20 = vcombine.low %v1018_v23, %v1022_v24 }
 0x282   :  { %v6565_v25 = vcombine.low %v1009_v7, %v1013_v8 }
 0x283   :  { %2431 = vmatpush1.bf16.msra.mxu1 %v6501_v16  ;;  %2513 = vmatpush1.bf16.msra.mxu0 %v6503_v17  ;;  %v6566_v16 = vcombine.high %v1009_v7, %v1013_v8  ;;  %v6568_v17 = vcombine.high %v1010_v9, %v1014_v10  ;;  %v6614_v8 = vcombine.high %v1057_v61, %v1061_v63  ;;  %v811_v10 = vld [vmem:[#allocation11 + $0x10] sm:$0xff] }
 0x284   :  { %2432 = vmatprep.subr.bf16.mxu1 %v6510_v21  ;;  %2514 = vmatprep.subr.bf16.mxu0 %v6512_v22  ;;  %v1017_v21 = vld [vmem:[#allocation11 + $0x680] sm:$0xff] }
 0x285   :  { %v1021_v22 = vld [vmem:[#allocation11 + $0x6a0] sm:$0xff] }
 0x286   :  { %v6573_v19 = vcombine.low %v1017_v21, %v1021_v22 }
 0x287   :  { %2433 = vmatpush1.bf16.msra.mxu1 %v6509_v27  ;;  %2515 = vmatpush1.bf16.msra.mxu0 %v6511_v28  ;;  %v6574_v27 = vcombine.high %v1017_v21, %v1021_v22  ;;  %v6576_v28 = vcombine.high %v1018_v23, %v1022_v24  ;;  %v816_v21 = vld [vmem:[#allocation11 + $0x38] sm:$0xff] }
 0x288   :  { %2434 = vmatprep.subr.bf16.mxu1 %v6518_v12  ;;  %2516 = vmatprep.subr.bf16.mxu0 %v6520_v13  ;;  %v1025_v12 = vld [vmem:[#allocation11 + $0x6c0] sm:$0xff] }
 0x289   :  { %v1029_v13 = vld [vmem:[#allocation11 + $0x6e0] sm:$0xff] }
 0x28a   :  { %v6581_v35 = vcombine.low %v1025_v12, %v1029_v13 }
 0x28b   :  { %2435 = vmatpush1.bf16.msra.mxu1 %v6517_v29  ;;  %2517 = vmatpush1.bf16.msra.mxu0 %v6519_v30  ;;  %v6582_v29 = vcombine.high %v1025_v12, %v1029_v13  ;;  %v6584_v30 = vcombine.high %v1026_v14, %v1030_v18  ;;  %v819_v14 = vld [vmem:[#allocation11 + $0x50] sm:$0xff] }
 0x28c   :  { %2436 = vmatprep.subr.bf16.mxu1 %v6526_v31  ;;  %2518 = vmatprep.subr.bf16.mxu0 %v6528_v32  ;;  %v1033_v31 = vld [vmem:[#allocation11 + $0x700] sm:$0xff] }
 0x28d   :  { %v1037_v32 = vld [vmem:[#allocation11 + $0x720] sm:$0xff] }
 0x28e   :  { %v6589_v46 = vcombine.low %v1033_v31, %v1037_v32 }
 0x28f   :  { %2437 = vmatpush1.bf16.msra.mxu1 %v6525_v38  ;;  %2519 = vmatpush1.bf16.msra.mxu0 %v6527_v39  ;;  %v6590_v38 = vcombine.high %v1033_v31, %v1037_v32  ;;  %v6592_v39 = vcombine.high %v1034_v33, %v1038_v34 }
 0x290   :  { %2438 = vmatprep.subr.bf16.mxu1 %v6534_v40  ;;  %2520 = vmatprep.subr.bf16.mxu0 %v6536_v41  ;;  %v1041_v40 = vld [vmem:[#allocation11 + $0x740] sm:$0xff] }
 0x291   :  { %v1045_v41 = vld [vmem:[#allocation11 + $0x760] sm:$0xff] }
 0x293   :  { %2439 = vmatpush1.bf16.msra.mxu1 %v6533_v48  ;;  %2521 = vmatpush1.bf16.msra.mxu0 %v6535_v49  ;;  %v6598_v48 = vcombine.high %v1041_v40, %v1045_v41  ;;  %v6600_v49 = vcombine.high %v1042_v44, %v1046_v45 }
 0x294   :  { %2440 = vmatprep.subr.bf16.mxu1 %v6542_v50  ;;  %2522 = vmatprep.subr.bf16.mxu0 %v6544_v51  ;;  %v1049_v50 = vld [vmem:[#allocation11 + $0x780] sm:$0xff]  ;;  %v8476_v51 = vsub.s32 2, %v8425_v36 }
 0x296   :  { %v382_v62 = vrot.slane %v8455_v52, %v8476_v51 }
 0x297   :  { %2441 = vmatpush1.bf16.msra.mxu1 %v6541_v57  ;;  %2523 = vmatpush1.bf16.msra.mxu0 %v6543_v58  ;;  %v6597_v57 = vcombine.low %v1041_v40, %v1045_v41  ;;  %v6599_v58 = vcombine.low %v1042_v44, %v1046_v45  ;;  %v832_v40 = vld [vmem:[#allocation11 + $0xb8] sm:$0xff] }
 0x298   :  { %2442 = vmatprep.subr.bf16.mxu1 %v6550_v59  ;;  %2524 = vmatprep.subr.bf16.mxu0 %v6552_v60  ;;  %v6606_v59 = vcombine.high %v1049_v50, %v1053_v53  ;;  %v6608_v60 = vcombine.high %v1050_v54, %v1054_v55 }
 0x29b   :  { %2443 = vmatpush1.bf16.msra.mxu1 %v6549_v1  ;;  %2525 = vmatpush1.bf16.msra.mxu0 %v6551_v2  ;;  %v1062_v1 = vld [vmem:[#allocation11 + $0x7e8] sm:$0xff]  ;;  %v386_v2 = vrot.slane %v8455_v52, %v8479_v56 }
 0x29c   :  { %2444 = vmatprep.subr.bf16.mxu1 %v6558_v3  ;;  %2526 = vmatprep.subr.bf16.mxu0 %v6560_v4  ;;  %v6605_v3 = vcombine.low %v1049_v50, %v1053_v53  ;;  %v6607_v4 = vcombine.low %v1050_v54, %v1054_v55  ;;  %v6616_v9 = vcombine.high %v1058_v0, %v1062_v1  ;;  %v840_v50 = vld [vmem:[#allocation11 + $0xf8] sm:$0xff] }
 0x29f   :  { %2445 = vmatpush1.bf16.msra.mxu1 %v6557_v11  ;;  %2527 = vmatpush1.bf16.msra.mxu0 %v6559_v15 }
 0x2a0   :  { %2446 = vmatprep.subr.bf16.mxu1 %v6566_v16  ;;  %2528 = vmatprep.subr.bf16.mxu0 %v6568_v17  ;;  %v815_v16 = vld [vmem:[#allocation11 + $0x30] sm:$0xff]  ;;  %v812_v17 = vld [vmem:[#allocation11 + $0x18] sm:$0xff] }
 0x2a1   :  { %v6372_v12 = vcombine.high %v812_v17, %v816_v21  ;;  %v6369_v31 = vcombine.low %v811_v10, %v815_v16  ;;  %v6371_v33 = vcombine.low %v812_v17, %v816_v21  ;;  %v864_v17 = vld [vmem:[#allocation11 + $0x1b8] sm:$0xff] }
 0x2a3   :  { %2447 = vmatpush1.bf16.msra.mxu1 %v6565_v25  ;;  %2529 = vmatpush1.bf16.msra.mxu0 %v6567_v26  ;;  %v6613_v25 = vcombine.low %v1057_v61, %v1061_v63  ;;  %v6615_v26 = vcombine.low %v1058_v0, %v1062_v1  ;;  %v851_v1 = vld [vmem:[#allocation11 + $0x150] sm:$0xff] }
 0x2a4   :  { %2448 = vmatprep.subr.bf16.mxu1 %v6574_v27  ;;  %2530 = vmatprep.subr.bf16.mxu0 %v6576_v28  ;;  %v6370_v28 = vcombine.high %v811_v10, %v815_v16  ;;  %v860_v16 = vld [vmem:[#allocation11 + $0x198] sm:$0xff] }
 0x2a7   :  { %2449 = vmatpush1.bf16.msra.mxu1 %v6573_v19  ;;  %2531 = vmatpush1.bf16.msra.mxu0 %v6575_v20  ;;  %v823_v19 = vld [vmem:[#allocation11 + $0x70] sm:$0xff]  ;;  %v820_v20 = vld [vmem:[#allocation11 + $0x58] sm:$0xff] }
 0x2a8   :  { %2450 = vmatprep.subr.bf16.mxu1 %v6582_v29  ;;  %2532 = vmatprep.subr.bf16.mxu0 %v6584_v30  ;;  %v824_v29 = vld [vmem:[#allocation11 + $0x78] sm:$0xff]  ;;  %v6378_v34 = vcombine.high %v819_v14, %v823_v19  ;;  %v6377_v41 = vcombine.low %v819_v14, %v823_v19  ;;  %v879_v19 = vld [vmem:[#allocation11 + $0x230] sm:$0xff] }
 0x2a9   :  { %v6379_v44 = vcombine.low %v820_v20, %v824_v29 }
 0x2ab   :  { %2451 = vmatpush1.bf16.msra.mxu1 %v6581_v35  ;;  %2533 = vmatpush1.bf16.msra.mxu0 %v6583_v37  ;;  %v6380_v35 = vcombine.high %v820_v20, %v824_v29  ;;  %v827_v37 = vld [vmem:[#allocation11 + $0x90] sm:$0xff]  ;;  %v876_v20 = vld [vmem:[#allocation11 + $0x218] sm:$0xff] }
 0x2ac   :  { %2452 = vmatprep.subr.bf16.mxu1 %v6590_v38  ;;  %2534 = vmatprep.subr.bf16.mxu0 %v6592_v39  ;;  %v831_v38 = vld [vmem:[#allocation11 + $0xb0] sm:$0xff]  ;;  %v828_v39 = vld [vmem:[#allocation11 + $0x98] sm:$0xff] }
 0x2ad   :  { %v6386_v45 = vcombine.high %v827_v37, %v831_v38  ;;  %v6385_v53 = vcombine.low %v827_v37, %v831_v38  ;;  %v6387_v54 = vcombine.low %v828_v39, %v832_v40  ;;  %v880_v29 = vld [vmem:[#allocation11 + $0x238] sm:$0xff]  ;;  %v883_v37 = vld [vmem:[#allocation11 + $0x250] sm:$0xff] }
 0x2ae   :  { %v887_v38 = vld [vmem:[#allocation11 + $0x270] sm:$0xff] }
 0x2af   :  { %2453 = vmatpush1.bf16.msra.mxu1 %v6589_v46  ;;  %2535 = vmatpush1.bf16.msra.mxu0 %v6591_v47  ;;  %v6388_v46 = vcombine.high %v828_v39, %v832_v40  ;;  %v835_v47 = vld [vmem:[#allocation11 + $0xd0] sm:$0xff]  ;;  %v884_v39 = vld [vmem:[#allocation11 + $0x258] sm:$0xff] }
 0x2b0   :  { %2454 = vmatprep.subr.bf16.mxu1 %v6598_v48  ;;  %2536 = vmatprep.subr.bf16.mxu0 %v6600_v49  ;;  %v839_v48 = vld [vmem:[#allocation11 + $0xf0] sm:$0xff]  ;;  %v836_v49 = vld [vmem:[#allocation11 + $0xd8] sm:$0xff] }
 0x2b1   :  { %v6394_v55 = vcombine.high %v835_v47, %v839_v48  ;;  %v6393_v61 = vcombine.low %v835_v47, %v839_v48  ;;  %v888_v40 = vld [vmem:[#allocation11 + $0x278] sm:$0xff]  ;;  %v891_v47 = vld [vmem:[#allocation11 + $0x290] sm:$0xff] }
 0x2b2   :  { %v895_v48 = vld [vmem:[#allocation11 + $0x2b0] sm:$0xff] }
 0x2b3   :  { %2455 = vmatpush1.bf16.msra.mxu1 %v6597_v57  ;;  %2537 = vmatpush1.bf16.msra.mxu0 %v6599_v58  ;;  %v6396_v57 = vcombine.high %v836_v49, %v840_v50  ;;  %v843_v58 = vld [vmem:[#allocation11 + $0x110] sm:$0xff] }
 0x2b4   :  { %v786_v7 = vpop.f32.mrb[8].mxu0  ;;  %2456 = vmatprep.subr.bf16.mxu1 %v6606_v59  ;;  %2538 = vmatprep.subr.bf16.mxu0 %v6608_v60  ;;  %v847_v59 = vld [vmem:[#allocation11 + $0x130] sm:$0xff]  ;;  %v848_v60 = vld [vmem:[#allocation11 + $0x138] sm:$0xff] }
 0x2b5   :  { %v787_v11 = vadd.f32 %v786_v7, %v382_v62  ;;  %v788_v15 = vpop.f32.mrb[9].mxu0  ;;  %v6395_v62 = vcombine.low %v836_v49, %v840_v50  ;;  %v6402_v63 = vcombine.high %v843_v58, %v847_v59  ;;  %v6401_v7 = vcombine.low %v843_v58, %v847_v59  ;;  %v892_v49 = vld [vmem:[#allocation11 + $0x298] sm:$0xff]  ;;  %v899_v58 = vld [vmem:[#allocation11 + $0x2d0] sm:$0xff] }
 0x2b6   :  { %v789_v22 = vadd.f32 %v788_v15, %v386_v2  ;;  %v790_v23 = vpop.f32.mrb[10].mxu0  ;;  %v855_v2 = vld [vmem:[#allocation11 + $0x170] sm:$0xff]  ;;  %v896_v50 = vld [vmem:[#allocation11 + $0x2b8] sm:$0xff] }
 0x2b7   :  { %vm795_vm4 = vcmp.gt.f32.partialorder %v787_v11, 0.0  ;;  %v799_v24 = vmul.f32 0.2, %v787_v11  ;;  %v791_v52 = vpop.f32.mrb[11].mxu0  ;;  %2457 = vmatpush1.bf16.msra.mxu1 %v6605_v3  ;;  %2539 = vmatpush1.bf16.msra.mxu0 %v6607_v4  ;;  %v852_v3 = vld [vmem:[#allocation11 + $0x158] sm:$0xff]  ;;  %v863_v15 = vld [vmem:[#allocation11 + $0x1b0] sm:$0xff]  ;;  %v6409_v21 = vcombine.low %v851_v1, %v855_v2 }
 0x2b8   :  { %vm796_vm5 = vcmp.gt.f32.partialorder %v789_v22, 0.0  ;;  %v800_v27 = vmul.f32 0.2, %v789_v22  ;;  %2458 = vmatprep.subr.bf16.mxu1 %v6614_v8  ;;  %2540 = vmatprep.subr.bf16.mxu0 %v6616_v9  ;;  %v856_v4 = vld [vmem:[#allocation11 + $0x178] sm:$0xff]  ;;  %v6410_v9 = vcombine.high %v851_v1, %v855_v2  ;;  %v867_v52 = vld [vmem:[#allocation11 + $0x1d0] sm:$0xff] }
 0x2b9   :  { %v803_v13 = vsel %vm795_vm4, %v787_v11, %v799_v24  ;;  %v6412_v10 = vcombine.high %v852_v3, %v856_v4  ;;  %v859_v11 = vld [vmem:[#allocation11 + $0x190] sm:$0xff]  ;;  %v6420_v24 = vcombine.high %v860_v16, %v864_v17 }
 0x2ba   :  { %v804_v18 = vsel %vm796_vm5, %v789_v22, %v800_v27  ;;  %v8487_v32 = vpack.c.bf16 %v803_v13, %v803_v13  ;;  %v6411_v22 = vcombine.low %v852_v3, %v856_v4  ;;  %v6418_v23 = vcombine.high %v859_v11, %v863_v15  ;;  %v872_v27 = vld [vmem:[#allocation11 + $0x1f8] sm:$0xff]  ;;  %v903_v59 = vld [vmem:[#allocation11 + $0x2f0] sm:$0xff] }
 0x2bb   :  { %v8485_v30 = vpack.c.bf16 %v804_v18, %v804_v18  ;;  %2459 = vmatpush1.bf16.msra.mxu1 %v6613_v25  ;;  %2541 = vmatpush1.bf16.msra.mxu0 %v6615_v26  ;;  %v871_v25 = vld [vmem:[#allocation11 + $0x1f0] sm:$0xff]  ;;  %v868_v26 = vld [vmem:[#allocation11 + $0x1d8] sm:$0xff] }
 0x2bc   :  { %2551 = vmatprep.subr.bf16.mxu1 %v6370_v28  ;;  %2633 = vmatprep.subr.bf16.mxu0 %v6372_v12  ;;  %v6417_v28 = vcombine.low %v859_v11, %v863_v15  ;;  %v6419_v12 = vcombine.low %v860_v16, %v864_v17  ;;  %v6426_v13 = vcombine.high %v867_v52, %v871_v25  ;;  %v875_v18 = vld [vmem:[#allocation11 + $0x210] sm:$0xff]  ;;  %v908_v3 = vld [vmem:[#allocation11 + $0x318] sm:$0xff] }
 0x2bd   :  { %2460 = vmatprep.mubr.bf16.mxu1 %v8485_v30  ;;  %2542 = vmatprep.mubr.bf16.mxu0 %v8485_v30  ;;  %v6428_v14 = vcombine.high %v868_v26, %v872_v27  ;;  %v907_v1 = vld [vmem:[#allocation11 + $0x310] sm:$0xff]  ;;  %v912_v4 = vld [vmem:[#allocation11 + $0x338] sm:$0xff] }
 0x2be   :  { %2461 = vmatmul.mubr.bf16.vlgmr.msra.gmra.mrb[0].mxu1 %v8487_v32  ;;  %2543 = vmatmul.mubr.bf16.vlgmr.msra.gmra.mrb[12].mxu0 %v8487_v32  ;;  %v911_v2 = vld [vmem:[#allocation11 + $0x330] sm:$0xff]  ;;  %v916_v16 = vld [vmem:[#allocation11 + $0x358] sm:$0xff] }
 0x2bf   :  { %2552 = vmatpush1.bf16.msra.mxu1 %v6369_v31  ;;  %2583 = vmatprep.mubr.bf16.mxu1 %v8461_v5  ;;  %v6425_v31 = vcombine.low %v867_v52, %v871_v25  ;;  %v915_v11 = vld [vmem:[#allocation11 + $0x350] sm:$0xff]  ;;  %v920_v17 = vld [vmem:[#allocation11 + $0x378] sm:$0xff] }
 0x2c0   :  { %2634 = vmatpush1.bf16.msra.mxu0 %v6371_v33  ;;  %2665 = vmatprep.mubr.bf16.mxu0 %v8461_v5  ;;  %v844_v5 = vld [vmem:[#allocation11 + $0x118] sm:$0xff]  ;;  %v6427_v33 = vcombine.low %v868_v26, %v872_v27  ;;  %v919_v15 = vld [vmem:[#allocation11 + $0x370] sm:$0xff] }
 0x2c1   :  { %2553 = vmatprep.subr.bf16.mxu1 %v6378_v34  ;;  %2635 = vmatprep.subr.bf16.mxu0 %v6380_v35  ;;  %v6404_v0 = vcombine.high %v844_v5, %v848_v60  ;;  %v6403_v8 = vcombine.low %v844_v5, %v848_v60  ;;  %v6434_v34 = vcombine.high %v875_v18, %v879_v19  ;;  %v900_v5 = vld [vmem:[#allocation11 + $0x2d8] sm:$0xff]  ;;  %v923_v52 = vld [vmem:[#allocation11 + $0x390] sm:$0xff] }
 0x2c2   :  { %v6436_v35 = vcombine.high %v876_v20, %v880_v29  ;;  %v904_v60 = vld [vmem:[#allocation11 + $0x2f8] sm:$0xff]  ;;  %v927_v25 = vld [vmem:[#allocation11 + $0x3b0] sm:$0xff] }
 0x2c3   :  { %2554 = vmatpush1.bf16.msra.mxu1 %v6377_v41  ;;  %v6433_v41 = vcombine.low %v875_v18, %v879_v19  ;;  %v924_v26 = vld [vmem:[#allocation11 + $0x398] sm:$0xff]  ;;  %v931_v18 = vld [vmem:[#allocation11 + $0x3d0] sm:$0xff] }
 0x2c4   :  { %2636 = vmatpush1.bf16.msra.mxu0 %v6379_v44  ;;  %2555 = vmatprep.subr.bf16.mxu1 %v6386_v45  ;;  %v6435_v44 = vcombine.low %v876_v20, %v880_v29  ;;  %v6442_v45 = vcombine.high %v883_v37, %v887_v38  ;;  %v928_v27 = vld [vmem:[#allocation11 + $0x3b8] sm:$0xff]  ;;  %v935_v19 = vld [vmem:[#allocation11 + $0x3f0] sm:$0xff] }
 0x2c5   :  { %2637 = vmatprep.subr.bf16.mxu0 %v6388_v46  ;;  %v6444_v46 = vcombine.high %v884_v39, %v888_v40  ;;  %v932_v20 = vld [vmem:[#allocation11 + $0x3d8] sm:$0xff] }
 0x2c6   :  { %v936_v29 = vld [vmem:[#allocation11 + $0x3f8] sm:$0xff] }
 0x2c7   :  { %2556 = vmatpush1.bf16.msra.mxu1 %v6385_v53  ;;  %v6441_v53 = vcombine.low %v883_v37, %v887_v38  ;;  %v939_v37 = vld [vmem:[#allocation11 + $0x410] sm:$0xff] }
 0x2c8   :  { %2638 = vmatpush1.bf16.msra.mxu0 %v6387_v54  ;;  %2557 = vmatprep.subr.bf16.mxu1 %v6394_v55  ;;  %v6443_v54 = vcombine.low %v884_v39, %v888_v40  ;;  %v6450_v55 = vcombine.high %v891_v47, %v895_v48  ;;  %v943_v38 = vld [vmem:[#allocation11 + $0x430] sm:$0xff]  ;;  %v940_v39 = vld [vmem:[#allocation11 + $0x418] sm:$0xff] }
 0x2c9   :  { %2639 = vmatprep.subr.bf16.mxu0 %v6396_v57  ;;  %v6452_v57 = vcombine.high %v892_v49, %v896_v50  ;;  %v944_v40 = vld [vmem:[#allocation11 + $0x438] sm:$0xff] }
 0x2cb   :  { %2558 = vmatpush1.bf16.msra.mxu1 %v6393_v61  ;;  %v6449_v61 = vcombine.low %v891_v47, %v895_v48  ;;  %v947_v47 = vld [vmem:[#allocation11 + $0x450] sm:$0xff] }
 0x2cc   :  { %2640 = vmatpush1.bf16.msra.mxu0 %v6395_v62  ;;  %2559 = vmatprep.subr.bf16.mxu1 %v6402_v63  ;;  %v6451_v62 = vcombine.low %v892_v49, %v896_v50  ;;  %v6458_v63 = vcombine.high %v899_v58, %v903_v59  ;;  %v951_v48 = vld [vmem:[#allocation11 + $0x470] sm:$0xff]  ;;  %v6497_v49 = vcombine.low %v939_v37, %v943_v38  ;;  %v948_v50 = vld [vmem:[#allocation11 + $0x458] sm:$0xff] }
 0x2cd   :  { %2641 = vmatprep.subr.bf16.mxu0 %v6404_v0  ;;  %v6460_v0 = vcombine.high %v900_v5, %v904_v60 }
 0x2cf   :  { %2560 = vmatpush1.bf16.msra.mxu1 %v6401_v7  ;;  %v6457_v7 = vcombine.low %v899_v58, %v903_v59  ;;  %v959_v58 = vld [vmem:[#allocation11 + $0x4b0] sm:$0xff] }
 0x2d0   :  { %2642 = vmatpush1.bf16.msra.mxu0 %v6403_v8  ;;  %2561 = vmatprep.subr.bf16.mxu1 %v6410_v9  ;;  %v6459_v8 = vcombine.low %v900_v5, %v904_v60  ;;  %v6466_v9 = vcombine.high %v907_v1, %v911_v2  ;;  %v956_v5 = vld [vmem:[#allocation11 + $0x498] sm:$0xff] }
 0x2d1   :  { %2643 = vmatprep.subr.bf16.mxu0 %v6412_v10  ;;  %v6468_v10 = vcombine.high %v908_v3, %v912_v4  ;;  %v960_v60 = vld [vmem:[#allocation11 + $0x4b8] sm:$0xff] }
 0x2d3   :  { %2562 = vmatpush1.bf16.msra.mxu1 %v6409_v21  ;;  %v6465_v21 = vcombine.low %v907_v1, %v911_v2  ;;  %v963_v1 = vld [vmem:[#allocation11 + $0x4d0] sm:$0xff] }
 0x2d4   :  { %2644 = vmatpush1.bf16.msra.mxu0 %v6411_v22  ;;  %2563 = vmatprep.subr.bf16.mxu1 %v6418_v23  ;;  %v6467_v22 = vcombine.low %v908_v3, %v912_v4  ;;  %v6474_v23 = vcombine.high %v915_v11, %v919_v15  ;;  %v967_v2 = vld [vmem:[#allocation11 + $0x4f0] sm:$0xff]  ;;  %v964_v3 = vld [vmem:[#allocation11 + $0x4d8] sm:$0xff] }
 0x2d5   :  { %2645 = vmatprep.subr.bf16.mxu0 %v6420_v24  ;;  %v6476_v24 = vcombine.high %v916_v16, %v920_v17  ;;  %v968_v4 = vld [vmem:[#allocation11 + $0x4f8] sm:$0xff] }
 0x2d7   :  { %2564 = vmatpush1.bf16.msra.mxu1 %v6417_v28  ;;  %v6473_v28 = vcombine.low %v915_v11, %v919_v15  ;;  %v975_v11 = vld [vmem:[#allocation11 + $0x530] sm:$0xff]  ;;  %v972_v15 = vld [vmem:[#allocation11 + $0x518] sm:$0xff] }
 0x2d8   :  { %2646 = vmatpush1.bf16.msra.mxu0 %v6419_v12  ;;  %2565 = vmatprep.subr.bf16.mxu1 %v6426_v13  ;;  %v6475_v12 = vcombine.low %v916_v16, %v920_v17  ;;  %v6482_v13 = vcombine.high %v923_v52, %v927_v25  ;;  %v976_v16 = vld [vmem:[#allocation11 + $0x538] sm:$0xff]  ;;  %v6523_v17 = vcombine.low %v964_v3, %v968_v4 }
 0x2d9   :  { %2647 = vmatprep.subr.bf16.mxu0 %v6428_v14  ;;  %v6484_v14 = vcombine.high %v924_v26, %v928_v27 }
 0x2db   :  { %2566 = vmatpush1.bf16.msra.mxu1 %v6425_v31  ;;  %v6481_v31 = vcombine.low %v923_v52, %v927_v25  ;;  %v980_v52 = vld [vmem:[#allocation11 + $0x558] sm:$0xff] }
 0x2dc   :  { %2648 = vmatpush1.bf16.msra.mxu0 %v6427_v33  ;;  %2567 = vmatprep.subr.bf16.mxu1 %v6434_v34  ;;  %v6483_v33 = vcombine.low %v924_v26, %v928_v27  ;;  %v6490_v34 = vcombine.high %v931_v18, %v935_v19  ;;  %v984_v25 = vld [vmem:[#allocation11 + $0x578] sm:$0xff]  ;;  %v6531_v27 = vcombine.low %v972_v15, %v976_v16 }
 0x2dd   :  { %2649 = vmatprep.subr.bf16.mxu0 %v6436_v35  ;;  %v6492_v35 = vcombine.high %v932_v20, %v936_v29 }
 0x2df   :  { %2568 = vmatpush1.bf16.msra.mxu1 %v6433_v41  ;;  %v6489_v41 = vcombine.low %v931_v18, %v935_v19  ;;  %v988_v18 = vld [vmem:[#allocation11 + $0x598] sm:$0xff] }
 0x2e0   :  { %2650 = vmatpush1.bf16.msra.mxu0 %v6435_v44  ;;  %2569 = vmatprep.subr.bf16.mxu1 %v6442_v45  ;;  %v6491_v44 = vcombine.low %v932_v20, %v936_v29  ;;  %v6498_v45 = vcombine.high %v939_v37, %v943_v38  ;;  %v992_v19 = vld [vmem:[#allocation11 + $0x5b8] sm:$0xff]  ;;  %v6539_v29 = vcombine.low %v980_v52, %v984_v25 }
 0x2e1   :  { %2651 = vmatprep.subr.bf16.mxu0 %v6444_v46  ;;  %v6500_v46 = vcombine.high %v940_v39, %v944_v40  ;;  %v996_v37 = vld [vmem:[#allocation11 + $0x5d8] sm:$0xff] }
 0x2e2   :  { %v1000_v38 = vld [vmem:[#allocation11 + $0x5f8] sm:$0xff] }
 0x2e3   :  { %2570 = vmatpush1.bf16.msra.mxu1 %v6441_v53  ;;  %v952_v53 = vld [vmem:[#allocation11 + $0x478] sm:$0xff] }
 0x2e4   :  { %2652 = vmatpush1.bf16.msra.mxu0 %v6443_v54  ;;  %2571 = vmatprep.subr.bf16.mxu1 %v6450_v55  ;;  %v6499_v54 = vcombine.low %v940_v39, %v944_v40  ;;  %v6506_v55 = vcombine.high %v947_v47, %v951_v48  ;;  %v6508_v59 = vcombine.high %v948_v50, %v952_v53 }
 0x2e5   :  { %2653 = vmatprep.subr.bf16.mxu0 %v6452_v57  ;;  %v955_v57 = vld [vmem:[#allocation11 + $0x490] sm:$0xff]  ;;  %v6547_v40 = vcombine.low %v988_v18, %v992_v19 }
 0x2e7   :  { %2572 = vmatpush1.bf16.msra.mxu1 %v6449_v61  ;;  %v6505_v61 = vcombine.low %v947_v47, %v951_v48  ;;  %v1004_v47 = vld [vmem:[#allocation11 + $0x618] sm:$0xff] }
 0x2e8   :  { %2654 = vmatpush1.bf16.msra.mxu0 %v6451_v62  ;;  %2573 = vmatprep.subr.bf16.mxu1 %v6458_v63  ;;  %v6507_v62 = vcombine.low %v948_v50, %v952_v53  ;;  %v6514_v63 = vcombine.high %v955_v57, %v959_v58  ;;  %v1008_v48 = vld [vmem:[#allocation11 + $0x638] sm:$0xff]  ;;  %v6555_v50 = vcombine.low %v996_v37, %v1000_v38 }
 0x2e9   :  { %2655 = vmatprep.subr.bf16.mxu0 %v6460_v0  ;;  %v6516_v0 = vcombine.high %v956_v5, %v960_v60 }
 0x2eb   :  { %2574 = vmatpush1.bf16.msra.mxu1 %v6457_v7  ;;  %v6513_v7 = vcombine.low %v955_v57, %v959_v58  ;;  %v1015_v57 = vld [vmem:[#allocation11 + $0x670] sm:$0xff]  ;;  %v1012_v58 = vld [vmem:[#allocation11 + $0x658] sm:$0xff] }
 0x2ec   :  { %2656 = vmatpush1.bf16.msra.mxu0 %v6459_v8  ;;  %2575 = vmatprep.subr.bf16.mxu1 %v6466_v9  ;;  %v6522_v8 = vcombine.high %v963_v1, %v967_v2  ;;  %v6524_v9 = vcombine.high %v964_v3, %v968_v4 }
 0x2ed   :  { %2657 = vmatprep.subr.bf16.mxu0 %v6468_v10  ;;  %v971_v10 = vld [vmem:[#allocation11 + $0x510] sm:$0xff] }
 0x2ee   :  { %v6529_v26 = vcombine.low %v971_v10, %v975_v11 }
 0x2ef   :  { %2576 = vmatpush1.bf16.msra.mxu1 %v6465_v21  ;;  %v6530_v21 = vcombine.high %v971_v10, %v975_v11  ;;  %v1028_v10 = vld [vmem:[#allocation11 + $0x6d8] sm:$0xff] }
 0x2f0   :  { %2658 = vmatpush1.bf16.msra.mxu0 %v6467_v22  ;;  %2577 = vmatprep.subr.bf16.mxu1 %v6474_v23  ;;  %v6532_v22 = vcombine.high %v972_v15, %v976_v16  ;;  %v979_v23 = vld [vmem:[#allocation11 + $0x550] sm:$0xff]  ;;  %v1032_v11 = vld [vmem:[#allocation11 + $0x6f8] sm:$0xff] }
 0x2f1   :  { %2659 = vmatprep.subr.bf16.mxu0 %v6476_v24  ;;  %v983_v24 = vld [vmem:[#allocation11 + $0x570] sm:$0xff] }
 0x2f2   :  { %v6537_v20 = vcombine.low %v979_v23, %v983_v24 }
 0x2f3   :  { %2578 = vmatpush1.bf16.msra.mxu1 %v6473_v28  ;;  %v6538_v28 = vcombine.high %v979_v23, %v983_v24  ;;  %v1036_v23 = vld [vmem:[#allocation11 + $0x718] sm:$0xff] }
 0x2f4   :  { %2660 = vmatpush1.bf16.msra.mxu0 %v6475_v12  ;;  %2579 = vmatprep.subr.bf16.mxu1 %v6482_v13  ;;  %v6540_v12 = vcombine.high %v980_v52, %v984_v25  ;;  %v987_v13 = vld [vmem:[#allocation11 + $0x590] sm:$0xff]  ;;  %v1040_v24 = vld [vmem:[#allocation11 + $0x738] sm:$0xff]  ;;  %v6587_v25 = vcombine.low %v1028_v10, %v1032_v11 }
 0x2f5   :  { %2661 = vmatprep.subr.bf16.mxu0 %v6484_v14  ;;  %v991_v14 = vld [vmem:[#allocation11 + $0x5b0] sm:$0xff] }
 0x2f6   :  { %v6545_v39 = vcombine.low %v987_v13, %v991_v14 }
 0x2f7   :  { %2580 = vmatpush1.bf16.msra.mxu1 %v6481_v31  ;;  %v6546_v31 = vcombine.high %v987_v13, %v991_v14  ;;  %v1044_v13 = vld [vmem:[#allocation11 + $0x758] sm:$0xff] }
 0x2f8   :  { %2662 = vmatpush1.bf16.msra.mxu0 %v6483_v33  ;;  %2581 = vmatprep.subr.bf16.mxu1 %v6490_v34  ;;  %v6548_v33 = vcombine.high %v988_v18, %v992_v19  ;;  %v995_v34 = vld [vmem:[#allocation11 + $0x5d0] sm:$0xff]  ;;  %v1048_v14 = vld [vmem:[#allocation11 + $0x778] sm:$0xff]  ;;  %v6595_v19 = vcombine.low %v1036_v23, %v1040_v24 }
 0x2f9   :  { %2663 = vmatprep.subr.bf16.mxu0 %v6492_v35  ;;  %v999_v35 = vld [vmem:[#allocation11 + $0x5f0] sm:$0xff] }
 0x2fb   :  { %2582 = vmatpush1.bf16.msra.mxu1 %v6489_v41  ;;  %v6554_v41 = vcombine.high %v995_v34, %v999_v35 }
 0x2fc   :  { %2664 = vmatpush1.bf16.msra.mxu0 %v6491_v44  ;;  %2592 = vmatprep.subr.bf16.mxu1 %v6498_v45  ;;  %v6556_v44 = vcombine.high %v996_v37, %v1000_v38  ;;  %v1003_v45 = vld [vmem:[#allocation11 + $0x610] sm:$0xff]  ;;  %v6603_v38 = vcombine.low %v1044_v13, %v1048_v14 }
 0x2fd   :  { %2674 = vmatprep.subr.bf16.mxu0 %v6500_v46  ;;  %v1007_v46 = vld [vmem:[#allocation11 + $0x630] sm:$0xff] }
 0x2fe   :  { %2584 = vmatmul.mubr.bf16.vlgmr.msra.gmra.mrb[4].mxu1 %v8463_v6  ;;  %v6562_v53 = vcombine.high %v1003_v45, %v1007_v46 }
 0x2ff   :  { %2666 = vmatmul.mubr.bf16.vlgmr.msra.gmra.mrb[16].mxu0 %v8463_v6  ;;  %2593 = vmatpush1.bf16.msra.mxu1 %v6497_v49  ;;  %v6515_v6 = vcombine.low %v956_v5, %v960_v60  ;;  %v6553_v49 = vcombine.low %v995_v34, %v999_v35  ;;  %v6561_v5 = vcombine.low %v1003_v45, %v1007_v46  ;;  %v1052_v34 = vld [vmem:[#allocation11 + $0x798] sm:$0xff] }
 0x300   :  { %2624 = vmatprep.mubr.bf16.mxu1 %v8485_v30  ;;  %2675 = vmatpush1.bf16.msra.mxu0 %v6499_v54  ;;  %v6564_v54 = vcombine.high %v1004_v47, %v1008_v48  ;;  %v6563_v60 = vcombine.low %v1004_v47, %v1008_v48  ;;  %v1056_v35 = vld [vmem:[#allocation11 + $0x7b8] sm:$0xff] }
 0x301   :  { %2706 = vmatprep.mubr.bf16.mxu0 %v8485_v30  ;;  %2594 = vmatprep.subr.bf16.mxu1 %v6506_v55  ;;  %v6521_v30 = vcombine.low %v963_v1, %v967_v2  ;;  %v1011_v55 = vld [vmem:[#allocation11 + $0x650] sm:$0xff]  ;;  %v1020_v1 = vld [vmem:[#allocation11 + $0x698] sm:$0xff]  ;;  %v6611_v48 = vcombine.low %v1052_v34, %v1056_v35 }
 0x302   :  { %2676 = vmatprep.subr.bf16.mxu0 %v6508_v59  ;;  %v1016_v59 = vld [vmem:[#allocation11 + $0x678] sm:$0xff]  ;;  %v6569_v3 = vcombine.low %v1011_v55, %v1015_v57 }
 0x303   :  { %2595 = vmatpush1.bf16.msra.mxu1 %v6505_v61  ;;  %v6570_v61 = vcombine.high %v1011_v55, %v1015_v57  ;;  %v1024_v2 = vld [vmem:[#allocation11 + $0x6b8] sm:$0xff]  ;;  %v6571_v4 = vcombine.low %v1012_v58, %v1016_v59  ;;  %v7364_v55 = vld [vmem:[#allocation14 + $0x4] ss:$28 sps:$4 sm:$0xff]   ;;  %v7367_v57 = vld [vmem:[#allocation14 + $0xc] ss:$28 sps:$4 sm:$0xff]  }
 0x304   :  { %2677 = vmatpush1.bf16.msra.mxu0 %v6507_v62  ;;  %2596 = vmatprep.subr.bf16.mxu1 %v6514_v63  ;;  %v6572_v62 = vcombine.high %v1012_v58, %v1016_v59  ;;  %v1019_v63 = vld [vmem:[#allocation11 + $0x690] sm:$0xff]  ;;  %v6579_v16 = vcombine.low %v1020_v1, %v1024_v2  ;;  %v1060_v45 = vld [vmem:[#allocation11 + $0x7d8] sm:$0xff]  ;;  %v7362_v58 = vld [vmem:[#allocation14] ss:$28 sps:$4 sm:$0xff]  }
 0x305   :  { %2678 = vmatprep.subr.bf16.mxu0 %v6516_v0  ;;  %v1023_v0 = vld [vmem:[#allocation11 + $0x6b0] sm:$0xff]  ;;  %v1064_v46 = vld [vmem:[#allocation11 + $0x7f8] sm:$0xff] }
 0x306   :  { %v6577_v15 = vcombine.low %v1019_v63, %v1023_v0  ;;  %v7365_v59 = vld [vmem:[#allocation14 + $0x8] ss:$28 sps:$4 sm:$0xff]  }
 0x307   :  { %2597 = vmatpush1.bf16.msra.mxu1 %v6513_v7  ;;  %v6578_v7 = vcombine.high %v1019_v63, %v1023_v0  ;;  %v7376_v63 = vld [vmem:[#allocation14 + $0x74] ss:$28 sps:$4 sm:$0xff]   ;;  %v7379_v0 = vld [vmem:[#allocation14 + $0x7c] ss:$28 sps:$4 sm:$0xff]  }
 0x308   :  { %2679 = vmatpush1.bf16.msra.mxu0 %v6515_v6  ;;  %2598 = vmatprep.subr.bf16.mxu1 %v6522_v8  ;;  %v6580_v6 = vcombine.high %v1020_v1, %v1024_v2  ;;  %v1027_v8 = vld [vmem:[#allocation11 + $0x6d0] sm:$0xff]  ;;  %v7377_v2 = vld [vmem:[#allocation14 + $0x78] ss:$28 sps:$4 sm:$0xff]  }
 0x309   :  { %2680 = vmatprep.subr.bf16.mxu0 %v6524_v9  ;;  %v1031_v9 = vld [vmem:[#allocation11 + $0x6f0] sm:$0xff] }
 0x30a   :  { %v6585_v52 = vcombine.low %v1027_v8, %v1031_v9  ;;  %v7374_v1 = vld [vmem:[#allocation14 + $0x70] ss:$28 sps:$4 sm:$0xff]  }
 0x30b   :  { %2599 = vmatpush1.bf16.msra.mxu1 %v6521_v30  ;;  %v6586_v30 = vcombine.high %v1027_v8, %v1031_v9  ;;  %v7391_v8 = vld [vmem:[#allocation14 + $0xec] ss:$28 sps:$4 sm:$0xff]   ;;  %v7386_v9 = vld [vmem:[#allocation14 + $0xe0] ss:$28 sps:$4 sm:$0xff]  }
 0x30c   :  { %2681 = vmatpush1.bf16.msra.mxu0 %v6523_v17  ;;  %2600 = vmatprep.subr.bf16.mxu1 %v6530_v21  ;;  %v6588_v17 = vcombine.high %v1028_v10, %v1032_v11  ;;  %v1035_v21 = vld [vmem:[#allocation11 + $0x710] sm:$0xff]  ;;  %v7394_v11 = vld [vmem:[#allocation14 + $0x11c] ss:$28 sps:$4 sm:$0xff]  }
 0x30d   :  { %2682 = vmatprep.subr.bf16.mxu0 %v6532_v22  ;;  %v1039_v22 = vld [vmem:[#allocation11 + $0x730] sm:$0xff] }
 0x30e   :  { %v6593_v18 = vcombine.low %v1035_v21, %v1039_v22  ;;  %v7389_v10 = vld [vmem:[#allocation14 + $0xe8] ss:$28 sps:$4 sm:$0xff]  }
 0x30f   :  { %2601 = vmatpush1.bf16.msra.mxu1 %v6529_v26  ;;  %v6594_v26 = vcombine.high %v1035_v21, %v1039_v22  ;;  %v7403_v21 = vld [vmem:[#allocation14 + $0x15c] ss:$28 sps:$4 sm:$0xff]   ;;  %v7398_v22 = vld [vmem:[#allocation14 + $0x150] ss:$28 sps:$4 sm:$0xff]  }
 0x310   :  { %2683 = vmatpush1.bf16.msra.mxu0 %v6531_v27  ;;  %2602 = vmatprep.subr.bf16.mxu1 %v6538_v28  ;;  %v6596_v27 = vcombine.high %v1036_v23, %v1040_v24  ;;  %v1043_v28 = vld [vmem:[#allocation11 + $0x750] sm:$0xff]  ;;  %v7401_v23 = vld [vmem:[#allocation14 + $0x158] ss:$28 sps:$4 sm:$0xff]  }
 0x311   :  { %2684 = vmatprep.subr.bf16.mxu0 %v6540_v12  ;;  %v1047_v12 = vld [vmem:[#allocation11 + $0x770] sm:$0xff] }
 0x312   :  { %v6601_v37 = vcombine.low %v1043_v28, %v1047_v12  ;;  %v7406_v24 = vld [vmem:[#allocation14 + $0x18c] ss:$28 sps:$4 sm:$0xff]  }
 0x313   :  { %2603 = vmatpush1.bf16.msra.mxu1 %v6537_v20  ;;  %v6602_v20 = vcombine.high %v1043_v28, %v1047_v12  ;;  %v7415_v28 = vld [vmem:[#allocation14 + $0x1cc] ss:$28 sps:$4 sm:$0xff]   ;;  %v7410_v12 = vld [vmem:[#allocation14 + $0x1c0] ss:$28 sps:$4 sm:$0xff]  }
 0x314   :  { %2685 = vmatpush1.bf16.msra.mxu0 %v6539_v29  ;;  %2604 = vmatprep.subr.bf16.mxu1 %v6546_v31  ;;  %v6604_v29 = vcombine.high %v1044_v13, %v1048_v14  ;;  %v1051_v31 = vld [vmem:[#allocation11 + $0x790] sm:$0xff]  ;;  %v7418_v14 = vld [vmem:[#allocation14 + $0x1fc] ss:$28 sps:$4 sm:$0xff]  }
 0x315   :  { %2686 = vmatprep.subr.bf16.mxu0 %v6548_v33  ;;  %v1055_v33 = vld [vmem:[#allocation11 + $0x7b0] sm:$0xff] }
 0x316   :  { %v6609_v47 = vcombine.low %v1051_v31, %v1055_v33  ;;  %v7413_v13 = vld [vmem:[#allocation14 + $0x1c8] ss:$28 sps:$4 sm:$0xff]  }
 0x317   :  { %2605 = vmatpush1.bf16.msra.mxu1 %v6545_v39  ;;  %v6610_v39 = vcombine.high %v1051_v31, %v1055_v33  ;;  %v7427_v31 = vld [vmem:[#allocation14 + $0x23c] ss:$28 sps:$4 sm:$0xff]   ;;  %v7422_v33 = vld [vmem:[#allocation14 + $0x230] ss:$28 sps:$4 sm:$0xff]  }
 0x318   :  { %2687 = vmatpush1.bf16.msra.mxu0 %v6547_v40  ;;  %2606 = vmatprep.subr.bf16.mxu1 %v6554_v41  ;;  %v6612_v40 = vcombine.high %v1052_v34, %v1056_v35  ;;  %v1059_v41 = vld [vmem:[#allocation11 + $0x7d0] sm:$0xff]  ;;  %v7425_v34 = vld [vmem:[#allocation14 + $0x238] ss:$28 sps:$4 sm:$0xff]  }
 0x319   :  { %2688 = vmatprep.subr.bf16.mxu0 %v6556_v44  ;;  %v1063_v44 = vld [vmem:[#allocation11 + $0x7f0] sm:$0xff] }
 0x31a   :  { %v7430_v35 = vld [vmem:[#allocation14 + $0x26c] ss:$28 sps:$4 sm:$0xff]  }
 0x31b   :  { %2607 = vmatpush1.bf16.msra.mxu1 %v6553_v49  ;;  %v6618_v49 = vcombine.high %v1059_v41, %v1063_v44 }
 0x31c   :  { %2689 = vmatpush1.bf16.msra.mxu0 %v6555_v50  ;;  %2608 = vmatprep.subr.bf16.mxu1 %v6562_v53  ;;  %v6620_v50 = vcombine.high %v1060_v45, %v1064_v46  ;;  %v6617_v53 = vcombine.low %v1059_v41, %v1063_v44  ;;  %v7439_v41 = vld [vmem:[#allocation14 + $0x2ac] ss:$28 sps:$4 sm:$0xff]   ;;  %v7434_v44 = vld [vmem:[#allocation14 + $0x2a0] ss:$28 sps:$4 sm:$0xff]  }
 0x31d   :  { %2690 = vmatprep.subr.bf16.mxu0 %v6564_v54  ;;  %v6619_v54 = vcombine.low %v1060_v45, %v1064_v46  ;;  %v7437_v45 = vld [vmem:[#allocation14 + $0x2a8] ss:$28 sps:$4 sm:$0xff]   ;;  %v7442_v46 = vld [vmem:[#allocation14 + $0x2dc] ss:$28 sps:$4 sm:$0xff]  }
 0x31f   :  { %2609 = vmatpush1.bf16.msra.mxu1 %v6561_v5  ;;  %v7370_v5 = vld [vmem:[#allocation14 + $0x3c] ss:$28 sps:$4 sm:$0xff]  }
 0x320   :  { %2691 = vmatpush1.bf16.msra.mxu0 %v6563_v60  ;;  %2610 = vmatprep.subr.bf16.mxu1 %v6570_v61  ;;  %v7373_v60 = vld [vmem:[#allocation14 + $0x44] ss:$28 sps:$4 sm:$0xff]   ;;  %v7368_v61 = vld [vmem:[#allocation14 + $0x38] ss:$28 sps:$4 sm:$0xff]  }
 0x321   :  { %2692 = vmatprep.subr.bf16.mxu0 %v6572_v62  ;;  %v7371_v62 = vld [vmem:[#allocation14 + $0x40] ss:$28 sps:$4 sm:$0xff]  }
 0x323   :  { %2611 = vmatpush1.bf16.msra.mxu1 %v6569_v3  ;;  %v7382_v3 = vld [vmem:[#allocation14 + $0xac] ss:$28 sps:$4 sm:$0xff]  }
 0x324   :  { %2693 = vmatpush1.bf16.msra.mxu0 %v6571_v4  ;;  %2612 = vmatprep.subr.bf16.mxu1 %v6578_v7  ;;  %v7385_v4 = vld [vmem:[#allocation14 + $0xb4] ss:$28 sps:$4 sm:$0xff]   ;;  %v7380_v7 = vld [vmem:[#allocation14 + $0xa8] ss:$28 sps:$4 sm:$0xff]  }
 0x325   :  { %2694 = vmatprep.subr.bf16.mxu0 %v6580_v6  ;;  %v7388_v6 = vld [vmem:[#allocation14 + $0xe4] ss:$28 sps:$4 sm:$0xff]  }
 0x327   :  { %2613 = vmatpush1.bf16.msra.mxu1 %v6577_v15  ;;  %v7397_v15 = vld [vmem:[#allocation14 + $0x124] ss:$28 sps:$4 sm:$0xff]  }
 0x328   :  { %2695 = vmatpush1.bf16.msra.mxu0 %v6579_v16  ;;  %2614 = vmatprep.subr.bf16.mxu1 %v6586_v30  ;;  %v7392_v16 = vld [vmem:[#allocation14 + $0x118] ss:$28 sps:$4 sm:$0xff]   ;;  %v7395_v30 = vld [vmem:[#allocation14 + $0x120] ss:$28 sps:$4 sm:$0xff]  }
 0x329   :  { %2696 = vmatprep.subr.bf16.mxu0 %v6588_v17  ;;  %v7400_v17 = vld [vmem:[#allocation14 + $0x154] ss:$28 sps:$4 sm:$0xff]  }
 0x32b   :  { %2615 = vmatpush1.bf16.msra.mxu1 %v6585_v52  ;;  %v7409_v52 = vld [vmem:[#allocation14 + $0x194] ss:$28 sps:$4 sm:$0xff]  }
 0x32c   :  { %2697 = vmatpush1.bf16.msra.mxu0 %v6587_v25  ;;  %2616 = vmatprep.subr.bf16.mxu1 %v6594_v26  ;;  %v7404_v25 = vld [vmem:[#allocation14 + $0x188] ss:$28 sps:$4 sm:$0xff]   ;;  %v7407_v26 = vld [vmem:[#allocation14 + $0x190] ss:$28 sps:$4 sm:$0xff]  }
 0x32d   :  { %2698 = vmatprep.subr.bf16.mxu0 %v6596_v27  ;;  %v7412_v27 = vld [vmem:[#allocation14 + $0x1c4] ss:$28 sps:$4 sm:$0xff]  }
 0x32f   :  { %2617 = vmatpush1.bf16.msra.mxu1 %v6593_v18  ;;  %v7421_v18 = vld [vmem:[#allocation14 + $0x204] ss:$28 sps:$4 sm:$0xff]  }
 0x330   :  { %2699 = vmatpush1.bf16.msra.mxu0 %v6595_v19  ;;  %2618 = vmatprep.subr.bf16.mxu1 %v6602_v20  ;;  %v7416_v19 = vld [vmem:[#allocation14 + $0x1f8] ss:$28 sps:$4 sm:$0xff]   ;;  %v7419_v20 = vld [vmem:[#allocation14 + $0x200] ss:$28 sps:$4 sm:$0xff]  }
 0x331   :  { %2700 = vmatprep.subr.bf16.mxu0 %v6604_v29  ;;  %v7424_v29 = vld [vmem:[#allocation14 + $0x234] ss:$28 sps:$4 sm:$0xff]  }
 0x333   :  { %2619 = vmatpush1.bf16.msra.mxu1 %v6601_v37  ;;  %v7433_v37 = vld [vmem:[#allocation14 + $0x274] ss:$28 sps:$4 sm:$0xff]  }
 0x334   :  { %2701 = vmatpush1.bf16.msra.mxu0 %v6603_v38  ;;  %2620 = vmatprep.subr.bf16.mxu1 %v6610_v39  ;;  %v7428_v38 = vld [vmem:[#allocation14 + $0x268] ss:$28 sps:$4 sm:$0xff]   ;;  %v7431_v39 = vld [vmem:[#allocation14 + $0x270] ss:$28 sps:$4 sm:$0xff]  }
 0x335   :  { %2702 = vmatprep.subr.bf16.mxu0 %v6612_v40  ;;  %v7436_v40 = vld [vmem:[#allocation14 + $0x2a4] ss:$28 sps:$4 sm:$0xff]  }
 0x337   :  { %2621 = vmatpush1.bf16.msra.mxu1 %v6609_v47  ;;  %v7445_v47 = vld [vmem:[#allocation14 + $0x2e4] ss:$28 sps:$4 sm:$0xff]  }
 0x338   :  { %2703 = vmatpush1.bf16.msra.mxu0 %v6611_v48  ;;  %2622 = vmatprep.subr.bf16.mxu1 %v6618_v49  ;;  %v7440_v48 = vld [vmem:[#allocation14 + $0x2d8] ss:$28 sps:$4 sm:$0xff]   ;;  %v7443_v49 = vld [vmem:[#allocation14 + $0x2e0] ss:$28 sps:$4 sm:$0xff]  }
 0x339   :  { %2704 = vmatprep.subr.bf16.mxu0 %v6620_v50  ;;  %v7448_v50 = vld [vmem:[#allocation14 + $0x314] ss:$28 sps:$4 sm:$0xff]  }
 0x33b   :  { %2623 = vmatpush1.bf16.msra.mxu1 %v6617_v53  ;;  %v7451_v53 = vld [vmem:[#allocation14 + $0x31c] ss:$28 sps:$4 sm:$0xff]  }
 0x33c   :  { %2705 = vmatpush1.bf16.msra.mxu0 %v6619_v54  ;;  %5600 = vmatprep.subr.bf16.mxu1 %v7364_v55  ;;  %v7446_v54 = vld [vmem:[#allocation14 + $0x310] ss:$28 sps:$4 sm:$0xff]   ;;  %v7449_v55 = vld [vmem:[#allocation14 + $0x318] ss:$28 sps:$4 sm:$0xff]  }
 0x33d   :  { %5764 = vmatprep.subr.bf16.mxu0 %v7367_v57  ;;  %v7454_v57 = vld [vmem:[#allocation14 + $0x34c] ss:$28 sps:$4 sm:$0xff]  }
 0x33e   :  { %2625 = vmatmul.mubr.bf16.vlgmr.msra.gmra.mrb[4].mxu1 %v8487_v32 }
 0x33f   :  { %2707 = vmatmul.mubr.bf16.vlgmr.msra.gmra.mrb[16].mxu0 %v8487_v32  ;;  %5601 = vmatpush1.bf16.msra.mxu1 %v7362_v58  ;;  %v7383_v32 = vld [vmem:[#allocation14 + $0xb0] ss:$28 sps:$4 sm:$0xff]  }
 0x340   :  { %5765 = vmatpush1.bf16.msra.mxu0 %v7365_v59  ;;  %5602 = vmatprep.subr.bf16.mxu1 %v7370_v5  ;;  %v7457_v58 = vld [vmem:[#allocation14 + $0x354] ss:$28 sps:$4 sm:$0xff]   ;;  %v7452_v59 = vld [vmem:[#allocation14 + $0x348] ss:$28 sps:$4 sm:$0xff]  }
 0x341   :  { %5766 = vmatprep.subr.bf16.mxu0 %v7373_v60  ;;  %v7455_v5 = vld [vmem:[#allocation14 + $0x350] ss:$28 sps:$4 sm:$0xff]   ;;  %v7460_v60 = vld [vmem:[#allocation14 + $0x384] ss:$28 sps:$4 sm:$0xff]  }
 0x343   :  { %5603 = vmatpush1.bf16.msra.mxu1 %v7368_v61  ;;  %v7463_v61 = vld [vmem:[#allocation14 + $0x38c] ss:$28 sps:$4 sm:$0xff]  }
 0x344   :  { %5767 = vmatpush1.bf16.msra.mxu0 %v7371_v62  ;;  %5604 = vmatprep.subr.bf16.mxu1 %v7376_v63  ;;  %v8501_v62 = vld [vmem:[#allocation13] sm:$0xff] }
 0x345   :  { %5768 = vmatprep.subr.bf16.mxu0 %v7379_v0  ;;  %v1070_v63 = vrot.slane %v8501_v62, %v8428_v42  ;;  %v1074_v0 = vrot.slane %v8501_v62, %v8431_v43 }
 0x347   :  { %5605 = vmatpush1.bf16.msra.mxu1 %v7374_v1  ;;  %v1082_v1 = vrot.slane %v8501_v62, %v8479_v56 }
 0x348   :  { %5769 = vmatpush1.bf16.msra.mxu0 %v7377_v2  ;;  %5606 = vmatprep.subr.bf16.mxu1 %v7382_v3 }
 0x349   :  { %5770 = vmatprep.subr.bf16.mxu0 %v7385_v4 }
 0x34b   :  { %5607 = vmatpush1.bf16.msra.mxu1 %v7380_v7 }
 0x34c   :  { %5771 = vmatpush1.bf16.msra.mxu0 %v7383_v32  ;;  %5608 = vmatprep.subr.bf16.mxu1 %v7388_v6 }
 0x34d   :  { %5772 = vmatprep.subr.bf16.mxu0 %v7391_v8 }
 0x34f   :  { %5609 = vmatpush1.bf16.msra.mxu1 %v7386_v9 }
 0x350   :  { %5773 = vmatpush1.bf16.msra.mxu0 %v7389_v10  ;;  %5610 = vmatprep.subr.bf16.mxu1 %v7394_v11 }
 0x351   :  { %5774 = vmatprep.subr.bf16.mxu0 %v7397_v15 }
 0x353   :  { %5611 = vmatpush1.bf16.msra.mxu1 %v7392_v16 }
 0x354   :  { %5775 = vmatpush1.bf16.msra.mxu0 %v7395_v30  ;;  %5612 = vmatprep.subr.bf16.mxu1 %v7400_v17 }
 0x355   :  { %5776 = vmatprep.subr.bf16.mxu0 %v7403_v21 }
 0x357   :  { %5613 = vmatpush1.bf16.msra.mxu1 %v7398_v22 }
 0x358   :  { %5777 = vmatpush1.bf16.msra.mxu0 %v7401_v23  ;;  %5614 = vmatprep.subr.bf16.mxu1 %v7406_v24 }
 0x359   :  { %5778 = vmatprep.subr.bf16.mxu0 %v7409_v52  ;;  %v7458_v52 = vld [vmem:[#allocation14 + $0x380] ss:$28 sps:$4 sm:$0xff]  }
 0x35b   :  { %5615 = vmatpush1.bf16.msra.mxu1 %v7404_v25  ;;  %v7461_v25 = vld [vmem:[#allocation14 + $0x388] ss:$28 sps:$4 sm:$0xff]  }
 0x35c   :  { %5779 = vmatpush1.bf16.msra.mxu0 %v7407_v26  ;;  %5616 = vmatprep.subr.bf16.mxu1 %v7412_v27  ;;  %v7466_v27 = vld [vmem:[#allocation14 + $0x3bc] ss:$28 sps:$4 sm:$0xff]  }
 0x35d   :  { %5780 = vmatprep.subr.bf16.mxu0 %v7415_v28  ;;  %v7469_v28 = vld [vmem:[#allocation14 + $0x3c4] ss:$28 sps:$4 sm:$0xff]  }
 0x35f   :  { %5617 = vmatpush1.bf16.msra.mxu1 %v7410_v12 }
 0x360   :  { %5781 = vmatpush1.bf16.msra.mxu0 %v7413_v13  ;;  %5618 = vmatprep.subr.bf16.mxu1 %v7418_v14  ;;  %v7464_v13 = vld [vmem:[#allocation14 + $0x3b8] ss:$28 sps:$4 sm:$0xff]   ;;  %v7467_v14 = vld [vmem:[#allocation14 + $0x3c0] ss:$28 sps:$4 sm:$0xff]  }
 0x361   :  { %5782 = vmatprep.subr.bf16.mxu0 %v7421_v18  ;;  %v7472_v18 = vld [vmem:[#allocation14 + $0x3f4] ss:$28 sps:$4 sm:$0xff]  }
 0x363   :  { %5619 = vmatpush1.bf16.msra.mxu1 %v7416_v19  ;;  %v7475_v19 = vld [vmem:[#allocation14 + $0x3fc] ss:$28 sps:$4 sm:$0xff]  }
 0x364   :  { %5783 = vmatpush1.bf16.msra.mxu0 %v7419_v20  ;;  %5620 = vmatprep.subr.bf16.mxu1 %v7424_v29  ;;  %v7470_v20 = vld [vmem:[#allocation14 + $0x3f0] ss:$28 sps:$4 sm:$0xff]   ;;  %v7473_v29 = vld [vmem:[#allocation14 + $0x3f8] ss:$28 sps:$4 sm:$0xff]  }
 0x365   :  { %5784 = vmatprep.subr.bf16.mxu0 %v7427_v31  ;;  %v7478_v31 = vld [vmem:[#allocation14 + $0x42c] ss:$28 sps:$4 sm:$0xff]  }
 0x367   :  { %5621 = vmatpush1.bf16.msra.mxu1 %v7422_v33  ;;  %v7481_v33 = vld [vmem:[#allocation14 + $0x434] ss:$28 sps:$4 sm:$0xff]  }
 0x368   :  { %5785 = vmatpush1.bf16.msra.mxu0 %v7425_v34  ;;  %5622 = vmatprep.subr.bf16.mxu1 %v7430_v35  ;;  %v7476_v34 = vld [vmem:[#allocation14 + $0x428] ss:$28 sps:$4 sm:$0xff]   ;;  %v7479_v35 = vld [vmem:[#allocation14 + $0x430] ss:$28 sps:$4 sm:$0xff]  }
 0x369   :  { %5786 = vmatprep.subr.bf16.mxu0 %v7433_v37  ;;  %v7484_v37 = vld [vmem:[#allocation14 + $0x464] ss:$28 sps:$4 sm:$0xff]  }
 0x36b   :  { %5623 = vmatpush1.bf16.msra.mxu1 %v7428_v38  ;;  %v7487_v38 = vld [vmem:[#allocation14 + $0x46c] ss:$28 sps:$4 sm:$0xff]  }
 0x36c   :  { %5787 = vmatpush1.bf16.msra.mxu0 %v7431_v39  ;;  %5624 = vmatprep.subr.bf16.mxu1 %v7436_v40  ;;  %v7482_v39 = vld [vmem:[#allocation14 + $0x460] ss:$28 sps:$4 sm:$0xff]   ;;  %v7485_v40 = vld [vmem:[#allocation14 + $0x468] ss:$28 sps:$4 sm:$0xff]  }
 0x36d   :  { %5788 = vmatprep.subr.bf16.mxu0 %v7439_v41  ;;  %v7490_v41 = vld [vmem:[#allocation14 + $0x49c] ss:$28 sps:$4 sm:$0xff]  }
 0x36f   :  { %5625 = vmatpush1.bf16.msra.mxu1 %v7434_v44  ;;  %v7493_v44 = vld [vmem:[#allocation14 + $0x4a4] ss:$28 sps:$4 sm:$0xff]  }
 0x370   :  { %5789 = vmatpush1.bf16.msra.mxu0 %v7437_v45  ;;  %5626 = vmatprep.subr.bf16.mxu1 %v7442_v46  ;;  %v7488_v45 = vld [vmem:[#allocation14 + $0x498] ss:$28 sps:$4 sm:$0xff]   ;;  %v7491_v46 = vld [vmem:[#allocation14 + $0x4a0] ss:$28 sps:$4 sm:$0xff]  }
 0x371   :  { %5790 = vmatprep.subr.bf16.mxu0 %v7445_v47  ;;  %v7496_v47 = vld [vmem:[#allocation14 + $0x4d4] ss:$28 sps:$4 sm:$0xff]  }
 0x373   :  { %5627 = vmatpush1.bf16.msra.mxu1 %v7440_v48  ;;  %v7499_v48 = vld [vmem:[#allocation14 + $0x4dc] ss:$28 sps:$4 sm:$0xff]  }
 0x374   :  { %5791 = vmatpush1.bf16.msra.mxu0 %v7443_v49  ;;  %5628 = vmatprep.subr.bf16.mxu1 %v7448_v50  ;;  %v7494_v49 = vld [vmem:[#allocation14 + $0x4d0] ss:$28 sps:$4 sm:$0xff]   ;;  %v7497_v50 = vld [vmem:[#allocation14 + $0x4d8] ss:$28 sps:$4 sm:$0xff]  }
 0x375   :  { %5792 = vmatprep.subr.bf16.mxu0 %v7451_v53  ;;  %v7502_v53 = vld [vmem:[#allocation14 + $0x50c] ss:$28 sps:$4 sm:$0xff]  }
 0x377   :  { %5629 = vmatpush1.bf16.msra.mxu1 %v7446_v54  ;;  %v7505_v54 = vld [vmem:[#allocation14 + $0x514] ss:$28 sps:$4 sm:$0xff]  }
 0x378   :  { %5793 = vmatpush1.bf16.msra.mxu0 %v7449_v55  ;;  %5630 = vmatprep.subr.bf16.mxu1 %v7454_v57  ;;  %v7500_v55 = vld [vmem:[#allocation14 + $0x508] ss:$28 sps:$4 sm:$0xff]   ;;  %v7503_v57 = vld [vmem:[#allocation14 + $0x510] ss:$28 sps:$4 sm:$0xff]  }
 0x379   :  { %5794 = vmatprep.subr.bf16.mxu0 %v7457_v58  ;;  %v7508_v58 = vld [vmem:[#allocation14 + $0x544] ss:$28 sps:$4 sm:$0xff]  }
 0x37b   :  { %5631 = vmatpush1.bf16.msra.mxu1 %v7452_v59  ;;  %v7511_v59 = vld [vmem:[#allocation14 + $0x54c] ss:$28 sps:$4 sm:$0xff]  }
 0x37c   :  { %5795 = vmatpush1.bf16.msra.mxu0 %v7455_v5  ;;  %5641 = vmatprep.subr.bf16.mxu1 %v7460_v60  ;;  %v7506_v5 = vld [vmem:[#allocation14 + $0x540] ss:$28 sps:$4 sm:$0xff]   ;;  %v7509_v60 = vld [vmem:[#allocation14 + $0x548] ss:$28 sps:$4 sm:$0xff]  }
 0x37d   :  { %5805 = vmatprep.subr.bf16.mxu0 %v7463_v61  ;;  %v7514_v61 = vld [vmem:[#allocation14 + $0x57c] ss:$28 sps:$4 sm:$0xff]  }
 0x391   :  { %v2462_v2 = vpop.f32.mrb[0].mxu1  ;;  %v8509_v3 = vpop.f32.mrb[12].mxu0 }
 0x392   :  { %v7157_v4 = vadd.f32 %v2462_v2, %v1070_v63  ;;  %v2464_v7 = vpop.f32.mrb[1].mxu1  ;;  %v2546_v32 = vpop.f32.mrb[13].mxu0  ;;  %v7517_v63 = vld [vmem:[#allocation14 + $0x584] ss:$28 sps:$4 sm:$0xff]   ;;  %v7520_v2 = vld [vmem:[#allocation14 + $0x5b4] ss:$28 sps:$4 sm:$0xff]  }
 0x393   :  { %v7158_v6 = vadd.f32 %v2464_v7, %v1074_v0  ;;  %v7160_v8 = vadd.f32 %v2546_v32, %v1082_v1  ;;  %v2466_v9 = vpop.f32.mrb[2].mxu1  ;;  %v2548_v10 = vpop.f32.mrb[14].mxu0  ;;  %v7512_v0 = vld [vmem:[#allocation14 + $0x578] ss:$28 sps:$4 sm:$0xff]   ;;  %v7515_v1 = vld [vmem:[#allocation14 + $0x580] ss:$28 sps:$4 sm:$0xff]  }
 0x394   :  { %vm2715_vm6 = vcmp.gt.f32.partialorder %v7157_v4, 0.0  ;;  %v2723_v11 = vmul.f32 0.2, %v7157_v4  ;;  %v2467_v17 = vpop.f32.mrb[3].mxu1  ;;  %v2549_v21 = vpop.f32.mrb[15].mxu0 }
 0x395   :  { %vm2716_vm7 = vcmp.gt.f32.partialorder %v7158_v6, 0.0  ;;  %v2724_v15 = vmul.f32 0.2, %v7158_v6  ;;  %vm2718_vm8 = vcmp.gt.f32.partialorder %v7160_v8, 0.0  ;;  %v2726_v16 = vmul.f32 0.2, %v7160_v8 }
 0x396   :  { %v2731_v30 = vsel %vm2715_vm6, %v7157_v4, %v2723_v11  ;;  %v7523_v4 = vld [vmem:[#allocation14 + $0x5bc] ss:$28 sps:$4 sm:$0xff]   ;;  %v7518_v7 = vld [vmem:[#allocation14 + $0x5b0] ss:$28 sps:$4 sm:$0xff]   ;;  %v7524_v9 = vld [vmem:[#allocation14 + $0x5e8] ss:$28 sps:$4 sm:$0xff]  }
 0x397   :  { %v2732_v22 = vsel %vm2716_vm7, %v7158_v6, %v2724_v15  ;;  %v2734_v24 = vsel %vm2718_vm8, %v7160_v8, %v2726_v16  ;;  %v8513_v26 = vpack.c.bf16 %v2731_v30, %v2731_v30  ;;  %v7521_v32 = vld [vmem:[#allocation14 + $0x5b8] ss:$28 sps:$4 sm:$0xff]   ;;  %v7526_v6 = vld [vmem:[#allocation14 + $0x5ec] ss:$28 sps:$4 sm:$0xff]   ;;  %v7532_v11 = vld [vmem:[#allocation14 + $0x624] ss:$28 sps:$4 sm:$0xff]  }
 0x398   :  { %v8511_v23 = vpack.c.bf16 %v2732_v22, %v2732_v22  ;;  %v8517_v12 = vpack.c.bf16 %v2734_v24, %v2734_v24  ;;  %v7529_v8 = vld [vmem:[#allocation14 + $0x5f4] ss:$28 sps:$4 sm:$0xff]   ;;  %v7535_v15 = vld [vmem:[#allocation14 + $0x62c] ss:$28 sps:$4 sm:$0xff]   ;;  %v7530_v16 = vld [vmem:[#allocation14 + $0x620] ss:$28 sps:$4 sm:$0xff]   ;;  %v1078_v22 = vrot.slane %v8501_v62, %v8476_v51 }
 0x399   :  { %v7527_v10 = vld [vmem:[#allocation14 + $0x5f0] ss:$28 sps:$4 sm:$0xff]   ;;  %v7533_v30 = vld [vmem:[#allocation14 + $0x628] ss:$28 sps:$4 sm:$0xff]   ;;  %v7538_v17 = vld [vmem:[#allocation14 + $0x65c] ss:$28 sps:$4 sm:$0xff]  }
 0x39a   :  { %5632 = vmatprep.mubr.bf16.mxu1 %v8511_v23  ;;  %5796 = vmatprep.mubr.bf16.mxu0 %v8511_v23  ;;  %v7541_v21 = vld [vmem:[#allocation14 + $0x664] ss:$28 sps:$4 sm:$0xff]   ;;  %v7536_v24 = vld [vmem:[#allocation14 + $0x658] ss:$28 sps:$4 sm:$0xff]  }
 0x39b   :  { %5633 = vmatmul.mubr.bf16.vlgmr.msra.gmra.mrb[8].mxu1 %v8513_v26  ;;  %5797 = vmatmul.mubr.bf16.vlgmr.msra.gmra.mrb[20].mxu0 %v8513_v26 }
 0x39c   :  { %5642 = vmatpush1.bf16.msra.mxu1 %v7458_v52  ;;  %5806 = vmatpush1.bf16.msra.mxu0 %v7461_v25  ;;  %v7539_v52 = vld [vmem:[#allocation14 + $0x660] ss:$28 sps:$4 sm:$0xff]   ;;  %v7544_v25 = vld [vmem:[#allocation14 + $0x694] ss:$28 sps:$4 sm:$0xff]  }
 0x39d   :  { %5673 = vmatprep.mubr.bf16.mxu1 %v8517_v12  ;;  %5837 = vmatprep.mubr.bf16.mxu0 %v8517_v12 }
 0x39e   :  { %5643 = vmatprep.subr.bf16.mxu1 %v7466_v27  ;;  %5807 = vmatprep.subr.bf16.mxu0 %v7469_v28  ;;  %v7547_v27 = vld [vmem:[#allocation14 + $0x69c] ss:$28 sps:$4 sm:$0xff]   ;;  %v7159_v28 = vadd.f32 %v8509_v3, %v1078_v22  ;;  %v7616_v22 = vld [vmem:[#allocation14 + $0x934] ss:$28 sps:$4 sm:$0xff]  }
 0x39f   :  { %v7554_v3 = vld [vmem:[#allocation14 + $0x700] ss:$28 sps:$4 sm:$0xff]  }
 0x3a0   :  { %5644 = vmatpush1.bf16.msra.mxu1 %v7464_v13  ;;  %5808 = vmatpush1.bf16.msra.mxu0 %v7467_v14  ;;  %v7542_v13 = vld [vmem:[#allocation14 + $0x690] ss:$28 sps:$4 sm:$0xff]   ;;  %v7545_v14 = vld [vmem:[#allocation14 + $0x698] ss:$28 sps:$4 sm:$0xff]   ;;  %vm2717_vm9 = vcmp.gt.f32.partialorder %v7159_v28, 0.0 }
 0x3a1   :  { %5645 = vmatprep.subr.bf16.mxu1 %v7472_v18  ;;  %5809 = vmatprep.subr.bf16.mxu0 %v7475_v19  ;;  %v7550_v18 = vld [vmem:[#allocation14 + $0x6cc] ss:$28 sps:$4 sm:$0xff]   ;;  %v7553_v19 = vld [vmem:[#allocation14 + $0x6d4] ss:$28 sps:$4 sm:$0xff]  }
 0x3a4   :  { %5646 = vmatpush1.bf16.msra.mxu1 %v7470_v20  ;;  %5810 = vmatpush1.bf16.msra.mxu0 %v7473_v29  ;;  %v2725_v20 = vmul.f32 0.2, %v7159_v28  ;;  %v7548_v29 = vld [vmem:[#allocation14 + $0x6c8] ss:$28 sps:$4 sm:$0xff]  }
 0x3a5   :  { %5647 = vmatprep.subr.bf16.mxu1 %v7478_v31  ;;  %5811 = vmatprep.subr.bf16.mxu0 %v7481_v33  ;;  %v7551_v31 = vld [vmem:[#allocation14 + $0x6d0] ss:$28 sps:$4 sm:$0xff]   ;;  %v7556_v33 = vld [vmem:[#allocation14 + $0x704] ss:$28 sps:$4 sm:$0xff]  }
 0x3a8   :  { %5648 = vmatpush1.bf16.msra.mxu1 %v7476_v34  ;;  %5812 = vmatpush1.bf16.msra.mxu0 %v7479_v35  ;;  %v7559_v34 = vld [vmem:[#allocation14 + $0x70c] ss:$28 sps:$4 sm:$0xff]   ;;  %v2733_v35 = vsel %vm2717_vm9, %v7159_v28, %v2725_v20  ;;  %v7625_v28 = vld [vmem:[#allocation14 + $0x974] ss:$28 sps:$4 sm:$0xff]   ;;  %v7626_v20 = vld [vmem:[#allocation14 + $0x9a0] ss:$28 sps:$4 sm:$0xff]  }
 0x3a9   :  { %5649 = vmatprep.subr.bf16.mxu1 %v7484_v37  ;;  %5813 = vmatprep.subr.bf16.mxu0 %v7487_v38  ;;  %v7557_v37 = vld [vmem:[#allocation14 + $0x708] ss:$28 sps:$4 sm:$0xff]   ;;  %v8526_v38 = vpack.c.bf16 %v2733_v35, %v2733_v35  ;;  %v1089_v35 = vsub.s32 5, %v8425_v36 }
 0x3ac   :  { %5650 = vmatpush1.bf16.msra.mxu1 %v7482_v39  ;;  %5814 = vmatpush1.bf16.msra.mxu0 %v7485_v40  ;;  %v7562_v39 = vld [vmem:[#allocation14 + $0x73c] ss:$28 sps:$4 sm:$0xff]   ;;  %v7565_v40 = vld [vmem:[#allocation14 + $0x744] ss:$28 sps:$4 sm:$0xff]  }
 0x3ad   :  { %5651 = vmatprep.subr.bf16.mxu1 %v7490_v41  ;;  %5815 = vmatprep.subr.bf16.mxu0 %v7493_v44  ;;  %v7560_v41 = vld [vmem:[#allocation14 + $0x738] ss:$28 sps:$4 sm:$0xff]   ;;  %v7563_v44 = vld [vmem:[#allocation14 + $0x740] ss:$28 sps:$4 sm:$0xff]  }
 0x3b0   :  { %5652 = vmatpush1.bf16.msra.mxu1 %v7488_v45  ;;  %5816 = vmatpush1.bf16.msra.mxu0 %v7491_v46  ;;  %v7568_v45 = vld [vmem:[#allocation14 + $0x774] ss:$28 sps:$4 sm:$0xff]   ;;  %v7571_v46 = vld [vmem:[#allocation14 + $0x77c] ss:$28 sps:$4 sm:$0xff]  }
 0x3b1   :  { %5653 = vmatprep.subr.bf16.mxu1 %v7496_v47  ;;  %5817 = vmatprep.subr.bf16.mxu0 %v7499_v48  ;;  %v7566_v47 = vld [vmem:[#allocation14 + $0x770] ss:$28 sps:$4 sm:$0xff]   ;;  %v7569_v48 = vld [vmem:[#allocation14 + $0x778] ss:$28 sps:$4 sm:$0xff]  }
 0x3b4   :  { %5654 = vmatpush1.bf16.msra.mxu1 %v7494_v49  ;;  %5818 = vmatpush1.bf16.msra.mxu0 %v7497_v50  ;;  %v7574_v49 = vld [vmem:[#allocation14 + $0x7ac] ss:$28 sps:$4 sm:$0xff]   ;;  %v7577_v50 = vld [vmem:[#allocation14 + $0x7b4] ss:$28 sps:$4 sm:$0xff]  }
 0x3b5   :  { %5655 = vmatprep.subr.bf16.mxu1 %v7502_v53  ;;  %5819 = vmatprep.subr.bf16.mxu0 %v7505_v54  ;;  %v7572_v53 = vld [vmem:[#allocation14 + $0x7a8] ss:$28 sps:$4 sm:$0xff]   ;;  %v7575_v54 = vld [vmem:[#allocation14 + $0x7b0] ss:$28 sps:$4 sm:$0xff]  }
 0x3b8   :  { %5656 = vmatpush1.bf16.msra.mxu1 %v7500_v55  ;;  %5820 = vmatpush1.bf16.msra.mxu0 %v7503_v57  ;;  %v7580_v55 = vld [vmem:[#allocation14 + $0x7e4] ss:$28 sps:$4 sm:$0xff]   ;;  %v7583_v57 = vld [vmem:[#allocation14 + $0x7ec] ss:$28 sps:$4 sm:$0xff]  }
 0x3b9   :  { %5657 = vmatprep.subr.bf16.mxu1 %v7508_v58  ;;  %5821 = vmatprep.subr.bf16.mxu0 %v7511_v59  ;;  %v7578_v58 = vld [vmem:[#allocation14 + $0x7e0] ss:$28 sps:$4 sm:$0xff]   ;;  %v7581_v59 = vld [vmem:[#allocation14 + $0x7e8] ss:$28 sps:$4 sm:$0xff]  }
 0x3bc   :  { %5658 = vmatpush1.bf16.msra.mxu1 %v7506_v5  ;;  %5822 = vmatpush1.bf16.msra.mxu0 %v7509_v60  ;;  %v7586_v5 = vld [vmem:[#allocation14 + $0x81c] ss:$28 sps:$4 sm:$0xff]   ;;  %v7589_v60 = vld [vmem:[#allocation14 + $0x824] ss:$28 sps:$4 sm:$0xff]  }
 0x3bd   :  { %5659 = vmatprep.subr.bf16.mxu1 %v7514_v61  ;;  %5823 = vmatprep.subr.bf16.mxu0 %v7517_v63  ;;  %v7584_v61 = vld [vmem:[#allocation14 + $0x818] ss:$28 sps:$4 sm:$0xff]   ;;  %v7587_v63 = vld [vmem:[#allocation14 + $0x820] ss:$28 sps:$4 sm:$0xff]  }
 0x3c0   :  { %5660 = vmatpush1.bf16.msra.mxu1 %v7512_v0  ;;  %5824 = vmatpush1.bf16.msra.mxu0 %v7515_v1  ;;  %v7592_v0 = vld [vmem:[#allocation14 + $0x854] ss:$28 sps:$4 sm:$0xff]   ;;  %v7595_v1 = vld [vmem:[#allocation14 + $0x85c] ss:$28 sps:$4 sm:$0xff]  }
 0x3c1   :  { %5661 = vmatprep.subr.bf16.mxu1 %v7520_v2  ;;  %5825 = vmatprep.subr.bf16.mxu0 %v7523_v4  ;;  %v7590_v2 = vld [vmem:[#allocation14 + $0x850] ss:$28 sps:$4 sm:$0xff]   ;;  %v7593_v4 = vld [vmem:[#allocation14 + $0x858] ss:$28 sps:$4 sm:$0xff]  }
 0x3c4   :  { %5662 = vmatpush1.bf16.msra.mxu1 %v7518_v7  ;;  %5826 = vmatpush1.bf16.msra.mxu0 %v7521_v32  ;;  %v7598_v7 = vld [vmem:[#allocation14 + $0x88c] ss:$28 sps:$4 sm:$0xff]   ;;  %v7601_v32 = vld [vmem:[#allocation14 + $0x894] ss:$28 sps:$4 sm:$0xff]  }
 0x3c5   :  { %5663 = vmatprep.subr.bf16.mxu1 %v7526_v6  ;;  %5827 = vmatprep.subr.bf16.mxu0 %v7529_v8  ;;  %v7596_v6 = vld [vmem:[#allocation14 + $0x888] ss:$28 sps:$4 sm:$0xff]   ;;  %v7599_v8 = vld [vmem:[#allocation14 + $0x890] ss:$28 sps:$4 sm:$0xff]  }
 0x3c8   :  { %5664 = vmatpush1.bf16.msra.mxu1 %v7524_v9  ;;  %5828 = vmatpush1.bf16.msra.mxu0 %v7527_v10  ;;  %v7604_v9 = vld [vmem:[#allocation14 + $0x8c4] ss:$28 sps:$4 sm:$0xff]   ;;  %v7607_v10 = vld [vmem:[#allocation14 + $0x8cc] ss:$28 sps:$4 sm:$0xff]  }
 0x3c9   :  { %5665 = vmatprep.subr.bf16.mxu1 %v7532_v11  ;;  %5829 = vmatprep.subr.bf16.mxu0 %v7535_v15  ;;  %v7602_v11 = vld [vmem:[#allocation14 + $0x8c0] ss:$28 sps:$4 sm:$0xff]   ;;  %v7605_v15 = vld [vmem:[#allocation14 + $0x8c8] ss:$28 sps:$4 sm:$0xff]  }
 0x3cc   :  { %5666 = vmatpush1.bf16.msra.mxu1 %v7530_v16  ;;  %5830 = vmatpush1.bf16.msra.mxu0 %v7533_v30  ;;  %v7610_v16 = vld [vmem:[#allocation14 + $0x8fc] ss:$28 sps:$4 sm:$0xff]   ;;  %v7613_v30 = vld [vmem:[#allocation14 + $0x904] ss:$28 sps:$4 sm:$0xff]  }
 0x3cd   :  { %5667 = vmatprep.subr.bf16.mxu1 %v7538_v17  ;;  %5831 = vmatprep.subr.bf16.mxu0 %v7541_v21  ;;  %v7608_v17 = vld [vmem:[#allocation14 + $0x8f8] ss:$28 sps:$4 sm:$0xff]   ;;  %v7611_v21 = vld [vmem:[#allocation14 + $0x900] ss:$28 sps:$4 sm:$0xff]  }
 0x3d0   :  { %5668 = vmatpush1.bf16.msra.mxu1 %v7536_v24  ;;  %5832 = vmatpush1.bf16.msra.mxu0 %v7539_v52  ;;  %v7619_v24 = vld [vmem:[#allocation14 + $0x93c] ss:$28 sps:$4 sm:$0xff]   ;;  %v7614_v52 = vld [vmem:[#allocation14 + $0x930] ss:$28 sps:$4 sm:$0xff]  }
 0x3d1   :  { %5669 = vmatprep.subr.bf16.mxu1 %v7544_v25  ;;  %5833 = vmatprep.subr.bf16.mxu0 %v7547_v27  ;;  %v7617_v25 = vld [vmem:[#allocation14 + $0x938] ss:$28 sps:$4 sm:$0xff]   ;;  %v7622_v27 = vld [vmem:[#allocation14 + $0x96c] ss:$28 sps:$4 sm:$0xff]  }
 0x3d4   :  { %5670 = vmatpush1.bf16.msra.mxu1 %v7542_v13  ;;  %5834 = vmatpush1.bf16.msra.mxu0 %v7545_v14  ;;  %v7620_v13 = vld [vmem:[#allocation14 + $0x968] ss:$28 sps:$4 sm:$0xff]   ;;  %v7623_v14 = vld [vmem:[#allocation14 + $0x970] ss:$28 sps:$4 sm:$0xff]  }
 0x3d5   :  { %5671 = vmatprep.subr.bf16.mxu1 %v7550_v18  ;;  %5835 = vmatprep.subr.bf16.mxu0 %v7553_v19  ;;  %v7628_v18 = vld [vmem:[#allocation14 + $0x9a4] ss:$28 sps:$4 sm:$0xff]   ;;  %v7631_v19 = vld [vmem:[#allocation14 + $0x9ac] ss:$28 sps:$4 sm:$0xff]  }
 0x3d8   :  { %5672 = vmatpush1.bf16.msra.mxu1 %v7548_v29  ;;  %5836 = vmatpush1.bf16.msra.mxu0 %v7551_v31  ;;  %v7629_v29 = vld [vmem:[#allocation14 + $0x9a8] ss:$28 sps:$4 sm:$0xff]   ;;  %v7634_v31 = vld [vmem:[#allocation14 + $0x9dc] ss:$28 sps:$4 sm:$0xff]  }
 0x3d9   :  { %5682 = vmatprep.subr.bf16.mxu1 %v7556_v33  ;;  %5846 = vmatprep.subr.bf16.mxu0 %v7559_v34  ;;  %v7637_v33 = vld [vmem:[#allocation14 + $0x9e4] ss:$28 sps:$4 sm:$0xff]   ;;  %v1085_v34 = vsub.s32 4, %v8425_v36 }
 0x3db   :  { %5674 = vmatmul.mubr.bf16.vlgmr.msra.gmra.mrb[8].mxu1 %v8526_v38  ;;  %5838 = vmatmul.mubr.bf16.vlgmr.msra.gmra.mrb[20].mxu0 %v8526_v38 }
 0x3dc   :  { %5683 = vmatpush1.bf16.msra.mxu1 %v7554_v3  ;;  %5847 = vmatpush1.bf16.msra.mxu0 %v7557_v37  ;;  %v7632_v3 = vld [vmem:[#allocation14 + $0x9d8] ss:$28 sps:$4 sm:$0xff]   ;;  %v7635_v37 = vld [vmem:[#allocation14 + $0x9e0] ss:$28 sps:$4 sm:$0xff]  }
 0x3dd   :  { %5684 = vmatprep.subr.bf16.mxu1 %v7562_v39  ;;  %5848 = vmatprep.subr.bf16.mxu0 %v7565_v40  ;;  %v1097_v39 = vsub.s32 7, %v8425_v36  ;;  %v7640_v40 = vld [vmem:[#allocation14 + $0xa14] ss:$28 sps:$4 sm:$0xff]  }
 0x3e0   :  { %5685 = vmatpush1.bf16.msra.mxu1 %v7560_v41  ;;  %5849 = vmatpush1.bf16.msra.mxu0 %v7563_v44  ;;  %v7643_v41 = vld [vmem:[#allocation14 + $0xa1c] ss:$28 sps:$4 sm:$0xff]   ;;  %v1086_v44 = vrot.slane %v8501_v62, %v1085_v34 }
 0x3e1   :  { %5686 = vmatprep.subr.bf16.mxu1 %v7568_v45  ;;  %5850 = vmatprep.subr.bf16.mxu0 %v7571_v46  ;;  %v1090_v45 = vrot.slane %v8501_v62, %v1089_v35  ;;  %v1098_v46 = vrot.slane %v8501_v62, %v1097_v39  ;;  %v7682_v39 = vld [vmem:[#allocation14 + $0xb9c] ss:$28 sps:$4 sm:$0xff]  }
 0x3e4   :  { %5687 = vmatpush1.bf16.msra.mxu1 %v7566_v47  ;;  %5851 = vmatpush1.bf16.msra.mxu0 %v7569_v48  ;;  %v7638_v47 = vld [vmem:[#allocation14 + $0xa10] ss:$28 sps:$4 sm:$0xff]   ;;  %v7641_v48 = vld [vmem:[#allocation14 + $0xa18] ss:$28 sps:$4 sm:$0xff]  }
 0x3e5   :  { %5688 = vmatprep.subr.bf16.mxu1 %v7574_v49  ;;  %5852 = vmatprep.subr.bf16.mxu0 %v7577_v50  ;;  %v7646_v50 = vld [vmem:[#allocation14 + $0xa4c] ss:$28 sps:$4 sm:$0xff]  }
 0x3e8   :  { %5689 = vmatpush1.bf16.msra.mxu1 %v7572_v53  ;;  %5853 = vmatpush1.bf16.msra.mxu0 %v7575_v54  ;;  %v7649_v53 = vld [vmem:[#allocation14 + $0xa54] ss:$28 sps:$4 sm:$0xff]  }
 0x3e9   :  { %5690 = vmatprep.subr.bf16.mxu1 %v7580_v55  ;;  %5854 = vmatprep.subr.bf16.mxu0 %v7583_v57 }
 0x3ec   :  { %5691 = vmatpush1.bf16.msra.mxu1 %v7578_v58  ;;  %5855 = vmatpush1.bf16.msra.mxu0 %v7581_v59  ;;  %v7644_v58 = vld [vmem:[#allocation14 + $0xa48] ss:$28 sps:$4 sm:$0xff]  }
 0x3ed   :  { %5692 = vmatprep.subr.bf16.mxu1 %v7586_v5  ;;  %5856 = vmatprep.subr.bf16.mxu0 %v7589_v60 }
 0x3f0   :  { %5693 = vmatpush1.bf16.msra.mxu1 %v7584_v61  ;;  %5857 = vmatpush1.bf16.msra.mxu0 %v7587_v63  ;;  %v7647_v61 = vld [vmem:[#allocation14 + $0xa50] ss:$28 sps:$4 sm:$0xff]   ;;  %v7652_v63 = vld [vmem:[#allocation14 + $0xa84] ss:$28 sps:$4 sm:$0xff]  }
 0x3f1   :  { %5694 = vmatprep.subr.bf16.mxu1 %v7592_v0  ;;  %5858 = vmatprep.subr.bf16.mxu0 %v7595_v1 }
 0x3f4   :  { %5695 = vmatpush1.bf16.msra.mxu1 %v7590_v2  ;;  %5859 = vmatpush1.bf16.msra.mxu0 %v7593_v4 }
 0x3f5   :  { %5696 = vmatprep.subr.bf16.mxu1 %v7598_v7  ;;  %5860 = vmatprep.subr.bf16.mxu0 %v7601_v32  ;;  %v7655_v32 = vld [vmem:[#allocation14 + $0xa8c] ss:$28 sps:$4 sm:$0xff]  }
 0x3f8   :  { %5697 = vmatpush1.bf16.msra.mxu1 %v7596_v6  ;;  %5861 = vmatpush1.bf16.msra.mxu0 %v7599_v8 }
 0x3f9   :  { %5698 = vmatprep.subr.bf16.mxu1 %v7604_v9  ;;  %5862 = vmatprep.subr.bf16.mxu0 %v7607_v10 }
 0x3fc   :  { %5699 = vmatpush1.bf16.msra.mxu1 %v7602_v11  ;;  %5863 = vmatpush1.bf16.msra.mxu0 %v7605_v15 }
 0x3fd   :  { %5700 = vmatprep.subr.bf16.mxu1 %v7610_v16  ;;  %5864 = vmatprep.subr.bf16.mxu0 %v7613_v30  ;;  %v7650_v16 = vld [vmem:[#allocation14 + $0xa80] ss:$28 sps:$4 sm:$0xff]   ;;  %v7653_v30 = vld [vmem:[#allocation14 + $0xa88] ss:$28 sps:$4 sm:$0xff]  }
 0x400   :  { %5701 = vmatpush1.bf16.msra.mxu1 %v7608_v17  ;;  %5865 = vmatpush1.bf16.msra.mxu0 %v7611_v21  ;;  %v7658_v21 = vld [vmem:[#allocation14 + $0xabc] ss:$28 sps:$4 sm:$0xff]  }
 0x401   :  { %5702 = vmatprep.subr.bf16.mxu1 %v7616_v22  ;;  %5866 = vmatprep.subr.bf16.mxu0 %v7619_v24  ;;  %v7661_v22 = vld [vmem:[#allocation14 + $0xac4] ss:$28 sps:$4 sm:$0xff]  }
 0x404   :  { %5703 = vmatpush1.bf16.msra.mxu1 %v7614_v52  ;;  %5867 = vmatpush1.bf16.msra.mxu0 %v7617_v25  ;;  %v7656_v52 = vld [vmem:[#allocation14 + $0xab8] ss:$28 sps:$4 sm:$0xff]   ;;  %v7659_v25 = vld [vmem:[#allocation14 + $0xac0] ss:$28 sps:$4 sm:$0xff]  }
 0x405   :  { %5704 = vmatprep.subr.bf16.mxu1 %v7622_v27  ;;  %5868 = vmatprep.subr.bf16.mxu0 %v7625_v28  ;;  %v7664_v27 = vld [vmem:[#allocation14 + $0xaf4] ss:$28 sps:$4 sm:$0xff]   ;;  %v7667_v28 = vld [vmem:[#allocation14 + $0xafc] ss:$28 sps:$4 sm:$0xff]  }
 0x408   :  { %5705 = vmatpush1.bf16.msra.mxu1 %v7620_v13  ;;  %5869 = vmatpush1.bf16.msra.mxu0 %v7623_v14  ;;  %v7662_v13 = vld [vmem:[#allocation14 + $0xaf0] ss:$28 sps:$4 sm:$0xff]   ;;  %v7665_v14 = vld [vmem:[#allocation14 + $0xaf8] ss:$28 sps:$4 sm:$0xff]  }
 0x409   :  { %5706 = vmatprep.subr.bf16.mxu1 %v7628_v18  ;;  %5870 = vmatprep.subr.bf16.mxu0 %v7631_v19  ;;  %v7670_v18 = vld [vmem:[#allocation14 + $0xb2c] ss:$28 sps:$4 sm:$0xff]   ;;  %v7673_v19 = vld [vmem:[#allocation14 + $0xb34] ss:$28 sps:$4 sm:$0xff]  }
 0x40c   :  { %5707 = vmatpush1.bf16.msra.mxu1 %v7626_v20  ;;  %5871 = vmatpush1.bf16.msra.mxu0 %v7629_v29  ;;  %v7668_v20 = vld [vmem:[#allocation14 + $0xb28] ss:$28 sps:$4 sm:$0xff]   ;;  %v7671_v29 = vld [vmem:[#allocation14 + $0xb30] ss:$28 sps:$4 sm:$0xff]  }
 0x40d   :  { %5708 = vmatprep.subr.bf16.mxu1 %v7634_v31  ;;  %5872 = vmatprep.subr.bf16.mxu0 %v7637_v33  ;;  %v7676_v31 = vld [vmem:[#allocation14 + $0xb64] ss:$28 sps:$4 sm:$0xff]   ;;  %v7679_v33 = vld [vmem:[#allocation14 + $0xb6c] ss:$28 sps:$4 sm:$0xff]  }
 0x410   :  { %5709 = vmatpush1.bf16.msra.mxu1 %v7632_v3  ;;  %5873 = vmatpush1.bf16.msra.mxu0 %v7635_v37  ;;  %v7674_v3 = vld [vmem:[#allocation14 + $0xb60] ss:$28 sps:$4 sm:$0xff]   ;;  %v7677_v37 = vld [vmem:[#allocation14 + $0xb68] ss:$28 sps:$4 sm:$0xff]  }
 0x411   :  { %v2626_v49 = vpop.f32.mrb[4].mxu1  ;;  %5710 = vmatprep.subr.bf16.mxu1 %v7640_v40  ;;  %5874 = vmatprep.subr.bf16.mxu0 %v7643_v41  ;;  %v7685_v40 = vld [vmem:[#allocation14 + $0xba4] ss:$28 sps:$4 sm:$0xff]   ;;  %v7680_v41 = vld [vmem:[#allocation14 + $0xb98] ss:$28 sps:$4 sm:$0xff]  }
 0x412   :  { %v7161_v54 = vadd.f32 %v2626_v49, %v1086_v44  ;;  %v8540_v55 = vpop.f32.mrb[16].mxu0  ;;  %v2628_v57 = vpop.f32.mrb[5].mxu1  ;;  %v7683_v44 = vld [vmem:[#allocation14 + $0xba0] ss:$28 sps:$4 sm:$0xff]   ;;  %v7694_v49 = vld [vmem:[#allocation14 + $0xc0c] ss:$28 sps:$4 sm:$0xff]  }
 0x413   :  { %v7162_v59 = vadd.f32 %v2628_v57, %v1090_v45  ;;  %v2710_v5 = vpop.f32.mrb[17].mxu0  ;;  %v2630_v60 = vpop.f32.mrb[6].mxu1  ;;  %v7688_v45 = vld [vmem:[#allocation14 + $0xbd4] ss:$28 sps:$4 sm:$0xff]   ;;  %v7700_v57 = vld [vmem:[#allocation14 + $0xc44] ss:$28 sps:$4 sm:$0xff]  }
 0x414   :  { %vm2719_vm10 = vcmp.gt.f32.partialorder %v7161_v54, 0.0  ;;  %v2727_v0 = vmul.f32 0.2, %v7161_v54  ;;  %v7164_v1 = vadd.f32 %v2710_v5, %v1098_v46  ;;  %v2712_v2 = vpop.f32.mrb[18].mxu0  ;;  %5711 = vmatpush1.bf16.msra.mxu1 %v7638_v47  ;;  %5875 = vmatpush1.bf16.msra.mxu0 %v7641_v48  ;;  %v2631_v4 = vpop.f32.mrb[7].mxu1 }
 0x415   :  { %vm2720_vm11 = vcmp.gt.f32.partialorder %v7162_v59, 0.0  ;;  %v2728_v7 = vmul.f32 0.2, %v7162_v59  ;;  %5712 = vmatprep.subr.bf16.mxu1 %v7646_v50  ;;  %5876 = vmatprep.subr.bf16.mxu0 %v7649_v53  ;;  %v2713_v9 = vpop.f32.mrb[19].mxu0  ;;  %v7691_v46 = vld [vmem:[#allocation14 + $0xbdc] ss:$28 sps:$4 sm:$0xff]  }
 0x416   :  { %v2735_v6 = vsel %vm2719_vm10, %v7161_v54, %v2727_v0  ;;  %vm2722_vm12 = vcmp.gt.f32.partialorder %v7164_v1, 0.0  ;;  %v2730_v8 = vmul.f32 0.2, %v7164_v1  ;;  %v7686_v47 = vld [vmem:[#allocation14 + $0xbd0] ss:$28 sps:$4 sm:$0xff]  }
 0x417   :  { %v2736_v10 = vsel %vm2720_vm11, %v7162_v59, %v2728_v7  ;;  %v8544_v17 = vpack.c.bf16 %v2735_v6, %v2735_v6  ;;  %v7689_v48 = vld [vmem:[#allocation14 + $0xbd8] ss:$28 sps:$4 sm:$0xff]   ;;  %v7692_v53 = vld [vmem:[#allocation14 + $0xc08] ss:$28 sps:$4 sm:$0xff]   ;;  %v7695_v54 = vld [vmem:[#allocation14 + $0xc10] ss:$28 sps:$4 sm:$0xff]  }
 0x418   :  { %v8542_v11 = vpack.c.bf16 %v2736_v10, %v2736_v10  ;;  %v2738_v15 = vsel %vm2722_vm12, %v7164_v1, %v2730_v8  ;;  %5713 = vmatpush1.bf16.msra.mxu1 %v7644_v58  ;;  %5877 = vmatpush1.bf16.msra.mxu0 %v7647_v61  ;;  %v7697_v50 = vld [vmem:[#allocation14 + $0xc14] ss:$28 sps:$4 sm:$0xff]   ;;  %v7703_v58 = vld [vmem:[#allocation14 + $0xc4c] ss:$28 sps:$4 sm:$0xff]   ;;  %v7698_v59 = vld [vmem:[#allocation14 + $0xc40] ss:$28 sps:$4 sm:$0xff]  }
 0x419   :  { %5723 = vmatprep.subr.bf16.mxu1 %v7652_v63  ;;  %5887 = vmatprep.subr.bf16.mxu0 %v7655_v32  ;;  %v8548_v24 = vpack.c.bf16 %v2738_v15, %v2738_v15  ;;  %v7701_v5 = vld [vmem:[#allocation14 + $0xc48] ss:$28 sps:$4 sm:$0xff]   ;;  %v7706_v60 = vld [vmem:[#allocation14 + $0xc7c] ss:$28 sps:$4 sm:$0xff]   ;;  %v7712_v1 = vld [vmem:[#allocation14 + $0xcb4] ss:$28 sps:$4 sm:$0xff]  }
 0x41a   :  { %5714 = vmatprep.mubr.bf16.mxu1 %v8542_v11  ;;  %5878 = vmatprep.mubr.bf16.mxu0 %v8542_v11  ;;  %v7709_v61 = vld [vmem:[#allocation14 + $0xc84] ss:$28 sps:$4 sm:$0xff]   ;;  %v7704_v63 = vld [vmem:[#allocation14 + $0xc78] ss:$28 sps:$4 sm:$0xff]   ;;  %v7710_v4 = vld [vmem:[#allocation14 + $0xcb0] ss:$28 sps:$4 sm:$0xff]  }
 0x41b   :  { %5715 = vmatmul.mubr.bf16.vlgmr.msra.gmra.mrb[8].mxu1 %v8544_v17  ;;  %5879 = vmatmul.mubr.bf16.vlgmr.msra.gmra.mrb[20].mxu0 %v8544_v17  ;;  %v7707_v0 = vld [vmem:[#allocation14 + $0xc80] ss:$28 sps:$4 sm:$0xff]   ;;  %v7713_v7 = vld [vmem:[#allocation14 + $0xcb8] ss:$28 sps:$4 sm:$0xff]   ;;  %v7718_v32 = vld [vmem:[#allocation14 + $0xcec] ss:$28 sps:$4 sm:$0xff]  }
 0x41c   :  { %5724 = vmatpush1.bf16.msra.mxu1 %v7650_v16  ;;  %5888 = vmatpush1.bf16.msra.mxu0 %v7653_v30  ;;  %v7715_v2 = vld [vmem:[#allocation14 + $0xcbc] ss:$28 sps:$4 sm:$0xff]   ;;  %v7721_v6 = vld [vmem:[#allocation14 + $0xcf4] ss:$28 sps:$4 sm:$0xff]   ;;  %v7716_v8 = vld [vmem:[#allocation14 + $0xce8] ss:$28 sps:$4 sm:$0xff]  }
 0x41d   :  { %5755 = vmatprep.mubr.bf16.mxu1 %v8548_v24  ;;  %5919 = vmatprep.mubr.bf16.mxu0 %v8548_v24  ;;  %v7719_v9 = vld [vmem:[#allocation14 + $0xcf0] ss:$28 sps:$4 sm:$0xff]   ;;  %v7724_v10 = vld [vmem:[#allocation14 + $0xd24] ss:$28 sps:$4 sm:$0xff]   ;;  %v1093_v16 = vsub.s32 6, %v8425_v36 }
 0x41e   :  { %5725 = vmatprep.subr.bf16.mxu1 %v7658_v21  ;;  %5889 = vmatprep.subr.bf16.mxu0 %v7661_v22  ;;  %v7727_v15 = vld [vmem:[#allocation14 + $0xd2c] ss:$28 sps:$4 sm:$0xff]   ;;  %v7722_v30 = vld [vmem:[#allocation14 + $0xd20] ss:$28 sps:$4 sm:$0xff]  }
 0x41f   :  { %v7725_v21 = vld [vmem:[#allocation14 + $0xd28] ss:$28 sps:$4 sm:$0xff]   ;;  %v7730_v22 = vld [vmem:[#allocation14 + $0xd5c] ss:$28 sps:$4 sm:$0xff]  }
 0x420   :  { %5726 = vmatpush1.bf16.msra.mxu1 %v7656_v52  ;;  %5890 = vmatpush1.bf16.msra.mxu0 %v7659_v25  ;;  %v7733_v52 = vld [vmem:[#allocation14 + $0xd64] ss:$28 sps:$4 sm:$0xff]   ;;  %v1094_v25 = vrot.slane %v8501_v62, %v1093_v16 }
 0x421   :  { %5727 = vmatprep.subr.bf16.mxu1 %v7664_v27  ;;  %5891 = vmatprep.subr.bf16.mxu0 %v7667_v28  ;;  %v7728_v27 = vld [vmem:[#allocation14 + $0xd58] ss:$28 sps:$4 sm:$0xff]   ;;  %v7731_v28 = vld [vmem:[#allocation14 + $0xd60] ss:$28 sps:$4 sm:$0xff]   ;;  %v7740_v62 = vld [vmem:[#allocation14 + $0xdc8] ss:$28 sps:$4 sm:$0xff]  }
 0x424   :  { %5728 = vmatpush1.bf16.msra.mxu1 %v7662_v13  ;;  %5892 = vmatpush1.bf16.msra.mxu0 %v7665_v14  ;;  %v7736_v13 = vld [vmem:[#allocation14 + $0xd94] ss:$28 sps:$4 sm:$0xff]   ;;  %v7739_v14 = vld [vmem:[#allocation14 + $0xd9c] ss:$28 sps:$4 sm:$0xff]  }
 0x425   :  { %5729 = vmatprep.subr.bf16.mxu1 %v7670_v18  ;;  %5893 = vmatprep.subr.bf16.mxu0 %v7673_v19  ;;  %v7163_v18 = vadd.f32 %v8540_v55, %v1094_v25  ;;  %v7734_v19 = vld [vmem:[#allocation14 + $0xd90] ss:$28 sps:$4 sm:$0xff]   ;;  %v7790_v25 = vld [vmem:[#allocation14 + $0x398] ss:$28 sps:$4 sm:$0xff]  }
 0x426   :  { %v7746_v55 = vld [vmem:[#allocation14 + $0x10] ss:$28 sps:$4 sm:$0xff]  }
 0x427   :  { %vm2721_vm13 = vcmp.gt.f32.partialorder %v7163_v18, 0.0 }
 0x428   :  { %5730 = vmatpush1.bf16.msra.mxu1 %v7668_v20  ;;  %5894 = vmatpush1.bf16.msra.mxu0 %v7671_v29  ;;  %v7737_v20 = vld [vmem:[#allocation14 + $0xd98] ss:$28 sps:$4 sm:$0xff]   ;;  %v7742_v29 = vld [vmem:[#allocation14 + $0xdcc] ss:$28 sps:$4 sm:$0xff]  }
 0x429   :  { %5731 = vmatprep.subr.bf16.mxu1 %v7676_v31  ;;  %5895 = vmatprep.subr.bf16.mxu0 %v7679_v33  ;;  %v7745_v31 = vld [vmem:[#allocation14 + $0xdd4] ss:$28 sps:$4 sm:$0xff]   ;;  %v2729_v33 = vmul.f32 0.2, %v7163_v18 }
 0x42c   :  { %5732 = vmatpush1.bf16.msra.mxu1 %v7674_v3  ;;  %5896 = vmatpush1.bf16.msra.mxu0 %v7677_v37  ;;  %v7743_v3 = vld [vmem:[#allocation14 + $0xdd0] ss:$28 sps:$4 sm:$0xff]  }
 0x42d   :  { %5733 = vmatprep.subr.bf16.mxu1 %v7682_v39  ;;  %5897 = vmatprep.subr.bf16.mxu0 %v7685_v40  ;;  %v7748_v37 = vld [vmem:[#allocation14 + $0x14] ss:$28 sps:$4 sm:$0xff]   ;;  %v2737_v40 = vsel %vm2721_vm13, %v7163_v18, %v2729_v33  ;;  %v7798_v18 = vld [vmem:[#allocation14 + $0x244] ss:$28 sps:$4 sm:$0xff]  }
 0x42e   :  { %v7749_v39 = vld [vmem:[#allocation14 + $0x1d8] ss:$28 sps:$4 sm:$0xff]   ;;  %v7804_v33 = vld [vmem:[#allocation14 + $0x600] ss:$28 sps:$4 sm:$0xff]  }
 0x430   :  { %5734 = vmatpush1.bf16.msra.mxu1 %v7680_v41  ;;  %5898 = vmatpush1.bf16.msra.mxu0 %v7683_v44  ;;  %v8559_v41 = vpack.c.bf16 %v2737_v40, %v2737_v40  ;;  %v7750_v44 = vld [vmem:[#allocation14 + $0x18] ss:$28 sps:$4 sm:$0xff]   ;;  %v7806_v40 = vld [vmem:[#allocation14 + $0x2b0] ss:$28 sps:$4 sm:$0xff]  }
 0x431   :  { %5735 = vmatprep.subr.bf16.mxu1 %v7688_v45  ;;  %5899 = vmatprep.subr.bf16.mxu0 %v7691_v46  ;;  %v7753_v45 = vld [vmem:[#allocation14 + $0x4c] ss:$28 sps:$4 sm:$0xff]  }
 0x432   :  { %v7754_v46 = vld [vmem:[#allocation14 + $0x210] ss:$28 sps:$4 sm:$0xff]  }
 0x434   :  { %5736 = vmatpush1.bf16.msra.mxu1 %v7686_v47  ;;  %5900 = vmatpush1.bf16.msra.mxu0 %v7689_v48  ;;  %v7751_v47 = vld [vmem:[#allocation14 + $0x48] ss:$28 sps:$4 sm:$0xff]   ;;  %v7755_v48 = vld [vmem:[#allocation14 + $0x50] ss:$28 sps:$4 sm:$0xff]  }
 0x435   :  { %5737 = vmatprep.subr.bf16.mxu1 %v7694_v49  ;;  %5901 = vmatprep.subr.bf16.mxu0 %v7697_v50  ;;  %v7758_v49 = vld [vmem:[#allocation14 + $0x84] ss:$28 sps:$4 sm:$0xff]  }
 0x436   :  { %v7759_v50 = vld [vmem:[#allocation14 + $0x248] ss:$28 sps:$4 sm:$0xff]  }
 0x438   :  { %5738 = vmatpush1.bf16.msra.mxu1 %v7692_v53  ;;  %5902 = vmatpush1.bf16.msra.mxu0 %v7695_v54  ;;  %v7756_v53 = vld [vmem:[#allocation14 + $0x80] ss:$28 sps:$4 sm:$0xff]   ;;  %v7760_v54 = vld [vmem:[#allocation14 + $0x88] ss:$28 sps:$4 sm:$0xff]  }
 0x439   :  { %5739 = vmatprep.subr.bf16.mxu1 %v7700_v57  ;;  %5903 = vmatprep.subr.bf16.mxu0 %v7703_v58  ;;  %v7763_v57 = vld [vmem:[#allocation14 + $0xbc] ss:$28 sps:$4 sm:$0xff]  }
 0x43a   :  { %v7764_v58 = vld [vmem:[#allocation14 + $0x280] ss:$28 sps:$4 sm:$0xff]  }
 0x43c   :  { %5740 = vmatpush1.bf16.msra.mxu1 %v7698_v59  ;;  %5904 = vmatpush1.bf16.msra.mxu0 %v7701_v5  ;;  %v7761_v59 = vld [vmem:[#allocation14 + $0xb8] ss:$28 sps:$4 sm:$0xff]   ;;  %v7765_v5 = vld [vmem:[#allocation14 + $0xc0] ss:$28 sps:$4 sm:$0xff]  }
 0x43d   :  { %5741 = vmatprep.subr.bf16.mxu1 %v7706_v60  ;;  %5905 = vmatprep.subr.bf16.mxu0 %v7709_v61  ;;  %v7768_v60 = vld [vmem:[#allocation14 + $0xf4] ss:$28 sps:$4 sm:$0xff]  }
 0x43e   :  { %v7766_v61 = vld [vmem:[#allocation14 + $0xf0] ss:$28 sps:$4 sm:$0xff]  }
 0x440   :  { %5742 = vmatpush1.bf16.msra.mxu1 %v7704_v63  ;;  %5906 = vmatpush1.bf16.msra.mxu0 %v7707_v0  ;;  %v7770_v63 = vld [vmem:[#allocation14 + $0xf8] ss:$28 sps:$4 sm:$0xff]   ;;  %v7773_v0 = vld [vmem:[#allocation14 + $0x12c] ss:$28 sps:$4 sm:$0xff]  }
 0x441   :  { %5743 = vmatprep.subr.bf16.mxu1 %v7712_v1  ;;  %5907 = vmatprep.subr.bf16.mxu0 %v7715_v2  ;;  %v7774_v1 = vld [vmem:[#allocation14 + $0x2f0] ss:$28 sps:$4 sm:$0xff]   ;;  %v7771_v2 = vld [vmem:[#allocation14 + $0x128] ss:$28 sps:$4 sm:$0xff]  }
 0x444   :  { %5744 = vmatpush1.bf16.msra.mxu1 %v7710_v4  ;;  %5908 = vmatpush1.bf16.msra.mxu0 %v7713_v7  ;;  %v7775_v4 = vld [vmem:[#allocation14 + $0x130] ss:$28 sps:$4 sm:$0xff]   ;;  %v7778_v7 = vld [vmem:[#allocation14 + $0x164] ss:$28 sps:$4 sm:$0xff]  }
 0x445   :  { %5745 = vmatprep.subr.bf16.mxu1 %v7718_v32  ;;  %5909 = vmatprep.subr.bf16.mxu0 %v7721_v6  ;;  %v7779_v32 = vld [vmem:[#allocation14 + $0x328] ss:$28 sps:$4 sm:$0xff]   ;;  %v7776_v6 = vld [vmem:[#allocation14 + $0x160] ss:$28 sps:$4 sm:$0xff]  }
 0x448   :  { %5746 = vmatpush1.bf16.msra.mxu1 %v7716_v8  ;;  %5910 = vmatpush1.bf16.msra.mxu0 %v7719_v9  ;;  %v7780_v8 = vld [vmem:[#allocation14 + $0x168] ss:$28 sps:$4 sm:$0xff]   ;;  %v7783_v9 = vld [vmem:[#allocation14 + $0x19c] ss:$28 sps:$4 sm:$0xff]  }
 0x449   :  { %5747 = vmatprep.subr.bf16.mxu1 %v7724_v10  ;;  %5911 = vmatprep.subr.bf16.mxu0 %v7727_v15  ;;  %v7784_v10 = vld [vmem:[#allocation14 + $0x360] ss:$28 sps:$4 sm:$0xff]   ;;  %v7781_v15 = vld [vmem:[#allocation14 + $0x198] ss:$28 sps:$4 sm:$0xff]  }
 0x44c   :  { %5748 = vmatpush1.bf16.msra.mxu1 %v7722_v30  ;;  %5912 = vmatpush1.bf16.msra.mxu0 %v7725_v21  ;;  %v7785_v30 = vld [vmem:[#allocation14 + $0x1a0] ss:$28 sps:$4 sm:$0xff]   ;;  %v7788_v21 = vld [vmem:[#allocation14 + $0x1d4] ss:$28 sps:$4 sm:$0xff]  }
 0x44d   :  { %5749 = vmatprep.subr.bf16.mxu1 %v7730_v22  ;;  %5913 = vmatprep.subr.bf16.mxu0 %v7733_v52  ;;  %v7789_v22 = vld [vmem:[#allocation14 + $0x558] ss:$28 sps:$4 sm:$0xff]   ;;  %v7786_v52 = vld [vmem:[#allocation14 + $0x1d0] ss:$28 sps:$4 sm:$0xff]  }
 0x450   :  { %5750 = vmatpush1.bf16.msra.mxu1 %v7728_v27  ;;  %5914 = vmatpush1.bf16.msra.mxu0 %v7731_v28  ;;  %v7793_v27 = vld [vmem:[#allocation14 + $0x20c] ss:$28 sps:$4 sm:$0xff]  }
 0x451   :  { %5751 = vmatprep.subr.bf16.mxu1 %v7736_v13  ;;  %5915 = vmatprep.subr.bf16.mxu0 %v7739_v14  ;;  %v7794_v28 = vld [vmem:[#allocation14 + $0x590] ss:$28 sps:$4 sm:$0xff]   ;;  %v7791_v13 = vld [vmem:[#allocation14 + $0x208] ss:$28 sps:$4 sm:$0xff]  }
 0x452   :  { %v7795_v14 = vld [vmem:[#allocation14 + $0x3d0] ss:$28 sps:$4 sm:$0xff]  }
 0x454   :  { %5752 = vmatpush1.bf16.msra.mxu1 %v7734_v19  ;;  %5916 = vmatpush1.bf16.msra.mxu0 %v7737_v20  ;;  %v7799_v19 = vld [vmem:[#allocation14 + $0x5c8] ss:$28 sps:$4 sm:$0xff]   ;;  %v7796_v20 = vld [vmem:[#allocation14 + $0x240] ss:$28 sps:$4 sm:$0xff]  }
 0x455   :  { %5753 = vmatprep.subr.bf16.mxu1 %v7742_v29  ;;  %5917 = vmatprep.subr.bf16.mxu0 %v7745_v31  ;;  %v7800_v29 = vld [vmem:[#allocation14 + $0x408] ss:$28 sps:$4 sm:$0xff]   ;;  %v7803_v31 = vld [vmem:[#allocation14 + $0x27c] ss:$28 sps:$4 sm:$0xff]  }
 0x458   :  { %5754 = vmatpush1.bf16.msra.mxu1 %v7740_v62  ;;  %5918 = vmatpush1.bf16.msra.mxu0 %v7743_v3  ;;  %v7801_v62 = vld [vmem:[#allocation14 + $0x278] ss:$28 sps:$4 sm:$0xff]   ;;  %v7805_v3 = vld [vmem:[#allocation14 + $0x440] ss:$28 sps:$4 sm:$0xff]  }
 0x459   :  { %5928 = vmatprep.subr.bf16.mxu1 %v7748_v37  ;;  %7069 = vmatprep.subr.bf16.mxu0 %v7749_v39  ;;  %v7808_v37 = vld [vmem:[#allocation14 + $0x2b4] ss:$28 sps:$4 sm:$0xff]  }
 0x45a   :  { %v7809_v39 = vld [vmem:[#allocation14 + $0x638] ss:$28 sps:$4 sm:$0xff]  }
 0x45b   :  { %5756 = vmatmul.mubr.bf16.vlgmr.msra.gmra.mrb[8].mxu1 %v8559_v41  ;;  %5920 = vmatmul.mubr.bf16.vlgmr.msra.gmra.mrb[20].mxu0 %v8559_v41 }
 0x45c   :  { %5929 = vmatpush1.bf16.msra.mxu1 %v7746_v55  ;;  %5960 = vmatprep.mubr.bf16.mxu1 %v8511_v23  ;;  %v7810_v55 = vld [vmem:[#allocation14 + $0x478] ss:$28 sps:$4 sm:$0xff]  }
 0x45d   :  { %7070 = vmatpush3.bf16.msra.mxu0 %v7750_v44  ;;  %6124 = vmatprep.mubr.bf16.mxu0 %v8511_v23  ;;  %v7769_v23 = vld [vmem:[#allocation14 + $0x2b8] ss:$28 sps:$4 sm:$0xff]   ;;  %v7813_v44 = vld [vmem:[#allocation14 + $0x2ec] ss:$28 sps:$4 sm:$0xff]  }
 0x45e   :  { %5930 = vmatprep.subr.bf16.mxu1 %v7753_v45  ;;  %7071 = vmatprep.subr.bf16.mxu0 %v7754_v46  ;;  %v7814_v45 = vld [vmem:[#allocation14 + $0x670] ss:$28 sps:$4 sm:$0xff]   ;;  %v7811_v46 = vld [vmem:[#allocation14 + $0x2e8] ss:$28 sps:$4 sm:$0xff]  }
 0x460   :  { %5931 = vmatpush1.bf16.msra.mxu1 %v7751_v47  ;;  %v7815_v47 = vld [vmem:[#allocation14 + $0x4b0] ss:$28 sps:$4 sm:$0xff]  }
 0x461   :  { %7072 = vmatpush3.bf16.msra.mxu0 %v7755_v48  ;;  %5932 = vmatprep.subr.bf16.mxu1 %v7758_v49  ;;  %v7818_v48 = vld [vmem:[#allocation14 + $0x324] ss:$28 sps:$4 sm:$0xff]  }
 0x462   :  { %7073 = vmatprep.subr.bf16.mxu0 %v7759_v50  ;;  %v7819_v49 = vld [vmem:[#allocation14 + $0x6a8] ss:$28 sps:$4 sm:$0xff]   ;;  %v7816_v50 = vld [vmem:[#allocation14 + $0x320] ss:$28 sps:$4 sm:$0xff]  }
 0x464   :  { %5933 = vmatpush1.bf16.msra.mxu1 %v7756_v53  ;;  %v7820_v53 = vld [vmem:[#allocation14 + $0x4e8] ss:$28 sps:$4 sm:$0xff]  }
 0x465   :  { %7074 = vmatpush3.bf16.msra.mxu0 %v7760_v54  ;;  %5934 = vmatprep.subr.bf16.mxu1 %v7763_v57  ;;  %v7823_v54 = vld [vmem:[#allocation14 + $0x35c] ss:$28 sps:$4 sm:$0xff]  }
 0x466   :  { %7075 = vmatprep.subr.bf16.mxu0 %v7764_v58  ;;  %v7824_v57 = vld [vmem:[#allocation14 + $0x6e0] ss:$28 sps:$4 sm:$0xff]   ;;  %v7821_v58 = vld [vmem:[#allocation14 + $0x358] ss:$28 sps:$4 sm:$0xff]  }
 0x468   :  { %5935 = vmatpush1.bf16.msra.mxu1 %v7761_v59  ;;  %v7825_v59 = vld [vmem:[#allocation14 + $0x520] ss:$28 sps:$4 sm:$0xff]  }
 0x469   :  { %7076 = vmatpush3.bf16.msra.mxu0 %v7765_v5  ;;  %5936 = vmatprep.subr.bf16.mxu1 %v7768_v60  ;;  %v7828_v5 = vld [vmem:[#allocation14 + $0x394] ss:$28 sps:$4 sm:$0xff]  }
 0x46a   :  { %7077 = vmatprep.subr.bf16.mxu0 %v7769_v23  ;;  %v7829_v60 = vld [vmem:[#allocation14 + $0x8d8] ss:$28 sps:$4 sm:$0xff]   ;;  %v7826_v23 = vld [vmem:[#allocation14 + $0x390] ss:$28 sps:$4 sm:$0xff]  }
 0x46c   :  { %5937 = vmatpush1.bf16.msra.mxu1 %v7766_v61  ;;  %v7830_v61 = vld [vmem:[#allocation14 + $0x718] ss:$28 sps:$4 sm:$0xff]  }
 0x46d   :  { %7078 = vmatpush3.bf16.msra.mxu0 %v7770_v63  ;;  %5938 = vmatprep.subr.bf16.mxu1 %v7773_v0  ;;  %v7833_v63 = vld [vmem:[#allocation14 + $0x3cc] ss:$28 sps:$4 sm:$0xff]  }
 0x46e   :  { %7079 = vmatprep.subr.bf16.mxu0 %v7774_v1  ;;  %v7834_v0 = vld [vmem:[#allocation14 + $0x910] ss:$28 sps:$4 sm:$0xff]   ;;  %v7831_v1 = vld [vmem:[#allocation14 + $0x3c8] ss:$28 sps:$4 sm:$0xff]  }
 0x470   :  { %5939 = vmatpush1.bf16.msra.mxu1 %v7771_v2  ;;  %v7835_v2 = vld [vmem:[#allocation14 + $0x750] ss:$28 sps:$4 sm:$0xff]  }
 0x471   :  { %7080 = vmatpush3.bf16.msra.mxu0 %v7775_v4  ;;  %5940 = vmatprep.subr.bf16.mxu1 %v7778_v7  ;;  %v7838_v4 = vld [vmem:[#allocation14 + $0x404] ss:$28 sps:$4 sm:$0xff]  }
 0x472   :  { %7081 = vmatprep.subr.bf16.mxu0 %v7779_v32  ;;  %v7839_v7 = vld [vmem:[#allocation14 + $0x948] ss:$28 sps:$4 sm:$0xff]   ;;  %v7836_v32 = vld [vmem:[#allocation14 + $0x400] ss:$28 sps:$4 sm:$0xff]  }
 0x474   :  { %5941 = vmatpush1.bf16.msra.mxu1 %v7776_v6  ;;  %v7843_v6 = vld [vmem:[#allocation14 + $0x43c] ss:$28 sps:$4 sm:$0xff]  }
 0x475   :  { %7082 = vmatpush3.bf16.msra.mxu0 %v7780_v8  ;;  %5942 = vmatprep.subr.bf16.mxu1 %v7783_v9  ;;  %v7844_v8 = vld [vmem:[#allocation14 + $0x980] ss:$28 sps:$4 sm:$0xff]   ;;  %v7841_v9 = vld [vmem:[#allocation14 + $0x438] ss:$28 sps:$4 sm:$0xff]  }
 0x476   :  { %7083 = vmatprep.subr.bf16.mxu0 %v7784_v10  ;;  %v7848_v10 = vld [vmem:[#allocation14 + $0x474] ss:$28 sps:$4 sm:$0xff]  }
 0x478   :  { %5943 = vmatpush1.bf16.msra.mxu1 %v7781_v15  ;;  %v7849_v15 = vld [vmem:[#allocation14 + $0x9b8] ss:$28 sps:$4 sm:$0xff]  }
 0x479   :  { %7084 = vmatpush3.bf16.msra.mxu0 %v7785_v30  ;;  %5944 = vmatprep.subr.bf16.mxu1 %v7788_v21  ;;  %v7846_v30 = vld [vmem:[#allocation14 + $0x470] ss:$28 sps:$4 sm:$0xff]   ;;  %v7850_v21 = vld [vmem:[#allocation14 + $0x7f8] ss:$28 sps:$4 sm:$0xff]  }
 0x47a   :  { %7091 = vmatprep.subr.bf16.mxu0 %v7789_v22  ;;  %v7853_v22 = vld [vmem:[#allocation14 + $0x4ac] ss:$28 sps:$4 sm:$0xff]  }
 0x47c   :  { %6125 = vmatmul.mubr.bf16.vlgmr.msra.gmra.mrb[24].mxu0 %v8513_v26  ;;  %5945 = vmatpush1.bf16.msra.mxu1 %v7786_v52  ;;  %v7854_v52 = vld [vmem:[#allocation14 + $0x9f0] ss:$28 sps:$4 sm:$0xff]  }
 0x47d   :  { %7092 = vmatpush3.bf16.msra.mxu0 %v7790_v25  ;;  %6164 = vmatprep.mubr.bf16.mxu0 %v8517_v12  ;;  %v7851_v25 = vld [vmem:[#allocation14 + $0x4a8] ss:$28 sps:$4 sm:$0xff]  }
 0x47e   :  { %5946 = vmatprep.subr.bf16.mxu1 %v7793_v27  ;;  %7093 = vmatprep.subr.bf16.mxu0 %v7794_v28  ;;  %v7855_v27 = vld [vmem:[#allocation14 + $0x830] ss:$28 sps:$4 sm:$0xff]   ;;  %v7858_v28 = vld [vmem:[#allocation14 + $0x4e4] ss:$28 sps:$4 sm:$0xff]  }
 0x480   :  { %5947 = vmatpush1.bf16.msra.mxu1 %v7791_v13  ;;  %v7859_v13 = vld [vmem:[#allocation14 + $0xa28] ss:$28 sps:$4 sm:$0xff]  }
 0x481   :  { %7094 = vmatpush3.bf16.msra.mxu0 %v7795_v14  ;;  %5948 = vmatprep.subr.bf16.mxu1 %v7798_v18  ;;  %v7856_v14 = vld [vmem:[#allocation14 + $0x4e0] ss:$28 sps:$4 sm:$0xff]   ;;  %v7860_v18 = vld [vmem:[#allocation14 + $0x868] ss:$28 sps:$4 sm:$0xff]  }
 0x482   :  { %7095 = vmatprep.subr.bf16.mxu0 %v7799_v19  ;;  %v7863_v19 = vld [vmem:[#allocation14 + $0x51c] ss:$28 sps:$4 sm:$0xff]  }
 0x484   :  { %5949 = vmatpush1.bf16.msra.mxu1 %v7796_v20  ;;  %v7864_v20 = vld [vmem:[#allocation14 + $0xa60] ss:$28 sps:$4 sm:$0xff]  }
 0x485   :  { %7096 = vmatpush3.bf16.msra.mxu0 %v7800_v29  ;;  %5950 = vmatprep.subr.bf16.mxu1 %v7803_v31  ;;  %v7861_v29 = vld [vmem:[#allocation14 + $0x518] ss:$28 sps:$4 sm:$0xff]   ;;  %v7865_v31 = vld [vmem:[#allocation14 + $0x8a0] ss:$28 sps:$4 sm:$0xff]  }
 0x486   :  { %7097 = vmatprep.subr.bf16.mxu0 %v7804_v33  ;;  %v7868_v33 = vld [vmem:[#allocation14 + $0x554] ss:$28 sps:$4 sm:$0xff]  }
 0x488   :  { %5951 = vmatpush1.bf16.msra.mxu1 %v7801_v62  ;;  %v7869_v62 = vld [vmem:[#allocation14 + $0xc58] ss:$28 sps:$4 sm:$0xff]  }
 0x489   :  { %7098 = vmatpush3.bf16.msra.mxu0 %v7805_v3  ;;  %5952 = vmatprep.subr.bf16.mxu1 %v7808_v37  ;;  %v7866_v3 = vld [vmem:[#allocation14 + $0x550] ss:$28 sps:$4 sm:$0xff]   ;;  %v7870_v37 = vld [vmem:[#allocation14 + $0xa98] ss:$28 sps:$4 sm:$0xff]  }
 0x48a   :  { %7099 = vmatprep.subr.bf16.mxu0 %v7809_v39  ;;  %v7873_v39 = vld [vmem:[#allocation14 + $0x58c] ss:$28 sps:$4 sm:$0xff]  }
 0x48c   :  { %5953 = vmatpush1.bf16.msra.mxu1 %v7806_v40  ;;  %v7874_v40 = vld [vmem:[#allocation14 + $0xc90] ss:$28 sps:$4 sm:$0xff]  }
 0x48d   :  { %7100 = vmatpush3.bf16.msra.mxu0 %v7810_v55  ;;  %5954 = vmatprep.subr.bf16.mxu1 %v7813_v44  ;;  %v7871_v55 = vld [vmem:[#allocation14 + $0x588] ss:$28 sps:$4 sm:$0xff]   ;;  %v7875_v44 = vld [vmem:[#allocation14 + $0xad0] ss:$28 sps:$4 sm:$0xff]  }
 0x48e   :  { %7101 = vmatprep.subr.bf16.mxu0 %v7814_v45  ;;  %v7878_v45 = vld [vmem:[#allocation14 + $0x5c4] ss:$28 sps:$4 sm:$0xff]  }
 0x490   :  { %5955 = vmatpush1.bf16.msra.mxu1 %v7811_v46  ;;  %v7879_v46 = vld [vmem:[#allocation14 + $0xcc8] ss:$28 sps:$4 sm:$0xff]  }
 0x491   :  { %7102 = vmatpush3.bf16.msra.mxu0 %v7815_v47  ;;  %5956 = vmatprep.subr.bf16.mxu1 %v7818_v48  ;;  %v7876_v47 = vld [vmem:[#allocation14 + $0x5c0] ss:$28 sps:$4 sm:$0xff]   ;;  %v7880_v48 = vld [vmem:[#allocation14 + $0xb08] ss:$28 sps:$4 sm:$0xff]  }
 0x492   :  { %7103 = vmatprep.subr.bf16.mxu0 %v7819_v49  ;;  %v7883_v49 = vld [vmem:[#allocation14 + $0x5fc] ss:$28 sps:$4 sm:$0xff]  }
 0x494   :  { %5957 = vmatpush1.bf16.msra.mxu1 %v7816_v50  ;;  %v7884_v50 = vld [vmem:[#allocation14 + $0xd00] ss:$28 sps:$4 sm:$0xff]  }
 0x495   :  { %7104 = vmatpush3.bf16.msra.mxu0 %v7820_v53  ;;  %5958 = vmatprep.subr.bf16.mxu1 %v7823_v54  ;;  %v7881_v53 = vld [vmem:[#allocation14 + $0x5f8] ss:$28 sps:$4 sm:$0xff]   ;;  %v7885_v54 = vld [vmem:[#allocation14 + $0xb40] ss:$28 sps:$4 sm:$0xff]  }
 0x496   :  { %7105 = vmatprep.subr.bf16.mxu0 %v7824_v57  ;;  %v7888_v57 = vld [vmem:[#allocation14 + $0x634] ss:$28 sps:$4 sm:$0xff]  }
 0x498   :  { %5959 = vmatpush1.bf16.msra.mxu1 %v7821_v58  ;;  %v7889_v58 = vld [vmem:[#allocation14 + $0xd38] ss:$28 sps:$4 sm:$0xff]  }
 0x499   :  { %7106 = vmatpush3.bf16.msra.mxu0 %v7825_v59  ;;  %5969 = vmatprep.subr.bf16.mxu1 %v7828_v5  ;;  %v7886_v59 = vld [vmem:[#allocation14 + $0x630] ss:$28 sps:$4 sm:$0xff]   ;;  %v7890_v5 = vld [vmem:[#allocation14 + $0xb78] ss:$28 sps:$4 sm:$0xff]  }
 0x49a   :  { %7113 = vmatprep.subr.bf16.mxu0 %v7829_v60  ;;  %v7893_v60 = vld [vmem:[#allocation14 + $0x66c] ss:$28 sps:$4 sm:$0xff]  }
 0x49b   :  { %5961 = vmatmul.mubr.bf16.vlgmr.msra.gmra.mrb[12].mxu1 %v8513_v26  ;;  %v7840_v26 = vld [vmem:[#allocation14 + $0x788] ss:$28 sps:$4 sm:$0xff]  }
 0x49c   :  { %6165 = vmatmul.mubr.bf16.vlgmr.msra.gmra.mrb[28].mxu0 %v8526_v38  ;;  %5970 = vmatpush1.bf16.msra.mxu1 %v7826_v23  ;;  %v7894_v23 = vld [vmem:[#allocation14 + $0xd70] ss:$28 sps:$4 sm:$0xff]  }
 0x49d   :  { %6001 = vmatprep.mubr.bf16.mxu1 %v8517_v12  ;;  %7114 = vmatpush3.bf16.msra.mxu0 %v7830_v61  ;;  %v7845_v12 = vld [vmem:[#allocation14 + $0x7c0] ss:$28 sps:$4 sm:$0xff]   ;;  %v7891_v61 = vld [vmem:[#allocation14 + $0x668] ss:$28 sps:$4 sm:$0xff]  }
 0x49e   :  { %6204 = vmatprep.mubr.bf16.mxu0 %v8542_v11  ;;  %5971 = vmatprep.subr.bf16.mxu1 %v7833_v63  ;;  %v7895_v63 = vld [vmem:[#allocation14 + $0xbb0] ss:$28 sps:$4 sm:$0xff]  }
 0x49f   :  { %7115 = vmatprep.subr.bf16.mxu0 %v7834_v0  ;;  %v7898_v0 = vld [vmem:[#allocation14 + $0x6a4] ss:$28 sps:$4 sm:$0xff]  }
 0x4a0   :  { %5972 = vmatpush1.bf16.msra.mxu1 %v7831_v1  ;;  %v7899_v1 = vld [vmem:[#allocation14 + $0xda8] ss:$28 sps:$4 sm:$0xff]  }
 0x4a1   :  { %7116 = vmatpush3.bf16.msra.mxu0 %v7835_v2  ;;  %5973 = vmatprep.subr.bf16.mxu1 %v7838_v4  ;;  %v7896_v2 = vld [vmem:[#allocation14 + $0x6a0] ss:$28 sps:$4 sm:$0xff]   ;;  %v7900_v4 = vld [vmem:[#allocation14 + $0xbe8] ss:$28 sps:$4 sm:$0xff]  }
 0x4a2   :  { %7117 = vmatprep.subr.bf16.mxu0 %v7839_v7  ;;  %v7903_v7 = vld [vmem:[#allocation14 + $0x6dc] ss:$28 sps:$4 sm:$0xff]  }
 0x4a4   :  { %5974 = vmatpush1.bf16.msra.mxu1 %v7836_v32  ;;  %v7904_v32 = vld [vmem:[#allocation14 + $0xde0] ss:$28 sps:$4 sm:$0xff]  }
 0x4a5   :  { %7118 = vmatpush3.bf16.msra.mxu0 %v7840_v26  ;;  %5975 = vmatprep.subr.bf16.mxu1 %v7843_v6  ;;  %v7901_v26 = vld [vmem:[#allocation14 + $0x6d8] ss:$28 sps:$4 sm:$0xff]   ;;  %v7905_v6 = vld [vmem:[#allocation14 + $0xc20] ss:$28 sps:$4 sm:$0xff]  }
 0x4a6   :  { %7119 = vmatprep.subr.bf16.mxu0 %v7844_v8  ;;  %v7908_v8 = vld [vmem:[#allocation14 + $0x714] ss:$28 sps:$4 sm:$0xff]  }
 0x4a8   :  { %5976 = vmatpush1.bf16.msra.mxu1 %v7841_v9  ;;  %v7906_v9 = vld [vmem:[#allocation14 + $0x710] ss:$28 sps:$4 sm:$0xff]  }
 0x4a9   :  { %7120 = vmatpush3.bf16.msra.mxu0 %v7845_v12  ;;  %5977 = vmatprep.subr.bf16.mxu1 %v7848_v10  ;;  %v7911_v12 = vld [vmem:[#allocation14 + $0x74c] ss:$28 sps:$4 sm:$0xff]  }
 0x4aa   :  { %7121 = vmatprep.subr.bf16.mxu0 %v7849_v15  ;;  %v7909_v10 = vld [vmem:[#allocation14 + $0x748] ss:$28 sps:$4 sm:$0xff]  }
 0x4ab   :  { %v7914_v15 = vld [vmem:[#allocation14 + $0x784] ss:$28 sps:$4 sm:$0xff]  }
 0x4ac   :  { %5978 = vmatpush1.bf16.msra.mxu1 %v7846_v30  ;;  %v7912_v30 = vld [vmem:[#allocation14 + $0x780] ss:$28 sps:$4 sm:$0xff]  }
 0x4ad   :  { %7122 = vmatpush3.bf16.msra.mxu0 %v7850_v21  ;;  %5979 = vmatprep.subr.bf16.mxu1 %v7853_v22  ;;  %v7917_v21 = vld [vmem:[#allocation14 + $0x7bc] ss:$28 sps:$4 sm:$0xff]  }
 0x4ae   :  { %7123 = vmatprep.subr.bf16.mxu0 %v7854_v52  ;;  %v7915_v22 = vld [vmem:[#allocation14 + $0x7b8] ss:$28 sps:$4 sm:$0xff]  }
 0x4af   :  { %v7920_v52 = vld [vmem:[#allocation14 + $0x7f4] ss:$28 sps:$4 sm:$0xff]  }
 0x4b0   :  { %5980 = vmatpush1.bf16.msra.mxu1 %v7851_v25  ;;  %v7918_v25 = vld [vmem:[#allocation14 + $0x7f0] ss:$28 sps:$4 sm:$0xff]  }
 0x4b1   :  { %7124 = vmatpush3.bf16.msra.mxu0 %v7855_v27  ;;  %5981 = vmatprep.subr.bf16.mxu1 %v7858_v28  ;;  %v7921_v27 = vld [vmem:[#allocation14 + $0x828] ss:$28 sps:$4 sm:$0xff]  }
 0x4b2   :  { %7125 = vmatprep.subr.bf16.mxu0 %v7859_v13  ;;  %v7926_v28 = vld [vmem:[#allocation14 + $0x864] ss:$28 sps:$4 sm:$0xff]   ;;  %v7929_v13 = vld [vmem:[#allocation14 + $0x89c] ss:$28 sps:$4 sm:$0xff]  }
 0x4b4   :  { %5982 = vmatpush1.bf16.msra.mxu1 %v7856_v14  ;;  %v7927_v14 = vld [vmem:[#allocation14 + $0x898] ss:$28 sps:$4 sm:$0xff]  }
 0x4b5   :  { %7126 = vmatpush3.bf16.msra.mxu0 %v7860_v18  ;;  %5983 = vmatprep.subr.bf16.mxu1 %v7863_v19  ;;  %v7932_v18 = vld [vmem:[#allocation14 + $0x8d4] ss:$28 sps:$4 sm:$0xff]  }
 0x4b6   :  { %7127 = vmatprep.subr.bf16.mxu0 %v7864_v20  ;;  %v7930_v19 = vld [vmem:[#allocation14 + $0x8d0] ss:$28 sps:$4 sm:$0xff]  }
 0x4b7   :  { %v7935_v20 = vld [vmem:[#allocation14 + $0x90c] ss:$28 sps:$4 sm:$0xff]  }
 0x4b8   :  { %5984 = vmatpush1.bf16.msra.mxu1 %v7861_v29  ;;  %v7933_v29 = vld [vmem:[#allocation14 + $0x908] ss:$28 sps:$4 sm:$0xff]  }
 0x4b9   :  { %7128 = vmatpush3.bf16.msra.mxu0 %v7865_v31  ;;  %5985 = vmatprep.subr.bf16.mxu1 %v7868_v33  ;;  %v7938_v31 = vld [vmem:[#allocation14 + $0x944] ss:$28 sps:$4 sm:$0xff]  }
 0x4ba   :  { %7135 = vmatprep.subr.bf16.mxu0 %v7869_v62  ;;  %v7936_v33 = vld [vmem:[#allocation14 + $0x940] ss:$28 sps:$4 sm:$0xff]  }
 0x4bb   :  { %v7941_v62 = vld [vmem:[#allocation14 + $0x97c] ss:$28 sps:$4 sm:$0xff]  }
 0x4bc   :  { %6205 = vmatmul.mubr.bf16.vlgmr.msra.gmra.mrb[32].mxu0 %v8544_v17  ;;  %5986 = vmatpush1.bf16.msra.mxu1 %v7866_v3  ;;  %v7939_v3 = vld [vmem:[#allocation14 + $0x978] ss:$28 sps:$4 sm:$0xff]  }
 0x4bd   :  { %7136 = vmatpush3.bf16.msra.mxu0 %v7870_v37  ;;  %6244 = vmatprep.mubr.bf16.mxu0 %v8548_v24  ;;  %v7944_v37 = vld [vmem:[#allocation14 + $0x9b4] ss:$28 sps:$4 sm:$0xff]  }
 0x4be   :  { %5987 = vmatprep.subr.bf16.mxu1 %v7873_v39  ;;  %7137 = vmatprep.subr.bf16.mxu0 %v7874_v40  ;;  %v7942_v39 = vld [vmem:[#allocation14 + $0x9b0] ss:$28 sps:$4 sm:$0xff]  }
 0x4bf   :  { %v7947_v40 = vld [vmem:[#allocation14 + $0x9ec] ss:$28 sps:$4 sm:$0xff]  }
 0x4c0   :  { %5988 = vmatpush1.bf16.msra.mxu1 %v7871_v55  ;;  %v7945_v55 = vld [vmem:[#allocation14 + $0x9e8] ss:$28 sps:$4 sm:$0xff]  }
 0x4c1   :  { %7138 = vmatpush3.bf16.msra.mxu0 %v7875_v44  ;;  %5989 = vmatprep.subr.bf16.mxu1 %v7878_v45  ;;  %v7950_v44 = vld [vmem:[#allocation14 + $0xa24] ss:$28 sps:$4 sm:$0xff]  }
 0x4c2   :  { %7139 = vmatprep.subr.bf16.mxu0 %v7879_v46  ;;  %v7948_v45 = vld [vmem:[#allocation14 + $0xa20] ss:$28 sps:$4 sm:$0xff]  }
 0x4c3   :  { %v7953_v46 = vld [vmem:[#allocation14 + $0xa5c] ss:$28 sps:$4 sm:$0xff]  }
 0x4c4   :  { %5990 = vmatpush1.bf16.msra.mxu1 %v7876_v47  ;;  %v7951_v47 = vld [vmem:[#allocation14 + $0xa58] ss:$28 sps:$4 sm:$0xff]  }
 0x4c5   :  { %7140 = vmatpush3.bf16.msra.mxu0 %v7880_v48  ;;  %5991 = vmatprep.subr.bf16.mxu1 %v7883_v49  ;;  %v7956_v48 = vld [vmem:[#allocation14 + $0xa94] ss:$28 sps:$4 sm:$0xff]  }
 0x4c6   :  { %7141 = vmatprep.subr.bf16.mxu0 %v7884_v50  ;;  %v7954_v49 = vld [vmem:[#allocation14 + $0xa90] ss:$28 sps:$4 sm:$0xff]  }
 0x4c7   :  { %v7959_v50 = vld [vmem:[#allocation14 + $0xacc] ss:$28 sps:$4 sm:$0xff]  }
 0x4c8   :  { %5992 = vmatpush1.bf16.msra.mxu1 %v7881_v53  ;;  %v7957_v53 = vld [vmem:[#allocation14 + $0xac8] ss:$28 sps:$4 sm:$0xff]  }
 0x4c9   :  { %7142 = vmatpush3.bf16.msra.mxu0 %v7885_v54  ;;  %5993 = vmatprep.subr.bf16.mxu1 %v7888_v57  ;;  %v7962_v54 = vld [vmem:[#allocation14 + $0xb04] ss:$28 sps:$4 sm:$0xff]  }
 0x4ca   :  { %7143 = vmatprep.subr.bf16.mxu0 %v7889_v58  ;;  %v7960_v57 = vld [vmem:[#allocation14 + $0xb00] ss:$28 sps:$4 sm:$0xff]  }
 0x4cb   :  { %v7965_v58 = vld [vmem:[#allocation14 + $0xb3c] ss:$28 sps:$4 sm:$0xff]  }
 0x4cc   :  { %5994 = vmatpush1.bf16.msra.mxu1 %v7886_v59  ;;  %v7963_v59 = vld [vmem:[#allocation14 + $0xb38] ss:$28 sps:$4 sm:$0xff]  }
 0x4cd   :  { %7144 = vmatpush3.bf16.msra.mxu0 %v7890_v5  ;;  %5995 = vmatprep.subr.bf16.mxu1 %v7893_v60  ;;  %v7968_v5 = vld [vmem:[#allocation14 + $0xb74] ss:$28 sps:$4 sm:$0xff]  }
 0x4ce   :  { %7145 = vmatprep.subr.bf16.mxu0 %v7894_v23  ;;  %v7966_v60 = vld [vmem:[#allocation14 + $0xb70] ss:$28 sps:$4 sm:$0xff]   ;;  %v8578_v23 = vld [vmem:[#allocation16] sm:$0xff] }
 0x4d0   :  { %5996 = vmatpush1.bf16.msra.mxu1 %v7891_v61  ;;  %v3272_v61 = vrot.slane %v8578_v23, %v8476_v51 }
 0x4d1   :  { %7146 = vmatpush3.bf16.msra.mxu0 %v7895_v63  ;;  %5997 = vmatprep.subr.bf16.mxu1 %v7898_v0  ;;  %v3268_v63 = vrot.slane %v8578_v23, %v8431_v43  ;;  %v3276_v0 = vrot.slane %v8578_v23, %v8479_v56  ;;  %v7977_v56 = vld [vmem:[#allocation14 + $0xc1c] ss:$28 sps:$4 sm:$0xff]  }
 0x4d2   :  { %7147 = vmatprep.subr.bf16.mxu0 %v7899_v1  ;;  %v7969_v1 = vld [vmem:[#allocation14 + $0xba8] ss:$28 sps:$4 sm:$0xff]  }
 0x4d4   :  { %5998 = vmatpush1.bf16.msra.mxu1 %v7896_v2  ;;  %v7974_v2 = vld [vmem:[#allocation14 + $0xbe4] ss:$28 sps:$4 sm:$0xff]  }
 0x4d5   :  { %7148 = vmatpush3.bf16.msra.mxu0 %v7900_v4  ;;  %5999 = vmatprep.subr.bf16.mxu1 %v7903_v7 }
 0x4d6   :  { %7149 = vmatprep.subr.bf16.mxu0 %v7904_v32 }
 0x4d8   :  { %6000 = vmatpush1.bf16.msra.mxu1 %v7901_v26 }
 0x4d9   :  { %7150 = vmatpush3.bf16.msra.mxu0 %v7905_v6  ;;  %6010 = vmatprep.subr.bf16.mxu1 %v7908_v8 }
 0x4db   :  { %6002 = vmatmul.mubr.bf16.vlgmr.msra.gmra.mrb[12].mxu1 %v8526_v38  ;;  %v7923_v38 = vld [vmem:[#allocation14 + $0x82c] ss:$28 sps:$4 sm:$0xff]  }
 0x4dc   :  { %6245 = vmatmul.mubr.bf16.vlgmr.msra.gmra.mrb[36].mxu0 %v8559_v41  ;;  %6011 = vmatpush1.bf16.msra.mxu1 %v7906_v9 }
 0x4dd   :  { %6042 = vmatprep.mubr.bf16.mxu1 %v8542_v11  ;;  %6012 = vmatprep.subr.bf16.mxu1 %v7911_v12  ;;  %v7924_v11 = vld [vmem:[#allocation14 + $0x860] ss:$28 sps:$4 sm:$0xff]  }
 0x4e0   :  { %6013 = vmatpush1.bf16.msra.mxu1 %v7909_v10  ;;  %v7972_v10 = vld [vmem:[#allocation14 + $0xbe0] ss:$28 sps:$4 sm:$0xff]  }
 0x4e1   :  { %6014 = vmatprep.subr.bf16.mxu1 %v7914_v15 }
 0x4e4   :  { %6015 = vmatpush1.bf16.msra.mxu1 %v7912_v30  ;;  %v7975_v30 = vld [vmem:[#allocation14 + $0xc18] ss:$28 sps:$4 sm:$0xff]  }
 0x4e5   :  { %6016 = vmatprep.subr.bf16.mxu1 %v7917_v21  ;;  %v7980_v21 = vld [vmem:[#allocation14 + $0xc54] ss:$28 sps:$4 sm:$0xff]  }
 0x4e8   :  { %6017 = vmatpush1.bf16.msra.mxu1 %v7915_v22  ;;  %v7978_v22 = vld [vmem:[#allocation14 + $0xc50] ss:$28 sps:$4 sm:$0xff]  }
 0x4e9   :  { %6018 = vmatprep.subr.bf16.mxu1 %v7920_v52  ;;  %v7983_v52 = vld [vmem:[#allocation14 + $0xc8c] ss:$28 sps:$4 sm:$0xff]  }
 0x4ec   :  { %6019 = vmatpush1.bf16.msra.mxu1 %v7918_v25 }
 0x4ed   :  { %6020 = vmatprep.subr.bf16.mxu1 %v7923_v38 }
 0x4f0   :  { %6021 = vmatpush1.bf16.msra.mxu1 %v7921_v27  ;;  %v7981_v27 = vld [vmem:[#allocation14 + $0xc88] ss:$28 sps:$4 sm:$0xff]  }
 0x4f1   :  { %6022 = vmatprep.subr.bf16.mxu1 %v7926_v28 }
 0x4f4   :  { %6023 = vmatpush1.bf16.msra.mxu1 %v7924_v11  ;;  %v7986_v11 = vld [vmem:[#allocation14 + $0xcc4] ss:$28 sps:$4 sm:$0xff]  }
 0x4f5   :  { %6024 = vmatprep.subr.bf16.mxu1 %v7929_v13 }
 0x4f8   :  { %6025 = vmatpush1.bf16.msra.mxu1 %v7927_v14  ;;  %v7984_v14 = vld [vmem:[#allocation14 + $0xcc0] ss:$28 sps:$4 sm:$0xff]  }
 0x4f9   :  { %6026 = vmatprep.subr.bf16.mxu1 %v7932_v18  ;;  %v7989_v18 = vld [vmem:[#allocation14 + $0xcfc] ss:$28 sps:$4 sm:$0xff]  }
 0x4fc   :  { %6027 = vmatpush1.bf16.msra.mxu1 %v7930_v19  ;;  %v7987_v19 = vld [vmem:[#allocation14 + $0xcf8] ss:$28 sps:$4 sm:$0xff]  }
 0x4fd   :  { %6028 = vmatprep.subr.bf16.mxu1 %v7935_v20  ;;  %v7992_v20 = vld [vmem:[#allocation14 + $0xd34] ss:$28 sps:$4 sm:$0xff]  }
 0x500   :  { %6029 = vmatpush1.bf16.msra.mxu1 %v7933_v29  ;;  %v7990_v29 = vld [vmem:[#allocation14 + $0xd30] ss:$28 sps:$4 sm:$0xff]  }
 0x501   :  { %6030 = vmatprep.subr.bf16.mxu1 %v7938_v31  ;;  %v7995_v31 = vld [vmem:[#allocation14 + $0xd6c] ss:$28 sps:$4 sm:$0xff]  }
 0x504   :  { %6031 = vmatpush1.bf16.msra.mxu1 %v7936_v33  ;;  %v7993_v33 = vld [vmem:[#allocation14 + $0xd68] ss:$28 sps:$4 sm:$0xff]  }
 0x505   :  { %6032 = vmatprep.subr.bf16.mxu1 %v7941_v62  ;;  %v7998_v62 = vld [vmem:[#allocation14 + $0xda4] ss:$28 sps:$4 sm:$0xff]  }
 0x508   :  { %6033 = vmatpush1.bf16.msra.mxu1 %v7939_v3 }
 0x509   :  { %6034 = vmatprep.subr.bf16.mxu1 %v7944_v37 }
 0x50c   :  { %6035 = vmatpush1.bf16.msra.mxu1 %v7942_v39  ;;  %v7996_v39 = vld [vmem:[#allocation14 + $0xda0] ss:$28 sps:$4 sm:$0xff]  }
 0x50d   :  { %6036 = vmatprep.subr.bf16.mxu1 %v7947_v40 }
 0x510   :  { %6037 = vmatpush1.bf16.msra.mxu1 %v7945_v55 }
 0x511   :  { %6038 = vmatprep.subr.bf16.mxu1 %v7950_v44  ;;  %v8001_v44 = vld [vmem:[#allocation14 + $0xddc] ss:$28 sps:$4 sm:$0xff]  }
 0x514   :  { %6039 = vmatpush1.bf16.msra.mxu1 %v7948_v45 }
 0x515   :  { %6040 = vmatprep.subr.bf16.mxu1 %v7953_v46  ;;  %v7999_v46 = vld [vmem:[#allocation14 + $0xdd8] ss:$28 sps:$4 sm:$0xff]  }
 0x518   :  { %6041 = vmatpush1.bf16.msra.mxu1 %v7951_v47  ;;  %v3288_v47 = vrot.slane %v8578_v23, %v1093_v16 }
 0x519   :  { %6051 = vmatprep.subr.bf16.mxu1 %v7956_v48 }
 0x51b   :  { %6043 = vmatmul.mubr.bf16.vlgmr.msra.gmra.mrb[12].mxu1 %v8544_v17  ;;  %v7971_v17 = vld [vmem:[#allocation14 + $0xbac] ss:$28 sps:$4 sm:$0xff]  }
 0x51c   :  { %6052 = vmatpush1.bf16.msra.mxu1 %v7954_v49  ;;  %6083 = vmatprep.mubr.bf16.mxu1 %v8548_v24  ;;  %v3264_v24 = vrot.slane %v8578_v23, %v8428_v42 }
 0x51d   :  { %6053 = vmatprep.subr.bf16.mxu1 %v7959_v50 }
 0x520   :  { %6054 = vmatpush1.bf16.msra.mxu1 %v7957_v53 }
 0x521   :  { %6055 = vmatprep.subr.bf16.mxu1 %v7962_v54 }
 0x524   :  { %6056 = vmatpush1.bf16.msra.mxu1 %v7960_v57 }
 0x525   :  { %6057 = vmatprep.subr.bf16.mxu1 %v7965_v58 }
 0x528   :  { %6058 = vmatpush1.bf16.msra.mxu1 %v7963_v59 }
 0x529   :  { %6059 = vmatprep.subr.bf16.mxu1 %v7968_v5 }
 0x52c   :  { %6060 = vmatpush1.bf16.msra.mxu1 %v7966_v60 }
 0x52d   :  { %6061 = vmatprep.subr.bf16.mxu1 %v7971_v17 }
 0x52e   :  { %v5757_v4 = vpop.f32.mrb[8].mxu1  ;;  %v5921_v7 = vpop.f32.mrb[20].mxu0 }
 0x52f   :  { %v7165_v32 = vadd.f32 %v5757_v4, %v3264_v24  ;;  %v7167_v26 = vadd.f32 %v5921_v7, %v3272_v61  ;;  %v5759_v6 = vpop.f32.mrb[9].mxu1  ;;  %v5923_v8 = vpop.f32.mrb[21].mxu0  ;;  %v3280_v7 = vrot.slane %v8578_v23, %v1085_v34 }
 0x530   :  { %v7166_v42 = vadd.f32 %v5759_v6, %v3268_v63  ;;  %v7168_v9 = vadd.f32 %v5923_v8, %v3276_v0  ;;  %v5761_v12 = vpop.f32.mrb[10].mxu1  ;;  %v5925_v51 = vpop.f32.mrb[22].mxu0  ;;  %6062 = vmatpush1.bf16.msra.mxu1 %v7969_v1 }
 0x531   :  { %8002 = vtanh.f32 %v7165_v32  ;;  %v5762_v43 = vpop.f32.mrb[11].mxu1  ;;  %v5926_v15 = vpop.f32.mrb[23].mxu0  ;;  %6063 = vmatprep.subr.bf16.mxu1 %v7974_v2  ;;  %v3284_v32 = vrot.slane %v8578_v23, %v1089_v35 }
 0x532   :  { %8004 = vtanh.f32 %v7167_v26 }
 0x533   :  { %8006 = vtanh.f32 %v7166_v42 }
 0x534   :  { %8008 = vtanh.f32 %v7168_v9  ;;  %6064 = vmatpush1.bf16.msra.mxu1 %v7972_v10 }
 0x535   :  { %6065 = vmatprep.subr.bf16.mxu1 %v7977_v56 }
 0x538   :  { %6066 = vmatpush1.bf16.msra.mxu1 %v7975_v30 }
 0x539   :  { %6067 = vmatprep.subr.bf16.mxu1 %v7980_v21 }
 0x53b   :  { %v8003_v25 = vpop.eup %8002 }
 0x53c   :  { %v8005_v38 = vpop.eup %8004  ;;  %6259 = vst [vmem:[#allocation17] sm:$0xff] %v8003_v25  ;;  %6068 = vmatpush1.bf16.msra.mxu1 %v7978_v22 }
 0x53d   :  { %v8007_v28 = vpop.eup %8006  ;;  %6261 = vst [vmem:[#allocation17 + $0x10] sm:$0xff] %v8005_v38  ;;  %6069 = vmatprep.subr.bf16.mxu1 %v7983_v52 }
 0x53e   :  { %v8009_v13 = vpop.eup %8008  ;;  %6260 = vst [vmem:[#allocation17 + $0x8] sm:$0xff] %v8007_v28 }
 0x53f   :  { %6262 = vst [vmem:[#allocation17 + $0x18] sm:$0xff] %v8009_v13 }
 0x540   :  { %6070 = vmatpush1.bf16.msra.mxu1 %v7981_v27 }
 0x541   :  { %6071 = vmatprep.subr.bf16.mxu1 %v7986_v11 }
 0x544   :  { %6072 = vmatpush1.bf16.msra.mxu1 %v7984_v14 }
 0x545   :  { %6073 = vmatprep.subr.bf16.mxu1 %v7989_v18 }
 0x548   :  { %6074 = vmatpush1.bf16.msra.mxu1 %v7987_v19 }
 0x549   :  { %6075 = vmatprep.subr.bf16.mxu1 %v7992_v20 }
 0x54c   :  { %6076 = vmatpush1.bf16.msra.mxu1 %v7990_v29 }
 0x54d   :  { %6077 = vmatprep.subr.bf16.mxu1 %v7995_v31 }
 0x54f   :  { %v7085_v3 = vpop.f32.mrb[24].mxu0 }
 0x550   :  { %v7086_v37 = vpop.f32.mrb[25].mxu0  ;;  %6078 = vmatpush1.bf16.msra.mxu1 %v7993_v33 }
 0x551   :  { %v7087_v40 = vadd.f32 %v7086_v37, %v7085_v3  ;;  %v7088_v55 = vpop.f32.mrb[26].mxu0  ;;  %6079 = vmatprep.subr.bf16.mxu1 %v7998_v62 }
 0x552   :  { %v7089_v45 = vpop.f32.mrb[27].mxu0 }
 0x553   :  { %v6127_v50 = vadd.f32 %v7087_v40, %v3288_v47 }
 0x554   :  { %6080 = vmatpush1.bf16.msra.mxu1 %v7996_v39 }
 0x555   :  { %6081 = vmatprep.subr.bf16.mxu1 %v8001_v44 }
 0x558   :  { %6082 = vmatpush1.bf16.msra.mxu1 %v7999_v46 }
 0x55b   :  { %6084 = vmatmul.mubr.bf16.vlgmr.msra.gmra.mrb[12].mxu1 %v8559_v41 }
 0x56f   :  { %v7107_v48 = vpop.f32.mrb[28].mxu0 }
 0x570   :  { %v7108_v49 = vpop.f32.mrb[29].mxu0 }
 0x571   :  { %v7109_v53 = vadd.f32 %v7108_v49, %v7107_v48  ;;  %v7110_v54 = vpop.f32.mrb[30].mxu0 }
 0x572   :  { %v7111_v57 = vpop.f32.mrb[31].mxu0 }
 0x573   :  { %v6167_v58 = vadd.f32 %v7109_v53, %v6127_v50 }
 0x58f   :  { %v7129_v59 = vpop.f32.mrb[32].mxu0 }
 0x590   :  { %v7130_v5 = vpop.f32.mrb[33].mxu0 }
 0x591   :  { %v7131_v60 = vadd.f32 %v7130_v5, %v7129_v59  ;;  %v7132_v17 = vpop.f32.mrb[34].mxu0 }
 0x592   :  { %v7133_v24 = vpop.f32.mrb[35].mxu0 }
 0x593   :  { %v6207_v61 = vadd.f32 %v7131_v60, %v6167_v58 }
 0x5af   :  { %v7151_v63 = vpop.f32.mrb[36].mxu0 }
 0x5b0   :  { %v7152_v0 = vpop.f32.mrb[37].mxu0 }
 0x5b1   :  { %v7153_v41 = vadd.f32 %v7152_v0, %v7151_v63  ;;  %v7154_v1 = vpop.f32.mrb[38].mxu0 }
 0x5b2   :  { %v7155_v2 = vpop.f32.mrb[39].mxu0 }
 0x5b3   :  { %v6247_v4 = vadd.f32 %v7153_v41, %v6207_v61 }
 0x5b5   :  { %8010 = vtanh.f32 %v6247_v4 }
 0x5bf   :  { %v8011_v16 = vpop.eup %8010 }
 0x5c0   :  { %6265 = vst [vmem:[#allocation17 + $0x30] sm:$0xff] %v8011_v16 }
 0x62e   :  { %v6085_v26 = vpop.f32.mrb[12].mxu1 }
 0x62f   :  { %v7169_v6 = vadd.f32 %v6085_v26, %v3280_v7  ;;  %v6087_v8 = vpop.f32.mrb[13].mxu1 }
 0x630   :  { %v7170_v42 = vadd.f32 %v6087_v8, %v3284_v32  ;;  %v6089_v9 = vpop.f32.mrb[14].mxu1 }
 0x631   :  { %8012 = vtanh.f32 %v7169_v6  ;;  %v6090_v12 = vpop.f32.mrb[15].mxu1 }
 0x632   :  { %8014 = vtanh.f32 %v7170_v42 }
 0x63b   :  { %v8013_v51 = vpop.eup %8012 }
 0x63c   :  { %v8015_v10 = vpop.eup %8014  ;;  %6263 = vst [vmem:[#allocation17 + $0x20] sm:$0xff] %v8013_v51 }
 0x63d   :  { %6264 = vst [vmem:[#allocation17 + $0x28] sm:$0xff] %v8015_v10 }
 0x63e   :  { %8225 = shalt.err (!%p8222_p6)
}
 0x63f   :  { %s8226_s22 = scalar_lea.hbm %s8619_s9, 896 }
 0x640   :  { %p8227_p7 = scmp.ne.s32.totalorder %s8619_s9, %s8226_s22  ;;  %p8230_p8 = scmp.lt.u32.totalorder %s8226_s22, %s8619_s9 }
 0x642   :  { %p8232_p9 = pnand %p8230_p8, %p8227_p7 }
 0x644   :  { %8235 = shalt.err (!%p8232_p9)
}
 0x645   :  { %6275 = dma.vmem_to_hbm [thread:$0]  %s6273_s24, 896, %s8619_s9, [#allocation4]  }
 0x646   :  { %8246 = dma.done.wait [#allocation4], 896  }
 0x647   :  { %8247 = vsyncadd [#allocation4], 4294966400 }
 0x648   :  { %6279 = vsyncpa [#allocation3], 1 }
 0x649   :  { %6280 = vsyncpa [#allocation6], 1 }
 0x64a   :  { %6281 = vsyncpa [#allocation9], 1 }
 0x64b   :  { %6282 = vsyncpa [#allocation12], 1 }
 0x64c   :  { %6283 = vsyncpa [#allocation15], 1 }
 0x64d   :  { %6284 = vsyncpa [#allocation4], 1 }

// kernel: tpu_custom_call.1
= control target key start
LH: loop header
LB: loop body
LE: loop exit
PB: predicated region body
PF: predicated region fallthrough
CT: control target
= control target key end

     0   :  { %14 = vsyncpa [#allocation3], 0  ;;  %s8610_s0 = inlined_call_operand.hbm [shape: f32[8,128], index: 0, kind: input, shape index: {}]   ;;  %s8611_s1 = inlined_call_operand.hbm [shape: bf16[128,256], index: 1, kind: input, shape index: {}]   ;;  %s8612_s2 = inlined_call_operand.hbm [shape: f32[1,256], index: 2, kind: input, shape index: {}]   ;;  %s8613_s3 = inlined_call_operand.hbm [shape: bf16[256,512], index: 3, kind: input, shape index: {}]   ;;  %s8614_s4 = inlined_call_operand.hbm [shape: f32[1,512], index: 4, kind: input, shape index: {}]   ;;  %s8615_s5 = inlined_call_operand.hbm [shape: bf16[512,1024], index: 5, kind: input, shape index: {}]   ;;  %s8616_s6 = inlined_call_operand.hbm [shape: f32[1,1024], index: 6, kind: input, shape index: {}]   ;;  %s8617_s7 = inlined_call_operand.hbm [shape: bf16[1024,896], index: 7, kind: input, shape index: {}]   ;;  %s8618_s8 = inlined_call_operand.hbm [shape: f32[1,896], index: 8, kind: input, shape index: {}]   ;;  %s8619_s9 = inlined_call_operand.hbm [shape: f32[8,896], index: 9, kind: output, shape index: {}]  }
   0x1   :  { %15 = vsyncpa [#allocation6], 0 }
   0x2   :  { %16 = vsyncpa [#allocation9], 0 }
   0x3   :  { %17 = vsyncpa [#allocation12], 0 }
   0x4   :  { %18 = vsyncpa [#allocation15], 0 }
   0x5   :  { %19 = vsyncpa [#allocation4], 0  ;;  %s8248_s30 = smov [#allocation5]   ;;  %s8016_s13 = scalar_lea.hbm %s8611_s1, 2048 }
   0x6   :  { %s35_s10 = sshll.u32 %s8248_s30, 4  ;;  %p8017_p0 = scmp.ne.s32.totalorder %s8611_s1, %s8016_s13  ;;  %s36_s10 = int_to_ptr.vmem [resolvable:$true] %s35_s10 }
   0x7   :  { %p8020_p1 = scmp.lt.u32.totalorder %s8016_s13, %s8611_s1 }
   0x9   :  { %p8022_p2 = pnand %p8020_p1, %p8017_p0 }
   0xb   :  { %8025 = shalt.err (!%p8022_p2)
}
   0xc   :  { %s8026_s18 = scalar_lea.vmem %s36_s10, 2048  ;;  %p8031_p4 = scmp.lt.s32.totalorder %s36_s10, %s36_s10 }
   0xd   :  { %p8027_p3 = scmp.ne.s32.totalorder %s36_s10, %s8026_s18  ;;  %p8032_p5 = scmp.lt.s32.totalorder %s8026_s18, %s8026_s18 }
   0xf   :  { %p8033_p6 = por %p8032_p5, %p8031_p4 }
  0x11   :  { %p8034_p7 = pnand %p8033_p6, %p8027_p3 }
  0x13   :  { %8037 = shalt.err (!%p8034_p7)
}
  0x14   :  { %s8249_s19 = smov 128   ;;  %s8250_s20 = smov 8  }
  0x15   :  { %41 = dma.hbm_to_vmem [thread:$0]  %s8611_s1, 2048, %s36_s10, [#allocation6], %s8249_s19, %s8249_s19, %s8250_s20  }
  0x16   :  { %s8251_s23 = smov [#allocation8]   ;;  %s8038_s27 = scalar_lea.hbm %s8613_s3, 8192 }
  0x17   :  { %s57_s24 = sshll.u32 %s8251_s23, 4  ;;  %p8039_p8 = scmp.ne.s32.totalorder %s8613_s3, %s8038_s27  ;;  %s58_s24 = int_to_ptr.vmem [resolvable:$true] %s57_s24 }
  0x18   :  { %p8042_p9 = scmp.lt.u32.totalorder %s8038_s27, %s8613_s3 }
  0x1a   :  { %p8044_p10 = pnand %p8042_p9, %p8039_p8 }
  0x1c   :  { %8047 = shalt.err (!%p8044_p10)
}
  0x1d   :  { %s8048_s12 = scalar_lea.vmem %s58_s24, 8192  ;;  %p8053_p12 = scmp.lt.s32.totalorder %s58_s24, %s58_s24 }
  0x1e   :  { %p8049_p11 = scmp.ne.s32.totalorder %s58_s24, %s8048_s12  ;;  %p8054_p13 = scmp.lt.s32.totalorder %s8048_s12, %s8048_s12 }
  0x20   :  { %p8055_p0 = por %p8054_p13, %p8053_p12 }
  0x22   :  { %p8056_p1 = pnand %p8055_p0, %p8049_p11 }
  0x24   :  { %8059 = shalt.err (!%p8056_p1)
}
  0x25   :  { %s8252_s1 = smov 256   ;;  %s8253_s10 = smov 16  }
  0x26   :  { %63 = dma.hbm_to_vmem [thread:$0]  %s8613_s3, 8192, %s58_s24, [#allocation9], %s8252_s1, %s8252_s1, %s8253_s10  }
  0x27   :  { %s8254_s15 = smov [#allocation11]   ;;  %s8060_s19 = scalar_lea.hbm %s8615_s5, 32768 }
  0x28   :  { %s79_s16 = sshll.u32 %s8254_s15, 4  ;;  %p8061_p2 = scmp.ne.s32.totalorder %s8615_s5, %s8060_s19  ;;  %s80_s16 = int_to_ptr.vmem [resolvable:$true] %s79_s16 }
  0x29   :  { %p8064_p3 = scmp.lt.u32.totalorder %s8060_s19, %s8615_s5 }
  0x2b   :  { %p8066_p4 = pnand %p8064_p3, %p8061_p2 }
  0x2d   :  { %8069 = shalt.err (!%p8066_p4)
}
  0x2e   :  { %s8070_s25 = scalar_lea.vmem %s80_s16, 32768  ;;  %p8075_p6 = scmp.lt.s32.totalorder %s80_s16, %s80_s16 }
  0x2f   :  { %p8071_p5 = scmp.ne.s32.totalorder %s80_s16, %s8070_s25  ;;  %p8076_p7 = scmp.lt.s32.totalorder %s8070_s25, %s8070_s25 }
  0x31   :  { %p8077_p8 = por %p8076_p7, %p8075_p6 }
  0x33   :  { %p8078_p9 = pnand %p8077_p8, %p8071_p5 }
  0x35   :  { %8081 = shalt.err (!%p8078_p9)
}
  0x36   :  { %s8255_s3 = smov 512   ;;  %s8256_s24 = smov 32  }
  0x37   :  { %85 = dma.hbm_to_vmem [thread:$0]  %s8615_s5, 32768, %s80_s16, [#allocation12], %s8255_s3, %s8255_s3, %s8256_s24  }
  0x38   :  { %s8257_s28 = smov [#allocation14]   ;;  %s8082_s12 = scalar_lea.hbm %s8617_s7, 57344 }
  0x39   :  { %s101_s29 = sshll.u32 %s8257_s28, 4  ;;  %p8083_p10 = scmp.ne.s32.totalorder %s8617_s7, %s8082_s12  ;;  %s102_s29 = int_to_ptr.vmem [resolvable:$true] %s101_s29 }
  0x3a   :  { %p8086_p11 = scmp.lt.u32.totalorder %s8082_s12, %s8617_s7 }
  0x3c   :  { %p8088_p12 = pnand %p8086_p11, %p8083_p10 }
  0x3e   :  { %8091 = shalt.err (!%p8088_p12)
}
  0x3f   :  { %s8092_s15 = scalar_lea.vmem %s102_s29, 57344  ;;  %p8097_p0 = scmp.lt.s32.totalorder %s102_s29, %s102_s29 }
  0x40   :  { %p8093_p13 = scmp.ne.s32.totalorder %s102_s29, %s8092_s15  ;;  %p8098_p1 = scmp.lt.s32.totalorder %s8092_s15, %s8092_s15 }
  0x42   :  { %p8099_p2 = por %p8098_p1, %p8097_p0 }
  0x44   :  { %p8100_p3 = pnand %p8099_p2, %p8093_p13 }
  0x46   :  { %8103 = shalt.err (!%p8100_p3)
}
  0x47   :  { %s8258_s5 = smov 448   ;;  %s8259_s16 = smov 28  }
  0x48   :  { %107 = dma.hbm_to_vmem [thread:$0]  %s8617_s7, 57344, %s102_s29, [#allocation15], %s8258_s5, %s8258_s5, %s8259_s16  }
  0x49   :  { %s8260_s19 = smov [#allocation2]   ;;  %s8261_s21 = smov [#allocation7]  }
  0x4a   :  { %s26_s20 = sshll.u32 %s8260_s19, 4  ;;  %s48_s22 = sshll.u32 %s8261_s21, 4  ;;  %s27_s20 = int_to_ptr.vmem [resolvable:$true] %s26_s20  ;;  %s49_s22 = int_to_ptr.vmem [resolvable:$true] %s48_s22 }
  0x4b   :  { %s8104_s3 = scalar_lea.hbm %s8610_s0, 128 }
  0x4c   :  { %p8105_p4 = scmp.ne.s32.totalorder %s8610_s0, %s8104_s3  ;;  %p8108_p5 = scmp.lt.u32.totalorder %s8104_s3, %s8610_s0 }
  0x4e   :  { %p8110_p6 = pnand %p8108_p5, %p8105_p4 }
  0x50   :  { %8113 = shalt.err (!%p8110_p6)
}
  0x51   :  { %s8114_s7 = scalar_lea.vmem %s27_s20, 128  ;;  %p8119_p8 = scmp.lt.s32.totalorder %s27_s20, %s27_s20 }
  0x52   :  { %p8115_p7 = scmp.ne.s32.totalorder %s27_s20, %s8114_s7  ;;  %p8120_p9 = scmp.lt.s32.totalorder %s8114_s7, %s8114_s7 }
  0x54   :  { %p8121_p10 = por %p8120_p9, %p8119_p8 }
  0x56   :  { %p8122_p11 = pnand %p8121_p10, %p8115_p7 }
  0x58   :  { %8125 = shalt.err (!%p8122_p11)
}
  0x59   :  { %29 = dma.hbm_to_vmem [thread:$0]  %s8610_s0, 128, %s27_s20, [#allocation3]  }
  0x5a   :  { %s8126_s1 = scalar_lea.hbm %s8612_s2, 32 }
  0x5b   :  { %p8127_p12 = scmp.ne.s32.totalorder %s8612_s2, %s8126_s1  ;;  %p8130_p13 = scmp.lt.u32.totalorder %s8126_s1, %s8612_s2 }
  0x5d   :  { %p8132_p0 = pnand %p8130_p13, %p8127_p12 }
  0x5f   :  { %8135 = shalt.err (!%p8132_p0)
}
  0x60   :  { %s8136_s5 = scalar_lea.vmem %s49_s22, 32  ;;  %p8141_p2 = scmp.lt.s32.totalorder %s49_s22, %s49_s22 }
  0x61   :  { %p8137_p1 = scmp.ne.s32.totalorder %s49_s22, %s8136_s5  ;;  %p8142_p3 = scmp.lt.s32.totalorder %s8136_s5, %s8136_s5 }
  0x63   :  { %p8143_p4 = por %p8142_p3, %p8141_p2 }
  0x65   :  { %p8144_p5 = pnand %p8143_p4, %p8137_p1 }
  0x67   :  { %8147 = shalt.err (!%p8144_p5)
}
  0x68   :  { %51 = dma.hbm_to_vmem [thread:$0]  %s8612_s2, 32, %s49_s22, [#allocation6]  }
  0x69   :  { %s8262_s17 = smov [#allocation10]   ;;  %s8263_s19 = smov [#allocation13]  }
  0x6a   :  { %s70_s18 = sshll.u32 %s8262_s17, 4  ;;  %s92_s20 = sshll.u32 %s8263_s19, 4  ;;  %s71_s18 = int_to_ptr.vmem [resolvable:$true] %s70_s18  ;;  %s93_s20 = int_to_ptr.vmem [resolvable:$true] %s92_s20 }
  0x6b   :  { %s8148_s25 = scalar_lea.hbm %s8614_s4, 64 }
  0x6c   :  { %p8149_p6 = scmp.ne.s32.totalorder %s8614_s4, %s8148_s25  ;;  %p8152_p7 = scmp.lt.u32.totalorder %s8148_s25, %s8614_s4 }
  0x6e   :  { %p8154_p8 = pnand %p8152_p7, %p8149_p6 }
  0x70   :  { %8157 = shalt.err (!%p8154_p8)
}
  0x71   :  { %s8158_s2 = scalar_lea.vmem %s71_s18, 64  ;;  %p8163_p10 = scmp.lt.s32.totalorder %s71_s18, %s71_s18 }
  0x72   :  { %p8159_p9 = scmp.ne.s32.totalorder %s71_s18, %s8158_s2  ;;  %p8164_p11 = scmp.lt.s32.totalorder %s8158_s2, %s8158_s2 }
  0x74   :  { %p8165_p12 = por %p8164_p11, %p8163_p10 }
  0x76   :  { %p8166_p13 = pnand %p8165_p12, %p8159_p9 }
  0x78   :  { %8169 = shalt.err (!%p8166_p13)
}
  0x79   :  { %73 = dma.hbm_to_vmem [thread:$0]  %s8614_s4, 64, %s71_s18, [#allocation9]  }
  0x7a   :  { %s8170_s30 = scalar_lea.hbm %s8616_s6, 128 }
  0x7b   :  { %p8171_p0 = scmp.ne.s32.totalorder %s8616_s6, %s8170_s30  ;;  %p8174_p1 = scmp.lt.u32.totalorder %s8170_s30, %s8616_s6 }
  0x7d   :  { %p8176_p2 = pnand %p8174_p1, %p8171_p0 }
  0x7f   :  { %8179 = shalt.err (!%p8176_p2)
}
  0x80   :  { %s8180_s13 = scalar_lea.vmem %s93_s20, 128  ;;  %p8185_p4 = scmp.lt.s32.totalorder %s93_s20, %s93_s20 }
  0x81   :  { %p8181_p3 = scmp.ne.s32.totalorder %s93_s20, %s8180_s13  ;;  %p8186_p5 = scmp.lt.s32.totalorder %s8180_s13, %s8180_s13 }
  0x83   :  { %p8187_p6 = por %p8186_p5, %p8185_p4 }
  0x85   :  { %p8188_p7 = pnand %p8187_p6, %p8181_p3 }
  0x87   :  { %8191 = shalt.err (!%p8188_p7)
}
  0x88   :  { %95 = dma.hbm_to_vmem [thread:$0]  %s8616_s6, 128, %s93_s20, [#allocation12]  }
  0x89   :  { %s8264_s15 = smov [#allocation16]   ;;  %s8192_s17 = scalar_lea.hbm %s8618_s8, 112 }
  0x8a   :  { %s114_s5 = sshll.u32 %s8264_s15, 4  ;;  %p8193_p8 = scmp.ne.s32.totalorder %s8618_s8, %s8192_s17  ;;  %s115_s5 = int_to_ptr.vmem [resolvable:$true] %s114_s5 }
  0x8b   :  { %p8196_p9 = scmp.lt.u32.totalorder %s8192_s17, %s8618_s8 }
  0x8d   :  { %p8198_p10 = pnand %p8196_p9, %p8193_p8 }
  0x8f   :  { %8201 = shalt.err (!%p8198_p10)
}
  0x90   :  { %s8202_s25 = scalar_lea.vmem %s115_s5, 112  ;;  %s8206_s6 = scalar_lea.vmem %s115_s5, 128 }
  0x91   :  { %p8203_p11 = scmp.ne.s32.totalorder %s115_s5, %s8202_s25  ;;  %p8207_p12 = scmp.lt.s32.totalorder %s115_s5, %s115_s5 }
  0x92   :  { %p8208_p13 = scmp.lt.s32.totalorder %s8206_s6, %s8202_s25 }
  0x94   :  { %p8209_p0 = por %p8208_p13, %p8207_p12 }
  0x96   :  { %p8210_p1 = pnand %p8209_p0, %p8203_p11 }
  0x98   :  { %8213 = shalt.err (!%p8210_p1)
}
  0x99   :  { %117 = dma.hbm_to_vmem [thread:$0]  %s8618_s8, 112, %s115_s5, [#allocation15]  }
  0x9a   :  { %8236 = dma.done.wait [#allocation3], 128  }
  0x9b   :  { %8237 = vsyncadd [#allocation3], 4294967168 }
  0x9c   :  { %8238 = dma.done.wait [#allocation6], 2080  }
  0x9d   :  { %8239 = vsyncadd [#allocation6], 4294965216 }
  0x9e   :  { %8240 = dma.done.wait [#allocation9], 8256  }
  0x9f   :  { %8241 = vsyncadd [#allocation9], 4294959040 }
  0xa0   :  { %8242 = dma.done.wait [#allocation12], 32896  }
  0xa1   :  { %8243 = vsyncadd [#allocation12], 4294934400 }
  0xa2   :  { %8244 = dma.done.wait [#allocation15], 57456  }
  0xa3   :  { %8245 = vsyncadd [#allocation15], 4294909840  ;;  %v8265_v0 = vmov 0   ;;  %v7242_v1 = vld [vmem:[#allocation5 + $0x4] ss:$8 sps:$4 sm:$0xff]   ;;  %v146_v17 = vld [vmem:[#allocation2] sm:$0xff] }
  0xa4   :  { %288 = vmatprep.mubr.bf16.mxu0 %v8265_v0  ;;  %v7244_v2 = vld [vmem:[#allocation5] ss:$8 sps:$4 sm:$0xff]   ;;  %256 = vmatprep.subr.bf16.mxu0 %v7242_v1  ;;  %v7245_v3 = vld [vmem:[#allocation5 + $0x14] ss:$8 sps:$4 sm:$0xff]   ;;  %v7247_v4 = vld [vmem:[#allocation5 + $0x10] ss:$8 sps:$4 sm:$0xff]   ;;  %v147_v20 = vpack.c.bf16 %v146_v17, %v146_v17 }
  0xa5   :  { %257 = vmatpush1.bf16.msra.mxu0 %v7244_v2  ;;  %v7248_v5 = vld [vmem:[#allocation5 + $0x24] ss:$8 sps:$4 sm:$0xff]   ;;  %v7250_v6 = vld [vmem:[#allocation5 + $0x20] ss:$8 sps:$4 sm:$0xff]   ;;  %v7251_v7 = vld [vmem:[#allocation5 + $0x34] ss:$8 sps:$4 sm:$0xff]  }
  0xa6   :  { %258 = vmatprep.subr.bf16.mxu0 %v7245_v3  ;;  %v7253_v8 = vld [vmem:[#allocation5 + $0x30] ss:$8 sps:$4 sm:$0xff]   ;;  %v7254_v9 = vld [vmem:[#allocation5 + $0x44] ss:$8 sps:$4 sm:$0xff]   ;;  %v7256_v10 = vld [vmem:[#allocation5 + $0x40] ss:$8 sps:$4 sm:$0xff]  }
  0xa7   :  { %v7257_v11 = vld [vmem:[#allocation5 + $0x54] ss:$8 sps:$4 sm:$0xff]   ;;  %v7259_v12 = vld [vmem:[#allocation5 + $0x50] ss:$8 sps:$4 sm:$0xff]   ;;  %v7260_v13 = vld [vmem:[#allocation5 + $0x64] ss:$8 sps:$4 sm:$0xff]  }
  0xa8   :  { %v7262_v14 = vld [vmem:[#allocation5 + $0x60] ss:$8 sps:$4 sm:$0xff]   ;;  %v7263_v15 = vld [vmem:[#allocation5 + $0x74] ss:$8 sps:$4 sm:$0xff]   ;;  %v7265_v16 = vld [vmem:[#allocation5 + $0x70] ss:$8 sps:$4 sm:$0xff]  }
  0xa9   :  { %259 = vmatpush1.bf16.msra.mxu0 %v7247_v4  ;;  %v7268_v18 = vld [vmem:[#allocation8 + $0x4] ss:$16 sps:$4 sm:$0xff]   ;;  %v7266_v19 = vld [vmem:[#allocation8] ss:$16 sps:$4 sm:$0xff]   ;;  %v7316_v51 = vld [vmem:[#allocation8 + $0xc] ss:$16 sps:$4 sm:$0xff]  }
  0xaa   :  { %260 = vmatprep.subr.bf16.mxu0 %v7248_v5  ;;  %v7271_v21 = vld [vmem:[#allocation8 + $0x24] ss:$16 sps:$4 sm:$0xff]   ;;  %v7269_v22 = vld [vmem:[#allocation8 + $0x20] ss:$16 sps:$4 sm:$0xff]   ;;  %s8266_s8 = smov [#allocation17]  }
  0xab   :  { %v7274_v23 = vld [vmem:[#allocation8 + $0x44] ss:$16 sps:$4 sm:$0xff]   ;;  %v7272_v24 = vld [vmem:[#allocation8 + $0x40] ss:$16 sps:$4 sm:$0xff]   ;;  %s6272_s24 = sshll.u32 %s8266_s8, 4  ;;  %s6273_s24 = int_to_ptr.vmem [resolvable:$true] %s6272_s24 }
  0xac   :  { %v7277_v25 = vld [vmem:[#allocation8 + $0x64] ss:$16 sps:$4 sm:$0xff]   ;;  %v7275_v26 = vld [vmem:[#allocation8 + $0x60] ss:$16 sps:$4 sm:$0xff]   ;;  %s8214_s26 = scalar_lea.vmem %s6273_s24, 896  ;;  %p8219_p3 = scmp.lt.s32.totalorder %s6273_s24, %s6273_s24 }
  0xad   :  { %261 = vmatpush1.bf16.msra.mxu0 %v7250_v6  ;;  %v7280_v27 = vld [vmem:[#allocation8 + $0x84] ss:$16 sps:$4 sm:$0xff]   ;;  %v7278_v28 = vld [vmem:[#allocation8 + $0x80] ss:$16 sps:$4 sm:$0xff]   ;;  %p8215_p2 = scmp.ne.s32.totalorder %s6273_s24, %s8214_s26  ;;  %p8220_p4 = scmp.lt.s32.totalorder %s8214_s26, %s8214_s26 }
  0xae   :  { %262 = vmatprep.subr.bf16.mxu0 %v7251_v7  ;;  %v7283_v29 = vld [vmem:[#allocation8 + $0xa4] ss:$16 sps:$4 sm:$0xff]   ;;  %v7281_v30 = vld [vmem:[#allocation8 + $0xa0] ss:$16 sps:$4 sm:$0xff]  }
  0xaf   :  { %v7286_v31 = vld [vmem:[#allocation8 + $0xc4] ss:$16 sps:$4 sm:$0xff]   ;;  %v7284_v32 = vld [vmem:[#allocation8 + $0xc0] ss:$16 sps:$4 sm:$0xff]   ;;  %p8221_p5 = por %p8220_p4, %p8219_p3 }
  0xb0   :  { %v7289_v33 = vld [vmem:[#allocation8 + $0xe4] ss:$16 sps:$4 sm:$0xff]   ;;  %v7287_v34 = vld [vmem:[#allocation8 + $0xe0] ss:$16 sps:$4 sm:$0xff]  }
  0xb1   :  { %263 = vmatpush1.bf16.msra.mxu0 %v7253_v8  ;;  %v7292_v35 = vld [vmem:[#allocation8 + $0x104] ss:$16 sps:$4 sm:$0xff]   ;;  %v7290_v36 = vld [vmem:[#allocation8 + $0x100] ss:$16 sps:$4 sm:$0xff]   ;;  %p8222_p6 = pnand %p8221_p5, %p8215_p2 }
  0xb2   :  { %264 = vmatprep.subr.bf16.mxu0 %v7254_v9  ;;  %v7295_v37 = vld [vmem:[#allocation8 + $0x124] ss:$16 sps:$4 sm:$0xff]   ;;  %v7293_v38 = vld [vmem:[#allocation8 + $0x120] ss:$16 sps:$4 sm:$0xff]  }
  0xb3   :  { %v7298_v39 = vld [vmem:[#allocation8 + $0x144] ss:$16 sps:$4 sm:$0xff]   ;;  %v7296_v40 = vld [vmem:[#allocation8 + $0x140] ss:$16 sps:$4 sm:$0xff]  }
  0xb4   :  { %v7301_v41 = vld [vmem:[#allocation8 + $0x164] ss:$16 sps:$4 sm:$0xff]   ;;  %v7299_v42 = vld [vmem:[#allocation8 + $0x160] ss:$16 sps:$4 sm:$0xff]  }
  0xb5   :  { %265 = vmatpush1.bf16.msra.mxu0 %v7256_v10  ;;  %v7304_v43 = vld [vmem:[#allocation8 + $0x184] ss:$16 sps:$4 sm:$0xff]   ;;  %v7302_v44 = vld [vmem:[#allocation8 + $0x180] ss:$16 sps:$4 sm:$0xff]  }
  0xb6   :  { %266 = vmatprep.subr.bf16.mxu0 %v7257_v11  ;;  %v7307_v45 = vld [vmem:[#allocation8 + $0x1a4] ss:$16 sps:$4 sm:$0xff]   ;;  %v7305_v46 = vld [vmem:[#allocation8 + $0x1a0] ss:$16 sps:$4 sm:$0xff]  }
  0xb7   :  { %v7310_v47 = vld [vmem:[#allocation8 + $0x1c4] ss:$16 sps:$4 sm:$0xff]   ;;  %v7308_v48 = vld [vmem:[#allocation8 + $0x1c0] ss:$16 sps:$4 sm:$0xff]  }
  0xb8   :  { %v7313_v49 = vld [vmem:[#allocation8 + $0x1e4] ss:$16 sps:$4 sm:$0xff]   ;;  %v7311_v50 = vld [vmem:[#allocation8 + $0x1e0] ss:$16 sps:$4 sm:$0xff]  }
  0xb9   :  { %267 = vmatpush1.bf16.msra.mxu0 %v7259_v12  ;;  %v809_v52 = vld [vmem:[#allocation11] sm:$0xff] }
  0xba   :  { %268 = vmatprep.subr.bf16.mxu0 %v7260_v13  ;;  %v813_v53 = vld [vmem:[#allocation11 + $0x20] sm:$0xff] }
  0xbb   :  { %v6366_v54 = vcombine.high %v809_v52, %v813_v53  ;;  %v6365_v55 = vcombine.low %v809_v52, %v813_v53  ;;  %v817_v56 = vld [vmem:[#allocation11 + $0x40] sm:$0xff] }
  0xbc   :  { %v821_v57 = vld [vmem:[#allocation11 + $0x60] sm:$0xff] }
  0xbd   :  { %269 = vmatpush1.bf16.msra.mxu0 %v7262_v14  ;;  %v6374_v58 = vcombine.high %v817_v56, %v821_v57  ;;  %2387 = vmatprep.subr.bf16.mxu1 %v6366_v54  ;;  %v6373_v59 = vcombine.low %v817_v56, %v821_v57  ;;  %v825_v60 = vld [vmem:[#allocation11 + $0x80] sm:$0xff] }
  0xbe   :  { %270 = vmatprep.subr.bf16.mxu0 %v7263_v15  ;;  %2388 = vmatpush1.bf16.msra.mxu1 %v6365_v55  ;;  %v829_v61 = vld [vmem:[#allocation11 + $0xa0] sm:$0xff] }
  0xbf   :  { %2389 = vmatprep.subr.bf16.mxu1 %v6374_v58  ;;  %v6382_v62 = vcombine.high %v825_v60, %v829_v61  ;;  %v6381_v63 = vcombine.low %v825_v60, %v829_v61  ;;  %v833_v0 = vld [vmem:[#allocation11 + $0xc0] sm:$0xff] }
  0xc0   :  { %v837_v1 = vld [vmem:[#allocation11 + $0xe0] sm:$0xff] }
  0xc1   :  { %271 = vmatpush1.bf16.msra.mxu0 %v7265_v16  ;;  %v6390_v2 = vcombine.high %v833_v0, %v837_v1  ;;  %v6389_v3 = vcombine.low %v833_v0, %v837_v1  ;;  %v841_v4 = vld [vmem:[#allocation11 + $0x100] sm:$0xff]  ;;  %v7319_v0 = vld [vmem:[#allocation8 + $0x2c] ss:$16 sps:$4 sm:$0xff]  }
  0xc2   :  { %711 = vmatprep.subr.bf16.mxu0 %v7268_v18  ;;  %2390 = vmatpush1.bf16.msra.mxu1 %v6373_v59  ;;  %v845_v5 = vld [vmem:[#allocation11 + $0x120] sm:$0xff] }
  0xc3   :  { %2391 = vmatprep.subr.bf16.mxu1 %v6382_v62  ;;  %v6398_v6 = vcombine.high %v841_v4, %v845_v5  ;;  %v6397_v7 = vcombine.low %v841_v4, %v845_v5  ;;  %v849_v8 = vld [vmem:[#allocation11 + $0x140] sm:$0xff]  ;;  %v7325_v4 = vld [vmem:[#allocation8 + $0x6c] ss:$16 sps:$4 sm:$0xff]  }
  0xc4   :  { %289 = vmatmul.mubr.bf16.vlgmr.msra.gmra.mrb[0].mxu0 %v147_v20  ;;  %v853_v9 = vld [vmem:[#allocation11 + $0x160] sm:$0xff] }
  0xc5   :  { %712 = vmatpush1.bf16.msra.mxu0 %v7266_v19  ;;  %v6406_v10 = vcombine.high %v849_v8, %v853_v9  ;;  %v6405_v11 = vcombine.low %v849_v8, %v853_v9  ;;  %v857_v12 = vld [vmem:[#allocation11 + $0x180] sm:$0xff]  ;;  %v7331_v8 = vld [vmem:[#allocation8 + $0xac] ss:$16 sps:$4 sm:$0xff]  }
  0xc6   :  { %713 = vmatprep.subr.bf16.mxu0 %v7271_v21  ;;  %2392 = vmatpush1.bf16.msra.mxu1 %v6381_v63  ;;  %v861_v13 = vld [vmem:[#allocation11 + $0x1a0] sm:$0xff] }
  0xc7   :  { %2393 = vmatprep.subr.bf16.mxu1 %v6390_v2  ;;  %v6414_v14 = vcombine.high %v857_v12, %v861_v13  ;;  %v6413_v15 = vcombine.low %v857_v12, %v861_v13  ;;  %v865_v16 = vld [vmem:[#allocation11 + $0x1c0] sm:$0xff]  ;;  %v7322_v2 = vld [vmem:[#allocation8 + $0x4c] ss:$16 sps:$4 sm:$0xff]  }
  0xc8   :  { %v869_v17 = vld [vmem:[#allocation11 + $0x1e0] sm:$0xff]  ;;  %v7337_v12 = vld [vmem:[#allocation8 + $0xec] ss:$16 sps:$4 sm:$0xff]  }
  0xc9   :  { %714 = vmatpush1.bf16.msra.mxu0 %v7269_v22  ;;  %v6422_v18 = vcombine.high %v865_v16, %v869_v17  ;;  %v6421_v19 = vcombine.low %v865_v16, %v869_v17  ;;  %v873_v20 = vld [vmem:[#allocation11 + $0x200] sm:$0xff]  ;;  %v7343_v16 = vld [vmem:[#allocation8 + $0x12c] ss:$16 sps:$4 sm:$0xff]  }
  0xca   :  { %715 = vmatprep.subr.bf16.mxu0 %v7274_v23  ;;  %2394 = vmatpush1.bf16.msra.mxu1 %v6389_v3  ;;  %v877_v21 = vld [vmem:[#allocation11 + $0x220] sm:$0xff] }
  0xcb   :  { %2395 = vmatprep.subr.bf16.mxu1 %v6398_v6  ;;  %v6430_v22 = vcombine.high %v873_v20, %v877_v21  ;;  %v6429_v23 = vcombine.low %v873_v20, %v877_v21  ;;  %v7314_v62 = vld [vmem:[#allocation8 + $0x8] ss:$16 sps:$4 sm:$0xff]   ;;  %v7328_v6 = vld [vmem:[#allocation8 + $0x8c] ss:$16 sps:$4 sm:$0xff]  }
  0xcc   :  { %v7317_v1 = vld [vmem:[#allocation8 + $0x28] ss:$16 sps:$4 sm:$0xff]   ;;  %v7349_v20 = vld [vmem:[#allocation8 + $0x16c] ss:$16 sps:$4 sm:$0xff]  }
  0xcd   :  { %716 = vmatpush1.bf16.msra.mxu0 %v7272_v24  ;;  %v881_v24 = vld [vmem:[#allocation11 + $0x240] sm:$0xff] }
  0xce   :  { %717 = vmatprep.subr.bf16.mxu0 %v7277_v25  ;;  %2396 = vmatpush1.bf16.msra.mxu1 %v6397_v7  ;;  %v885_v25 = vld [vmem:[#allocation11 + $0x260] sm:$0xff] }
  0xcf   :  { %2397 = vmatprep.subr.bf16.mxu1 %v6406_v10  ;;  %v7320_v3 = vld [vmem:[#allocation8 + $0x48] ss:$16 sps:$4 sm:$0xff]   ;;  %v7334_v10 = vld [vmem:[#allocation8 + $0xcc] ss:$16 sps:$4 sm:$0xff]  }
  0xd0   :  { %v7323_v5 = vld [vmem:[#allocation8 + $0x68] ss:$16 sps:$4 sm:$0xff]  }
  0xd1   :  { %718 = vmatpush1.bf16.msra.mxu0 %v7275_v26  ;;  %v6438_v26 = vcombine.high %v881_v24, %v885_v25  ;;  %v7326_v7 = vld [vmem:[#allocation8 + $0x88] ss:$16 sps:$4 sm:$0xff]  }
  0xd2   :  { %719 = vmatprep.subr.bf16.mxu0 %v7280_v27  ;;  %2398 = vmatpush1.bf16.msra.mxu1 %v6405_v11  ;;  %v6437_v27 = vcombine.low %v881_v24, %v885_v25  ;;  %v7329_v9 = vld [vmem:[#allocation8 + $0xa8] ss:$16 sps:$4 sm:$0xff]   ;;  %v7355_v24 = vld [vmem:[#allocation8 + $0x1ac] ss:$16 sps:$4 sm:$0xff]  }
  0xd3   :  { %2399 = vmatprep.subr.bf16.mxu1 %v6414_v14  ;;  %v7332_v11 = vld [vmem:[#allocation8 + $0xc8] ss:$16 sps:$4 sm:$0xff]   ;;  %v7340_v14 = vld [vmem:[#allocation8 + $0x10c] ss:$16 sps:$4 sm:$0xff]  }
  0xd4   :  { %v7335_v13 = vld [vmem:[#allocation8 + $0xe8] ss:$16 sps:$4 sm:$0xff]  }
  0xd5   :  { %720 = vmatpush1.bf16.msra.mxu0 %v7278_v28  ;;  %v889_v28 = vld [vmem:[#allocation11 + $0x280] sm:$0xff] }
  0xd6   :  { %721 = vmatprep.subr.bf16.mxu0 %v7283_v29  ;;  %2400 = vmatpush1.bf16.msra.mxu1 %v6413_v15  ;;  %v893_v29 = vld [vmem:[#allocation11 + $0x2a0] sm:$0xff] }
  0xd7   :  { %2401 = vmatprep.subr.bf16.mxu1 %v6422_v18  ;;  %v7338_v15 = vld [vmem:[#allocation8 + $0x108] ss:$16 sps:$4 sm:$0xff]   ;;  %v7346_v18 = vld [vmem:[#allocation8 + $0x14c] ss:$16 sps:$4 sm:$0xff]  }
  0xd8   :  { %v7341_v17 = vld [vmem:[#allocation8 + $0x128] ss:$16 sps:$4 sm:$0xff]  }
  0xd9   :  { %722 = vmatpush1.bf16.msra.mxu0 %v7281_v30  ;;  %v6446_v30 = vcombine.high %v889_v28, %v893_v29  ;;  %v7347_v21 = vld [vmem:[#allocation8 + $0x168] ss:$16 sps:$4 sm:$0xff]  }
  0xda   :  { %723 = vmatprep.subr.bf16.mxu0 %v7286_v31  ;;  %2402 = vmatpush1.bf16.msra.mxu1 %v6421_v19  ;;  %v166_v31 = vlaneseq  ;;  %v7344_v19 = vld [vmem:[#allocation8 + $0x148] ss:$16 sps:$4 sm:$0xff]  }
  0xdb   :  { %2403 = vmatprep.subr.bf16.mxu1 %v6430_v22  ;;  %v7352_v22 = vld [vmem:[#allocation8 + $0x18c] ss:$16 sps:$4 sm:$0xff]   ;;  %v7353_v25 = vld [vmem:[#allocation8 + $0x1a8] ss:$16 sps:$4 sm:$0xff]  }
  0xdd   :  { %724 = vmatpush1.bf16.msra.mxu0 %v7284_v32  ;;  %v6445_v32 = vcombine.low %v889_v28, %v893_v29  ;;  %v7361_v28 = vld [vmem:[#allocation8 + $0x1ec] ss:$16 sps:$4 sm:$0xff]  }
  0xde   :  { %725 = vmatprep.subr.bf16.mxu0 %v7289_v33  ;;  %2404 = vmatpush1.bf16.msra.mxu1 %v6429_v23  ;;  %v897_v33 = vld [vmem:[#allocation11 + $0x2c0] sm:$0xff]  ;;  %v810_v29 = vld [vmem:[#allocation11 + $0x8] sm:$0xff] }
  0xdf   :  { %2405 = vmatprep.subr.bf16.mxu1 %v6438_v26  ;;  %v7350_v23 = vld [vmem:[#allocation8 + $0x188] ss:$16 sps:$4 sm:$0xff]   ;;  %v7358_v26 = vld [vmem:[#allocation8 + $0x1cc] ss:$16 sps:$4 sm:$0xff]  }
  0xe1   :  { %726 = vmatpush1.bf16.msra.mxu0 %v7287_v34  ;;  %v901_v34 = vld [vmem:[#allocation11 + $0x2e0] sm:$0xff] }
  0xe2   :  { %727 = vmatprep.subr.bf16.mxu0 %v7292_v35  ;;  %2406 = vmatpush1.bf16.msra.mxu1 %v6437_v27  ;;  %v6454_v35 = vcombine.high %v897_v33, %v901_v34  ;;  %v7356_v27 = vld [vmem:[#allocation8 + $0x1c8] ss:$16 sps:$4 sm:$0xff]  }
  0xe3   :  { %2407 = vmatprep.subr.bf16.mxu1 %v6446_v30  ;;  %v814_v30 = vld [vmem:[#allocation11 + $0x28] sm:$0xff] }
  0xe5   :  { %728 = vmatpush1.bf16.msra.mxu0 %v7290_v36  ;;  %v8425_v36 = vshrl.u32 %v166_v31, 7  ;;  %v7359_v31 = vld [vmem:[#allocation8 + $0x1e8] ss:$16 sps:$4 sm:$0xff]  }
  0xe6   :  { %729 = vmatprep.subr.bf16.mxu0 %v7295_v37  ;;  %2408 = vmatpush1.bf16.msra.mxu1 %v6445_v32  ;;  %v6453_v37 = vcombine.low %v897_v33, %v901_v34  ;;  %v6368_v32 = vcombine.high %v810_v29, %v814_v30  ;;  %v818_v33 = vld [vmem:[#allocation11 + $0x48] sm:$0xff] }
  0xe7   :  { %2409 = vmatprep.subr.bf16.mxu1 %v6454_v35  ;;  %v822_v34 = vld [vmem:[#allocation11 + $0x68] sm:$0xff]  ;;  %v6367_v35 = vcombine.low %v810_v29, %v814_v30 }
  0xe9   :  { %730 = vmatpush1.bf16.msra.mxu0 %v7293_v38  ;;  %v905_v38 = vld [vmem:[#allocation11 + $0x300] sm:$0xff] }
  0xea   :  { %731 = vmatprep.subr.bf16.mxu0 %v7298_v39  ;;  %v909_v39 = vld [vmem:[#allocation11 + $0x320] sm:$0xff]  ;;  %2410 = vmatpush1.bf16.msra.mxu1 %v6453_v37  ;;  %v6376_v37 = vcombine.high %v818_v33, %v822_v34 }
  0xed   :  { %732 = vmatpush1.bf16.msra.mxu0 %v7296_v40  ;;  %v164_v40 = vld [vmem:[#allocation7] sm:$0x3] }
  0xee   :  { %733 = vmatprep.subr.bf16.mxu0 %v7301_v41  ;;  %v6462_v41 = vcombine.high %v905_v38, %v909_v39 }
  0xf0   :  { %2411 = vmatprep.subr.bf16.mxu1 %v6462_v41 }
  0xf1   :  { %734 = vmatpush1.bf16.msra.mxu0 %v7299_v42  ;;  %v8428_v42 = vsub.s32 0, %v8425_v36 }
  0xf2   :  { %735 = vmatprep.subr.bf16.mxu0 %v7304_v43  ;;  %v8431_v43 = vsub.s32 1, %v8425_v36 }
  0xf5   :  { %736 = vmatpush1.bf16.msra.mxu0 %v7302_v44  ;;  %v6461_v44 = vcombine.low %v905_v38, %v909_v39  ;;  %v826_v38 = vld [vmem:[#allocation11 + $0x88] sm:$0xff] }
  0xf6   :  { %737 = vmatprep.subr.bf16.mxu0 %v7307_v45  ;;  %v913_v45 = vld [vmem:[#allocation11 + $0x340] sm:$0xff]  ;;  %v830_v39 = vld [vmem:[#allocation11 + $0xa8] sm:$0xff] }
  0xf7   :  { %2412 = vmatpush1.bf16.msra.mxu1 %v6461_v44  ;;  %v6384_v41 = vcombine.high %v826_v38, %v830_v39  ;;  %v834_v44 = vld [vmem:[#allocation11 + $0xc8] sm:$0xff] }
  0xf9   :  { %738 = vmatpush1.bf16.msra.mxu0 %v7305_v46  ;;  %v917_v46 = vld [vmem:[#allocation11 + $0x360] sm:$0xff] }
  0xfa   :  { %739 = vmatprep.subr.bf16.mxu0 %v7310_v47  ;;  %v6470_v47 = vcombine.high %v913_v45, %v917_v46 }
  0xfc   :  { %2413 = vmatprep.subr.bf16.mxu1 %v6470_v47 }
  0xfd   :  { %740 = vmatpush1.bf16.msra.mxu0 %v7308_v48  ;;  %v169_v48 = vrot.slane %v164_v40, %v8428_v42 }
  0xfe   :  { %741 = vmatprep.subr.bf16.mxu0 %v7313_v49  ;;  %v173_v49 = vrot.slane %v164_v40, %v8431_v43  ;;  %v6375_v40 = vcombine.low %v818_v33, %v822_v34 }
 0x101   :  { %742 = vmatpush1.bf16.msra.mxu0 %v7311_v50  ;;  %v6469_v50 = vcombine.low %v913_v45, %v917_v46  ;;  %v838_v45 = vld [vmem:[#allocation11 + $0xe8] sm:$0xff]  ;;  %v6383_v46 = vcombine.low %v826_v38, %v830_v39 }
 0x102   :  { %752 = vmatprep.subr.bf16.mxu0 %v7316_v51  ;;  %v6392_v47 = vcombine.high %v834_v44, %v838_v45 }
 0x103   :  { %2414 = vmatpush1.bf16.msra.mxu1 %v6469_v50  ;;  %v6391_v50 = vcombine.low %v834_v44, %v838_v45 }
 0x197   :  { %v290_v51 = vpop.f32.mrb[0].mxu0 }
 0x198   :  { %v291_v52 = vadd.f32 %v290_v51, %v169_v48  ;;  %v292_v53 = vpop.f32.mrb[1].mxu0  ;;  %v842_v48 = vld [vmem:[#allocation11 + $0x108] sm:$0xff] }
 0x199   :  { %v293_v54 = vadd.f32 %v292_v53, %v173_v49  ;;  %v294_v55 = vpop.f32.mrb[2].mxu0  ;;  %v846_v49 = vld [vmem:[#allocation11 + $0x128] sm:$0xff] }
 0x19a   :  { %vm297_vm0 = vcmp.gt.f32.partialorder %v291_v52, 0.0  ;;  %v299_v56 = vmul.f32 0.2, %v291_v52  ;;  %v295_v57 = vpop.f32.mrb[3].mxu0  ;;  %v6400_v51 = vcombine.high %v842_v48, %v846_v49  ;;  %v854_v53 = vld [vmem:[#allocation11 + $0x168] sm:$0xff] }
 0x19b   :  { %vm298_vm1 = vcmp.gt.f32.partialorder %v293_v54, 0.0  ;;  %v300_v58 = vmul.f32 0.2, %v293_v54  ;;  %v862_v57 = vld [vmem:[#allocation11 + $0x1a8] sm:$0xff] }
 0x19c   :  { %v301_v59 = vsel %vm297_vm0, %v291_v52, %v299_v56  ;;  %v850_v52 = vld [vmem:[#allocation11 + $0x148] sm:$0xff] }
 0x19d   :  { %v302_v60 = vsel %vm298_vm1, %v293_v54, %v300_v58  ;;  %v8435_v63 = vpack.c.bf16 %v301_v59, %v301_v59  ;;  %v6399_v54 = vcombine.low %v842_v48, %v846_v49  ;;  %v6408_v55 = vcombine.high %v850_v52, %v854_v53  ;;  %v858_v56 = vld [vmem:[#allocation11 + $0x188] sm:$0xff] }
 0x19e   :  { %v304_v61 = vpack.c.bf16 %v302_v60, %v302_v60  ;;  %v6407_v58 = vcombine.low %v850_v52, %v854_v53  ;;  %v6416_v59 = vcombine.high %v858_v56, %v862_v57  ;;  %v921_v60 = vld [vmem:[#allocation11 + $0x380] sm:$0xff]  ;;  %v8455_v52 = vld [vmem:[#allocation10] sm:$0xf] }
 0x19f   :  { %v374_v53 = vrot.slane %v8455_v52, %v8428_v42 }
 0x1a0   :  { %743 = vmatprep.mubr.bf16.mxu0 %v304_v61 }
 0x1a1   :  { %744 = vmatmul.mubr.bf16.vlgmr.msra.gmra.mrb[4].mxu0 %v8435_v63 }
 0x1a2   :  { %753 = vmatpush1.bf16.msra.mxu0 %v7314_v62  ;;  %784 = vmatprep.mubr.bf16.mxu0 %v304_v61  ;;  %v925_v61 = vld [vmem:[#allocation11 + $0x3a0] sm:$0xff]  ;;  %v866_v62 = vld [vmem:[#allocation11 + $0x1c8] sm:$0xff] }
 0x1a3   :  { %754 = vmatprep.subr.bf16.mxu0 %v7319_v0  ;;  %v6478_v0 = vcombine.high %v921_v60, %v925_v61 }
 0x1a5   :  { %2415 = vmatprep.subr.bf16.mxu1 %v6478_v0 }
 0x1a6   :  { %755 = vmatpush1.bf16.msra.mxu0 %v7317_v1  ;;  %v6477_v1 = vcombine.low %v921_v60, %v925_v61 }
 0x1a7   :  { %756 = vmatprep.subr.bf16.mxu0 %v7322_v2  ;;  %v6415_v2 = vcombine.low %v858_v56, %v862_v57 }
 0x1a8   :  { %2416 = vmatpush1.bf16.msra.mxu1 %v6477_v1  ;;  %v949_v1 = vld [vmem:[#allocation11 + $0x460] sm:$0xff] }
 0x1aa   :  { %757 = vmatpush1.bf16.msra.mxu0 %v7320_v3 }
 0x1ab   :  { %758 = vmatprep.subr.bf16.mxu0 %v7325_v4  ;;  %v929_v4 = vld [vmem:[#allocation11 + $0x3c0] sm:$0xff] }
 0x1ae   :  { %759 = vmatpush1.bf16.msra.mxu0 %v7323_v5  ;;  %v933_v5 = vld [vmem:[#allocation11 + $0x3e0] sm:$0xff] }
 0x1af   :  { %760 = vmatprep.subr.bf16.mxu0 %v7328_v6  ;;  %v874_v6 = vld [vmem:[#allocation11 + $0x208] sm:$0xff] }
 0x1b2   :  { %761 = vmatpush1.bf16.msra.mxu0 %v7326_v7  ;;  %v878_v7 = vld [vmem:[#allocation11 + $0x228] sm:$0xff] }
 0x1b3   :  { %762 = vmatprep.subr.bf16.mxu0 %v7331_v8  ;;  %v6486_v8 = vcombine.high %v929_v4, %v933_v5 }
 0x1b5   :  { %2417 = vmatprep.subr.bf16.mxu1 %v6486_v8 }
 0x1b6   :  { %763 = vmatpush1.bf16.msra.mxu0 %v7329_v9  ;;  %v6485_v9 = vcombine.low %v929_v4, %v933_v5 }
 0x1b7   :  { %764 = vmatprep.subr.bf16.mxu0 %v7334_v10 }
 0x1b8   :  { %2418 = vmatpush1.bf16.msra.mxu1 %v6485_v9  ;;  %v953_v9 = vld [vmem:[#allocation11 + $0x480] sm:$0xff] }
 0x1ba   :  { %765 = vmatpush1.bf16.msra.mxu0 %v7332_v11  ;;  %v6432_v11 = vcombine.high %v874_v6, %v878_v7 }
 0x1bb   :  { %766 = vmatprep.subr.bf16.mxu0 %v7337_v12  ;;  %v8439_v12 = vld [vmem:[#allocation11 + $0x400] sm:$0xff] }
 0x1be   :  { %767 = vmatpush1.bf16.msra.mxu0 %v7335_v13  ;;  %v8441_v13 = vld [vmem:[#allocation11 + $0x420] sm:$0xff] }
 0x1bf   :  { %768 = vmatprep.subr.bf16.mxu0 %v7340_v14  ;;  %v8443_v14 = vld [vmem:[#allocation11 + $0x408] sm:$0xff] }
 0x1c2   :  { %769 = vmatpush1.bf16.msra.mxu0 %v7338_v15  ;;  %v882_v15 = vld [vmem:[#allocation11 + $0x248] sm:$0xff] }
 0x1c3   :  { %770 = vmatprep.subr.bf16.mxu0 %v7343_v16  ;;  %v886_v16 = vld [vmem:[#allocation11 + $0x268] sm:$0xff] }
 0x1c6   :  { %771 = vmatpush1.bf16.msra.mxu0 %v7341_v17  ;;  %v6494_v17 = vcombine.high %v8439_v12, %v8441_v13 }
 0x1c7   :  { %772 = vmatprep.subr.bf16.mxu0 %v7346_v18  ;;  %v8447_v18 = vld [vmem:[#allocation11 + $0x428] sm:$0xff] }
 0x1c8   :  { %2428 = vmatprep.subr.bf16.mxu1 %v6494_v17 }
 0x1ca   :  { %773 = vmatpush1.bf16.msra.mxu0 %v7344_v19  ;;  %v6493_v19 = vcombine.low %v8439_v12, %v8441_v13 }
 0x1cb   :  { %774 = vmatprep.subr.bf16.mxu0 %v7349_v20  ;;  %v6495_v20 = vcombine.low %v8443_v14, %v8447_v18 }
 0x1ce   :  { %775 = vmatpush1.bf16.msra.mxu0 %v7347_v21  ;;  %v6431_v21 = vcombine.low %v874_v6, %v878_v7 }
 0x1cf   :  { %776 = vmatprep.subr.bf16.mxu0 %v7352_v22  ;;  %v6440_v22 = vcombine.high %v882_v15, %v886_v16 }
 0x1d2   :  { %777 = vmatpush1.bf16.msra.mxu0 %v7350_v23  ;;  %v890_v23 = vld [vmem:[#allocation11 + $0x288] sm:$0xff] }
 0x1d3   :  { %778 = vmatprep.subr.bf16.mxu0 %v7355_v24  ;;  %v894_v24 = vld [vmem:[#allocation11 + $0x2a8] sm:$0xff] }
 0x1d4   :  { %v6447_v29 = vcombine.low %v890_v23, %v894_v24 }
 0x1d6   :  { %779 = vmatpush1.bf16.msra.mxu0 %v7353_v25  ;;  %v6439_v25 = vcombine.low %v882_v15, %v886_v16  ;;  %v958_v15 = vld [vmem:[#allocation11 + $0x4a8] sm:$0xff] }
 0x1d7   :  { %780 = vmatprep.subr.bf16.mxu0 %v7358_v26  ;;  %v6448_v26 = vcombine.high %v890_v23, %v894_v24  ;;  %v961_v23 = vld [vmem:[#allocation11 + $0x4c0] sm:$0xff] }
 0x1d8   :  { %v965_v24 = vld [vmem:[#allocation11 + $0x4e0] sm:$0xff] }
 0x1d9   :  { %v6518_v12 = vcombine.high %v961_v23, %v965_v24 }
 0x1da   :  { %781 = vmatpush1.bf16.msra.mxu0 %v7356_v27  ;;  %v898_v27 = vld [vmem:[#allocation11 + $0x2c8] sm:$0xff] }
 0x1db   :  { %782 = vmatprep.subr.bf16.mxu0 %v7361_v28  ;;  %v902_v28 = vld [vmem:[#allocation11 + $0x2e8] sm:$0xff] }
 0x1dc   :  { %v6456_v30 = vcombine.high %v898_v27, %v902_v28  ;;  %v6455_v33 = vcombine.low %v898_v27, %v902_v28 }
 0x1de   :  { %783 = vmatpush1.bf16.msra.mxu0 %v7359_v31  ;;  %v906_v31 = vld [vmem:[#allocation11 + $0x308] sm:$0xff] }
 0x1df   :  { %2469 = vmatprep.subr.bf16.mxu0 %v6368_v32  ;;  %v910_v32 = vld [vmem:[#allocation11 + $0x328] sm:$0xff] }
 0x1e0   :  { %v6464_v34 = vcombine.high %v906_v31, %v910_v32  ;;  %v6463_v38 = vcombine.low %v906_v31, %v910_v32 }
 0x1e1   :  { %785 = vmatmul.mubr.bf16.vlgmr.msra.gmra.mrb[8].mxu0 %v8435_v63  ;;  %v870_v63 = vld [vmem:[#allocation11 + $0x1e8] sm:$0xff] }
 0x1e2   :  { %2470 = vmatpush1.bf16.msra.mxu0 %v6367_v35  ;;  %v6424_v3 = vcombine.high %v866_v62, %v870_v63  ;;  %v6423_v10 = vcombine.low %v866_v62, %v870_v63  ;;  %v914_v35 = vld [vmem:[#allocation11 + $0x348] sm:$0xff]  ;;  %v945_v63 = vld [vmem:[#allocation11 + $0x440] sm:$0xff] }
 0x1e3   :  { %2471 = vmatprep.subr.bf16.mxu0 %v6376_v37  ;;  %v918_v37 = vld [vmem:[#allocation11 + $0x368] sm:$0xff]  ;;  %v6502_v7 = vcombine.high %v945_v63, %v949_v1  ;;  %v6501_v16 = vcombine.low %v945_v63, %v949_v1 }
 0x1e4   :  { %v6472_v39 = vcombine.high %v914_v35, %v918_v37  ;;  %v6471_v44 = vcombine.low %v914_v35, %v918_v37  ;;  %v978_v35 = vld [vmem:[#allocation11 + $0x548] sm:$0xff] }
 0x1e5   :  { %v982_v37 = vld [vmem:[#allocation11 + $0x568] sm:$0xff] }
 0x1e6   :  { %2472 = vmatpush1.bf16.msra.mxu0 %v6375_v40  ;;  %v922_v40 = vld [vmem:[#allocation11 + $0x388] sm:$0xff] }
 0x1e7   :  { %2473 = vmatprep.subr.bf16.mxu0 %v6384_v41  ;;  %v926_v41 = vld [vmem:[#allocation11 + $0x3a8] sm:$0xff] }
 0x1e8   :  { %v6480_v45 = vcombine.high %v922_v40, %v926_v41  ;;  %v6479_v48 = vcombine.low %v922_v40, %v926_v41  ;;  %v6536_v41 = vcombine.high %v978_v35, %v982_v37  ;;  %v1002_v63 = vld [vmem:[#allocation11 + $0x608] sm:$0xff] }
 0x1ea   :  { %2474 = vmatpush1.bf16.msra.mxu0 %v6383_v46  ;;  %v930_v46 = vld [vmem:[#allocation11 + $0x3c8] sm:$0xff] }
 0x1eb   :  { %2475 = vmatprep.subr.bf16.mxu0 %v6392_v47  ;;  %v934_v47 = vld [vmem:[#allocation11 + $0x3e8] sm:$0xff] }
 0x1ec   :  { %v6488_v49 = vcombine.high %v930_v46, %v934_v47 }
 0x1ee   :  { %2476 = vmatpush1.bf16.msra.mxu0 %v6391_v50  ;;  %v6487_v50 = vcombine.low %v930_v46, %v934_v47  ;;  %v986_v46 = vld [vmem:[#allocation11 + $0x588] sm:$0xff] }
 0x1ef   :  { %2477 = vmatprep.subr.bf16.mxu0 %v6400_v51  ;;  %v6496_v51 = vcombine.high %v8443_v14, %v8447_v18  ;;  %v969_v14 = vld [vmem:[#allocation11 + $0x500] sm:$0xff]  ;;  %v990_v47 = vld [vmem:[#allocation11 + $0x5a8] sm:$0xff] }
 0x1f0   :  { %v973_v18 = vld [vmem:[#allocation11 + $0x520] sm:$0xff] }
 0x1f1   :  { %v6526_v31 = vcombine.high %v969_v14, %v973_v18 }
 0x1f2   :  { %2478 = vmatpush1.bf16.msra.mxu0 %v6399_v54  ;;  %v378_v54 = vrot.slane %v8455_v52, %v8431_v43 }
 0x1f3   :  { %2479 = vmatprep.subr.bf16.mxu0 %v6408_v55 }
 0x1f6   :  { %2480 = vmatpush1.bf16.msra.mxu0 %v6407_v58 }
 0x1f7   :  { %2481 = vmatprep.subr.bf16.mxu0 %v6416_v59 }
 0x1fa   :  { %2482 = vmatpush1.bf16.msra.mxu0 %v6415_v2  ;;  %v946_v2 = vld [vmem:[#allocation11 + $0x448] sm:$0xff] }
 0x1fb   :  { %2483 = vmatprep.subr.bf16.mxu0 %v6424_v3  ;;  %v950_v3 = vld [vmem:[#allocation11 + $0x468] sm:$0xff] }
 0x1fc   :  { %v6504_v8 = vcombine.high %v946_v2, %v950_v3  ;;  %v6503_v17 = vcombine.low %v946_v2, %v950_v3 }
 0x1fe   :  { %2484 = vmatpush1.bf16.msra.mxu0 %v6423_v10  ;;  %v957_v10 = vld [vmem:[#allocation11 + $0x4a0] sm:$0xff] }
 0x1ff   :  { %2485 = vmatprep.subr.bf16.mxu0 %v6432_v11  ;;  %v954_v11 = vld [vmem:[#allocation11 + $0x488] sm:$0xff]  ;;  %v6509_v27 = vcombine.low %v953_v9, %v957_v10 }
 0x200   :  { %v6511_v28 = vcombine.low %v954_v11, %v958_v15 }
 0x202   :  { %2486 = vmatpush1.bf16.msra.mxu0 %v6431_v21  ;;  %v6510_v21 = vcombine.high %v953_v9, %v957_v10  ;;  %v1010_v9 = vld [vmem:[#allocation11 + $0x648] sm:$0xff] }
 0x203   :  { %2487 = vmatprep.subr.bf16.mxu0 %v6440_v22  ;;  %v6512_v22 = vcombine.high %v954_v11, %v958_v15  ;;  %v1014_v10 = vld [vmem:[#allocation11 + $0x668] sm:$0xff] }
 0x206   :  { %2488 = vmatpush1.bf16.msra.mxu0 %v6439_v25  ;;  %v962_v25 = vld [vmem:[#allocation11 + $0x4c8] sm:$0xff] }
 0x207   :  { %2489 = vmatprep.subr.bf16.mxu0 %v6448_v26  ;;  %v966_v26 = vld [vmem:[#allocation11 + $0x4e8] sm:$0xff] }
 0x208   :  { %v6520_v13 = vcombine.high %v962_v25, %v966_v26 }
 0x20a   :  { %2490 = vmatpush1.bf16.msra.mxu0 %v6447_v29  ;;  %v6517_v29 = vcombine.low %v961_v23, %v965_v24  ;;  %v1018_v23 = vld [vmem:[#allocation11 + $0x688] sm:$0xff] }
 0x20b   :  { %2491 = vmatprep.subr.bf16.mxu0 %v6456_v30  ;;  %v6519_v30 = vcombine.low %v962_v25, %v966_v26  ;;  %v1022_v24 = vld [vmem:[#allocation11 + $0x6a8] sm:$0xff]  ;;  %v6567_v26 = vcombine.low %v1010_v9, %v1014_v10 }
 0x20e   :  { %2492 = vmatpush1.bf16.msra.mxu0 %v6455_v33  ;;  %v977_v33 = vld [vmem:[#allocation11 + $0x540] sm:$0xff] }
 0x20f   :  { %2493 = vmatprep.subr.bf16.mxu0 %v6464_v34  ;;  %v981_v34 = vld [vmem:[#allocation11 + $0x560] sm:$0xff] }
 0x210   :  { %v6534_v40 = vcombine.high %v977_v33, %v981_v34 }
 0x212   :  { %2494 = vmatpush1.bf16.msra.mxu0 %v6463_v38  ;;  %v6525_v38 = vcombine.low %v969_v14, %v973_v18  ;;  %v1026_v14 = vld [vmem:[#allocation11 + $0x6c8] sm:$0xff] }
 0x213   :  { %2495 = vmatprep.subr.bf16.mxu0 %v6472_v39  ;;  %v1030_v18 = vld [vmem:[#allocation11 + $0x6e8] sm:$0xff] }
 0x216   :  { %2496 = vmatpush1.bf16.msra.mxu0 %v6471_v44  ;;  %v985_v44 = vld [vmem:[#allocation11 + $0x580] sm:$0xff] }
 0x217   :  { %2497 = vmatprep.subr.bf16.mxu0 %v6480_v45  ;;  %v989_v45 = vld [vmem:[#allocation11 + $0x5a0] sm:$0xff] }
 0x21a   :  { %2498 = vmatpush1.bf16.msra.mxu0 %v6479_v48  ;;  %v6533_v48 = vcombine.low %v977_v33, %v981_v34  ;;  %v1034_v33 = vld [vmem:[#allocation11 + $0x708] sm:$0xff] }
 0x21b   :  { %2499 = vmatprep.subr.bf16.mxu0 %v6488_v49  ;;  %v6535_v49 = vcombine.low %v978_v35, %v982_v37  ;;  %v1038_v34 = vld [vmem:[#allocation11 + $0x728] sm:$0xff]  ;;  %v6583_v37 = vcombine.low %v1026_v14, %v1030_v18 }
 0x21e   :  { %2500 = vmatpush1.bf16.msra.mxu0 %v6487_v50  ;;  %v6542_v50 = vcombine.high %v985_v44, %v989_v45 }
 0x21f   :  { %2510 = vmatprep.subr.bf16.mxu0 %v6496_v51  ;;  %v6544_v51 = vcombine.high %v986_v46, %v990_v47 }
 0x274   :  { %v745_v55 = vpop.f32.mrb[4].mxu0 }
 0x275   :  { %v746_v56 = vadd.f32 %v745_v55, %v374_v53  ;;  %v747_v57 = vpop.f32.mrb[5].mxu0  ;;  %v993_v53 = vld [vmem:[#allocation11 + $0x5c0] sm:$0xff]  ;;  %v994_v55 = vld [vmem:[#allocation11 + $0x5c8] sm:$0xff] }
 0x276   :  { %v748_v58 = vadd.f32 %v747_v57, %v378_v54  ;;  %v749_v59 = vpop.f32.mrb[6].mxu0  ;;  %v997_v54 = vld [vmem:[#allocation11 + $0x5e0] sm:$0xff]  ;;  %v6541_v57 = vcombine.low %v985_v44, %v989_v45  ;;  %v1042_v44 = vld [vmem:[#allocation11 + $0x748] sm:$0xff] }
 0x277   :  { %vm793_vm2 = vcmp.gt.f32.partialorder %v746_v56, 0.0  ;;  %v797_v60 = vmul.f32 0.2, %v746_v56  ;;  %v750_v61 = vpop.f32.mrb[7].mxu0  ;;  %v6550_v59 = vcombine.high %v993_v53, %v997_v54  ;;  %v6549_v1 = vcombine.low %v993_v53, %v997_v54  ;;  %v1046_v45 = vld [vmem:[#allocation11 + $0x768] sm:$0xff]  ;;  %v1053_v53 = vld [vmem:[#allocation11 + $0x7a0] sm:$0xff] }
 0x278   :  { %vm794_vm3 = vcmp.gt.f32.partialorder %v748_v58, 0.0  ;;  %v798_v62 = vmul.f32 0.2, %v748_v58  ;;  %v1001_v61 = vld [vmem:[#allocation11 + $0x600] sm:$0xff]  ;;  %v1050_v54 = vld [vmem:[#allocation11 + $0x788] sm:$0xff] }
 0x279   :  { %v801_v0 = vsel %vm793_vm2, %v746_v56, %v797_v60  ;;  %v998_v56 = vld [vmem:[#allocation11 + $0x5e8] sm:$0xff] }
 0x27a   :  { %v802_v4 = vsel %vm794_vm3, %v748_v58, %v798_v62  ;;  %v8463_v6 = vpack.c.bf16 %v801_v0, %v801_v0  ;;  %v6543_v58 = vcombine.low %v986_v46, %v990_v47  ;;  %v6552_v60 = vcombine.high %v994_v55, %v998_v56  ;;  %v1005_v62 = vld [vmem:[#allocation11 + $0x620] sm:$0xff]  ;;  %v1006_v0 = vld [vmem:[#allocation11 + $0x628] sm:$0xff] }
 0x27b   :  { %v8461_v5 = vpack.c.bf16 %v802_v4, %v802_v4  ;;  %v6551_v2 = vcombine.low %v994_v55, %v998_v56  ;;  %v6558_v3 = vcombine.high %v1001_v61, %v1005_v62  ;;  %v6560_v4 = vcombine.high %v1002_v63, %v1006_v0  ;;  %v1054_v55 = vld [vmem:[#allocation11 + $0x7a8] sm:$0xff] }
 0x27c   :  { %v6557_v11 = vcombine.low %v1001_v61, %v1005_v62  ;;  %v6559_v15 = vcombine.low %v1002_v63, %v1006_v0  ;;  %v6591_v47 = vcombine.low %v1034_v33, %v1038_v34  ;;  %v8479_v56 = vsub.s32 3, %v8425_v36  ;;  %v1057_v61 = vld [vmem:[#allocation11 + $0x7c0] sm:$0xff]  ;;  %v1058_v0 = vld [vmem:[#allocation11 + $0x7c8] sm:$0xff] }
 0x27d   :  { %2419 = vmatprep.mubr.bf16.mxu1 %v8461_v5  ;;  %2501 = vmatprep.mubr.bf16.mxu0 %v8461_v5  ;;  %v1061_v63 = vld [vmem:[#allocation11 + $0x7e0] sm:$0xff] }
 0x27e   :  { %2420 = vmatmul.mubr.bf16.vlgmr.msra.gmra.mrb[0].mxu1 %v8463_v6  ;;  %2502 = vmatmul.mubr.bf16.vlgmr.msra.gmra.mrb[12].mxu0 %v8463_v6 }
 0x27f   :  { %2429 = vmatpush1.bf16.msra.mxu1 %v6493_v19  ;;  %2511 = vmatpush1.bf16.msra.mxu0 %v6495_v20  ;;  %v970_v19 = vld [vmem:[#allocation11 + $0x508] sm:$0xff] }
 0x280   :  { %2430 = vmatprep.subr.bf16.mxu1 %v6502_v7  ;;  %2512 = vmatprep.subr.bf16.mxu0 %v6504_v8  ;;  %v974_v20 = vld [vmem:[#allocation11 + $0x528] sm:$0xff]  ;;  %v1009_v7 = vld [vmem:[#allocation11 + $0x640] sm:$0xff] }
 0x281   :  { %v6528_v32 = vcombine.high %v970_v19, %v974_v20  ;;  %v6527_v39 = vcombine.low %v970_v19, %v974_v20  ;;  %v1013_v8 = vld [vmem:[#allocation11 + $0x660] sm:$0xff]  ;;  %v6575_v20 = vcombine.low %v1018_v23, %v1022_v24 }
 0x282   :  { %v6565_v25 = vcombine.low %v1009_v7, %v1013_v8 }
 0x283   :  { %2431 = vmatpush1.bf16.msra.mxu1 %v6501_v16  ;;  %2513 = vmatpush1.bf16.msra.mxu0 %v6503_v17  ;;  %v6566_v16 = vcombine.high %v1009_v7, %v1013_v8  ;;  %v6568_v17 = vcombine.high %v1010_v9, %v1014_v10  ;;  %v6614_v8 = vcombine.high %v1057_v61, %v1061_v63  ;;  %v811_v10 = vld [vmem:[#allocation11 + $0x10] sm:$0xff] }
 0x284   :  { %2432 = vmatprep.subr.bf16.mxu1 %v6510_v21  ;;  %2514 = vmatprep.subr.bf16.mxu0 %v6512_v22  ;;  %v1017_v21 = vld [vmem:[#allocation11 + $0x680] sm:$0xff] }
 0x285   :  { %v1021_v22 = vld [vmem:[#allocation11 + $0x6a0] sm:$0xff] }
 0x286   :  { %v6573_v19 = vcombine.low %v1017_v21, %v1021_v22 }
 0x287   :  { %2433 = vmatpush1.bf16.msra.mxu1 %v6509_v27  ;;  %2515 = vmatpush1.bf16.msra.mxu0 %v6511_v28  ;;  %v6574_v27 = vcombine.high %v1017_v21, %v1021_v22  ;;  %v6576_v28 = vcombine.high %v1018_v23, %v1022_v24  ;;  %v816_v21 = vld [vmem:[#allocation11 + $0x38] sm:$0xff] }
 0x288   :  { %2434 = vmatprep.subr.bf16.mxu1 %v6518_v12  ;;  %2516 = vmatprep.subr.bf16.mxu0 %v6520_v13  ;;  %v1025_v12 = vld [vmem:[#allocation11 + $0x6c0] sm:$0xff] }
 0x289   :  { %v1029_v13 = vld [vmem:[#allocation11 + $0x6e0] sm:$0xff] }
 0x28a   :  { %v6581_v35 = vcombine.low %v1025_v12, %v1029_v13 }
 0x28b   :  { %2435 = vmatpush1.bf16.msra.mxu1 %v6517_v29  ;;  %2517 = vmatpush1.bf16.msra.mxu0 %v6519_v30  ;;  %v6582_v29 = vcombine.high %v1025_v12, %v1029_v13  ;;  %v6584_v30 = vcombine.high %v1026_v14, %v1030_v18  ;;  %v819_v14 = vld [vmem:[#allocation11 + $0x50] sm:$0xff] }
 0x28c   :  { %2436 = vmatprep.subr.bf16.mxu1 %v6526_v31  ;;  %2518 = vmatprep.subr.bf16.mxu0 %v6528_v32  ;;  %v1033_v31 = vld [vmem:[#allocation11 + $0x700] sm:$0xff] }
 0x28d   :  { %v1037_v32 = vld [vmem:[#allocation11 + $0x720] sm:$0xff] }
 0x28e   :  { %v6589_v46 = vcombine.low %v1033_v31, %v1037_v32 }
 0x28f   :  { %2437 = vmatpush1.bf16.msra.mxu1 %v6525_v38  ;;  %2519 = vmatpush1.bf16.msra.mxu0 %v6527_v39  ;;  %v6590_v38 = vcombine.high %v1033_v31, %v1037_v32  ;;  %v6592_v39 = vcombine.high %v1034_v33, %v1038_v34 }
 0x290   :  { %2438 = vmatprep.subr.bf16.mxu1 %v6534_v40  ;;  %2520 = vmatprep.subr.bf16.mxu0 %v6536_v41  ;;  %v1041_v40 = vld [vmem:[#allocation11 + $0x740] sm:$0xff] }
 0x291   :  { %v1045_v41 = vld [vmem:[#allocation11 + $0x760] sm:$0xff] }
 0x293   :  { %2439 = vmatpush1.bf16.msra.mxu1 %v6533_v48  ;;  %2521 = vmatpush1.bf16.msra.mxu0 %v6535_v49  ;;  %v6598_v48 = vcombine.high %v1041_v40, %v1045_v41  ;;  %v6600_v49 = vcombine.high %v1042_v44, %v1046_v45 }
 0x294   :  { %2440 = vmatprep.subr.bf16.mxu1 %v6542_v50  ;;  %2522 = vmatprep.subr.bf16.mxu0 %v6544_v51  ;;  %v1049_v50 = vld [vmem:[#allocation11 + $0x780] sm:$0xff]  ;;  %v8476_v51 = vsub.s32 2, %v8425_v36 }
 0x296   :  { %v382_v62 = vrot.slane %v8455_v52, %v8476_v51 }
 0x297   :  { %2441 = vmatpush1.bf16.msra.mxu1 %v6541_v57  ;;  %2523 = vmatpush1.bf16.msra.mxu0 %v6543_v58  ;;  %v6597_v57 = vcombine.low %v1041_v40, %v1045_v41  ;;  %v6599_v58 = vcombine.low %v1042_v44, %v1046_v45  ;;  %v832_v40 = vld [vmem:[#allocation11 + $0xb8] sm:$0xff] }
 0x298   :  { %2442 = vmatprep.subr.bf16.mxu1 %v6550_v59  ;;  %2524 = vmatprep.subr.bf16.mxu0 %v6552_v60  ;;  %v6606_v59 = vcombine.high %v1049_v50, %v1053_v53  ;;  %v6608_v60 = vcombine.high %v1050_v54, %v1054_v55 }
 0x29b   :  { %2443 = vmatpush1.bf16.msra.mxu1 %v6549_v1  ;;  %2525 = vmatpush1.bf16.msra.mxu0 %v6551_v2  ;;  %v1062_v1 = vld [vmem:[#allocation11 + $0x7e8] sm:$0xff]  ;;  %v386_v2 = vrot.slane %v8455_v52, %v8479_v56 }
 0x29c   :  { %2444 = vmatprep.subr.bf16.mxu1 %v6558_v3  ;;  %2526 = vmatprep.subr.bf16.mxu0 %v6560_v4  ;;  %v6605_v3 = vcombine.low %v1049_v50, %v1053_v53  ;;  %v6607_v4 = vcombine.low %v1050_v54, %v1054_v55  ;;  %v6616_v9 = vcombine.high %v1058_v0, %v1062_v1  ;;  %v840_v50 = vld [vmem:[#allocation11 + $0xf8] sm:$0xff] }
 0x29f   :  { %2445 = vmatpush1.bf16.msra.mxu1 %v6557_v11  ;;  %2527 = vmatpush1.bf16.msra.mxu0 %v6559_v15 }
 0x2a0   :  { %2446 = vmatprep.subr.bf16.mxu1 %v6566_v16  ;;  %2528 = vmatprep.subr.bf16.mxu0 %v6568_v17  ;;  %v815_v16 = vld [vmem:[#allocation11 + $0x30] sm:$0xff]  ;;  %v812_v17 = vld [vmem:[#allocation11 + $0x18] sm:$0xff] }
 0x2a1   :  { %v6372_v12 = vcombine.high %v812_v17, %v816_v21  ;;  %v6369_v31 = vcombine.low %v811_v10, %v815_v16  ;;  %v6371_v33 = vcombine.low %v812_v17, %v816_v21  ;;  %v864_v17 = vld [vmem:[#allocation11 + $0x1b8] sm:$0xff] }
 0x2a3   :  { %2447 = vmatpush1.bf16.msra.mxu1 %v6565_v25  ;;  %2529 = vmatpush1.bf16.msra.mxu0 %v6567_v26  ;;  %v6613_v25 = vcombine.low %v1057_v61, %v1061_v63  ;;  %v6615_v26 = vcombine.low %v1058_v0, %v1062_v1  ;;  %v851_v1 = vld [vmem:[#allocation11 + $0x150] sm:$0xff] }
 0x2a4   :  { %2448 = vmatprep.subr.bf16.mxu1 %v6574_v27  ;;  %2530 = vmatprep.subr.bf16.mxu0 %v6576_v28  ;;  %v6370_v28 = vcombine.high %v811_v10, %v815_v16  ;;  %v860_v16 = vld [vmem:[#allocation11 + $0x198] sm:$0xff] }
 0x2a7   :  { %2449 = vmatpush1.bf16.msra.mxu1 %v6573_v19  ;;  %2531 = vmatpush1.bf16.msra.mxu0 %v6575_v20  ;;  %v823_v19 = vld [vmem:[#allocation11 + $0x70] sm:$0xff]  ;;  %v820_v20 = vld [vmem:[#allocation11 + $0x58] sm:$0xff] }
 0x2a8   :  { %2450 = vmatprep.subr.bf16.mxu1 %v6582_v29  ;;  %2532 = vmatprep.subr.bf16.mxu0 %v6584_v30  ;;  %v824_v29 = vld [vmem:[#allocation11 + $0x78] sm:$0xff]  ;;  %v6378_v34 = vcombine.high %v819_v14, %v823_v19  ;;  %v6377_v41 = vcombine.low %v819_v14, %v823_v19  ;;  %v879_v19 = vld [vmem:[#allocation11 + $0x230] sm:$0xff] }
 0x2a9   :  { %v6379_v44 = vcombine.low %v820_v20, %v824_v29 }
 0x2ab   :  { %2451 = vmatpush1.bf16.msra.mxu1 %v6581_v35  ;;  %2533 = vmatpush1.bf16.msra.mxu0 %v6583_v37  ;;  %v6380_v35 = vcombine.high %v820_v20, %v824_v29  ;;  %v827_v37 = vld [vmem:[#allocation11 + $0x90] sm:$0xff]  ;;  %v876_v20 = vld [vmem:[#allocation11 + $0x218] sm:$0xff] }
 0x2ac   :  { %2452 = vmatprep.subr.bf16.mxu1 %v6590_v38  ;;  %2534 = vmatprep.subr.bf16.mxu0 %v6592_v39  ;;  %v831_v38 = vld [vmem:[#allocation11 + $0xb0] sm:$0xff]  ;;  %v828_v39 = vld [vmem:[#allocation11 + $0x98] sm:$0xff] }
 0x2ad   :  { %v6386_v45 = vcombine.high %v827_v37, %v831_v38  ;;  %v6385_v53 = vcombine.low %v827_v37, %v831_v38  ;;  %v6387_v54 = vcombine.low %v828_v39, %v832_v40  ;;  %v880_v29 = vld [vmem:[#allocation11 + $0x238] sm:$0xff]  ;;  %v883_v37 = vld [vmem:[#allocation11 + $0x250] sm:$0xff] }
 0x2ae   :  { %v887_v38 = vld [vmem:[#allocation11 + $0x270] sm:$0xff] }
 0x2af   :  { %2453 = vmatpush1.bf16.msra.mxu1 %v6589_v46  ;;  %2535 = vmatpush1.bf16.msra.mxu0 %v6591_v47  ;;  %v6388_v46 = vcombine.high %v828_v39, %v832_v40  ;;  %v835_v47 = vld [vmem:[#allocation11 + $0xd0] sm:$0xff]  ;;  %v884_v39 = vld [vmem:[#allocation11 + $0x258] sm:$0xff] }
 0x2b0   :  { %2454 = vmatprep.subr.bf16.mxu1 %v6598_v48  ;;  %2536 = vmatprep.subr.bf16.mxu0 %v6600_v49  ;;  %v839_v48 = vld [vmem:[#allocation11 + $0xf0] sm:$0xff]  ;;  %v836_v49 = vld [vmem:[#allocation11 + $0xd8] sm:$0xff] }
 0x2b1   :  { %v6394_v55 = vcombine.high %v835_v47, %v839_v48  ;;  %v6393_v61 = vcombine.low %v835_v47, %v839_v48  ;;  %v888_v40 = vld [vmem:[#allocation11 + $0x278] sm:$0xff]  ;;  %v891_v47 = vld [vmem:[#allocation11 + $0x290] sm:$0xff] }
 0x2b2   :  { %v895_v48 = vld [vmem:[#allocation11 + $0x2b0] sm:$0xff] }
 0x2b3   :  { %2455 = vmatpush1.bf16.msra.mxu1 %v6597_v57  ;;  %2537 = vmatpush1.bf16.msra.mxu0 %v6599_v58  ;;  %v6396_v57 = vcombine.high %v836_v49, %v840_v50  ;;  %v843_v58 = vld [vmem:[#allocation11 + $0x110] sm:$0xff] }
 0x2b4   :  { %v786_v7 = vpop.f32.mrb[8].mxu0  ;;  %2456 = vmatprep.subr.bf16.mxu1 %v6606_v59  ;;  %2538 = vmatprep.subr.bf16.mxu0 %v6608_v60  ;;  %v847_v59 = vld [vmem:[#allocation11 + $0x130] sm:$0xff]  ;;  %v848_v60 = vld [vmem:[#allocation11 + $0x138] sm:$0xff] }
 0x2b5   :  { %v787_v11 = vadd.f32 %v786_v7, %v382_v62  ;;  %v788_v15 = vpop.f32.mrb[9].mxu0  ;;  %v6395_v62 = vcombine.low %v836_v49, %v840_v50  ;;  %v6402_v63 = vcombine.high %v843_v58, %v847_v59  ;;  %v6401_v7 = vcombine.low %v843_v58, %v847_v59  ;;  %v892_v49 = vld [vmem:[#allocation11 + $0x298] sm:$0xff]  ;;  %v899_v58 = vld [vmem:[#allocation11 + $0x2d0] sm:$0xff] }
 0x2b6   :  { %v789_v22 = vadd.f32 %v788_v15, %v386_v2  ;;  %v790_v23 = vpop.f32.mrb[10].mxu0  ;;  %v855_v2 = vld [vmem:[#allocation11 + $0x170] sm:$0xff]  ;;  %v896_v50 = vld [vmem:[#allocation11 + $0x2b8] sm:$0xff] }
 0x2b7   :  { %vm795_vm4 = vcmp.gt.f32.partialorder %v787_v11, 0.0  ;;  %v799_v24 = vmul.f32 0.2, %v787_v11  ;;  %v791_v52 = vpop.f32.mrb[11].mxu0  ;;  %2457 = vmatpush1.bf16.msra.mxu1 %v6605_v3  ;;  %2539 = vmatpush1.bf16.msra.mxu0 %v6607_v4  ;;  %v852_v3 = vld [vmem:[#allocation11 + $0x158] sm:$0xff]  ;;  %v863_v15 = vld [vmem:[#allocation11 + $0x1b0] sm:$0xff]  ;;  %v6409_v21 = vcombine.low %v851_v1, %v855_v2 }
 0x2b8   :  { %vm796_vm5 = vcmp.gt.f32.partialorder %v789_v22, 0.0  ;;  %v800_v27 = vmul.f32 0.2, %v789_v22  ;;  %2458 = vmatprep.subr.bf16.mxu1 %v6614_v8  ;;  %2540 = vmatprep.subr.bf16.mxu0 %v6616_v9  ;;  %v856_v4 = vld [vmem:[#allocation11 + $0x178] sm:$0xff]  ;;  %v6410_v9 = vcombine.high %v851_v1, %v855_v2  ;;  %v867_v52 = vld [vmem:[#allocation11 + $0x1d0] sm:$0xff] }
 0x2b9   :  { %v803_v13 = vsel %vm795_vm4, %v787_v11, %v799_v24  ;;  %v6412_v10 = vcombine.high %v852_v3, %v856_v4  ;;  %v859_v11 = vld [vmem:[#allocation11 + $0x190] sm:$0xff]  ;;  %v6420_v24 = vcombine.high %v860_v16, %v864_v17 }
 0x2ba   :  { %v804_v18 = vsel %vm796_vm5, %v789_v22, %v800_v27  ;;  %v8487_v32 = vpack.c.bf16 %v803_v13, %v803_v13  ;;  %v6411_v22 = vcombine.low %v852_v3, %v856_v4  ;;  %v6418_v23 = vcombine.high %v859_v11, %v863_v15  ;;  %v872_v27 = vld [vmem:[#allocation11 + $0x1f8] sm:$0xff]  ;;  %v903_v59 = vld [vmem:[#allocation11 + $0x2f0] sm:$0xff] }
 0x2bb   :  { %v8485_v30 = vpack.c.bf16 %v804_v18, %v804_v18  ;;  %2459 = vmatpush1.bf16.msra.mxu1 %v6613_v25  ;;  %2541 = vmatpush1.bf16.msra.mxu0 %v6615_v26  ;;  %v871_v25 = vld [vmem:[#allocation11 + $0x1f0] sm:$0xff]  ;;  %v868_v26 = vld [vmem:[#allocation11 + $0x1d8] sm:$0xff] }
 0x2bc   :  { %2551 = vmatprep.subr.bf16.mxu1 %v6370_v28  ;;  %2633 = vmatprep.subr.bf16.mxu0 %v6372_v12  ;;  %v6417_v28 = vcombine.low %v859_v11, %v863_v15  ;;  %v6419_v12 = vcombine.low %v860_v16, %v864_v17  ;;  %v6426_v13 = vcombine.high %v867_v52, %v871_v25  ;;  %v875_v18 = vld [vmem:[#allocation11 + $0x210] sm:$0xff]  ;;  %v908_v3 = vld [vmem:[#allocation11 + $0x318] sm:$0xff] }
 0x2bd   :  { %2460 = vmatprep.mubr.bf16.mxu1 %v8485_v30  ;;  %2542 = vmatprep.mubr.bf16.mxu0 %v8485_v30  ;;  %v6428_v14 = vcombine.high %v868_v26, %v872_v27  ;;  %v907_v1 = vld [vmem:[#allocation11 + $0x310] sm:$0xff]  ;;  %v912_v4 = vld [vmem:[#allocation11 + $0x338] sm:$0xff] }
 0x2be   :  { %2461 = vmatmul.mubr.bf16.vlgmr.msra.gmra.mrb[0].mxu1 %v8487_v32  ;;  %2543 = vmatmul.mubr.bf16.vlgmr.msra.gmra.mrb[12].mxu0 %v8487_v32  ;;  %v911_v2 = vld [vmem:[#allocation11 + $0x330] sm:$0xff]  ;;  %v916_v16 = vld [vmem:[#allocation11 + $0x358] sm:$0xff] }
 0x2bf   :  { %2552 = vmatpush1.bf16.msra.mxu1 %v6369_v31  ;;  %2583 = vmatprep.mubr.bf16.mxu1 %v8461_v5  ;;  %v6425_v31 = vcombine.low %v867_v52, %v871_v25  ;;  %v915_v11 = vld [vmem:[#allocation11 + $0x350] sm:$0xff]  ;;  %v920_v17 = vld [vmem:[#allocation11 + $0x378] sm:$0xff] }
 0x2c0   :  { %2634 = vmatpush1.bf16.msra.mxu0 %v6371_v33  ;;  %2665 = vmatprep.mubr.bf16.mxu0 %v8461_v5  ;;  %v844_v5 = vld [vmem:[#allocation11 + $0x118] sm:$0xff]  ;;  %v6427_v33 = vcombine.low %v868_v26, %v872_v27  ;;  %v919_v15 = vld [vmem:[#allocation11 + $0x370] sm:$0xff] }
 0x2c1   :  { %2553 = vmatprep.subr.bf16.mxu1 %v6378_v34  ;;  %2635 = vmatprep.subr.bf16.mxu0 %v6380_v35  ;;  %v6404_v0 = vcombine.high %v844_v5, %v848_v60  ;;  %v6403_v8 = vcombine.low %v844_v5, %v848_v60  ;;  %v6434_v34 = vcombine.high %v875_v18, %v879_v19  ;;  %v900_v5 = vld [vmem:[#allocation11 + $0x2d8] sm:$0xff]  ;;  %v923_v52 = vld [vmem:[#allocation11 + $0x390] sm:$0xff] }
 0x2c2   :  { %v6436_v35 = vcombine.high %v876_v20, %v880_v29  ;;  %v904_v60 = vld [vmem:[#allocation11 + $0x2f8] sm:$0xff]  ;;  %v927_v25 = vld [vmem:[#allocation11 + $0x3b0] sm:$0xff] }
 0x2c3   :  { %2554 = vmatpush1.bf16.msra.mxu1 %v6377_v41  ;;  %v6433_v41 = vcombine.low %v875_v18, %v879_v19  ;;  %v924_v26 = vld [vmem:[#allocation11 + $0x398] sm:$0xff]  ;;  %v931_v18 = vld [vmem:[#allocation11 + $0x3d0] sm:$0xff] }
 0x2c4   :  { %2636 = vmatpush1.bf16.msra.mxu0 %v6379_v44  ;;  %2555 = vmatprep.subr.bf16.mxu1 %v6386_v45  ;;  %v6435_v44 = vcombine.low %v876_v20, %v880_v29  ;;  %v6442_v45 = vcombine.high %v883_v37, %v887_v38  ;;  %v928_v27 = vld [vmem:[#allocation11 + $0x3b8] sm:$0xff]  ;;  %v935_v19 = vld [vmem:[#allocation11 + $0x3f0] sm:$0xff] }
 0x2c5   :  { %2637 = vmatprep.subr.bf16.mxu0 %v6388_v46  ;;  %v6444_v46 = vcombine.high %v884_v39, %v888_v40  ;;  %v932_v20 = vld [vmem:[#allocation11 + $0x3d8] sm:$0xff] }
 0x2c6   :  { %v936_v29 = vld [vmem:[#allocation11 + $0x3f8] sm:$0xff] }
 0x2c7   :  { %2556 = vmatpush1.bf16.msra.mxu1 %v6385_v53  ;;  %v6441_v53 = vcombine.low %v883_v37, %v887_v38  ;;  %v939_v37 = vld [vmem:[#allocation11 + $0x410] sm:$0xff] }
 0x2c8   :  { %2638 = vmatpush1.bf16.msra.mxu0 %v6387_v54  ;;  %2557 = vmatprep.subr.bf16.mxu1 %v6394_v55  ;;  %v6443_v54 = vcombine.low %v884_v39, %v888_v40  ;;  %v6450_v55 = vcombine.high %v891_v47, %v895_v48  ;;  %v943_v38 = vld [vmem:[#allocation11 + $0x430] sm:$0xff]  ;;  %v940_v39 = vld [vmem:[#allocation11 + $0x418] sm:$0xff] }
 0x2c9   :  { %2639 = vmatprep.subr.bf16.mxu0 %v6396_v57  ;;  %v6452_v57 = vcombine.high %v892_v49, %v896_v50  ;;  %v944_v40 = vld [vmem:[#allocation11 + $0x438] sm:$0xff] }
 0x2cb   :  { %2558 = vmatpush1.bf16.msra.mxu1 %v6393_v61  ;;  %v6449_v61 = vcombine.low %v891_v47, %v895_v48  ;;  %v947_v47 = vld [vmem:[#allocation11 + $0x450] sm:$0xff] }
 0x2cc   :  { %2640 = vmatpush1.bf16.msra.mxu0 %v6395_v62  ;;  %2559 = vmatprep.subr.bf16.mxu1 %v6402_v63  ;;  %v6451_v62 = vcombine.low %v892_v49, %v896_v50  ;;  %v6458_v63 = vcombine.high %v899_v58, %v903_v59  ;;  %v951_v48 = vld [vmem:[#allocation11 + $0x470] sm:$0xff]  ;;  %v6497_v49 = vcombine.low %v939_v37, %v943_v38  ;;  %v948_v50 = vld [vmem:[#allocation11 + $0x458] sm:$0xff] }
 0x2cd   :  { %2641 = vmatprep.subr.bf16.mxu0 %v6404_v0  ;;  %v6460_v0 = vcombine.high %v900_v5, %v904_v60 }
 0x2cf   :  { %2560 = vmatpush1.bf16.msra.mxu1 %v6401_v7  ;;  %v6457_v7 = vcombine.low %v899_v58, %v903_v59  ;;  %v959_v58 = vld [vmem:[#allocation11 + $0x4b0] sm:$0xff] }
 0x2d0   :  { %2642 = vmatpush1.bf16.msra.mxu0 %v6403_v8  ;;  %2561 = vmatprep.subr.bf16.mxu1 %v6410_v9  ;;  %v6459_v8 = vcombine.low %v900_v5, %v904_v60  ;;  %v6466_v9 = vcombine.high %v907_v1, %v911_v2  ;;  %v956_v5 = vld [vmem:[#allocation11 + $0x498] sm:$0xff] }
 0x2d1   :  { %2643 = vmatprep.subr.bf16.mxu0 %v6412_v10  ;;  %v6468_v10 = vcombine.high %v908_v3, %v912_v4  ;;  %v960_v60 = vld [vmem:[#allocation11 + $0x4b8] sm:$0xff] }
 0x2d3   :  { %2562 = vmatpush1.bf16.msra.mxu1 %v6409_v21  ;;  %v6465_v21 = vcombine.low %v907_v1, %v911_v2  ;;  %v963_v1 = vld [vmem:[#allocation11 + $0x4d0] sm:$0xff] }
 0x2d4   :  { %2644 = vmatpush1.bf16.msra.mxu0 %v6411_v22  ;;  %2563 = vmatprep.subr.bf16.mxu1 %v6418_v23  ;;  %v6467_v22 = vcombine.low %v908_v3, %v912_v4  ;;  %v6474_v23 = vcombine.high %v915_v11, %v919_v15  ;;  %v967_v2 = vld [vmem:[#allocation11 + $0x4f0] sm:$0xff]  ;;  %v964_v3 = vld [vmem:[#allocation11 + $0x4d8] sm:$0xff] }
 0x2d5   :  { %2645 = vmatprep.subr.bf16.mxu0 %v6420_v24  ;;  %v6476_v24 = vcombine.high %v916_v16, %v920_v17  ;;  %v968_v4 = vld [vmem:[#allocation11 + $0x4f8] sm:$0xff] }
 0x2d7   :  { %2564 = vmatpush1.bf16.msra.mxu1 %v6417_v28  ;;  %v6473_v28 = vcombine.low %v915_v11, %v919_v15  ;;  %v975_v11 = vld [vmem:[#allocation11 + $0x530] sm:$0xff]  ;;  %v972_v15 = vld [vmem:[#allocation11 + $0x518] sm:$0xff] }
 0x2d8   :  { %2646 = vmatpush1.bf16.msra.mxu0 %v6419_v12  ;;  %2565 = vmatprep.subr.bf16.mxu1 %v6426_v13  ;;  %v6475_v12 = vcombine.low %v916_v16, %v920_v17  ;;  %v6482_v13 = vcombine.high %v923_v52, %v927_v25  ;;  %v976_v16 = vld [vmem:[#allocation11 + $0x538] sm:$0xff]  ;;  %v6523_v17 = vcombine.low %v964_v3, %v968_v4 }
 0x2d9   :  { %2647 = vmatprep.subr.bf16.mxu0 %v6428_v14  ;;  %v6484_v14 = vcombine.high %v924_v26, %v928_v27 }
 0x2db   :  { %2566 = vmatpush1.bf16.msra.mxu1 %v6425_v31  ;;  %v6481_v31 = vcombine.low %v923_v52, %v927_v25  ;;  %v980_v52 = vld [vmem:[#allocation11 + $0x558] sm:$0xff] }
 0x2dc   :  { %2648 = vmatpush1.bf16.msra.mxu0 %v6427_v33  ;;  %2567 = vmatprep.subr.bf16.mxu1 %v6434_v34  ;;  %v6483_v33 = vcombine.low %v924_v26, %v928_v27  ;;  %v6490_v34 = vcombine.high %v931_v18, %v935_v19  ;;  %v984_v25 = vld [vmem:[#allocation11 + $0x578] sm:$0xff]  ;;  %v6531_v27 = vcombine.low %v972_v15, %v976_v16 }
 0x2dd   :  { %2649 = vmatprep.subr.bf16.mxu0 %v6436_v35  ;;  %v6492_v35 = vcombine.high %v932_v20, %v936_v29 }
 0x2df   :  { %2568 = vmatpush1.bf16.msra.mxu1 %v6433_v41  ;;  %v6489_v41 = vcombine.low %v931_v18, %v935_v19  ;;  %v988_v18 = vld [vmem:[#allocation11 + $0x598] sm:$0xff] }
 0x2e0   :  { %2650 = vmatpush1.bf16.msra.mxu0 %v6435_v44  ;;  %2569 = vmatprep.subr.bf16.mxu1 %v6442_v45  ;;  %v6491_v44 = vcombine.low %v932_v20, %v936_v29  ;;  %v6498_v45 = vcombine.high %v939_v37, %v943_v38  ;;  %v992_v19 = vld [vmem:[#allocation11 + $0x5b8] sm:$0xff]  ;;  %v6539_v29 = vcombine.low %v980_v52, %v984_v25 }
 0x2e1   :  { %2651 = vmatprep.subr.bf16.mxu0 %v6444_v46  ;;  %v6500_v46 = vcombine.high %v940_v39, %v944_v40  ;;  %v996_v37 = vld [vmem:[#allocation11 + $0x5d8] sm:$0xff] }
 0x2e2   :  { %v1000_v38 = vld [vmem:[#allocation11 + $0x5f8] sm:$0xff] }
 0x2e3   :  { %2570 = vmatpush1.bf16.msra.mxu1 %v6441_v53  ;;  %v952_v53 = vld [vmem:[#allocation11 + $0x478] sm:$0xff] }
 0x2e4   :  { %2652 = vmatpush1.bf16.msra.mxu0 %v6443_v54  ;;  %2571 = vmatprep.subr.bf16.mxu1 %v6450_v55  ;;  %v6499_v54 = vcombine.low %v940_v39, %v944_v40  ;;  %v6506_v55 = vcombine.high %v947_v47, %v951_v48  ;;  %v6508_v59 = vcombine.high %v948_v50, %v952_v53 }
 0x2e5   :  { %2653 = vmatprep.subr.bf16.mxu0 %v6452_v57  ;;  %v955_v57 = vld [vmem:[#allocation11 + $0x490] sm:$0xff]  ;;  %v6547_v40 = vcombine.low %v988_v18, %v992_v19 }
 0x2e7   :  { %2572 = vmatpush1.bf16.msra.mxu1 %v6449_v61  ;;  %v6505_v61 = vcombine.low %v947_v47, %v951_v48  ;;  %v1004_v47 = vld [vmem:[#allocation11 + $0x618] sm:$0xff] }
 0x2e8   :  { %2654 = vmatpush1.bf16.msra.mxu0 %v6451_v62  ;;  %2573 = vmatprep.subr.bf16.mxu1 %v6458_v63  ;;  %v6507_v62 = vcombine.low %v948_v50, %v952_v53  ;;  %v6514_v63 = vcombine.high %v955_v57, %v959_v58  ;;  %v1008_v48 = vld [vmem:[#allocation11 + $0x638] sm:$0xff]  ;;  %v6555_v50 = vcombine.low %v996_v37, %v1000_v38 }
 0x2e9   :  { %2655 = vmatprep.subr.bf16.mxu0 %v6460_v0  ;;  %v6516_v0 = vcombine.high %v956_v5, %v960_v60 }
 0x2eb   :  { %2574 = vmatpush1.bf16.msra.mxu1 %v6457_v7  ;;  %v6513_v7 = vcombine.low %v955_v57, %v959_v58  ;;  %v1015_v57 = vld [vmem:[#allocation11 + $0x670] sm:$0xff]  ;;  %v1012_v58 = vld [vmem:[#allocation11 + $0x658] sm:$0xff] }
 0x2ec   :  { %2656 = vmatpush1.bf16.msra.mxu0 %v6459_v8  ;;  %2575 = vmatprep.subr.bf16.mxu1 %v6466_v9  ;;  %v6522_v8 = vcombine.high %v963_v1, %v967_v2  ;;  %v6524_v9 = vcombine.high %v964_v3, %v968_v4 }
 0x2ed   :  { %2657 = vmatprep.subr.bf16.mxu0 %v6468_v10  ;;  %v971_v10 = vld [vmem:[#allocation11 + $0x510] sm:$0xff] }
 0x2ee   :  { %v6529_v26 = vcombine.low %v971_v10, %v975_v11 }
 0x2ef   :  { %2576 = vmatpush1.bf16.msra.mxu1 %v6465_v21  ;;  %v6530_v21 = vcombine.high %v971_v10, %v975_v11  ;;  %v1028_v10 = vld [vmem:[#allocation11 + $0x6d8] sm:$0xff] }
 0x2f0   :  { %2658 = vmatpush1.bf16.msra.mxu0 %v6467_v22  ;;  %2577 = vmatprep.subr.bf16.mxu1 %v6474_v23  ;;  %v6532_v22 = vcombine.high %v972_v15, %v976_v16  ;;  %v979_v23 = vld [vmem:[#allocation11 + $0x550] sm:$0xff]  ;;  %v1032_v11 = vld [vmem:[#allocation11 + $0x6f8] sm:$0xff] }
 0x2f1   :  { %2659 = vmatprep.subr.bf16.mxu0 %v6476_v24  ;;  %v983_v24 = vld [vmem:[#allocation11 + $0x570] sm:$0xff] }
 0x2f2   :  { %v6537_v20 = vcombine.low %v979_v23, %v983_v24 }
 0x2f3   :  { %2578 = vmatpush1.bf16.msra.mxu1 %v6473_v28  ;;  %v6538_v28 = vcombine.high %v979_v23, %v983_v24  ;;  %v1036_v23 = vld [vmem:[#allocation11 + $0x718] sm:$0xff] }
 0x2f4   :  { %2660 = vmatpush1.bf16.msra.mxu0 %v6475_v12  ;;  %2579 = vmatprep.subr.bf16.mxu1 %v6482_v13  ;;  %v6540_v12 = vcombine.high %v980_v52, %v984_v25  ;;  %v987_v13 = vld [vmem:[#allocation11 + $0x590] sm:$0xff]  ;;  %v1040_v24 = vld [vmem:[#allocation11 + $0x738] sm:$0xff]  ;;  %v6587_v25 = vcombine.low %v1028_v10, %v1032_v11 }
 0x2f5   :  { %2661 = vmatprep.subr.bf16.mxu0 %v6484_v14  ;;  %v991_v14 = vld [vmem:[#allocation11 + $0x5b0] sm:$0xff] }
 0x2f6   :  { %v6545_v39 = vcombine.low %v987_v13, %v991_v14 }
 0x2f7   :  { %2580 = vmatpush1.bf16.msra.mxu1 %v6481_v31  ;;  %v6546_v31 = vcombine.high %v987_v13, %v991_v14  ;;  %v1044_v13 = vld [vmem:[#allocation11 + $0x758] sm:$0xff] }
 0x2f8   :  { %2662 = vmatpush1.bf16.msra.mxu0 %v6483_v33  ;;  %2581 = vmatprep.subr.bf16.mxu1 %v6490_v34  ;;  %v6548_v33 = vcombine.high %v988_v18, %v992_v19  ;;  %v995_v34 = vld [vmem:[#allocation11 + $0x5d0] sm:$0xff]  ;;  %v1048_v14 = vld [vmem:[#allocation11 + $0x778] sm:$0xff]  ;;  %v6595_v19 = vcombine.low %v1036_v23, %v1040_v24 }
 0x2f9   :  { %2663 = vmatprep.subr.bf16.mxu0 %v6492_v35  ;;  %v999_v35 = vld [vmem:[#allocation11 + $0x5f0] sm:$0xff] }
 0x2fb   :  { %2582 = vmatpush1.bf16.msra.mxu1 %v6489_v41  ;;  %v6554_v41 = vcombine.high %v995_v34, %v999_v35 }
 0x2fc   :  { %2664 = vmatpush1.bf16.msra.mxu0 %v6491_v44  ;;  %2592 = vmatprep.subr.bf16.mxu1 %v6498_v45  ;;  %v6556_v44 = vcombine.high %v996_v37, %v1000_v38  ;;  %v1003_v45 = vld [vmem:[#allocation11 + $0x610] sm:$0xff]  ;;  %v6603_v38 = vcombine.low %v1044_v13, %v1048_v14 }
 0x2fd   :  { %2674 = vmatprep.subr.bf16.mxu0 %v6500_v46  ;;  %v1007_v46 = vld [vmem:[#allocation11 + $0x630] sm:$0xff] }
 0x2fe   :  { %2584 = vmatmul.mubr.bf16.vlgmr.msra.gmra.mrb[4].mxu1 %v8463_v6  ;;  %v6562_v53 = vcombine.high %v1003_v45, %v1007_v46 }
 0x2ff   :  { %2666 = vmatmul.mubr.bf16.vlgmr.msra.gmra.mrb[16].mxu0 %v8463_v6  ;;  %2593 = vmatpush1.bf16.msra.mxu1 %v6497_v49  ;;  %v6515_v6 = vcombine.low %v956_v5, %v960_v60  ;;  %v6553_v49 = vcombine.low %v995_v34, %v999_v35  ;;  %v6561_v5 = vcombine.low %v1003_v45, %v1007_v46  ;;  %v1052_v34 = vld [vmem:[#allocation11 + $0x798] sm:$0xff] }
 0x300   :  { %2624 = vmatprep.mubr.bf16.mxu1 %v8485_v30  ;;  %2675 = vmatpush1.bf16.msra.mxu0 %v6499_v54  ;;  %v6564_v54 = vcombine.high %v1004_v47, %v1008_v48  ;;  %v6563_v60 = vcombine.low %v1004_v47, %v1008_v48  ;;  %v1056_v35 = vld [vmem:[#allocation11 + $0x7b8] sm:$0xff] }
 0x301   :  { %2706 = vmatprep.mubr.bf16.mxu0 %v8485_v30  ;;  %2594 = vmatprep.subr.bf16.mxu1 %v6506_v55  ;;  %v6521_v30 = vcombine.low %v963_v1, %v967_v2  ;;  %v1011_v55 = vld [vmem:[#allocation11 + $0x650] sm:$0xff]  ;;  %v1020_v1 = vld [vmem:[#allocation11 + $0x698] sm:$0xff]  ;;  %v6611_v48 = vcombine.low %v1052_v34, %v1056_v35 }
 0x302   :  { %2676 = vmatprep.subr.bf16.mxu0 %v6508_v59  ;;  %v1016_v59 = vld [vmem:[#allocation11 + $0x678] sm:$0xff]  ;;  %v6569_v3 = vcombine.low %v1011_v55, %v1015_v57 }
 0x303   :  { %2595 = vmatpush1.bf16.msra.mxu1 %v6505_v61  ;;  %v6570_v61 = vcombine.high %v1011_v55, %v1015_v57  ;;  %v1024_v2 = vld [vmem:[#allocation11 + $0x6b8] sm:$0xff]  ;;  %v6571_v4 = vcombine.low %v1012_v58, %v1016_v59  ;;  %v7364_v55 = vld [vmem:[#allocation14 + $0x4] ss:$28 sps:$4 sm:$0xff]   ;;  %v7367_v57 = vld [vmem:[#allocation14 + $0xc] ss:$28 sps:$4 sm:$0xff]  }
 0x304   :  { %2677 = vmatpush1.bf16.msra.mxu0 %v6507_v62  ;;  %2596 = vmatprep.subr.bf16.mxu1 %v6514_v63  ;;  %v6572_v62 = vcombine.high %v1012_v58, %v1016_v59  ;;  %v1019_v63 = vld [vmem:[#allocation11 + $0x690] sm:$0xff]  ;;  %v6579_v16 = vcombine.low %v1020_v1, %v1024_v2  ;;  %v1060_v45 = vld [vmem:[#allocation11 + $0x7d8] sm:$0xff]  ;;  %v7362_v58 = vld [vmem:[#allocation14] ss:$28 sps:$4 sm:$0xff]  }
 0x305   :  { %2678 = vmatprep.subr.bf16.mxu0 %v6516_v0  ;;  %v1023_v0 = vld [vmem:[#allocation11 + $0x6b0] sm:$0xff]  ;;  %v1064_v46 = vld [vmem:[#allocation11 + $0x7f8] sm:$0xff] }
 0x306   :  { %v6577_v15 = vcombine.low %v1019_v63, %v1023_v0  ;;  %v7365_v59 = vld [vmem:[#allocation14 + $0x8] ss:$28 sps:$4 sm:$0xff]  }
 0x307   :  { %2597 = vmatpush1.bf16.msra.mxu1 %v6513_v7  ;;  %v6578_v7 = vcombine.high %v1019_v63, %v1023_v0  ;;  %v7376_v63 = vld [vmem:[#allocation14 + $0x74] ss:$28 sps:$4 sm:$0xff]   ;;  %v7379_v0 = vld [vmem:[#allocation14 + $0x7c] ss:$28 sps:$4 sm:$0xff]  }
 0x308   :  { %2679 = vmatpush1.bf16.msra.mxu0 %v6515_v6  ;;  %2598 = vmatprep.subr.bf16.mxu1 %v6522_v8  ;;  %v6580_v6 = vcombine.high %v1020_v1, %v1024_v2  ;;  %v1027_v8 = vld [vmem:[#allocation11 + $0x6d0] sm:$0xff]  ;;  %v7377_v2 = vld [vmem:[#allocation14 + $0x78] ss:$28 sps:$4 sm:$0xff]  }
 0x309   :  { %2680 = vmatprep.subr.bf16.mxu0 %v6524_v9  ;;  %v1031_v9 = vld [vmem:[#allocation11 + $0x6f0] sm:$0xff] }
 0x30a   :  { %v6585_v52 = vcombine.low %v1027_v8, %v1031_v9  ;;  %v7374_v1 = vld [vmem:[#allocation14 + $0x70] ss:$28 sps:$4 sm:$0xff]  }
 0x30b   :  { %2599 = vmatpush1.bf16.msra.mxu1 %v6521_v30  ;;  %v6586_v30 = vcombine.high %v1027_v8, %v1031_v9  ;;  %v7391_v8 = vld [vmem:[#allocation14 + $0xec] ss:$28 sps:$4 sm:$0xff]   ;;  %v7386_v9 = vld [vmem:[#allocation14 + $0xe0] ss:$28 sps:$4 sm:$0xff]  }
 0x30c   :  { %2681 = vmatpush1.bf16.msra.mxu0 %v6523_v17  ;;  %2600 = vmatprep.subr.bf16.mxu1 %v6530_v21  ;;  %v6588_v17 = vcombine.high %v1028_v10, %v1032_v11  ;;  %v1035_v21 = vld [vmem:[#allocation11 + $0x710] sm:$0xff]  ;;  %v7394_v11 = vld [vmem:[#allocation14 + $0x11c] ss:$28 sps:$4 sm:$0xff]  }
 0x30d   :  { %2682 = vmatprep.subr.bf16.mxu0 %v6532_v22  ;;  %v1039_v22 = vld [vmem:[#allocation11 + $0x730] sm:$0xff] }
 0x30e   :  { %v6593_v18 = vcombine.low %v1035_v21, %v1039_v22  ;;  %v7389_v10 = vld [vmem:[#allocation14 + $0xe8] ss:$28 sps:$4 sm:$0xff]  }
 0x30f   :  { %2601 = vmatpush1.bf16.msra.mxu1 %v6529_v26  ;;  %v6594_v26 = vcombine.high %v1035_v21, %v1039_v22  ;;  %v7403_v21 = vld [vmem:[#allocation14 + $0x15c] ss:$28 sps:$4 sm:$0xff]   ;;  %v7398_v22 = vld [vmem:[#allocation14 + $0x150] ss:$28 sps:$4 sm:$0xff]  }
 0x310   :  { %2683 = vmatpush1.bf16.msra.mxu0 %v6531_v27  ;;  %2602 = vmatprep.subr.bf16.mxu1 %v6538_v28  ;;  %v6596_v27 = vcombine.high %v1036_v23, %v1040_v24  ;;  %v1043_v28 = vld [vmem:[#allocation11 + $0x750] sm:$0xff]  ;;  %v7401_v23 = vld [vmem:[#allocation14 + $0x158] ss:$28 sps:$4 sm:$0xff]  }
 0x311   :  { %2684 = vmatprep.subr.bf16.mxu0 %v6540_v12  ;;  %v1047_v12 = vld [vmem:[#allocation11 + $0x770] sm:$0xff] }
 0x312   :  { %v6601_v37 = vcombine.low %v1043_v28, %v1047_v12  ;;  %v7406_v24 = vld [vmem:[#allocation14 + $0x18c] ss:$28 sps:$4 sm:$0xff]  }
 0x313   :  { %2603 = vmatpush1.bf16.msra.mxu1 %v6537_v20  ;;  %v6602_v20 = vcombine.high %v1043_v28, %v1047_v12  ;;  %v7415_v28 = vld [vmem:[#allocation14 + $0x1cc] ss:$28 sps:$4 sm:$0xff]   ;;  %v7410_v12 = vld [vmem:[#allocation14 + $0x1c0] ss:$28 sps:$4 sm:$0xff]  }
 0x314   :  { %2685 = vmatpush1.bf16.msra.mxu0 %v6539_v29  ;;  %2604 = vmatprep.subr.bf16.mxu1 %v6546_v31  ;;  %v6604_v29 = vcombine.high %v1044_v13, %v1048_v14  ;;  %v1051_v31 = vld [vmem:[#allocation11 + $0x790] sm:$0xff]  ;;  %v7418_v14 = vld [vmem:[#allocation14 + $0x1fc] ss:$28 sps:$4 sm:$0xff]  }
 0x315   :  { %2686 = vmatprep.subr.bf16.mxu0 %v6548_v33  ;;  %v1055_v33 = vld [vmem:[#allocation11 + $0x7b0] sm:$0xff] }
 0x316   :  { %v6609_v47 = vcombine.low %v1051_v31, %v1055_v33  ;;  %v7413_v13 = vld [vmem:[#allocation14 + $0x1c8] ss:$28 sps:$4 sm:$0xff]  }
 0x317   :  { %2605 = vmatpush1.bf16.msra.mxu1 %v6545_v39  ;;  %v6610_v39 = vcombine.high %v1051_v31, %v1055_v33  ;;  %v7427_v31 = vld [vmem:[#allocation14 + $0x23c] ss:$28 sps:$4 sm:$0xff]   ;;  %v7422_v33 = vld [vmem:[#allocation14 + $0x230] ss:$28 sps:$4 sm:$0xff]  }
 0x318   :  { %2687 = vmatpush1.bf16.msra.mxu0 %v6547_v40  ;;  %2606 = vmatprep.subr.bf16.mxu1 %v6554_v41  ;;  %v6612_v40 = vcombine.high %v1052_v34, %v1056_v35  ;;  %v1059_v41 = vld [vmem:[#allocation11 + $0x7d0] sm:$0xff]  ;;  %v7425_v34 = vld [vmem:[#allocation14 + $0x238] ss:$28 sps:$4 sm:$0xff]  }
 0x319   :  { %2688 = vmatprep.subr.bf16.mxu0 %v6556_v44  ;;  %v1063_v44 = vld [vmem:[#allocation11 + $0x7f0] sm:$0xff] }
 0x31a   :  { %v7430_v35 = vld [vmem:[#allocation14 + $0x26c] ss:$28 sps:$4 sm:$0xff]  }
 0x31b   :  { %2607 = vmatpush1.bf16.msra.mxu1 %v6553_v49  ;;  %v6618_v49 = vcombine.high %v1059_v41, %v1063_v44 }
 0x31c   :  { %2689 = vmatpush1.bf16.msra.mxu0 %v6555_v50  ;;  %2608 = vmatprep.subr.bf16.mxu1 %v6562_v53  ;;  %v6620_v50 = vcombine.high %v1060_v45, %v1064_v46  ;;  %v6617_v53 = vcombine.low %v1059_v41, %v1063_v44  ;;  %v7439_v41 = vld [vmem:[#allocation14 + $0x2ac] ss:$28 sps:$4 sm:$0xff]   ;;  %v7434_v44 = vld [vmem:[#allocation14 + $0x2a0] ss:$28 sps:$4 sm:$0xff]  }
 0x31d   :  { %2690 = vmatprep.subr.bf16.mxu0 %v6564_v54  ;;  %v6619_v54 = vcombine.low %v1060_v45, %v1064_v46  ;;  %v7437_v45 = vld [vmem:[#allocation14 + $0x2a8] ss:$28 sps:$4 sm:$0xff]   ;;  %v7442_v46 = vld [vmem:[#allocation14 + $0x2dc] ss:$28 sps:$4 sm:$0xff]  }
 0x31f   :  { %2609 = vmatpush1.bf16.msra.mxu1 %v6561_v5  ;;  %v7370_v5 = vld [vmem:[#allocation14 + $0x3c] ss:$28 sps:$4 sm:$0xff]  }
 0x320   :  { %2691 = vmatpush1.bf16.msra.mxu0 %v6563_v60  ;;  %2610 = vmatprep.subr.bf16.mxu1 %v6570_v61  ;;  %v7373_v60 = vld [vmem:[#allocation14 + $0x44] ss:$28 sps:$4 sm:$0xff]   ;;  %v7368_v61 = vld [vmem:[#allocation14 + $0x38] ss:$28 sps:$4 sm:$0xff]  }
 0x321   :  { %2692 = vmatprep.subr.bf16.mxu0 %v6572_v62  ;;  %v7371_v62 = vld [vmem:[#allocation14 + $0x40] ss:$28 sps:$4 sm:$0xff]  }
 0x323   :  { %2611 = vmatpush1.bf16.msra.mxu1 %v6569_v3  ;;  %v7382_v3 = vld [vmem:[#allocation14 + $0xac] ss:$28 sps:$4 sm:$0xff]  }
 0x324   :  { %2693 = vmatpush1.bf16.msra.mxu0 %v6571_v4  ;;  %2612 = vmatprep.subr.bf16.mxu1 %v6578_v7  ;;  %v7385_v4 = vld [vmem:[#allocation14 + $0xb4] ss:$28 sps:$4 sm:$0xff]   ;;  %v7380_v7 = vld [vmem:[#allocation14 + $0xa8] ss:$28 sps:$4 sm:$0xff]  }
 0x325   :  { %2694 = vmatprep.subr.bf16.mxu0 %v6580_v6  ;;  %v7388_v6 = vld [vmem:[#allocation14 + $0xe4] ss:$28 sps:$4 sm:$0xff]  }
 0x327   :  { %2613 = vmatpush1.bf16.msra.mxu1 %v6577_v15  ;;  %v7397_v15 = vld [vmem:[#allocation14 + $0x124] ss:$28 sps:$4 sm:$0xff]  }
 0x328   :  { %2695 = vmatpush1.bf16.msra.mxu0 %v6579_v16  ;;  %2614 = vmatprep.subr.bf16.mxu1 %v6586_v30  ;;  %v7392_v16 = vld [vmem:[#allocation14 + $0x118] ss:$28 sps:$4 sm:$0xff]   ;;  %v7395_v30 = vld [vmem:[#allocation14 + $0x120] ss:$28 sps:$4 sm:$0xff]  }
 0x329   :  { %2696 = vmatprep.subr.bf16.mxu0 %v6588_v17  ;;  %v7400_v17 = vld [vmem:[#allocation14 + $0x154] ss:$28 sps:$4 sm:$0xff]  }
 0x32b   :  { %2615 = vmatpush1.bf16.msra.mxu1 %v6585_v52  ;;  %v7409_v52 = vld [vmem:[#allocation14 + $0x194] ss:$28 sps:$4 sm:$0xff]  }
 0x32c   :  { %2697 = vmatpush1.bf16.msra.mxu0 %v6587_v25  ;;  %2616 = vmatprep.subr.bf16.mxu1 %v6594_v26  ;;  %v7404_v25 = vld [vmem:[#allocation14 + $0x188] ss:$28 sps:$4 sm:$0xff]   ;;  %v7407_v26 = vld [vmem:[#allocation14 + $0x190] ss:$28 sps:$4 sm:$0xff]  }
 0x32d   :  { %2698 = vmatprep.subr.bf16.mxu0 %v6596_v27  ;;  %v7412_v27 = vld [vmem:[#allocation14 + $0x1c4] ss:$28 sps:$4 sm:$0xff]  }
 0x32f   :  { %2617 = vmatpush1.bf16.msra.mxu1 %v6593_v18  ;;  %v7421_v18 = vld [vmem:[#allocation14 + $0x204] ss:$28 sps:$4 sm:$0xff]  }
 0x330   :  { %2699 = vmatpush1.bf16.msra.mxu0 %v6595_v19  ;;  %2618 = vmatprep.subr.bf16.mxu1 %v6602_v20  ;;  %v7416_v19 = vld [vmem:[#allocation14 + $0x1f8] ss:$28 sps:$4 sm:$0xff]   ;;  %v7419_v20 = vld [vmem:[#allocation14 + $0x200] ss:$28 sps:$4 sm:$0xff]  }
 0x331   :  { %2700 = vmatprep.subr.bf16.mxu0 %v6604_v29  ;;  %v7424_v29 = vld [vmem:[#allocation14 + $0x234] ss:$28 sps:$4 sm:$0xff]  }
 0x333   :  { %2619 = vmatpush1.bf16.msra.mxu1 %v6601_v37  ;;  %v7433_v37 = vld [vmem:[#allocation14 + $0x274] ss:$28 sps:$4 sm:$0xff]  }
 0x334   :  { %2701 = vmatpush1.bf16.msra.mxu0 %v6603_v38  ;;  %2620 = vmatprep.subr.bf16.mxu1 %v6610_v39  ;;  %v7428_v38 = vld [vmem:[#allocation14 + $0x268] ss:$28 sps:$4 sm:$0xff]   ;;  %v7431_v39 = vld [vmem:[#allocation14 + $0x270] ss:$28 sps:$4 sm:$0xff]  }
 0x335   :  { %2702 = vmatprep.subr.bf16.mxu0 %v6612_v40  ;;  %v7436_v40 = vld [vmem:[#allocation14 + $0x2a4] ss:$28 sps:$4 sm:$0xff]  }
 0x337   :  { %2621 = vmatpush1.bf16.msra.mxu1 %v6609_v47  ;;  %v7445_v47 = vld [vmem:[#allocation14 + $0x2e4] ss:$28 sps:$4 sm:$0xff]  }
 0x338   :  { %2703 = vmatpush1.bf16.msra.mxu0 %v6611_v48  ;;  %2622 = vmatprep.subr.bf16.mxu1 %v6618_v49  ;;  %v7440_v48 = vld [vmem:[#allocation14 + $0x2d8] ss:$28 sps:$4 sm:$0xff]   ;;  %v7443_v49 = vld [vmem:[#allocation14 + $0x2e0] ss:$28 sps:$4 sm:$0xff]  }
 0x339   :  { %2704 = vmatprep.subr.bf16.mxu0 %v6620_v50  ;;  %v7448_v50 = vld [vmem:[#allocation14 + $0x314] ss:$28 sps:$4 sm:$0xff]  }
 0x33b   :  { %2623 = vmatpush1.bf16.msra.mxu1 %v6617_v53  ;;  %v7451_v53 = vld [vmem:[#allocation14 + $0x31c] ss:$28 sps:$4 sm:$0xff]  }
 0x33c   :  { %2705 = vmatpush1.bf16.msra.mxu0 %v6619_v54  ;;  %5600 = vmatprep.subr.bf16.mxu1 %v7364_v55  ;;  %v7446_v54 = vld [vmem:[#allocation14 + $0x310] ss:$28 sps:$4 sm:$0xff]   ;;  %v7449_v55 = vld [vmem:[#allocation14 + $0x318] ss:$28 sps:$4 sm:$0xff]  }
 0x33d   :  { %5764 = vmatprep.subr.bf16.mxu0 %v7367_v57  ;;  %v7454_v57 = vld [vmem:[#allocation14 + $0x34c] ss:$28 sps:$4 sm:$0xff]  }
 0x33e   :  { %2625 = vmatmul.mubr.bf16.vlgmr.msra.gmra.mrb[4].mxu1 %v8487_v32 }
 0x33f   :  { %2707 = vmatmul.mubr.bf16.vlgmr.msra.gmra.mrb[16].mxu0 %v8487_v32  ;;  %5601 = vmatpush1.bf16.msra.mxu1 %v7362_v58  ;;  %v7383_v32 = vld [vmem:[#allocation14 + $0xb0] ss:$28 sps:$4 sm:$0xff]  }
 0x340   :  { %5765 = vmatpush1.bf16.msra.mxu0 %v7365_v59  ;;  %5602 = vmatprep.subr.bf16.mxu1 %v7370_v5  ;;  %v7457_v58 = vld [vmem:[#allocation14 + $0x354] ss:$28 sps:$4 sm:$0xff]   ;;  %v7452_v59 = vld [vmem:[#allocation14 + $0x348] ss:$28 sps:$4 sm:$0xff]  }
 0x341   :  { %5766 = vmatprep.subr.bf16.mxu0 %v7373_v60  ;;  %v7455_v5 = vld [vmem:[#allocation14 + $0x350] ss:$28 sps:$4 sm:$0xff]   ;;  %v7460_v60 = vld [vmem:[#allocation14 + $0x384] ss:$28 sps:$4 sm:$0xff]  }
 0x343   :  { %5603 = vmatpush1.bf16.msra.mxu1 %v7368_v61  ;;  %v7463_v61 = vld [vmem:[#allocation14 + $0x38c] ss:$28 sps:$4 sm:$0xff]  }
 0x344   :  { %5767 = vmatpush1.bf16.msra.mxu0 %v7371_v62  ;;  %5604 = vmatprep.subr.bf16.mxu1 %v7376_v63  ;;  %v8501_v62 = vld [vmem:[#allocation13] sm:$0xff] }
 0x345   :  { %5768 = vmatprep.subr.bf16.mxu0 %v7379_v0  ;;  %v1070_v63 = vrot.slane %v8501_v62, %v8428_v42  ;;  %v1074_v0 = vrot.slane %v8501_v62, %v8431_v43 }
 0x347   :  { %5605 = vmatpush1.bf16.msra.mxu1 %v7374_v1  ;;  %v1082_v1 = vrot.slane %v8501_v62, %v8479_v56 }
 0x348   :  { %5769 = vmatpush1.bf16.msra.mxu0 %v7377_v2  ;;  %5606 = vmatprep.subr.bf16.mxu1 %v7382_v3 }
 0x349   :  { %5770 = vmatprep.subr.bf16.mxu0 %v7385_v4 }
 0x34b   :  { %5607 = vmatpush1.bf16.msra.mxu1 %v7380_v7 }
 0x34c   :  { %5771 = vmatpush1.bf16.msra.mxu0 %v7383_v32  ;;  %5608 = vmatprep.subr.bf16.mxu1 %v7388_v6 }
 0x34d   :  { %5772 = vmatprep.subr.bf16.mxu0 %v7391_v8 }
 0x34f   :  { %5609 = vmatpush1.bf16.msra.mxu1 %v7386_v9 }
 0x350   :  { %5773 = vmatpush1.bf16.msra.mxu0 %v7389_v10  ;;  %5610 = vmatprep.subr.bf16.mxu1 %v7394_v11 }
 0x351   :  { %5774 = vmatprep.subr.bf16.mxu0 %v7397_v15 }
 0x353   :  { %5611 = vmatpush1.bf16.msra.mxu1 %v7392_v16 }
 0x354   :  { %5775 = vmatpush1.bf16.msra.mxu0 %v7395_v30  ;;  %5612 = vmatprep.subr.bf16.mxu1 %v7400_v17 }
 0x355   :  { %5776 = vmatprep.subr.bf16.mxu0 %v7403_v21 }
 0x357   :  { %5613 = vmatpush1.bf16.msra.mxu1 %v7398_v22 }
 0x358   :  { %5777 = vmatpush1.bf16.msra.mxu0 %v7401_v23  ;;  %5614 = vmatprep.subr.bf16.mxu1 %v7406_v24 }
 0x359   :  { %5778 = vmatprep.subr.bf16.mxu0 %v7409_v52  ;;  %v7458_v52 = vld [vmem:[#allocation14 + $0x380] ss:$28 sps:$4 sm:$0xff]  }
 0x35b   :  { %5615 = vmatpush1.bf16.msra.mxu1 %v7404_v25  ;;  %v7461_v25 = vld [vmem:[#allocation14 + $0x388] ss:$28 sps:$4 sm:$0xff]  }
 0x35c   :  { %5779 = vmatpush1.bf16.msra.mxu0 %v7407_v26  ;;  %5616 = vmatprep.subr.bf16.mxu1 %v7412_v27  ;;  %v7466_v27 = vld [vmem:[#allocation14 + $0x3bc] ss:$28 sps:$4 sm:$0xff]  }
 0x35d   :  { %5780 = vmatprep.subr.bf16.mxu0 %v7415_v28  ;;  %v7469_v28 = vld [vmem:[#allocation14 + $0x3c4] ss:$28 sps:$4 sm:$0xff]  }
 0x35f   :  { %5617 = vmatpush1.bf16.msra.mxu1 %v7410_v12 }
 0x360   :  { %5781 = vmatpush1.bf16.msra.mxu0 %v7413_v13  ;;  %5618 = vmatprep.subr.bf16.mxu1 %v7418_v14  ;;  %v7464_v13 = vld [vmem:[#allocation14 + $0x3b8] ss:$28 sps:$4 sm:$0xff]   ;;  %v7467_v14 = vld [vmem:[#allocation14 + $0x3c0] ss:$28 sps:$4 sm:$0xff]  }
 0x361   :  { %5782 = vmatprep.subr.bf16.mxu0 %v7421_v18  ;;  %v7472_v18 = vld [vmem:[#allocation14 + $0x3f4] ss:$28 sps:$4 sm:$0xff]  }
 0x363   :  { %5619 = vmatpush1.bf16.msra.mxu1 %v7416_v19  ;;  %v7475_v19 = vld [vmem:[#allocation14 + $0x3fc] ss:$28 sps:$4 sm:$0xff]  }
 0x364   :  { %5783 = vmatpush1.bf16.msra.mxu0 %v7419_v20  ;;  %5620 = vmatprep.subr.bf16.mxu1 %v7424_v29  ;;  %v7470_v20 = vld [vmem:[#allocation14 + $0x3f0] ss:$28 sps:$4 sm:$0xff]   ;;  %v7473_v29 = vld [vmem:[#allocation14 + $0x3f8] ss:$28 sps:$4 sm:$0xff]  }
 0x365   :  { %5784 = vmatprep.subr.bf16.mxu0 %v7427_v31  ;;  %v7478_v31 = vld [vmem:[#allocation14 + $0x42c] ss:$28 sps:$4 sm:$0xff]  }
 0x367   :  { %5621 = vmatpush1.bf16.msra.mxu1 %v7422_v33  ;;  %v7481_v33 = vld [vmem:[#allocation14 + $0x434] ss:$28 sps:$4 sm:$0xff]  }
 0x368   :  { %5785 = vmatpush1.bf16.msra.mxu0 %v7425_v34  ;;  %5622 = vmatprep.subr.bf16.mxu1 %v7430_v35  ;;  %v7476_v34 = vld [vmem:[#allocation14 + $0x428] ss:$28 sps:$4 sm:$0xff]   ;;  %v7479_v35 = vld [vmem:[#allocation14 + $0x430] ss:$28 sps:$4 sm:$0xff]  }
 0x369   :  { %5786 = vmatprep.subr.bf16.mxu0 %v7433_v37  ;;  %v7484_v37 = vld [vmem:[#allocation14 + $0x464] ss:$28 sps:$4 sm:$0xff]  }
 0x36b   :  { %5623 = vmatpush1.bf16.msra.mxu1 %v7428_v38  ;;  %v7487_v38 = vld [vmem:[#allocation14 + $0x46c] ss:$28 sps:$4 sm:$0xff]  }
 0x36c   :  { %5787 = vmatpush1.bf16.msra.mxu0 %v7431_v39  ;;  %5624 = vmatprep.subr.bf16.mxu1 %v7436_v40  ;;  %v7482_v39 = vld [vmem:[#allocation14 + $0x460] ss:$28 sps:$4 sm:$0xff]   ;;  %v7485_v40 = vld [vmem:[#allocation14 + $0x468] ss:$28 sps:$4 sm:$0xff]  }
 0x36d   :  { %5788 = vmatprep.subr.bf16.mxu0 %v7439_v41  ;;  %v7490_v41 = vld [vmem:[#allocation14 + $0x49c] ss:$28 sps:$4 sm:$0xff]  }
 0x36f   :  { %5625 = vmatpush1.bf16.msra.mxu1 %v7434_v44  ;;  %v7493_v44 = vld [vmem:[#allocation14 + $0x4a4] ss:$28 sps:$4 sm:$0xff]  }
 0x370   :  { %5789 = vmatpush1.bf16.msra.mxu0 %v7437_v45  ;;  %5626 = vmatprep.subr.bf16.mxu1 %v7442_v46  ;;  %v7488_v45 = vld [vmem:[#allocation14 + $0x498] ss:$28 sps:$4 sm:$0xff]   ;;  %v7491_v46 = vld [vmem:[#allocation14 + $0x4a0] ss:$28 sps:$4 sm:$0xff]  }
 0x371   :  { %5790 = vmatprep.subr.bf16.mxu0 %v7445_v47  ;;  %v7496_v47 = vld [vmem:[#allocation14 + $0x4d4] ss:$28 sps:$4 sm:$0xff]  }
 0x373   :  { %5627 = vmatpush1.bf16.msra.mxu1 %v7440_v48  ;;  %v7499_v48 = vld [vmem:[#allocation14 + $0x4dc] ss:$28 sps:$4 sm:$0xff]  }
 0x374   :  { %5791 = vmatpush1.bf16.msra.mxu0 %v7443_v49  ;;  %5628 = vmatprep.subr.bf16.mxu1 %v7448_v50  ;;  %v7494_v49 = vld [vmem:[#allocation14 + $0x4d0] ss:$28 sps:$4 sm:$0xff]   ;;  %v7497_v50 = vld [vmem:[#allocation14 + $0x4d8] ss:$28 sps:$4 sm:$0xff]  }
 0x375   :  { %5792 = vmatprep.subr.bf16.mxu0 %v7451_v53  ;;  %v7502_v53 = vld [vmem:[#allocation14 + $0x50c] ss:$28 sps:$4 sm:$0xff]  }
 0x377   :  { %5629 = vmatpush1.bf16.msra.mxu1 %v7446_v54  ;;  %v7505_v54 = vld [vmem:[#allocation14 + $0x514] ss:$28 sps:$4 sm:$0xff]  }
 0x378   :  { %5793 = vmatpush1.bf16.msra.mxu0 %v7449_v55  ;;  %5630 = vmatprep.subr.bf16.mxu1 %v7454_v57  ;;  %v7500_v55 = vld [vmem:[#allocation14 + $0x508] ss:$28 sps:$4 sm:$0xff]   ;;  %v7503_v57 = vld [vmem:[#allocation14 + $0x510] ss:$28 sps:$4 sm:$0xff]  }
 0x379   :  { %5794 = vmatprep.subr.bf16.mxu0 %v7457_v58  ;;  %v7508_v58 = vld [vmem:[#allocation14 + $0x544] ss:$28 sps:$4 sm:$0xff]  }
 0x37b   :  { %5631 = vmatpush1.bf16.msra.mxu1 %v7452_v59  ;;  %v7511_v59 = vld [vmem:[#allocation14 + $0x54c] ss:$28 sps:$4 sm:$0xff]  }
 0x37c   :  { %5795 = vmatpush1.bf16.msra.mxu0 %v7455_v5  ;;  %5641 = vmatprep.subr.bf16.mxu1 %v7460_v60  ;;  %v7506_v5 = vld [vmem:[#allocation14 + $0x540] ss:$28 sps:$4 sm:$0xff]   ;;  %v7509_v60 = vld [vmem:[#allocation14 + $0x548] ss:$28 sps:$4 sm:$0xff]  }
 0x37d   :  { %5805 = vmatprep.subr.bf16.mxu0 %v7463_v61  ;;  %v7514_v61 = vld [vmem:[#allocation14 + $0x57c] ss:$28 sps:$4 sm:$0xff]  }
 0x391   :  { %v2462_v2 = vpop.f32.mrb[0].mxu1  ;;  %v8509_v3 = vpop.f32.mrb[12].mxu0 }
 0x392   :  { %v7157_v4 = vadd.f32 %v2462_v2, %v1070_v63  ;;  %v2464_v7 = vpop.f32.mrb[1].mxu1  ;;  %v2546_v32 = vpop.f32.mrb[13].mxu0  ;;  %v7517_v63 = vld [vmem:[#allocation14 + $0x584] ss:$28 sps:$4 sm:$0xff]   ;;  %v7520_v2 = vld [vmem:[#allocation14 + $0x5b4] ss:$28 sps:$4 sm:$0xff]  }
 0x393   :  { %v7158_v6 = vadd.f32 %v2464_v7, %v1074_v0  ;;  %v7160_v8 = vadd.f32 %v2546_v32, %v1082_v1  ;;  %v2466_v9 = vpop.f32.mrb[2].mxu1  ;;  %v2548_v10 = vpop.f32.mrb[14].mxu0  ;;  %v7512_v0 = vld [vmem:[#allocation14 + $0x578] ss:$28 sps:$4 sm:$0xff]   ;;  %v7515_v1 = vld [vmem:[#allocation14 + $0x580] ss:$28 sps:$4 sm:$0xff]  }
 0x394   :  { %vm2715_vm6 = vcmp.gt.f32.partialorder %v7157_v4, 0.0  ;;  %v2723_v11 = vmul.f32 0.2, %v7157_v4  ;;  %v2467_v17 = vpop.f32.mrb[3].mxu1  ;;  %v2549_v21 = vpop.f32.mrb[15].mxu0 }
 0x395   :  { %vm2716_vm7 = vcmp.gt.f32.partialorder %v7158_v6, 0.0  ;;  %v2724_v15 = vmul.f32 0.2, %v7158_v6  ;;  %vm2718_vm8 = vcmp.gt.f32.partialorder %v7160_v8, 0.0  ;;  %v2726_v16 = vmul.f32 0.2, %v7160_v8 }
 0x396   :  { %v2731_v30 = vsel %vm2715_vm6, %v7157_v4, %v2723_v11  ;;  %v7523_v4 = vld [vmem:[#allocation14 + $0x5bc] ss:$28 sps:$4 sm:$0xff]   ;;  %v7518_v7 = vld [vmem:[#allocation14 + $0x5b0] ss:$28 sps:$4 sm:$0xff]   ;;  %v7524_v9 = vld [vmem:[#allocation14 + $0x5e8] ss:$28 sps:$4 sm:$0xff]  }
 0x397   :  { %v2732_v22 = vsel %vm2716_vm7, %v7158_v6, %v2724_v15  ;;  %v2734_v24 = vsel %vm2718_vm8, %v7160_v8, %v2726_v16  ;;  %v8513_v26 = vpack.c.bf16 %v2731_v30, %v2731_v30  ;;  %v7521_v32 = vld [vmem:[#allocation14 + $0x5b8] ss:$28 sps:$4 sm:$0xff]   ;;  %v7526_v6 = vld [vmem:[#allocation14 + $0x5ec] ss:$28 sps:$4 sm:$0xff]   ;;  %v7532_v11 = vld [vmem:[#allocation14 + $0x624] ss:$28 sps:$4 sm:$0xff]  }
 0x398   :  { %v8511_v23 = vpack.c.bf16 %v2732_v22, %v2732_v22  ;;  %v8517_v12 = vpack.c.bf16 %v2734_v24, %v2734_v24  ;;  %v7529_v8 = vld [vmem:[#allocation14 + $0x5f4] ss:$28 sps:$4 sm:$0xff]   ;;  %v7535_v15 = vld [vmem:[#allocation14 + $0x62c] ss:$28 sps:$4 sm:$0xff]   ;;  %v7530_v16 = vld [vmem:[#allocation14 + $0x620] ss:$28 sps:$4 sm:$0xff]   ;;  %v1078_v22 = vrot.slane %v8501_v62, %v8476_v51 }
 0x399   :  { %v7527_v10 = vld [vmem:[#allocation14 + $0x5f0] ss:$28 sps:$4 sm:$0xff]   ;;  %v7533_v30 = vld [vmem:[#allocation14 + $0x628] ss:$28 sps:$4 sm:$0xff]   ;;  %v7538_v17 = vld [vmem:[#allocation14 + $0x65c] ss:$28 sps:$4 sm:$0xff]  }
 0x39a   :  { %5632 = vmatprep.mubr.bf16.mxu1 %v8511_v23  ;;  %5796 = vmatprep.mubr.bf16.mxu0 %v8511_v23  ;;  %v7541_v21 = vld [vmem:[#allocation14 + $0x664] ss:$28 sps:$4 sm:$0xff]   ;;  %v7536_v24 = vld [vmem:[#allocation14 + $0x658] ss:$28 sps:$4 sm:$0xff]  }
 0x39b   :  { %5633 = vmatmul.mubr.bf16.vlgmr.msra.gmra.mrb[8].mxu1 %v8513_v26  ;;  %5797 = vmatmul.mubr.bf16.vlgmr.msra.gmra.mrb[20].mxu0 %v8513_v26 }
 0x39c   :  { %5642 = vmatpush1.bf16.msra.mxu1 %v7458_v52  ;;  %5806 = vmatpush1.bf16.msra.mxu0 %v7461_v25  ;;  %v7539_v52 = vld [vmem:[#allocation14 + $0x660] ss:$28 sps:$4 sm:$0xff]   ;;  %v7544_v25 = vld [vmem:[#allocation14 + $0x694] ss:$28 sps:$4 sm:$0xff]  }
 0x39d   :  { %5673 = vmatprep.mubr.bf16.mxu1 %v8517_v12  ;;  %5837 = vmatprep.mubr.bf16.mxu0 %v8517_v12 }
 0x39e   :  { %5643 = vmatprep.subr.bf16.mxu1 %v7466_v27  ;;  %5807 = vmatprep.subr.bf16.mxu0 %v7469_v28  ;;  %v7547_v27 = vld [vmem:[#allocation14 + $0x69c] ss:$28 sps:$4 sm:$0xff]   ;;  %v7159_v28 = vadd.f32 %v8509_v3, %v1078_v22  ;;  %v7616_v22 = vld [vmem:[#allocation14 + $0x934] ss:$28 sps:$4 sm:$0xff]  }
 0x39f   :  { %v7554_v3 = vld [vmem:[#allocation14 + $0x700] ss:$28 sps:$4 sm:$0xff]  }
 0x3a0   :  { %5644 = vmatpush1.bf16.msra.mxu1 %v7464_v13  ;;  %5808 = vmatpush1.bf16.msra.mxu0 %v7467_v14  ;;  %v7542_v13 = vld [vmem:[#allocation14 + $0x690] ss:$28 sps:$4 sm:$0xff]   ;;  %v7545_v14 = vld [vmem:[#allocation14 + $0x698] ss:$28 sps:$4 sm:$0xff]   ;;  %vm2717_vm9 = vcmp.gt.f32.partialorder %v7159_v28, 0.0 }
 0x3a1   :  { %5645 = vmatprep.subr.bf16.mxu1 %v7472_v18  ;;  %5809 = vmatprep.subr.bf16.mxu0 %v7475_v19  ;;  %v7550_v18 = vld [vmem:[#allocation14 + $0x6cc] ss:$28 sps:$4 sm:$0xff]   ;;  %v7553_v19 = vld [vmem:[#allocation14 + $0x6d4] ss:$28 sps:$4 sm:$0xff]  }
 0x3a4   :  { %5646 = vmatpush1.bf16.msra.mxu1 %v7470_v20  ;;  %5810 = vmatpush1.bf16.msra.mxu0 %v7473_v29  ;;  %v2725_v20 = vmul.f32 0.2, %v7159_v28  ;;  %v7548_v29 = vld [vmem:[#allocation14 + $0x6c8] ss:$28 sps:$4 sm:$0xff]  }
 0x3a5   :  { %5647 = vmatprep.subr.bf16.mxu1 %v7478_v31  ;;  %5811 = vmatprep.subr.bf16.mxu0 %v7481_v33  ;;  %v7551_v31 = vld [vmem:[#allocation14 + $0x6d0] ss:$28 sps:$4 sm:$0xff]   ;;  %v7556_v33 = vld [vmem:[#allocation14 + $0x704] ss:$28 sps:$4 sm:$0xff]  }
 0x3a8   :  { %5648 = vmatpush1.bf16.msra.mxu1 %v7476_v34  ;;  %5812 = vmatpush1.bf16.msra.mxu0 %v7479_v35  ;;  %v7559_v34 = vld [vmem:[#allocation14 + $0x70c] ss:$28 sps:$4 sm:$0xff]   ;;  %v2733_v35 = vsel %vm2717_vm9, %v7159_v28, %v2725_v20  ;;  %v7625_v28 = vld [vmem:[#allocation14 + $0x974] ss:$28 sps:$4 sm:$0xff]   ;;  %v7626_v20 = vld [vmem:[#allocation14 + $0x9a0] ss:$28 sps:$4 sm:$0xff]  }
 0x3a9   :  { %5649 = vmatprep.subr.bf16.mxu1 %v7484_v37  ;;  %5813 = vmatprep.subr.bf16.mxu0 %v7487_v38  ;;  %v7557_v37 = vld [vmem:[#allocation14 + $0x708] ss:$28 sps:$4 sm:$0xff]   ;;  %v8526_v38 = vpack.c.bf16 %v2733_v35, %v2733_v35  ;;  %v1089_v35 = vsub.s32 5, %v8425_v36 }
 0x3ac   :  { %5650 = vmatpush1.bf16.msra.mxu1 %v7482_v39  ;;  %5814 = vmatpush1.bf16.msra.mxu0 %v7485_v40  ;;  %v7562_v39 = vld [vmem:[#allocation14 + $0x73c] ss:$28 sps:$4 sm:$0xff]   ;;  %v7565_v40 = vld [vmem:[#allocation14 + $0x744] ss:$28 sps:$4 sm:$0xff]  }
 0x3ad   :  { %5651 = vmatprep.subr.bf16.mxu1 %v7490_v41  ;;  %5815 = vmatprep.subr.bf16.mxu0 %v7493_v44  ;;  %v7560_v41 = vld [vmem:[#allocation14 + $0x738] ss:$28 sps:$4 sm:$0xff]   ;;  %v7563_v44 = vld [vmem:[#allocation14 + $0x740] ss:$28 sps:$4 sm:$0xff]  }
 0x3b0   :  { %5652 = vmatpush1.bf16.msra.mxu1 %v7488_v45  ;;  %5816 = vmatpush1.bf16.msra.mxu0 %v7491_v46  ;;  %v7568_v45 = vld [vmem:[#allocation14 + $0x774] ss:$28 sps:$4 sm:$0xff]   ;;  %v7571_v46 = vld [vmem:[#allocation14 + $0x77c] ss:$28 sps:$4 sm:$0xff]  }
 0x3b1   :  { %5653 = vmatprep.subr.bf16.mxu1 %v7496_v47  ;;  %5817 = vmatprep.subr.bf16.mxu0 %v7499_v48  ;;  %v7566_v47 = vld [vmem:[#allocation14 + $0x770] ss:$28 sps:$4 sm:$0xff]   ;;  %v7569_v48 = vld [vmem:[#allocation14 + $0x778] ss:$28 sps:$4 sm:$0xff]  }
 0x3b4   :  { %5654 = vmatpush1.bf16.msra.mxu1 %v7494_v49  ;;  %5818 = vmatpush1.bf16.msra.mxu0 %v7497_v50  ;;  %v7574_v49 = vld [vmem:[#allocation14 + $0x7ac] ss:$28 sps:$4 sm:$0xff]   ;;  %v7577_v50 = vld [vmem:[#allocation14 + $0x7b4] ss:$28 sps:$4 sm:$0xff]  }
 0x3b5   :  { %5655 = vmatprep.subr.bf16.mxu1 %v7502_v53  ;;  %5819 = vmatprep.subr.bf16.mxu0 %v7505_v54  ;;  %v7572_v53 = vld [vmem:[#allocation14 + $0x7a8] ss:$28 sps:$4 sm:$0xff]   ;;  %v7575_v54 = vld [vmem:[#allocation14 + $0x7b0] ss:$28 sps:$4 sm:$0xff]  }
 0x3b8   :  { %5656 = vmatpush1.bf16.msra.mxu1 %v7500_v55  ;;  %5820 = vmatpush1.bf16.msra.mxu0 %v7503_v57  ;;  %v7580_v55 = vld [vmem:[#allocation14 + $0x7e4] ss:$28 sps:$4 sm:$0xff]   ;;  %v7583_v57 = vld [vmem:[#allocation14 + $0x7ec] ss:$28 sps:$4 sm:$0xff]  }
 0x3b9   :  { %5657 = vmatprep.subr.bf16.mxu1 %v7508_v58  ;;  %5821 = vmatprep.subr.bf16.mxu0 %v7511_v59  ;;  %v7578_v58 = vld [vmem:[#allocation14 + $0x7e0] ss:$28 sps:$4 sm:$0xff]   ;;  %v7581_v59 = vld [vmem:[#allocation14 + $0x7e8] ss:$28 sps:$4 sm:$0xff]  }
 0x3bc   :  { %5658 = vmatpush1.bf16.msra.mxu1 %v7506_v5  ;;  %5822 = vmatpush1.bf16.msra.mxu0 %v7509_v60  ;;  %v7586_v5 = vld [vmem:[#allocation14 + $0x81c] ss:$28 sps:$4 sm:$0xff]   ;;  %v7589_v60 = vld [vmem:[#allocation14 + $0x824] ss:$28 sps:$4 sm:$0xff]  }
 0x3bd   :  { %5659 = vmatprep.subr.bf16.mxu1 %v7514_v61  ;;  %5823 = vmatprep.subr.bf16.mxu0 %v7517_v63  ;;  %v7584_v61 = vld [vmem:[#allocation14 + $0x818] ss:$28 sps:$4 sm:$0xff]   ;;  %v7587_v63 = vld [vmem:[#allocation14 + $0x820] ss:$28 sps:$4 sm:$0xff]  }
 0x3c0   :  { %5660 = vmatpush1.bf16.msra.mxu1 %v7512_v0  ;;  %5824 = vmatpush1.bf16.msra.mxu0 %v7515_v1  ;;  %v7592_v0 = vld [vmem:[#allocation14 + $0x854] ss:$28 sps:$4 sm:$0xff]   ;;  %v7595_v1 = vld [vmem:[#allocation14 + $0x85c] ss:$28 sps:$4 sm:$0xff]  }
 0x3c1   :  { %5661 = vmatprep.subr.bf16.mxu1 %v7520_v2  ;;  %5825 = vmatprep.subr.bf16.mxu0 %v7523_v4  ;;  %v7590_v2 = vld [vmem:[#allocation14 + $0x850] ss:$28 sps:$4 sm:$0xff]   ;;  %v7593_v4 = vld [vmem:[#allocation14 + $0x858] ss:$28 sps:$4 sm:$0xff]  }
 0x3c4   :  { %5662 = vmatpush1.bf16.msra.mxu1 %v7518_v7  ;;  %5826 = vmatpush1.bf16.msra.mxu0 %v7521_v32  ;;  %v7598_v7 = vld [vmem:[#allocation14 + $0x88c] ss:$28 sps:$4 sm:$0xff]   ;;  %v7601_v32 = vld [vmem:[#allocation14 + $0x894] ss:$28 sps:$4 sm:$0xff]  }
 0x3c5   :  { %5663 = vmatprep.subr.bf16.mxu1 %v7526_v6  ;;  %5827 = vmatprep.subr.bf16.mxu0 %v7529_v8  ;;  %v7596_v6 = vld [vmem:[#allocation14 + $0x888] ss:$28 sps:$4 sm:$0xff]   ;;  %v7599_v8 = vld [vmem:[#allocation14 + $0x890] ss:$28 sps:$4 sm:$0xff]  }
 0x3c8   :  { %5664 = vmatpush1.bf16.msra.mxu1 %v7524_v9  ;;  %5828 = vmatpush1.bf16.msra.mxu0 %v7527_v10  ;;  %v7604_v9 = vld [vmem:[#allocation14 + $0x8c4] ss:$28 sps:$4 sm:$0xff]   ;;  %v7607_v10 = vld [vmem:[#allocation14 + $0x8cc] ss:$28 sps:$4 sm:$0xff]  }
 0x3c9   :  { %5665 = vmatprep.subr.bf16.mxu1 %v7532_v11  ;;  %5829 = vmatprep.subr.bf16.mxu0 %v7535_v15  ;;  %v7602_v11 = vld [vmem:[#allocation14 + $0x8c0] ss:$28 sps:$4 sm:$0xff]   ;;  %v7605_v15 = vld [vmem:[#allocation14 + $0x8c8] ss:$28 sps:$4 sm:$0xff]  }
 0x3cc   :  { %5666 = vmatpush1.bf16.msra.mxu1 %v7530_v16  ;;  %5830 = vmatpush1.bf16.msra.mxu0 %v7533_v30  ;;  %v7610_v16 = vld [vmem:[#allocation14 + $0x8fc] ss:$28 sps:$4 sm:$0xff]   ;;  %v7613_v30 = vld [vmem:[#allocation14 + $0x904] ss:$28 sps:$4 sm:$0xff]  }
 0x3cd   :  { %5667 = vmatprep.subr.bf16.mxu1 %v7538_v17  ;;  %5831 = vmatprep.subr.bf16.mxu0 %v7541_v21  ;;  %v7608_v17 = vld [vmem:[#allocation14 + $0x8f8] ss:$28 sps:$4 sm:$0xff]   ;;  %v7611_v21 = vld [vmem:[#allocation14 + $0x900] ss:$28 sps:$4 sm:$0xff]  }
 0x3d0   :  { %5668 = vmatpush1.bf16.msra.mxu1 %v7536_v24  ;;  %5832 = vmatpush1.bf16.msra.mxu0 %v7539_v52  ;;  %v7619_v24 = vld [vmem:[#allocation14 + $0x93c] ss:$28 sps:$4 sm:$0xff]   ;;  %v7614_v52 = vld [vmem:[#allocation14 + $0x930] ss:$28 sps:$4 sm:$0xff]  }
 0x3d1   :  { %5669 = vmatprep.subr.bf16.mxu1 %v7544_v25  ;;  %5833 = vmatprep.subr.bf16.mxu0 %v7547_v27  ;;  %v7617_v25 = vld [vmem:[#allocation14 + $0x938] ss:$28 sps:$4 sm:$0xff]   ;;  %v7622_v27 = vld [vmem:[#allocation14 + $0x96c] ss:$28 sps:$4 sm:$0xff]  }
 0x3d4   :  { %5670 = vmatpush1.bf16.msra.mxu1 %v7542_v13  ;;  %5834 = vmatpush1.bf16.msra.mxu0 %v7545_v14  ;;  %v7620_v13 = vld [vmem:[#allocation14 + $0x968] ss:$28 sps:$4 sm:$0xff]   ;;  %v7623_v14 = vld [vmem:[#allocation14 + $0x970] ss:$28 sps:$4 sm:$0xff]  }
 0x3d5   :  { %5671 = vmatprep.subr.bf16.mxu1 %v7550_v18  ;;  %5835 = vmatprep.subr.bf16.mxu0 %v7553_v19  ;;  %v7628_v18 = vld [vmem:[#allocation14 + $0x9a4] ss:$28 sps:$4 sm:$0xff]   ;;  %v7631_v19 = vld [vmem:[#allocation14 + $0x9ac] ss:$28 sps:$4 sm:$0xff]  }
 0x3d8   :  { %5672 = vmatpush1.bf16.msra.mxu1 %v7548_v29  ;;  %5836 = vmatpush1.bf16.msra.mxu0 %v7551_v31  ;;  %v7629_v29 = vld [vmem:[#allocation14 + $0x9a8] ss:$28 sps:$4 sm:$0xff]   ;;  %v7634_v31 = vld [vmem:[#allocation14 + $0x9dc] ss:$28 sps:$4 sm:$0xff]  }
 0x3d9   :  { %5682 = vmatprep.subr.bf16.mxu1 %v7556_v33  ;;  %5846 = vmatprep.subr.bf16.mxu0 %v7559_v34  ;;  %v7637_v33 = vld [vmem:[#allocation14 + $0x9e4] ss:$28 sps:$4 sm:$0xff]   ;;  %v1085_v34 = vsub.s32 4, %v8425_v36 }
 0x3db   :  { %5674 = vmatmul.mubr.bf16.vlgmr.msra.gmra.mrb[8].mxu1 %v8526_v38  ;;  %5838 = vmatmul.mubr.bf16.vlgmr.msra.gmra.mrb[20].mxu0 %v8526_v38 }
 0x3dc   :  { %5683 = vmatpush1.bf16.msra.mxu1 %v7554_v3  ;;  %5847 = vmatpush1.bf16.msra.mxu0 %v7557_v37  ;;  %v7632_v3 = vld [vmem:[#allocation14 + $0x9d8] ss:$28 sps:$4 sm:$0xff]   ;;  %v7635_v37 = vld [vmem:[#allocation14 + $0x9e0] ss:$28 sps:$4 sm:$0xff]  }
 0x3dd   :  { %5684 = vmatprep.subr.bf16.mxu1 %v7562_v39  ;;  %5848 = vmatprep.subr.bf16.mxu0 %v7565_v40  ;;  %v1097_v39 = vsub.s32 7, %v8425_v36  ;;  %v7640_v40 = vld [vmem:[#allocation14 + $0xa14] ss:$28 sps:$4 sm:$0xff]  }
 0x3e0   :  { %5685 = vmatpush1.bf16.msra.mxu1 %v7560_v41  ;;  %5849 = vmatpush1.bf16.msra.mxu0 %v7563_v44  ;;  %v7643_v41 = vld [vmem:[#allocation14 + $0xa1c] ss:$28 sps:$4 sm:$0xff]   ;;  %v1086_v44 = vrot.slane %v8501_v62, %v1085_v34 }
 0x3e1   :  { %5686 = vmatprep.subr.bf16.mxu1 %v7568_v45  ;;  %5850 = vmatprep.subr.bf16.mxu0 %v7571_v46  ;;  %v1090_v45 = vrot.slane %v8501_v62, %v1089_v35  ;;  %v1098_v46 = vrot.slane %v8501_v62, %v1097_v39  ;;  %v7682_v39 = vld [vmem:[#allocation14 + $0xb9c] ss:$28 sps:$4 sm:$0xff]  }
 0x3e4   :  { %5687 = vmatpush1.bf16.msra.mxu1 %v7566_v47  ;;  %5851 = vmatpush1.bf16.msra.mxu0 %v7569_v48  ;;  %v7638_v47 = vld [vmem:[#allocation14 + $0xa10] ss:$28 sps:$4 sm:$0xff]   ;;  %v7641_v48 = vld [vmem:[#allocation14 + $0xa18] ss:$28 sps:$4 sm:$0xff]  }
 0x3e5   :  { %5688 = vmatprep.subr.bf16.mxu1 %v7574_v49  ;;  %5852 = vmatprep.subr.bf16.mxu0 %v7577_v50  ;;  %v7646_v50 = vld [vmem:[#allocation14 + $0xa4c] ss:$28 sps:$4 sm:$0xff]  }
 0x3e8   :  { %5689 = vmatpush1.bf16.msra.mxu1 %v7572_v53  ;;  %5853 = vmatpush1.bf16.msra.mxu0 %v7575_v54  ;;  %v7649_v53 = vld [vmem:[#allocation14 + $0xa54] ss:$28 sps:$4 sm:$0xff]  }
 0x3e9   :  { %5690 = vmatprep.subr.bf16.mxu1 %v7580_v55  ;;  %5854 = vmatprep.subr.bf16.mxu0 %v7583_v57 }
 0x3ec   :  { %5691 = vmatpush1.bf16.msra.mxu1 %v7578_v58  ;;  %5855 = vmatpush1.bf16.msra.mxu0 %v7581_v59  ;;  %v7644_v58 = vld [vmem:[#allocation14 + $0xa48] ss:$28 sps:$4 sm:$0xff]  }
 0x3ed   :  { %5692 = vmatprep.subr.bf16.mxu1 %v7586_v5  ;;  %5856 = vmatprep.subr.bf16.mxu0 %v7589_v60 }
 0x3f0   :  { %5693 = vmatpush1.bf16.msra.mxu1 %v7584_v61  ;;  %5857 = vmatpush1.bf16.msra.mxu0 %v7587_v63  ;;  %v7647_v61 = vld [vmem:[#allocation14 + $0xa50] ss:$28 sps:$4 sm:$0xff]   ;;  %v7652_v63 = vld [vmem:[#allocation14 + $0xa84] ss:$28 sps:$4 sm:$0xff]  }
 0x3f1   :  { %5694 = vmatprep.subr.bf16.mxu1 %v7592_v0  ;;  %5858 = vmatprep.subr.bf16.mxu0 %v7595_v1 }
 0x3f4   :  { %5695 = vmatpush1.bf16.msra.mxu1 %v7590_v2  ;;  %5859 = vmatpush1.bf16.msra.mxu0 %v7593_v4 }
 0x3f5   :  { %5696 = vmatprep.subr.bf16.mxu1 %v7598_v7  ;;  %5860 = vmatprep.subr.bf16.mxu0 %v7601_v32  ;;  %v7655_v32 = vld [vmem:[#allocation14 + $0xa8c] ss:$28 sps:$4 sm:$0xff]  }
 0x3f8   :  { %5697 = vmatpush1.bf16.msra.mxu1 %v7596_v6  ;;  %5861 = vmatpush1.bf16.msra.mxu0 %v7599_v8 }
 0x3f9   :  { %5698 = vmatprep.subr.bf16.mxu1 %v7604_v9  ;;  %5862 = vmatprep.subr.bf16.mxu0 %v7607_v10 }
 0x3fc   :  { %5699 = vmatpush1.bf16.msra.mxu1 %v7602_v11  ;;  %5863 = vmatpush1.bf16.msra.mxu0 %v7605_v15 }
 0x3fd   :  { %5700 = vmatprep.subr.bf16.mxu1 %v7610_v16  ;;  %5864 = vmatprep.subr.bf16.mxu0 %v7613_v30  ;;  %v7650_v16 = vld [vmem:[#allocation14 + $0xa80] ss:$28 sps:$4 sm:$0xff]   ;;  %v7653_v30 = vld [vmem:[#allocation14 + $0xa88] ss:$28 sps:$4 sm:$0xff]  }
 0x400   :  { %5701 = vmatpush1.bf16.msra.mxu1 %v7608_v17  ;;  %5865 = vmatpush1.bf16.msra.mxu0 %v7611_v21  ;;  %v7658_v21 = vld [vmem:[#allocation14 + $0xabc] ss:$28 sps:$4 sm:$0xff]  }
 0x401   :  { %5702 = vmatprep.subr.bf16.mxu1 %v7616_v22  ;;  %5866 = vmatprep.subr.bf16.mxu0 %v7619_v24  ;;  %v7661_v22 = vld [vmem:[#allocation14 + $0xac4] ss:$28 sps:$4 sm:$0xff]  }
 0x404   :  { %5703 = vmatpush1.bf16.msra.mxu1 %v7614_v52  ;;  %5867 = vmatpush1.bf16.msra.mxu0 %v7617_v25  ;;  %v7656_v52 = vld [vmem:[#allocation14 + $0xab8] ss:$28 sps:$4 sm:$0xff]   ;;  %v7659_v25 = vld [vmem:[#allocation14 + $0xac0] ss:$28 sps:$4 sm:$0xff]  }
 0x405   :  { %5704 = vmatprep.subr.bf16.mxu1 %v7622_v27  ;;  %5868 = vmatprep.subr.bf16.mxu0 %v7625_v28  ;;  %v7664_v27 = vld [vmem:[#allocation14 + $0xaf4] ss:$28 sps:$4 sm:$0xff]   ;;  %v7667_v28 = vld [vmem:[#allocation14 + $0xafc] ss:$28 sps:$4 sm:$0xff]  }
 0x408   :  { %5705 = vmatpush1.bf16.msra.mxu1 %v7620_v13  ;;  %5869 = vmatpush1.bf16.msra.mxu0 %v7623_v14  ;;  %v7662_v13 = vld [vmem:[#allocation14 + $0xaf0] ss:$28 sps:$4 sm:$0xff]   ;;  %v7665_v14 = vld [vmem:[#allocation14 + $0xaf8] ss:$28 sps:$4 sm:$0xff]  }
 0x409   :  { %5706 = vmatprep.subr.bf16.mxu1 %v7628_v18  ;;  %5870 = vmatprep.subr.bf16.mxu0 %v7631_v19  ;;  %v7670_v18 = vld [vmem:[#allocation14 + $0xb2c] ss:$28 sps:$4 sm:$0xff]   ;;  %v7673_v19 = vld [vmem:[#allocation14 + $0xb34] ss:$28 sps:$4 sm:$0xff]  }
 0x40c   :  { %5707 = vmatpush1.bf16.msra.mxu1 %v7626_v20  ;;  %5871 = vmatpush1.bf16.msra.mxu0 %v7629_v29  ;;  %v7668_v20 = vld [vmem:[#allocation14 + $0xb28] ss:$28 sps:$4 sm:$0xff]   ;;  %v7671_v29 = vld [vmem:[#allocation14 + $0xb30] ss:$28 sps:$4 sm:$0xff]  }
 0x40d   :  { %5708 = vmatprep.subr.bf16.mxu1 %v7634_v31  ;;  %5872 = vmatprep.subr.bf16.mxu0 %v7637_v33  ;;  %v7676_v31 = vld [vmem:[#allocation14 + $0xb64] ss:$28 sps:$4 sm:$0xff]   ;;  %v7679_v33 = vld [vmem:[#allocation14 + $0xb6c] ss:$28 sps:$4 sm:$0xff]  }
 0x410   :  { %5709 = vmatpush1.bf16.msra.mxu1 %v7632_v3  ;;  %5873 = vmatpush1.bf16.msra.mxu0 %v7635_v37  ;;  %v7674_v3 = vld [vmem:[#allocation14 + $0xb60] ss:$28 sps:$4 sm:$0xff]   ;;  %v7677_v37 = vld [vmem:[#allocation14 + $0xb68] ss:$28 sps:$4 sm:$0xff]  }
 0x411   :  { %v2626_v49 = vpop.f32.mrb[4].mxu1  ;;  %5710 = vmatprep.subr.bf16.mxu1 %v7640_v40  ;;  %5874 = vmatprep.subr.bf16.mxu0 %v7643_v41  ;;  %v7685_v40 = vld [vmem:[#allocation14 + $0xba4] ss:$28 sps:$4 sm:$0xff]   ;;  %v7680_v41 = vld [vmem:[#allocation14 + $0xb98] ss:$28 sps:$4 sm:$0xff]  }
 0x412   :  { %v7161_v54 = vadd.f32 %v2626_v49, %v1086_v44  ;;  %v8540_v55 = vpop.f32.mrb[16].mxu0  ;;  %v2628_v57 = vpop.f32.mrb[5].mxu1  ;;  %v7683_v44 = vld [vmem:[#allocation14 + $0xba0] ss:$28 sps:$4 sm:$0xff]   ;;  %v7694_v49 = vld [vmem:[#allocation14 + $0xc0c] ss:$28 sps:$4 sm:$0xff]  }
 0x413   :  { %v7162_v59 = vadd.f32 %v2628_v57, %v1090_v45  ;;  %v2710_v5 = vpop.f32.mrb[17].mxu0  ;;  %v2630_v60 = vpop.f32.mrb[6].mxu1  ;;  %v7688_v45 = vld [vmem:[#allocation14 + $0xbd4] ss:$28 sps:$4 sm:$0xff]   ;;  %v7700_v57 = vld [vmem:[#allocation14 + $0xc44] ss:$28 sps:$4 sm:$0xff]  }
 0x414   :  { %vm2719_vm10 = vcmp.gt.f32.partialorder %v7161_v54, 0.0  ;;  %v2727_v0 = vmul.f32 0.2, %v7161_v54  ;;  %v7164_v1 = vadd.f32 %v2710_v5, %v1098_v46  ;;  %v2712_v2 = vpop.f32.mrb[18].mxu0  ;;  %5711 = vmatpush1.bf16.msra.mxu1 %v7638_v47  ;;  %5875 = vmatpush1.bf16.msra.mxu0 %v7641_v48  ;;  %v2631_v4 = vpop.f32.mrb[7].mxu1 }
 0x415   :  { %vm2720_vm11 = vcmp.gt.f32.partialorder %v7162_v59, 0.0  ;;  %v2728_v7 = vmul.f32 0.2, %v7162_v59  ;;  %5712 = vmatprep.subr.bf16.mxu1 %v7646_v50  ;;  %5876 = vmatprep.subr.bf16.mxu0 %v7649_v53  ;;  %v2713_v9 = vpop.f32.mrb[19].mxu0  ;;  %v7691_v46 = vld [vmem:[#allocation14 + $0xbdc] ss:$28 sps:$4 sm:$0xff]  }
 0x416   :  { %v2735_v6 = vsel %vm2719_vm10, %v7161_v54, %v2727_v0  ;;  %vm2722_vm12 = vcmp.gt.f32.partialorder %v7164_v1, 0.0  ;;  %v2730_v8 = vmul.f32 0.2, %v7164_v1  ;;  %v7686_v47 = vld [vmem:[#allocation14 + $0xbd0] ss:$28 sps:$4 sm:$0xff]  }
 0x417   :  { %v2736_v10 = vsel %vm2720_vm11, %v7162_v59, %v2728_v7  ;;  %v8544_v17 = vpack.c.bf16 %v2735_v6, %v2735_v6  ;;  %v7689_v48 = vld [vmem:[#allocation14 + $0xbd8] ss:$28 sps:$4 sm:$0xff]   ;;  %v7692_v53 = vld [vmem:[#allocation14 + $0xc08] ss:$28 sps:$4 sm:$0xff]   ;;  %v7695_v54 = vld [vmem:[#allocation14 + $0xc10] ss:$28 sps:$4 sm:$0xff]  }
 0x418   :  { %v8542_v11 = vpack.c.bf16 %v2736_v10, %v2736_v10  ;;  %v2738_v15 = vsel %vm2722_vm12, %v7164_v1, %v2730_v8  ;;  %5713 = vmatpush1.bf16.msra.mxu1 %v7644_v58  ;;  %5877 = vmatpush1.bf16.msra.mxu0 %v7647_v61  ;;  %v7697_v50 = vld [vmem:[#allocation14 + $0xc14] ss:$28 sps:$4 sm:$0xff]   ;;  %v7703_v58 = vld [vmem:[#allocation14 + $0xc4c] ss:$28 sps:$4 sm:$0xff]   ;;  %v7698_v59 = vld [vmem:[#allocation14 + $0xc40] ss:$28 sps:$4 sm:$0xff]  }
 0x419   :  { %5723 = vmatprep.subr.bf16.mxu1 %v7652_v63  ;;  %5887 = vmatprep.subr.bf16.mxu0 %v7655_v32  ;;  %v8548_v24 = vpack.c.bf16 %v2738_v15, %v2738_v15  ;;  %v7701_v5 = vld [vmem:[#allocation14 + $0xc48] ss:$28 sps:$4 sm:$0xff]   ;;  %v7706_v60 = vld [vmem:[#allocation14 + $0xc7c] ss:$28 sps:$4 sm:$0xff]   ;;  %v7712_v1 = vld [vmem:[#allocation14 + $0xcb4] ss:$28 sps:$4 sm:$0xff]  }
 0x41a   :  { %5714 = vmatprep.mubr.bf16.mxu1 %v8542_v11  ;;  %5878 = vmatprep.mubr.bf16.mxu0 %v8542_v11  ;;  %v7709_v61 = vld [vmem:[#allocation14 + $0xc84] ss:$28 sps:$4 sm:$0xff]   ;;  %v7704_v63 = vld [vmem:[#allocation14 + $0xc78] ss:$28 sps:$4 sm:$0xff]   ;;  %v7710_v4 = vld [vmem:[#allocation14 + $0xcb0] ss:$28 sps:$4 sm:$0xff]  }
 0x41b   :  { %5715 = vmatmul.mubr.bf16.vlgmr.msra.gmra.mrb[8].mxu1 %v8544_v17  ;;  %5879 = vmatmul.mubr.bf16.vlgmr.msra.gmra.mrb[20].mxu0 %v8544_v17  ;;  %v7707_v0 = vld [vmem:[#allocation14 + $0xc80] ss:$28 sps:$4 sm:$0xff]   ;;  %v7713_v7 = vld [vmem:[#allocation14 + $0xcb8] ss:$28 sps:$4 sm:$0xff]   ;;  %v7718_v32 = vld [vmem:[#allocation14 + $0xcec] ss:$28 sps:$4 sm:$0xff]  }
 0x41c   :  { %5724 = vmatpush1.bf16.msra.mxu1 %v7650_v16  ;;  %5888 = vmatpush1.bf16.msra.mxu0 %v7653_v30  ;;  %v7715_v2 = vld [vmem:[#allocation14 + $0xcbc] ss:$28 sps:$4 sm:$0xff]   ;;  %v7721_v6 = vld [vmem:[#allocation14 + $0xcf4] ss:$28 sps:$4 sm:$0xff]   ;;  %v7716_v8 = vld [vmem:[#allocation14 + $0xce8] ss:$28 sps:$4 sm:$0xff]  }
 0x41d   :  { %5755 = vmatprep.mubr.bf16.mxu1 %v8548_v24  ;;  %5919 = vmatprep.mubr.bf16.mxu0 %v8548_v24  ;;  %v7719_v9 = vld [vmem:[#allocation14 + $0xcf0] ss:$28 sps:$4 sm:$0xff]   ;;  %v7724_v10 = vld [vmem:[#allocation14 + $0xd24] ss:$28 sps:$4 sm:$0xff]   ;;  %v1093_v16 = vsub.s32 6, %v8425_v36 }
 0x41e   :  { %5725 = vmatprep.subr.bf16.mxu1 %v7658_v21  ;;  %5889 = vmatprep.subr.bf16.mxu0 %v7661_v22  ;;  %v7727_v15 = vld [vmem:[#allocation14 + $0xd2c] ss:$28 sps:$4 sm:$0xff]   ;;  %v7722_v30 = vld [vmem:[#allocation14 + $0xd20] ss:$28 sps:$4 sm:$0xff]  }
 0x41f   :  { %v7725_v21 = vld [vmem:[#allocation14 + $0xd28] ss:$28 sps:$4 sm:$0xff]   ;;  %v7730_v22 = vld [vmem:[#allocation14 + $0xd5c] ss:$28 sps:$4 sm:$0xff]  }
 0x420   :  { %5726 = vmatpush1.bf16.msra.mxu1 %v7656_v52  ;;  %5890 = vmatpush1.bf16.msra.mxu0 %v7659_v25  ;;  %v7733_v52 = vld [vmem:[#allocation14 + $0xd64] ss:$28 sps:$4 sm:$0xff]   ;;  %v1094_v25 = vrot.slane %v8501_v62, %v1093_v16 }
 0x421   :  { %5727 = vmatprep.subr.bf16.mxu1 %v7664_v27  ;;  %5891 = vmatprep.subr.bf16.mxu0 %v7667_v28  ;;  %v7728_v27 = vld [vmem:[#allocation14 + $0xd58] ss:$28 sps:$4 sm:$0xff]   ;;  %v7731_v28 = vld [vmem:[#allocation14 + $0xd60] ss:$28 sps:$4 sm:$0xff]   ;;  %v7740_v62 = vld [vmem:[#allocation14 + $0xdc8] ss:$28 sps:$4 sm:$0xff]  }
 0x424   :  { %5728 = vmatpush1.bf16.msra.mxu1 %v7662_v13  ;;  %5892 = vmatpush1.bf16.msra.mxu0 %v7665_v14  ;;  %v7736_v13 = vld [vmem:[#allocation14 + $0xd94] ss:$28 sps:$4 sm:$0xff]   ;;  %v7739_v14 = vld [vmem:[#allocation14 + $0xd9c] ss:$28 sps:$4 sm:$0xff]  }
 0x425   :  { %5729 = vmatprep.subr.bf16.mxu1 %v7670_v18  ;;  %5893 = vmatprep.subr.bf16.mxu0 %v7673_v19  ;;  %v7163_v18 = vadd.f32 %v8540_v55, %v1094_v25  ;;  %v7734_v19 = vld [vmem:[#allocation14 + $0xd90] ss:$28 sps:$4 sm:$0xff]   ;;  %v7790_v25 = vld [vmem:[#allocation14 + $0x398] ss:$28 sps:$4 sm:$0xff]  }
 0x426   :  { %v7746_v55 = vld [vmem:[#allocation14 + $0x10] ss:$28 sps:$4 sm:$0xff]  }
 0x427   :  { %vm2721_vm13 = vcmp.gt.f32.partialorder %v7163_v18, 0.0 }
 0x428   :  { %5730 = vmatpush1.bf16.msra.mxu1 %v7668_v20  ;;  %5894 = vmatpush1.bf16.msra.mxu0 %v7671_v29  ;;  %v7737_v20 = vld [vmem:[#allocation14 + $0xd98] ss:$28 sps:$4 sm:$0xff]   ;;  %v7742_v29 = vld [vmem:[#allocation14 + $0xdcc] ss:$28 sps:$4 sm:$0xff]  }
 0x429   :  { %5731 = vmatprep.subr.bf16.mxu1 %v7676_v31  ;;  %5895 = vmatprep.subr.bf16.mxu0 %v7679_v33  ;;  %v7745_v31 = vld [vmem:[#allocation14 + $0xdd4] ss:$28 sps:$4 sm:$0xff]   ;;  %v2729_v33 = vmul.f32 0.2, %v7163_v18 }
 0x42c   :  { %5732 = vmatpush1.bf16.msra.mxu1 %v7674_v3  ;;  %5896 = vmatpush1.bf16.msra.mxu0 %v7677_v37  ;;  %v7743_v3 = vld [vmem:[#allocation14 + $0xdd0] ss:$28 sps:$4 sm:$0xff]  }
 0x42d   :  { %5733 = vmatprep.subr.bf16.mxu1 %v7682_v39  ;;  %5897 = vmatprep.subr.bf16.mxu0 %v7685_v40  ;;  %v7748_v37 = vld [vmem:[#allocation14 + $0x14] ss:$28 sps:$4 sm:$0xff]   ;;  %v2737_v40 = vsel %vm2721_vm13, %v7163_v18, %v2729_v33  ;;  %v7798_v18 = vld [vmem:[#allocation14 + $0x244] ss:$28 sps:$4 sm:$0xff]  }
 0x42e   :  { %v7749_v39 = vld [vmem:[#allocation14 + $0x1d8] ss:$28 sps:$4 sm:$0xff]   ;;  %v7804_v33 = vld [vmem:[#allocation14 + $0x600] ss:$28 sps:$4 sm:$0xff]  }
 0x430   :  { %5734 = vmatpush1.bf16.msra.mxu1 %v7680_v41  ;;  %5898 = vmatpush1.bf16.msra.mxu0 %v7683_v44  ;;  %v8559_v41 = vpack.c.bf16 %v2737_v40, %v2737_v40  ;;  %v7750_v44 = vld [vmem:[#allocation14 + $0x18] ss:$28 sps:$4 sm:$0xff]   ;;  %v7806_v40 = vld [vmem:[#allocation14 + $0x2b0] ss:$28 sps:$4 sm:$0xff]  }
 0x431   :  { %5735 = vmatprep.subr.bf16.mxu1 %v7688_v45  ;;  %5899 = vmatprep.subr.bf16.mxu0 %v7691_v46  ;;  %v7753_v45 = vld [vmem:[#allocation14 + $0x4c] ss:$28 sps:$4 sm:$0xff]  }
 0x432   :  { %v7754_v46 = vld [vmem:[#allocation14 + $0x210] ss:$28 sps:$4 sm:$0xff]  }
 0x434   :  { %5736 = vmatpush1.bf16.msra.mxu1 %v7686_v47  ;;  %5900 = vmatpush1.bf16.msra.mxu0 %v7689_v48  ;;  %v7751_v47 = vld [vmem:[#allocation14 + $0x48] ss:$28 sps:$4 sm:$0xff]   ;;  %v7755_v48 = vld [vmem:[#allocation14 + $0x50] ss:$28 sps:$4 sm:$0xff]  }
 0x435   :  { %5737 = vmatprep.subr.bf16.mxu1 %v7694_v49  ;;  %5901 = vmatprep.subr.bf16.mxu0 %v7697_v50  ;;  %v7758_v49 = vld [vmem:[#allocation14 + $0x84] ss:$28 sps:$4 sm:$0xff]  }
 0x436   :  { %v7759_v50 = vld [vmem:[#allocation14 + $0x248] ss:$28 sps:$4 sm:$0xff]  }
 0x438   :  { %5738 = vmatpush1.bf16.msra.mxu1 %v7692_v53  ;;  %5902 = vmatpush1.bf16.msra.mxu0 %v7695_v54  ;;  %v7756_v53 = vld [vmem:[#allocation14 + $0x80] ss:$28 sps:$4 sm:$0xff]   ;;  %v7760_v54 = vld [vmem:[#allocation14 + $0x88] ss:$28 sps:$4 sm:$0xff]  }
 0x439   :  { %5739 = vmatprep.subr.bf16.mxu1 %v7700_v57  ;;  %5903 = vmatprep.subr.bf16.mxu0 %v7703_v58  ;;  %v7763_v57 = vld [vmem:[#allocation14 + $0xbc] ss:$28 sps:$4 sm:$0xff]  }
 0x43a   :  { %v7764_v58 = vld [vmem:[#allocation14 + $0x280] ss:$28 sps:$4 sm:$0xff]  }
 0x43c   :  { %5740 = vmatpush1.bf16.msra.mxu1 %v7698_v59  ;;  %5904 = vmatpush1.bf16.msra.mxu0 %v7701_v5  ;;  %v7761_v59 = vld [vmem:[#allocation14 + $0xb8] ss:$28 sps:$4 sm:$0xff]   ;;  %v7765_v5 = vld [vmem:[#allocation14 + $0xc0] ss:$28 sps:$4 sm:$0xff]  }
 0x43d   :  { %5741 = vmatprep.subr.bf16.mxu1 %v7706_v60  ;;  %5905 = vmatprep.subr.bf16.mxu0 %v7709_v61  ;;  %v7768_v60 = vld [vmem:[#allocation14 + $0xf4] ss:$28 sps:$4 sm:$0xff]  }
 0x43e   :  { %v7766_v61 = vld [vmem:[#allocation14 + $0xf0] ss:$28 sps:$4 sm:$0xff]  }
 0x440   :  { %5742 = vmatpush1.bf16.msra.mxu1 %v7704_v63  ;;  %5906 = vmatpush1.bf16.msra.mxu0 %v7707_v0  ;;  %v7770_v63 = vld [vmem:[#allocation14 + $0xf8] ss:$28 sps:$4 sm:$0xff]   ;;  %v7773_v0 = vld [vmem:[#allocation14 + $0x12c] ss:$28 sps:$4 sm:$0xff]  }
 0x441   :  { %5743 = vmatprep.subr.bf16.mxu1 %v7712_v1  ;;  %5907 = vmatprep.subr.bf16.mxu0 %v7715_v2  ;;  %v7774_v1 = vld [vmem:[#allocation14 + $0x2f0] ss:$28 sps:$4 sm:$0xff]   ;;  %v7771_v2 = vld [vmem:[#allocation14 + $0x128] ss:$28 sps:$4 sm:$0xff]  }
 0x444   :  { %5744 = vmatpush1.bf16.msra.mxu1 %v7710_v4  ;;  %5908 = vmatpush1.bf16.msra.mxu0 %v7713_v7  ;;  %v7775_v4 = vld [vmem:[#allocation14 + $0x130] ss:$28 sps:$4 sm:$0xff]   ;;  %v7778_v7 = vld [vmem:[#allocation14 + $0x164] ss:$28 sps:$4 sm:$0xff]  }
 0x445   :  { %5745 = vmatprep.subr.bf16.mxu1 %v7718_v32  ;;  %5909 = vmatprep.subr.bf16.mxu0 %v7721_v6  ;;  %v7779_v32 = vld [vmem:[#allocation14 + $0x328] ss:$28 sps:$4 sm:$0xff]   ;;  %v7776_v6 = vld [vmem:[#allocation14 + $0x160] ss:$28 sps:$4 sm:$0xff]  }
 0x448   :  { %5746 = vmatpush1.bf16.msra.mxu1 %v7716_v8  ;;  %5910 = vmatpush1.bf16.msra.mxu0 %v7719_v9  ;;  %v7780_v8 = vld [vmem:[#allocation14 + $0x168] ss:$28 sps:$4 sm:$0xff]   ;;  %v7783_v9 = vld [vmem:[#allocation14 + $0x19c] ss:$28 sps:$4 sm:$0xff]  }
 0x449   :  { %5747 = vmatprep.subr.bf16.mxu1 %v7724_v10  ;;  %5911 = vmatprep.subr.bf16.mxu0 %v7727_v15  ;;  %v7784_v10 = vld [vmem:[#allocation14 + $0x360] ss:$28 sps:$4 sm:$0xff]   ;;  %v7781_v15 = vld [vmem:[#allocation14 + $0x198] ss:$28 sps:$4 sm:$0xff]  }
 0x44c   :  { %5748 = vmatpush1.bf16.msra.mxu1 %v7722_v30  ;;  %5912 = vmatpush1.bf16.msra.mxu0 %v7725_v21  ;;  %v7785_v30 = vld [vmem:[#allocation14 + $0x1a0] ss:$28 sps:$4 sm:$0xff]   ;;  %v7788_v21 = vld [vmem:[#allocation14 + $0x1d4] ss:$28 sps:$4 sm:$0xff]  }
 0x44d   :  { %5749 = vmatprep.subr.bf16.mxu1 %v7730_v22  ;;  %5913 = vmatprep.subr.bf16.mxu0 %v7733_v52  ;;  %v7789_v22 = vld [vmem:[#allocation14 + $0x558] ss:$28 sps:$4 sm:$0xff]   ;;  %v7786_v52 = vld [vmem:[#allocation14 + $0x1d0] ss:$28 sps:$4 sm:$0xff]  }
 0x450   :  { %5750 = vmatpush1.bf16.msra.mxu1 %v7728_v27  ;;  %5914 = vmatpush1.bf16.msra.mxu0 %v7731_v28  ;;  %v7793_v27 = vld [vmem:[#allocation14 + $0x20c] ss:$28 sps:$4 sm:$0xff]  }
 0x451   :  { %5751 = vmatprep.subr.bf16.mxu1 %v7736_v13  ;;  %5915 = vmatprep.subr.bf16.mxu0 %v7739_v14  ;;  %v7794_v28 = vld [vmem:[#allocation14 + $0x590] ss:$28 sps:$4 sm:$0xff]   ;;  %v7791_v13 = vld [vmem:[#allocation14 + $0x208] ss:$28 sps:$4 sm:$0xff]  }
 0x452   :  { %v7795_v14 = vld [vmem:[#allocation14 + $0x3d0] ss:$28 sps:$4 sm:$0xff]  }
 0x454   :  { %5752 = vmatpush1.bf16.msra.mxu1 %v7734_v19  ;;  %5916 = vmatpush1.bf16.msra.mxu0 %v7737_v20  ;;  %v7799_v19 = vld [vmem:[#allocation14 + $0x5c8] ss:$28 sps:$4 sm:$0xff]   ;;  %v7796_v20 = vld [vmem:[#allocation14 + $0x240] ss:$28 sps:$4 sm:$0xff]  }
 0x455   :  { %5753 = vmatprep.subr.bf16.mxu1 %v7742_v29  ;;  %5917 = vmatprep.subr.bf16.mxu0 %v7745_v31  ;;  %v7800_v29 = vld [vmem:[#allocation14 + $0x408] ss:$28 sps:$4 sm:$0xff]   ;;  %v7803_v31 = vld [vmem:[#allocation14 + $0x27c] ss:$28 sps:$4 sm:$0xff]  }
 0x458   :  { %5754 = vmatpush1.bf16.msra.mxu1 %v7740_v62  ;;  %5918 = vmatpush1.bf16.msra.mxu0 %v7743_v3  ;;  %v7801_v62 = vld [vmem:[#allocation14 + $0x278] ss:$28 sps:$4 sm:$0xff]   ;;  %v7805_v3 = vld [vmem:[#allocation14 + $0x440] ss:$28 sps:$4 sm:$0xff]  }
 0x459   :  { %5928 = vmatprep.subr.bf16.mxu1 %v7748_v37  ;;  %7069 = vmatprep.subr.bf16.mxu0 %v7749_v39  ;;  %v7808_v37 = vld [vmem:[#allocation14 + $0x2b4] ss:$28 sps:$4 sm:$0xff]  }
 0x45a   :  { %v7809_v39 = vld [vmem:[#allocation14 + $0x638] ss:$28 sps:$4 sm:$0xff]  }
 0x45b   :  { %5756 = vmatmul.mubr.bf16.vlgmr.msra.gmra.mrb[8].mxu1 %v8559_v41  ;;  %5920 = vmatmul.mubr.bf16.vlgmr.msra.gmra.mrb[20].mxu0 %v8559_v41 }
 0x45c   :  { %5929 = vmatpush1.bf16.msra.mxu1 %v7746_v55  ;;  %5960 = vmatprep.mubr.bf16.mxu1 %v8511_v23  ;;  %v7810_v55 = vld [vmem:[#allocation14 + $0x478] ss:$28 sps:$4 sm:$0xff]  }
 0x45d   :  { %7070 = vmatpush3.bf16.msra.mxu0 %v7750_v44  ;;  %6124 = vmatprep.mubr.bf16.mxu0 %v8511_v23  ;;  %v7769_v23 = vld [vmem:[#allocation14 + $0x2b8] ss:$28 sps:$4 sm:$0xff]   ;;  %v7813_v44 = vld [vmem:[#allocation14 + $0x2ec] ss:$28 sps:$4 sm:$0xff]  }
 0x45e   :  { %5930 = vmatprep.subr.bf16.mxu1 %v7753_v45  ;;  %7071 = vmatprep.subr.bf16.mxu0 %v7754_v46  ;;  %v7814_v45 = vld [vmem:[#allocation14 + $0x670] ss:$28 sps:$4 sm:$0xff]   ;;  %v7811_v46 = vld [vmem:[#allocation14 + $0x2e8] ss:$28 sps:$4 sm:$0xff]  }
 0x460   :  { %5931 = vmatpush1.bf16.msra.mxu1 %v7751_v47  ;;  %v7815_v47 = vld [vmem:[#allocation14 + $0x4b0] ss:$28 sps:$4 sm:$0xff]  }
 0x461   :  { %7072 = vmatpush3.bf16.msra.mxu0 %v7755_v48  ;;  %5932 = vmatprep.subr.bf16.mxu1 %v7758_v49  ;;  %v7818_v48 = vld [vmem:[#allocation14 + $0x324] ss:$28 sps:$4 sm:$0xff]  }
 0x462   :  { %7073 = vmatprep.subr.bf16.mxu0 %v7759_v50  ;;  %v7819_v49 = vld [vmem:[#allocation14 + $0x6a8] ss:$28 sps:$4 sm:$0xff]   ;;  %v7816_v50 = vld [vmem:[#allocation14 + $0x320] ss:$28 sps:$4 sm:$0xff]  }
 0x464   :  { %5933 = vmatpush1.bf16.msra.mxu1 %v7756_v53  ;;  %v7820_v53 = vld [vmem:[#allocation14 + $0x4e8] ss:$28 sps:$4 sm:$0xff]  }
 0x465   :  { %7074 = vmatpush3.bf16.msra.mxu0 %v7760_v54  ;;  %5934 = vmatprep.subr.bf16.mxu1 %v7763_v57  ;;  %v7823_v54 = vld [vmem:[#allocation14 + $0x35c] ss:$28 sps:$4 sm:$0xff]  }
 0x466   :  { %7075 = vmatprep.subr.bf16.mxu0 %v7764_v58  ;;  %v7824_v57 = vld [vmem:[#allocation14 + $0x6e0] ss:$28 sps:$4 sm:$0xff]   ;;  %v7821_v58 = vld [vmem:[#allocation14 + $0x358] ss:$28 sps:$4 sm:$0xff]  }
 0x468   :  { %5935 = vmatpush1.bf16.msra.mxu1 %v7761_v59  ;;  %v7825_v59 = vld [vmem:[#allocation14 + $0x520] ss:$28 sps:$4 sm:$0xff]  }
 0x469   :  { %7076 = vmatpush3.bf16.msra.mxu0 %v7765_v5  ;;  %5936 = vmatprep.subr.bf16.mxu1 %v7768_v60  ;;  %v7828_v5 = vld [vmem:[#allocation14 + $0x394] ss:$28 sps:$4 sm:$0xff]  }
 0x46a   :  { %7077 = vmatprep.subr.bf16.mxu0 %v7769_v23  ;;  %v7829_v60 = vld [vmem:[#allocation14 + $0x8d8] ss:$28 sps:$4 sm:$0xff]   ;;  %v7826_v23 = vld [vmem:[#allocation14 + $0x390] ss:$28 sps:$4 sm:$0xff]  }
 0x46c   :  { %5937 = vmatpush1.bf16.msra.mxu1 %v7766_v61  ;;  %v7830_v61 = vld [vmem:[#allocation14 + $0x718] ss:$28 sps:$4 sm:$0xff]  }
 0x46d   :  { %7078 = vmatpush3.bf16.msra.mxu0 %v7770_v63  ;;  %5938 = vmatprep.subr.bf16.mxu1 %v7773_v0  ;;  %v7833_v63 = vld [vmem:[#allocation14 + $0x3cc] ss:$28 sps:$4 sm:$0xff]  }
 0x46e   :  { %7079 = vmatprep.subr.bf16.mxu0 %v7774_v1  ;;  %v7834_v0 = vld [vmem:[#allocation14 + $0x910] ss:$28 sps:$4 sm:$0xff]   ;;  %v7831_v1 = vld [vmem:[#allocation14 + $0x3c8] ss:$28 sps:$4 sm:$0xff]  }
 0x470   :  { %5939 = vmatpush1.bf16.msra.mxu1 %v7771_v2  ;;  %v7835_v2 = vld [vmem:[#allocation14 + $0x750] ss:$28 sps:$4 sm:$0xff]  }
 0x471   :  { %7080 = vmatpush3.bf16.msra.mxu0 %v7775_v4  ;;  %5940 = vmatprep.subr.bf16.mxu1 %v7778_v7  ;;  %v7838_v4 = vld [vmem:[#allocation14 + $0x404] ss:$28 sps:$4 sm:$0xff]  }
 0x472   :  { %7081 = vmatprep.subr.bf16.mxu0 %v7779_v32  ;;  %v7839_v7 = vld [vmem:[#allocation14 + $0x948] ss:$28 sps:$4 sm:$0xff]   ;;  %v7836_v32 = vld [vmem:[#allocation14 + $0x400] ss:$28 sps:$4 sm:$0xff]  }
 0x474   :  { %5941 = vmatpush1.bf16.msra.mxu1 %v7776_v6  ;;  %v7843_v6 = vld [vmem:[#allocation14 + $0x43c] ss:$28 sps:$4 sm:$0xff]  }
 0x475   :  { %7082 = vmatpush3.bf16.msra.mxu0 %v7780_v8  ;;  %5942 = vmatprep.subr.bf16.mxu1 %v7783_v9  ;;  %v7844_v8 = vld [vmem:[#allocation14 + $0x980] ss:$28 sps:$4 sm:$0xff]   ;;  %v7841_v9 = vld [vmem:[#allocation14 + $0x438] ss:$28 sps:$4 sm:$0xff]  }
 0x476   :  { %7083 = vmatprep.subr.bf16.mxu0 %v7784_v10  ;;  %v7848_v10 = vld [vmem:[#allocation14 + $0x474] ss:$28 sps:$4 sm:$0xff]  }
 0x478   :  { %5943 = vmatpush1.bf16.msra.mxu1 %v7781_v15  ;;  %v7849_v15 = vld [vmem:[#allocation14 + $0x9b8] ss:$28 sps:$4 sm:$0xff]  }
 0x479   :  { %7084 = vmatpush3.bf16.msra.mxu0 %v7785_v30  ;;  %5944 = vmatprep.subr.bf16.mxu1 %v7788_v21  ;;  %v7846_v30 = vld [vmem:[#allocation14 + $0x470] ss:$28 sps:$4 sm:$0xff]   ;;  %v7850_v21 = vld [vmem:[#allocation14 + $0x7f8] ss:$28 sps:$4 sm:$0xff]  }
 0x47a   :  { %7091 = vmatprep.subr.bf16.mxu0 %v7789_v22  ;;  %v7853_v22 = vld [vmem:[#allocation14 + $0x4ac] ss:$28 sps:$4 sm:$0xff]  }
 0x47c   :  { %6125 = vmatmul.mubr.bf16.vlgmr.msra.gmra.mrb[24].mxu0 %v8513_v26  ;;  %5945 = vmatpush1.bf16.msra.mxu1 %v7786_v52  ;;  %v7854_v52 = vld [vmem:[#allocation14 + $0x9f0] ss:$28 sps:$4 sm:$0xff]  }
 0x47d   :  { %7092 = vmatpush3.bf16.msra.mxu0 %v7790_v25  ;;  %6164 = vmatprep.mubr.bf16.mxu0 %v8517_v12  ;;  %v7851_v25 = vld [vmem:[#allocation14 + $0x4a8] ss:$28 sps:$4 sm:$0xff]  }
 0x47e   :  { %5946 = vmatprep.subr.bf16.mxu1 %v7793_v27  ;;  %7093 = vmatprep.subr.bf16.mxu0 %v7794_v28  ;;  %v7855_v27 = vld [vmem:[#allocation14 + $0x830] ss:$28 sps:$4 sm:$0xff]   ;;  %v7858_v28 = vld [vmem:[#allocation14 + $0x4e4] ss:$28 sps:$4 sm:$0xff]  }
 0x480   :  { %5947 = vmatpush1.bf16.msra.mxu1 %v7791_v13  ;;  %v7859_v13 = vld [vmem:[#allocation14 + $0xa28] ss:$28 sps:$4 sm:$0xff]  }
 0x481   :  { %7094 = vmatpush3.bf16.msra.mxu0 %v7795_v14  ;;  %5948 = vmatprep.subr.bf16.mxu1 %v7798_v18  ;;  %v7856_v14 = vld [vmem:[#allocation14 + $0x4e0] ss:$28 sps:$4 sm:$0xff]   ;;  %v7860_v18 = vld [vmem:[#allocation14 + $0x868] ss:$28 sps:$4 sm:$0xff]  }
 0x482   :  { %7095 = vmatprep.subr.bf16.mxu0 %v7799_v19  ;;  %v7863_v19 = vld [vmem:[#allocation14 + $0x51c] ss:$28 sps:$4 sm:$0xff]  }
 0x484   :  { %5949 = vmatpush1.bf16.msra.mxu1 %v7796_v20  ;;  %v7864_v20 = vld [vmem:[#allocation14 + $0xa60] ss:$28 sps:$4 sm:$0xff]  }
 0x485   :  { %7096 = vmatpush3.bf16.msra.mxu0 %v7800_v29  ;;  %5950 = vmatprep.subr.bf16.mxu1 %v7803_v31  ;;  %v7861_v29 = vld [vmem:[#allocation14 + $0x518] ss:$28 sps:$4 sm:$0xff]   ;;  %v7865_v31 = vld [vmem:[#allocation14 + $0x8a0] ss:$28 sps:$4 sm:$0xff]  }
 0x486   :  { %7097 = vmatprep.subr.bf16.mxu0 %v7804_v33  ;;  %v7868_v33 = vld [vmem:[#allocation14 + $0x554] ss:$28 sps:$4 sm:$0xff]  }
 0x488   :  { %5951 = vmatpush1.bf16.msra.mxu1 %v7801_v62  ;;  %v7869_v62 = vld [vmem:[#allocation14 + $0xc58] ss:$28 sps:$4 sm:$0xff]  }
 0x489   :  { %7098 = vmatpush3.bf16.msra.mxu0 %v7805_v3  ;;  %5952 = vmatprep.subr.bf16.mxu1 %v7808_v37  ;;  %v7866_v3 = vld [vmem:[#allocation14 + $0x550] ss:$28 sps:$4 sm:$0xff]   ;;  %v7870_v37 = vld [vmem:[#allocation14 + $0xa98] ss:$28 sps:$4 sm:$0xff]  }
 0x48a   :  { %7099 = vmatprep.subr.bf16.mxu0 %v7809_v39  ;;  %v7873_v39 = vld [vmem:[#allocation14 + $0x58c] ss:$28 sps:$4 sm:$0xff]  }
 0x48c   :  { %5953 = vmatpush1.bf16.msra.mxu1 %v7806_v40  ;;  %v7874_v40 = vld [vmem:[#allocation14 + $0xc90] ss:$28 sps:$4 sm:$0xff]  }
 0x48d   :  { %7100 = vmatpush3.bf16.msra.mxu0 %v7810_v55  ;;  %5954 = vmatprep.subr.bf16.mxu1 %v7813_v44  ;;  %v7871_v55 = vld [vmem:[#allocation14 + $0x588] ss:$28 sps:$4 sm:$0xff]   ;;  %v7875_v44 = vld [vmem:[#allocation14 + $0xad0] ss:$28 sps:$4 sm:$0xff]  }
 0x48e   :  { %7101 = vmatprep.subr.bf16.mxu0 %v7814_v45  ;;  %v7878_v45 = vld [vmem:[#allocation14 + $0x5c4] ss:$28 sps:$4 sm:$0xff]  }
 0x490   :  { %5955 = vmatpush1.bf16.msra.mxu1 %v7811_v46  ;;  %v7879_v46 = vld [vmem:[#allocation14 + $0xcc8] ss:$28 sps:$4 sm:$0xff]  }
 0x491   :  { %7102 = vmatpush3.bf16.msra.mxu0 %v7815_v47  ;;  %5956 = vmatprep.subr.bf16.mxu1 %v7818_v48  ;;  %v7876_v47 = vld [vmem:[#allocation14 + $0x5c0] ss:$28 sps:$4 sm:$0xff]   ;;  %v7880_v48 = vld [vmem:[#allocation14 + $0xb08] ss:$28 sps:$4 sm:$0xff]  }
 0x492   :  { %7103 = vmatprep.subr.bf16.mxu0 %v7819_v49  ;;  %v7883_v49 = vld [vmem:[#allocation14 + $0x5fc] ss:$28 sps:$4 sm:$0xff]  }
 0x494   :  { %5957 = vmatpush1.bf16.msra.mxu1 %v7816_v50  ;;  %v7884_v50 = vld [vmem:[#allocation14 + $0xd00] ss:$28 sps:$4 sm:$0xff]  }
 0x495   :  { %7104 = vmatpush3.bf16.msra.mxu0 %v7820_v53  ;;  %5958 = vmatprep.subr.bf16.mxu1 %v7823_v54  ;;  %v7881_v53 = vld [vmem:[#allocation14 + $0x5f8] ss:$28 sps:$4 sm:$0xff]   ;;  %v7885_v54 = vld [vmem:[#allocation14 + $0xb40] ss:$28 sps:$4 sm:$0xff]  }
 0x496   :  { %7105 = vmatprep.subr.bf16.mxu0 %v7824_v57  ;;  %v7888_v57 = vld [vmem:[#allocation14 + $0x634] ss:$28 sps:$4 sm:$0xff]  }
 0x498   :  { %5959 = vmatpush1.bf16.msra.mxu1 %v7821_v58  ;;  %v7889_v58 = vld [vmem:[#allocation14 + $0xd38] ss:$28 sps:$4 sm:$0xff]  }
 0x499   :  { %7106 = vmatpush3.bf16.msra.mxu0 %v7825_v59  ;;  %5969 = vmatprep.subr.bf16.mxu1 %v7828_v5  ;;  %v7886_v59 = vld [vmem:[#allocation14 + $0x630] ss:$28 sps:$4 sm:$0xff]   ;;  %v7890_v5 = vld [vmem:[#allocation14 + $0xb78] ss:$28 sps:$4 sm:$0xff]  }
 0x49a   :  { %7113 = vmatprep.subr.bf16.mxu0 %v7829_v60  ;;  %v7893_v60 = vld [vmem:[#allocation14 + $0x66c] ss:$28 sps:$4 sm:$0xff]  }
 0x49b   :  { %5961 = vmatmul.mubr.bf16.vlgmr.msra.gmra.mrb[12].mxu1 %v8513_v26  ;;  %v7840_v26 = vld [vmem:[#allocation14 + $0x788] ss:$28 sps:$4 sm:$0xff]  }
 0x49c   :  { %6165 = vmatmul.mubr.bf16.vlgmr.msra.gmra.mrb[28].mxu0 %v8526_v38  ;;  %5970 = vmatpush1.bf16.msra.mxu1 %v7826_v23  ;;  %v7894_v23 = vld [vmem:[#allocation14 + $0xd70] ss:$28 sps:$4 sm:$0xff]  }
 0x49d   :  { %6001 = vmatprep.mubr.bf16.mxu1 %v8517_v12  ;;  %7114 = vmatpush3.bf16.msra.mxu0 %v7830_v61  ;;  %v7845_v12 = vld [vmem:[#allocation14 + $0x7c0] ss:$28 sps:$4 sm:$0xff]   ;;  %v7891_v61 = vld [vmem:[#allocation14 + $0x668] ss:$28 sps:$4 sm:$0xff]  }
 0x49e   :  { %6204 = vmatprep.mubr.bf16.mxu0 %v8542_v11  ;;  %5971 = vmatprep.subr.bf16.mxu1 %v7833_v63  ;;  %v7895_v63 = vld [vmem:[#allocation14 + $0xbb0] ss:$28 sps:$4 sm:$0xff]  }
 0x49f   :  { %7115 = vmatprep.subr.bf16.mxu0 %v7834_v0  ;;  %v7898_v0 = vld [vmem:[#allocation14 + $0x6a4] ss:$28 sps:$4 sm:$0xff]  }
 0x4a0   :  { %5972 = vmatpush1.bf16.msra.mxu1 %v7831_v1  ;;  %v7899_v1 = vld [vmem:[#allocation14 + $0xda8] ss:$28 sps:$4 sm:$0xff]  }
 0x4a1   :  { %7116 = vmatpush3.bf16.msra.mxu0 %v7835_v2  ;;  %5973 = vmatprep.subr.bf16.mxu1 %v7838_v4  ;;  %v7896_v2 = vld [vmem:[#allocation14 + $0x6a0] ss:$28 sps:$4 sm:$0xff]   ;;  %v7900_v4 = vld [vmem:[#allocation14 + $0xbe8] ss:$28 sps:$4 sm:$0xff]  }
 0x4a2   :  { %7117 = vmatprep.subr.bf16.mxu0 %v7839_v7  ;;  %v7903_v7 = vld [vmem:[#allocation14 + $0x6dc] ss:$28 sps:$4 sm:$0xff]  }
 0x4a4   :  { %5974 = vmatpush1.bf16.msra.mxu1 %v7836_v32  ;;  %v7904_v32 = vld [vmem:[#allocation14 + $0xde0] ss:$28 sps:$4 sm:$0xff]  }
 0x4a5   :  { %7118 = vmatpush3.bf16.msra.mxu0 %v7840_v26  ;;  %5975 = vmatprep.subr.bf16.mxu1 %v7843_v6  ;;  %v7901_v26 = vld [vmem:[#allocation14 + $0x6d8] ss:$28 sps:$4 sm:$0xff]   ;;  %v7905_v6 = vld [vmem:[#allocation14 + $0xc20] ss:$28 sps:$4 sm:$0xff]  }
 0x4a6   :  { %7119 = vmatprep.subr.bf16.mxu0 %v7844_v8  ;;  %v7908_v8 = vld [vmem:[#allocation14 + $0x714] ss:$28 sps:$4 sm:$0xff]  }
 0x4a8   :  { %5976 = vmatpush1.bf16.msra.mxu1 %v7841_v9  ;;  %v7906_v9 = vld [vmem:[#allocation14 + $0x710] ss:$28 sps:$4 sm:$0xff]  }
 0x4a9   :  { %7120 = vmatpush3.bf16.msra.mxu0 %v7845_v12  ;;  %5977 = vmatprep.subr.bf16.mxu1 %v7848_v10  ;;  %v7911_v12 = vld [vmem:[#allocation14 + $0x74c] ss:$28 sps:$4 sm:$0xff]  }
 0x4aa   :  { %7121 = vmatprep.subr.bf16.mxu0 %v7849_v15  ;;  %v7909_v10 = vld [vmem:[#allocation14 + $0x748] ss:$28 sps:$4 sm:$0xff]  }
 0x4ab   :  { %v7914_v15 = vld [vmem:[#allocation14 + $0x784] ss:$28 sps:$4 sm:$0xff]  }
 0x4ac   :  { %5978 = vmatpush1.bf16.msra.mxu1 %v7846_v30  ;;  %v7912_v30 = vld [vmem:[#allocation14 + $0x780] ss:$28 sps:$4 sm:$0xff]  }
 0x4ad   :  { %7122 = vmatpush3.bf16.msra.mxu0 %v7850_v21  ;;  %5979 = vmatprep.subr.bf16.mxu1 %v7853_v22  ;;  %v7917_v21 = vld [vmem:[#allocation14 + $0x7bc] ss:$28 sps:$4 sm:$0xff]  }
 0x4ae   :  { %7123 = vmatprep.subr.bf16.mxu0 %v7854_v52  ;;  %v7915_v22 = vld [vmem:[#allocation14 + $0x7b8] ss:$28 sps:$4 sm:$0xff]  }
 0x4af   :  { %v7920_v52 = vld [vmem:[#allocation14 + $0x7f4] ss:$28 sps:$4 sm:$0xff]  }
 0x4b0   :  { %5980 = vmatpush1.bf16.msra.mxu1 %v7851_v25  ;;  %v7918_v25 = vld [vmem:[#allocation14 + $0x7f0] ss:$28 sps:$4 sm:$0xff]  }
 0x4b1   :  { %7124 = vmatpush3.bf16.msra.mxu0 %v7855_v27  ;;  %5981 = vmatprep.subr.bf16.mxu1 %v7858_v28  ;;  %v7921_v27 = vld [vmem:[#allocation14 + $0x828] ss:$28 sps:$4 sm:$0xff]  }
 0x4b2   :  { %7125 = vmatprep.subr.bf16.mxu0 %v7859_v13  ;;  %v7926_v28 = vld [vmem:[#allocation14 + $0x864] ss:$28 sps:$4 sm:$0xff]   ;;  %v7929_v13 = vld [vmem:[#allocation14 + $0x89c] ss:$28 sps:$4 sm:$0xff]  }
 0x4b4   :  { %5982 = vmatpush1.bf16.msra.mxu1 %v7856_v14  ;;  %v7927_v14 = vld [vmem:[#allocation14 + $0x898] ss:$28 sps:$4 sm:$0xff]  }
 0x4b5   :  { %7126 = vmatpush3.bf16.msra.mxu0 %v7860_v18  ;;  %5983 = vmatprep.subr.bf16.mxu1 %v7863_v19  ;;  %v7932_v18 = vld [vmem:[#allocation14 + $0x8d4] ss:$28 sps:$4 sm:$0xff]  }
 0x4b6   :  { %7127 = vmatprep.subr.bf16.mxu0 %v7864_v20  ;;  %v7930_v19 = vld [vmem:[#allocation14 + $0x8d0] ss:$28 sps:$4 sm:$0xff]  }
 0x4b7   :  { %v7935_v20 = vld [vmem:[#allocation14 + $0x90c] ss:$28 sps:$4 sm:$0xff]  }
 0x4b8   :  { %5984 = vmatpush1.bf16.msra.mxu1 %v7861_v29  ;;  %v7933_v29 = vld [vmem:[#allocation14 + $0x908] ss:$28 sps:$4 sm:$0xff]  }
 0x4b9   :  { %7128 = vmatpush3.bf16.msra.mxu0 %v7865_v31  ;;  %5985 = vmatprep.subr.bf16.mxu1 %v7868_v33  ;;  %v7938_v31 = vld [vmem:[#allocation14 + $0x944] ss:$28 sps:$4 sm:$0xff]  }
 0x4ba   :  { %7135 = vmatprep.subr.bf16.mxu0 %v7869_v62  ;;  %v7936_v33 = vld [vmem:[#allocation14 + $0x940] ss:$28 sps:$4 sm:$0xff]  }
 0x4bb   :  { %v7941_v62 = vld [vmem:[#allocation14 + $0x97c] ss:$28 sps:$4 sm:$0xff]  }
 0x4bc   :  { %6205 = vmatmul.mubr.bf16.vlgmr.msra.gmra.mrb[32].mxu0 %v8544_v17  ;;  %5986 = vmatpush1.bf16.msra.mxu1 %v7866_v3  ;;  %v7939_v3 = vld [vmem:[#allocation14 + $0x978] ss:$28 sps:$4 sm:$0xff]  }
 0x4bd   :  { %7136 = vmatpush3.bf16.msra.mxu0 %v7870_v37  ;;  %6244 = vmatprep.mubr.bf16.mxu0 %v8548_v24  ;;  %v7944_v37 = vld [vmem:[#allocation14 + $0x9b4] ss:$28 sps:$4 sm:$0xff]  }
 0x4be   :  { %5987 = vmatprep.subr.bf16.mxu1 %v7873_v39  ;;  %7137 = vmatprep.subr.bf16.mxu0 %v7874_v40  ;;  %v7942_v39 = vld [vmem:[#allocation14 + $0x9b0] ss:$28 sps:$4 sm:$0xff]  }
 0x4bf   :  { %v7947_v40 = vld [vmem:[#allocation14 + $0x9ec] ss:$28 sps:$4 sm:$0xff]  }
 0x4c0   :  { %5988 = vmatpush1.bf16.msra.mxu1 %v7871_v55  ;;  %v7945_v55 = vld [vmem:[#allocation14 + $0x9e8] ss:$28 sps:$4 sm:$0xff]  }
 0x4c1   :  { %7138 = vmatpush3.bf16.msra.mxu0 %v7875_v44  ;;  %5989 = vmatprep.subr.bf16.mxu1 %v7878_v45  ;;  %v7950_v44 = vld [vmem:[#allocation14 + $0xa24] ss:$28 sps:$4 sm:$0xff]  }
 0x4c2   :  { %7139 = vmatprep.subr.bf16.mxu0 %v7879_v46  ;;  %v7948_v45 = vld [vmem:[#allocation14 + $0xa20] ss:$28 sps:$4 sm:$0xff]  }
 0x4c3   :  { %v7953_v46 = vld [vmem:[#allocation14 + $0xa5c] ss:$28 sps:$4 sm:$0xff]  }
 0x4c4   :  { %5990 = vmatpush1.bf16.msra.mxu1 %v7876_v47  ;;  %v7951_v47 = vld [vmem:[#allocation14 + $0xa58] ss:$28 sps:$4 sm:$0xff]  }
 0x4c5   :  { %7140 = vmatpush3.bf16.msra.mxu0 %v7880_v48  ;;  %5991 = vmatprep.subr.bf16.mxu1 %v7883_v49  ;;  %v7956_v48 = vld [vmem:[#allocation14 + $0xa94] ss:$28 sps:$4 sm:$0xff]  }
 0x4c6   :  { %7141 = vmatprep.subr.bf16.mxu0 %v7884_v50  ;;  %v7954_v49 = vld [vmem:[#allocation14 + $0xa90] ss:$28 sps:$4 sm:$0xff]  }
 0x4c7   :  { %v7959_v50 = vld [vmem:[#allocation14 + $0xacc] ss:$28 sps:$4 sm:$0xff]  }
 0x4c8   :  { %5992 = vmatpush1.bf16.msra.mxu1 %v7881_v53  ;;  %v7957_v53 = vld [vmem:[#allocation14 + $0xac8] ss:$28 sps:$4 sm:$0xff]  }
 0x4c9   :  { %7142 = vmatpush3.bf16.msra.mxu0 %v7885_v54  ;;  %5993 = vmatprep.subr.bf16.mxu1 %v7888_v57  ;;  %v7962_v54 = vld [vmem:[#allocation14 + $0xb04] ss:$28 sps:$4 sm:$0xff]  }
 0x4ca   :  { %7143 = vmatprep.subr.bf16.mxu0 %v7889_v58  ;;  %v7960_v57 = vld [vmem:[#allocation14 + $0xb00] ss:$28 sps:$4 sm:$0xff]  }
 0x4cb   :  { %v7965_v58 = vld [vmem:[#allocation14 + $0xb3c] ss:$28 sps:$4 sm:$0xff]  }
 0x4cc   :  { %5994 = vmatpush1.bf16.msra.mxu1 %v7886_v59  ;;  %v7963_v59 = vld [vmem:[#allocation14 + $0xb38] ss:$28 sps:$4 sm:$0xff]  }
 0x4cd   :  { %7144 = vmatpush3.bf16.msra.mxu0 %v7890_v5  ;;  %5995 = vmatprep.subr.bf16.mxu1 %v7893_v60  ;;  %v7968_v5 = vld [vmem:[#allocation14 + $0xb74] ss:$28 sps:$4 sm:$0xff]  }
 0x4ce   :  { %7145 = vmatprep.subr.bf16.mxu0 %v7894_v23  ;;  %v7966_v60 = vld [vmem:[#allocation14 + $0xb70] ss:$28 sps:$4 sm:$0xff]   ;;  %v8578_v23 = vld [vmem:[#allocation16] sm:$0xff] }
 0x4d0   :  { %5996 = vmatpush1.bf16.msra.mxu1 %v7891_v61  ;;  %v3272_v61 = vrot.slane %v8578_v23, %v8476_v51 }
 0x4d1   :  { %7146 = vmatpush3.bf16.msra.mxu0 %v7895_v63  ;;  %5997 = vmatprep.subr.bf16.mxu1 %v7898_v0  ;;  %v3268_v63 = vrot.slane %v8578_v23, %v8431_v43  ;;  %v3276_v0 = vrot.slane %v8578_v23, %v8479_v56  ;;  %v7977_v56 = vld [vmem:[#allocation14 + $0xc1c] ss:$28 sps:$4 sm:$0xff]  }
 0x4d2   :  { %7147 = vmatprep.subr.bf16.mxu0 %v7899_v1  ;;  %v7969_v1 = vld [vmem:[#allocation14 + $0xba8] ss:$28 sps:$4 sm:$0xff]  }
 0x4d4   :  { %5998 = vmatpush1.bf16.msra.mxu1 %v7896_v2  ;;  %v7974_v2 = vld [vmem:[#allocation14 + $0xbe4] ss:$28 sps:$4 sm:$0xff]  }
 0x4d5   :  { %7148 = vmatpush3.bf16.msra.mxu0 %v7900_v4  ;;  %5999 = vmatprep.subr.bf16.mxu1 %v7903_v7 }
 0x4d6   :  { %7149 = vmatprep.subr.bf16.mxu0 %v7904_v32 }
 0x4d8   :  { %6000 = vmatpush1.bf16.msra.mxu1 %v7901_v26 }
 0x4d9   :  { %7150 = vmatpush3.bf16.msra.mxu0 %v7905_v6  ;;  %6010 = vmatprep.subr.bf16.mxu1 %v7908_v8 }
 0x4db   :  { %6002 = vmatmul.mubr.bf16.vlgmr.msra.gmra.mrb[12].mxu1 %v8526_v38  ;;  %v7923_v38 = vld [vmem:[#allocation14 + $0x82c] ss:$28 sps:$4 sm:$0xff]  }
 0x4dc   :  { %6245 = vmatmul.mubr.bf16.vlgmr.msra.gmra.mrb[36].mxu0 %v8559_v41  ;;  %6011 = vmatpush1.bf16.msra.mxu1 %v7906_v9 }
 0x4dd   :  { %6042 = vmatprep.mubr.bf16.mxu1 %v8542_v11  ;;  %6012 = vmatprep.subr.bf16.mxu1 %v7911_v12  ;;  %v7924_v11 = vld [vmem:[#allocation14 + $0x860] ss:$28 sps:$4 sm:$0xff]  }
 0x4e0   :  { %6013 = vmatpush1.bf16.msra.mxu1 %v7909_v10  ;;  %v7972_v10 = vld [vmem:[#allocation14 + $0xbe0] ss:$28 sps:$4 sm:$0xff]  }
 0x4e1   :  { %6014 = vmatprep.subr.bf16.mxu1 %v7914_v15 }
 0x4e4   :  { %6015 = vmatpush1.bf16.msra.mxu1 %v7912_v30  ;;  %v7975_v30 = vld [vmem:[#allocation14 + $0xc18] ss:$28 sps:$4 sm:$0xff]  }
 0x4e5   :  { %6016 = vmatprep.subr.bf16.mxu1 %v7917_v21  ;;  %v7980_v21 = vld [vmem:[#allocation14 + $0xc54] ss:$28 sps:$4 sm:$0xff]  }
 0x4e8   :  { %6017 = vmatpush1.bf16.msra.mxu1 %v7915_v22  ;;  %v7978_v22 = vld [vmem:[#allocation14 + $0xc50] ss:$28 sps:$4 sm:$0xff]  }
 0x4e9   :  { %6018 = vmatprep.subr.bf16.mxu1 %v7920_v52  ;;  %v7983_v52 = vld [vmem:[#allocation14 + $0xc8c] ss:$28 sps:$4 sm:$0xff]  }
 0x4ec   :  { %6019 = vmatpush1.bf16.msra.mxu1 %v7918_v25 }
 0x4ed   :  { %6020 = vmatprep.subr.bf16.mxu1 %v7923_v38 }
 0x4f0   :  { %6021 = vmatpush1.bf16.msra.mxu1 %v7921_v27  ;;  %v7981_v27 = vld [vmem:[#allocation14 + $0xc88] ss:$28 sps:$4 sm:$0xff]  }
 0x4f1   :  { %6022 = vmatprep.subr.bf16.mxu1 %v7926_v28 }
 0x4f4   :  { %6023 = vmatpush1.bf16.msra.mxu1 %v7924_v11  ;;  %v7986_v11 = vld [vmem:[#allocation14 + $0xcc4] ss:$28 sps:$4 sm:$0xff]  }
 0x4f5   :  { %6024 = vmatprep.subr.bf16.mxu1 %v7929_v13 }
 0x4f8   :  { %6025 = vmatpush1.bf16.msra.mxu1 %v7927_v14  ;;  %v7984_v14 = vld [vmem:[#allocation14 + $0xcc0] ss:$28 sps:$4 sm:$0xff]  }
 0x4f9   :  { %6026 = vmatprep.subr.bf16.mxu1 %v7932_v18  ;;  %v7989_v18 = vld [vmem:[#allocation14 + $0xcfc] ss:$28 sps:$4 sm:$0xff]  }
 0x4fc   :  { %6027 = vmatpush1.bf16.msra.mxu1 %v7930_v19  ;;  %v7987_v19 = vld [vmem:[#allocation14 + $0xcf8] ss:$28 sps:$4 sm:$0xff]  }
 0x4fd   :  { %6028 = vmatprep.subr.bf16.mxu1 %v7935_v20  ;;  %v7992_v20 = vld [vmem:[#allocation14 + $0xd34] ss:$28 sps:$4 sm:$0xff]  }
 0x500   :  { %6029 = vmatpush1.bf16.msra.mxu1 %v7933_v29  ;;  %v7990_v29 = vld [vmem:[#allocation14 + $0xd30] ss:$28 sps:$4 sm:$0xff]  }
 0x501   :  { %6030 = vmatprep.subr.bf16.mxu1 %v7938_v31  ;;  %v7995_v31 = vld [vmem:[#allocation14 + $0xd6c] ss:$28 sps:$4 sm:$0xff]  }
 0x504   :  { %6031 = vmatpush1.bf16.msra.mxu1 %v7936_v33  ;;  %v7993_v33 = vld [vmem:[#allocation14 + $0xd68] ss:$28 sps:$4 sm:$0xff]  }
 0x505   :  { %6032 = vmatprep.subr.bf16.mxu1 %v7941_v62  ;;  %v7998_v62 = vld [vmem:[#allocation14 + $0xda4] ss:$28 sps:$4 sm:$0xff]  }
 0x508   :  { %6033 = vmatpush1.bf16.msra.mxu1 %v7939_v3 }
 0x509   :  { %6034 = vmatprep.subr.bf16.mxu1 %v7944_v37 }
 0x50c   :  { %6035 = vmatpush1.bf16.msra.mxu1 %v7942_v39  ;;  %v7996_v39 = vld [vmem:[#allocation14 + $0xda0] ss:$28 sps:$4 sm:$0xff]  }
 0x50d   :  { %6036 = vmatprep.subr.bf16.mxu1 %v7947_v40 }
 0x510   :  { %6037 = vmatpush1.bf16.msra.mxu1 %v7945_v55 }
 0x511   :  { %6038 = vmatprep.subr.bf16.mxu1 %v7950_v44  ;;  %v8001_v44 = vld [vmem:[#allocation14 + $0xddc] ss:$28 sps:$4 sm:$0xff]  }
 0x514   :  { %6039 = vmatpush1.bf16.msra.mxu1 %v7948_v45 }
 0x515   :  { %6040 = vmatprep.subr.bf16.mxu1 %v7953_v46  ;;  %v7999_v46 = vld [vmem:[#allocation14 + $0xdd8] ss:$28 sps:$4 sm:$0xff]  }
 0x518   :  { %6041 = vmatpush1.bf16.msra.mxu1 %v7951_v47  ;;  %v3288_v47 = vrot.slane %v8578_v23, %v1093_v16 }
 0x519   :  { %6051 = vmatprep.subr.bf16.mxu1 %v7956_v48 }
 0x51b   :  { %6043 = vmatmul.mubr.bf16.vlgmr.msra.gmra.mrb[12].mxu1 %v8544_v17  ;;  %v7971_v17 = vld [vmem:[#allocation14 + $0xbac] ss:$28 sps:$4 sm:$0xff]  }
 0x51c   :  { %6052 = vmatpush1.bf16.msra.mxu1 %v7954_v49  ;;  %6083 = vmatprep.mubr.bf16.mxu1 %v8548_v24  ;;  %v3264_v24 = vrot.slane %v8578_v23, %v8428_v42 }
 0x51d   :  { %6053 = vmatprep.subr.bf16.mxu1 %v7959_v50 }
 0x520   :  { %6054 = vmatpush1.bf16.msra.mxu1 %v7957_v53 }
 0x521   :  { %6055 = vmatprep.subr.bf16.mxu1 %v7962_v54 }
 0x524   :  { %6056 = vmatpush1.bf16.msra.mxu1 %v7960_v57 }
 0x525   :  { %6057 = vmatprep.subr.bf16.mxu1 %v7965_v58 }
 0x528   :  { %6058 = vmatpush1.bf16.msra.mxu1 %v7963_v59 }
 0x529   :  { %6059 = vmatprep.subr.bf16.mxu1 %v7968_v5 }
 0x52c   :  { %6060 = vmatpush1.bf16.msra.mxu1 %v7966_v60 }
 0x52d   :  { %6061 = vmatprep.subr.bf16.mxu1 %v7971_v17 }
 0x52e   :  { %v5757_v4 = vpop.f32.mrb[8].mxu1  ;;  %v5921_v7 = vpop.f32.mrb[20].mxu0 }
 0x52f   :  { %v7165_v32 = vadd.f32 %v5757_v4, %v3264_v24  ;;  %v7167_v26 = vadd.f32 %v5921_v7, %v3272_v61  ;;  %v5759_v6 = vpop.f32.mrb[9].mxu1  ;;  %v5923_v8 = vpop.f32.mrb[21].mxu0  ;;  %v3280_v7 = vrot.slane %v8578_v23, %v1085_v34 }
 0x530   :  { %v7166_v42 = vadd.f32 %v5759_v6, %v3268_v63  ;;  %v7168_v9 = vadd.f32 %v5923_v8, %v3276_v0  ;;  %v5761_v12 = vpop.f32.mrb[10].mxu1  ;;  %v5925_v51 = vpop.f32.mrb[22].mxu0  ;;  %6062 = vmatpush1.bf16.msra.mxu1 %v7969_v1 }
 0x531   :  { %8002 = vtanh.f32 %v7165_v32  ;;  %v5762_v43 = vpop.f32.mrb[11].mxu1  ;;  %v5926_v15 = vpop.f32.mrb[23].mxu0  ;;  %6063 = vmatprep.subr.bf16.mxu1 %v7974_v2  ;;  %v3284_v32 = vrot.slane %v8578_v23, %v1089_v35 }
 0x532   :  { %8004 = vtanh.f32 %v7167_v26 }
 0x533   :  { %8006 = vtanh.f32 %v7166_v42 }
 0x534   :  { %8008 = vtanh.f32 %v7168_v9  ;;  %6064 = vmatpush1.bf16.msra.mxu1 %v7972_v10 }
 0x535   :  { %6065 = vmatprep.subr.bf16.mxu1 %v7977_v56 }
 0x538   :  { %6066 = vmatpush1.bf16.msra.mxu1 %v7975_v30 }
 0x539   :  { %6067 = vmatprep.subr.bf16.mxu1 %v7980_v21 }
 0x53b   :  { %v8003_v25 = vpop.eup %8002 }
 0x53c   :  { %v8005_v38 = vpop.eup %8004  ;;  %6259 = vst [vmem:[#allocation17] sm:$0xff] %v8003_v25  ;;  %6068 = vmatpush1.bf16.msra.mxu1 %v7978_v22 }
 0x53d   :  { %v8007_v28 = vpop.eup %8006  ;;  %6261 = vst [vmem:[#allocation17 + $0x10] sm:$0xff] %v8005_v38  ;;  %6069 = vmatprep.subr.bf16.mxu1 %v7983_v52 }
 0x53e   :  { %v8009_v13 = vpop.eup %8008  ;;  %6260 = vst [vmem:[#allocation17 + $0x8] sm:$0xff] %v8007_v28 }
 0x53f   :  { %6262 = vst [vmem:[#allocation17 + $0x18] sm:$0xff] %v8009_v13 }
 0x540   :  { %6070 = vmatpush1.bf16.msra.mxu1 %v7981_v27 }
 0x541   :  { %6071 = vmatprep.subr.bf16.mxu1 %v7986_v11 }
 0x544   :  { %6072 = vmatpush1.bf16.msra.mxu1 %v7984_v14 }
 0x545   :  { %6073 = vmatprep.subr.bf16.mxu1 %v7989_v18 }
 0x548   :  { %6074 = vmatpush1.bf16.msra.mxu1 %v7987_v19 }
 0x549   :  { %6075 = vmatprep.subr.bf16.mxu1 %v7992_v20 }
 0x54c   :  { %6076 = vmatpush1.bf16.msra.mxu1 %v7990_v29 }
 0x54d   :  { %6077 = vmatprep.subr.bf16.mxu1 %v7995_v31 }
 0x54f   :  { %v7085_v3 = vpop.f32.mrb[24].mxu0 }
 0x550   :  { %v7086_v37 = vpop.f32.mrb[25].mxu0  ;;  %6078 = vmatpush1.bf16.msra.mxu1 %v7993_v33 }
 0x551   :  { %v7087_v40 = vadd.f32 %v7086_v37, %v7085_v3  ;;  %v7088_v55 = vpop.f32.mrb[26].mxu0  ;;  %6079 = vmatprep.subr.bf16.mxu1 %v7998_v62 }
 0x552   :  { %v7089_v45 = vpop.f32.mrb[27].mxu0 }
 0x553   :  { %v6127_v50 = vadd.f32 %v7087_v40, %v3288_v47 }
 0x554   :  { %6080 = vmatpush1.bf16.msra.mxu1 %v7996_v39 }
 0x555   :  { %6081 = vmatprep.subr.bf16.mxu1 %v8001_v44 }
 0x558   :  { %6082 = vmatpush1.bf16.msra.mxu1 %v7999_v46 }
 0x55b   :  { %6084 = vmatmul.mubr.bf16.vlgmr.msra.gmra.mrb[12].mxu1 %v8559_v41 }
 0x56f   :  { %v7107_v48 = vpop.f32.mrb[28].mxu0 }
 0x570   :  { %v7108_v49 = vpop.f32.mrb[29].mxu0 }
 0x571   :  { %v7109_v53 = vadd.f32 %v7108_v49, %v7107_v48  ;;  %v7110_v54 = vpop.f32.mrb[30].mxu0 }
 0x572   :  { %v7111_v57 = vpop.f32.mrb[31].mxu0 }
 0x573   :  { %v6167_v58 = vadd.f32 %v7109_v53, %v6127_v50 }
 0x58f   :  { %v7129_v59 = vpop.f32.mrb[32].mxu0 }
 0x590   :  { %v7130_v5 = vpop.f32.mrb[33].mxu0 }
 0x591   :  { %v7131_v60 = vadd.f32 %v7130_v5, %v7129_v59  ;;  %v7132_v17 = vpop.f32.mrb[34].mxu0 }
 0x592   :  { %v7133_v24 = vpop.f32.mrb[35].mxu0 }
 0x593   :  { %v6207_v61 = vadd.f32 %v7131_v60, %v6167_v58 }
 0x5af   :  { %v7151_v63 = vpop.f32.mrb[36].mxu0 }
 0x5b0   :  { %v7152_v0 = vpop.f32.mrb[37].mxu0 }
 0x5b1   :  { %v7153_v41 = vadd.f32 %v7152_v0, %v7151_v63  ;;  %v7154_v1 = vpop.f32.mrb[38].mxu0 }
 0x5b2   :  { %v7155_v2 = vpop.f32.mrb[39].mxu0 }
 0x5b3   :  { %v6247_v4 = vadd.f32 %v7153_v41, %v6207_v61 }
 0x5b5   :  { %8010 = vtanh.f32 %v6247_v4 }
 0x5bf   :  { %v8011_v16 = vpop.eup %8010 }
 0x5c0   :  { %6265 = vst [vmem:[#allocation17 + $0x30] sm:$0xff] %v8011_v16 }
 0x62e   :  { %v6085_v26 = vpop.f32.mrb[12].mxu1 }
 0x62f   :  { %v7169_v6 = vadd.f32 %v6085_v26, %v3280_v7  ;;  %v6087_v8 = vpop.f32.mrb[13].mxu1 }
 0x630   :  { %v7170_v42 = vadd.f32 %v6087_v8, %v3284_v32  ;;  %v6089_v9 = vpop.f32.mrb[14].mxu1 }
 0x631   :  { %8012 = vtanh.f32 %v7169_v6  ;;  %v6090_v12 = vpop.f32.mrb[15].mxu1 }
 0x632   :  { %8014 = vtanh.f32 %v7170_v42 }
 0x63b   :  { %v8013_v51 = vpop.eup %8012 }
 0x63c   :  { %v8015_v10 = vpop.eup %8014  ;;  %6263 = vst [vmem:[#allocation17 + $0x20] sm:$0xff] %v8013_v51 }
 0x63d   :  { %6264 = vst [vmem:[#allocation17 + $0x28] sm:$0xff] %v8015_v10 }
 0x63e   :  { %8225 = shalt.err (!%p8222_p6)
}
 0x63f   :  { %s8226_s22 = scalar_lea.hbm %s8619_s9, 896 }
 0x640   :  { %p8227_p7 = scmp.ne.s32.totalorder %s8619_s9, %s8226_s22  ;;  %p8230_p8 = scmp.lt.u32.totalorder %s8226_s22, %s8619_s9 }
 0x642   :  { %p8232_p9 = pnand %p8230_p8, %p8227_p7 }
 0x644   :  { %8235 = shalt.err (!%p8232_p9)
}
 0x645   :  { %6275 = dma.vmem_to_hbm [thread:$0]  %s6273_s24, 896, %s8619_s9, [#allocation4]  }
 0x646   :  { %8246 = dma.done.wait [#allocation4], 896  }
 0x647   :  { %8247 = vsyncadd [#allocation4], 4294966400 }
 0x648   :  { %6279 = vsyncpa [#allocation3], 1 }
 0x649   :  { %6280 = vsyncpa [#allocation6], 1 }
 0x64a   :  { %6281 = vsyncpa [#allocation9], 1 }
 0x64b   :  { %6282 = vsyncpa [#allocation12], 1 }
 0x64c   :  { %6283 = vsyncpa [#allocation15], 1 }
 0x64d   :  { %6284 = vsyncpa [#allocation4], 1 }

</bundles_post_ra>
